<compile_context>
chip_gen: v6e
topology: v6e:2x2x1
jax: 0.10.0
libtpu: 0.0.40
codegen_flags: <defaults>
</compile_context>

<pallas_src>
import jax
import jax.numpy as jnp
from jax import lax
from jax.experimental import pallas as pl
from jax.experimental.pallas import tpu as pltpu

IN_FEATURES = 196608           # fixed by the module definition
OUT_FEATURES = 10
TK = 98304                     # reduction tile (multiple of 128)
K_TILES = IN_FEATURES // TK    # = 2 grid steps total


def _linear_kernel(x_ref, w_ref, b_ref, o_ref):
    """One grid step: o += x_tile (B, TK) contracted with w_tile (10, TK) on the MXU.

    The f32 output block is VMEM-resident across the reduction axis and is
    accumulated in place; the bias is added on the last step.
    """
    k = pl.program_id(0)

    @pl.when(k == 0)
    def _():
        o_ref[...] = jnp.zeros_like(o_ref)

    # In-kernel f32 -> bf16 cast of the activation tile (no separate HLO,
    # no extra HBM round trip for the bf16 copy of x).
    x_bf = x_ref[...].astype(jnp.bfloat16)

    # Both operands are lane-dense along the contraction (F) axis ("trans_b").
    o_ref[...] += lax.dot_general(
        x_bf, w_ref[...],
        dimension_numbers=(((1,), (1,)), ((), ())),
        preferred_element_type=jnp.float32,
    )

    # Epilogue: fold the bias add into the final reduction step.
    @pl.when(k == pl.num_programs(0) - 1)
    def _():
        o_ref[...] += b_ref[...]


@jax.jit
def tudui_forward(x, w_bf16, b2d):
    """x: (B, 196608) f32; w_bf16: (10, 196608) bf16; b2d: (1, 10) f32 -> (B, 10) f32."""
    B, F = x.shape
    assert F == IN_FEATURES

    flops = 2 * B * OUT_FEATURES * IN_FEATURES
    bytes_accessed = (
        B * IN_FEATURES * 4                # x stream (f32)
        + OUT_FEATURES * IN_FEATURES * 2   # W stream (bf16, 10 rows, no padding)
        + B * OUT_FEATURES * 4             # output
        + OUT_FEATURES * 4                 # bias
    )

    return pl.pallas_call(
        _linear_kernel,
        out_shape=jax.ShapeDtypeStruct((B, OUT_FEATURES), jnp.float32),
        grid_spec=pltpu.PrefetchScalarGridSpec(
            num_scalar_prefetch=0,
            grid=(K_TILES,),
            in_specs=[
                # x tile: (B, TK) f32, lane-dense along F; cast in-kernel.
                pl.BlockSpec((B, TK), lambda k: (0, k)),
                # W tile: (10, TK) bf16, lane-dense along F. 10 == full array
                # extent on the sublane axis, so the BlockSpec is legal and
                # the DMA only moves 10 rows (no zero-padding traffic).
                pl.BlockSpec((OUT_FEATURES, TK), lambda k: (0, k)),
                # Bias: tiny full-array block, added in the epilogue.
                pl.BlockSpec((1, OUT_FEATURES), lambda k: (0, 0)),
            ],
            # Single tiny output block, resident across the reduction axis.
            out_specs=pl.BlockSpec((B, OUT_FEATURES), lambda k: (0, 0)),
        ),
        compiler_params=pltpu.CompilerParams(
            dimension_semantics=("arbitrary",),      # reduction axis
            vmem_limit_bytes=32 * 1024 * 1024,       # ~12.6 MB double-buffered tiles
        ),
        cost_estimate=pl.CostEstimate(
            flops=flops, transcendentals=0, bytes_accessed=bytes_accessed),
    )(x, w_bf16, b2d)


def init_params(key):
    """nn.Linear default init: U(-1/sqrt(in), 1/sqrt(in)); weight is (out, in)."""
    kw, kb = jax.random.split(key)
    bound = 1.0 / jnp.sqrt(jnp.float32(IN_FEATURES))
    w = jax.random.uniform(kw, (OUT_FEATURES, IN_FEATURES), jnp.float32, -bound, bound)
    b = jax.random.uniform(kb, (OUT_FEATURES,), jnp.float32, -bound, bound)
    # Kernel layout: narrow (10, F) bf16 weight, (1, 10) f32 bias.
    w_bf16 = w.astype(jnp.bfloat16)
    b2d = b.reshape(1, OUT_FEATURES)
    return w, b, w_bf16, b2d


if __name__ == "__main__":
    key = jax.random.PRNGKey(0)
    k_param, k_x = jax.random.split(key)

    w, b, w_bf16, b2d = init_params(k_param)

    # Small batch; the feature dim (196608) is fixed by the module.
    B = 2
    x = jax.random.normal(k_x, (B, IN_FEATURES), jnp.float32)

    out = jax.block_until_ready(tudui_forward(x, w_bf16, b2d))

    # Reference with the same bf16-rounded operands (MXU accumulates in f32).
    # Documented tolerance vs a pure-f32 nn.Linear: ~1e-2 relative over the
    # 196608-long reduction due to the bf16 operand rounding.
    ref = (
        x.astype(jnp.bfloat16).astype(jnp.float32)
        @ w.astype(jnp.bfloat16).astype(jnp.float32).T
    ) + b

    assert out.shape == (B, OUT_FEATURES)
    assert jnp.allclose(out, ref, atol=1e-2, rtol=1e-2), float(
        jnp.max(jnp.abs(out - ref))
    )

    print("KERNEL_OK")
</pallas_src>

<mosaic_0001>
module attributes {stable_mosaic.version = 11 : i64} {
  func.func @_linear_kernel(%arg0: i32, %arg1: memref<2x98304xf32, #tpu.memory_space<vmem>>, %arg2: memref<10x98304xbf16, #tpu.memory_space<vmem>>, %arg3: memref<1x10xf32, #tpu.memory_space<vmem>>, %arg4: memref<2x10xf32, #tpu.memory_space<vmem>>) attributes {dimension_semantics = [#tpu.dimension_semantics<arbitrary>], iteration_bounds = array<i64: 2>, scalar_prefetch = 0 : i64, scratch_operands = 0 : i64, tpu.core_type = #tpu.core_type<tc>, window_params = [{transform_indices = @transform_0, window_bounds = array<i64: 2, 98304>}, {transform_indices = @transform_1, window_bounds = array<i64: 10, 98304>}, {pipeline_mode = #tpu.pipeline_mode<synchronous>, transform_indices = @transform_2, window_bounds = array<i64: 1, 10>}, {pipeline_mode = #tpu.pipeline_mode<synchronous>, transform_indices = @transform_3, window_bounds = array<i64: 2, 10>}]} {
    %c0_i32 = arith.constant 0 : i32
    %0 = arith.cmpi eq, %arg0, %c0_i32 : i32
    %1 = arith.extui %0 : i1 to i32
    %c0_i32_0 = arith.constant 0 : i32
    %2 = arith.cmpi ne, %1, %c0_i32_0 : i32
    scf.if %2 {
      %cst_9 = arith.constant 0.000000e+00 : f32
      %13 = vector.broadcast %cst_9 : f32 to vector<2x10xf32>
      %c0_10 = arith.constant 0 : index
      %c0_11 = arith.constant 0 : index
      %14 = vector.load %arg4[%c0_10, %c0_11] : memref<2x10xf32, #tpu.memory_space<vmem>>, vector<2x10xf32>
      tpu.vector_store %arg4[%c0_10, %c0_11], %13 {strides = array<i32>} : memref<2x10xf32, #tpu.memory_space<vmem>>, vector<2x10xf32>,
    } else {
    }
    %c0 = arith.constant 0 : index
    %c0_1 = arith.constant 0 : index
    %3 = vector.load %arg1[%c0, %c0_1] : memref<2x98304xf32, #tpu.memory_space<vmem>>, vector<2x98304xf32>
    %4 = arith.truncf %3 : vector<2x98304xf32> to vector<2x98304xbf16>
    %c0_2 = arith.constant 0 : index
    %c0_3 = arith.constant 0 : index
    %5 = vector.load %arg4[%c0_2, %c0_3] : memref<2x10xf32, #tpu.memory_space<vmem>>, vector<2x10xf32>
    %c0_4 = arith.constant 0 : index
    %c0_5 = arith.constant 0 : index
    %6 = vector.load %arg2[%c0_4, %c0_5] : memref<10x98304xbf16, #tpu.memory_space<vmem>>, vector<10x98304xbf16>
    %cst = arith.constant dense<0.000000e+00> : vector<2x10xf32>
    %7 = tpu.matmul %4, %6, %cst {dimension_numbers = #tpu.dot_dimension_numbers<[1], [1], [0], [0], [0, 0, 1, 0], [], []>} : vector<2x98304xbf16>, vector<10x98304xbf16>, vector<2x10xf32> -> vector<2x10xf32>
    %8 = arith.addf %5, %7 : vector<2x10xf32>
    %c0_6 = arith.constant 0 : index
    %c0_7 = arith.constant 0 : index
    %9 = vector.load %arg4[%c0_6, %c0_7] : memref<2x10xf32, #tpu.memory_space<vmem>>, vector<2x10xf32>
    tpu.vector_store %arg4[%c0_6, %c0_7], %8 {strides = array<i32>} : memref<2x10xf32, #tpu.memory_space<vmem>>, vector<2x10xf32>,
    %c1_i32 = arith.constant 1 : i32
    %10 = arith.cmpi eq, %arg0, %c1_i32 : i32
    %11 = arith.extui %10 : i1 to i32
    %c0_i32_8 = arith.constant 0 : i32
    %12 = arith.cmpi ne, %11, %c0_i32_8 : i32
    scf.if %12 {
      %c0_9 = arith.constant 0 : index
      %c0_10 = arith.constant 0 : index
      %13 = vector.load %arg4[%c0_9, %c0_10] : memref<2x10xf32, #tpu.memory_space<vmem>>, vector<2x10xf32>
      %c0_11 = arith.constant 0 : index
      %c0_12 = arith.constant 0 : index
      %14 = vector.load %arg3[%c0_11, %c0_12] : memref<1x10xf32, #tpu.memory_space<vmem>>, vector<1x10xf32>
      %15 = vector.broadcast %14 : vector<1x10xf32> to vector<2x10xf32>
      %16 = arith.addf %13, %15 : vector<2x10xf32>
      %c0_13 = arith.constant 0 : index
      %c0_14 = arith.constant 0 : index
      %17 = vector.load %arg4[%c0_13, %c0_14] : memref<2x10xf32, #tpu.memory_space<vmem>>, vector<2x10xf32>
      tpu.vector_store %arg4[%c0_13, %c0_14], %16 {strides = array<i32>} : memref<2x10xf32, #tpu.memory_space<vmem>>, vector<2x10xf32>,
    } else {
    }
    return
  }
  func.func @transform_0(%arg0: i32) -> (i32, i32) {
    %c0_i32 = arith.constant 0 : i32
    %c0_i32_0 = arith.constant 0 : i32
    return %c0_i32, %arg0 : i32, i32
  }
  func.func @transform_1(%arg0: i32) -> (i32, i32) {
    %c0_i32 = arith.constant 0 : i32
    %c0_i32_0 = arith.constant 0 : i32
    return %c0_i32, %arg0 : i32, i32
  }
  func.func @transform_2(%arg0: i32) -> (i32, i32) {
    %c0_i32 = arith.constant 0 : i32
    %c0_i32_0 = arith.constant 0 : i32
    %c0_i32_1 = arith.constant 0 : i32
    return %c0_i32, %c0_i32_0 : i32, i32
  }
  func.func @transform_3(%arg0: i32) -> (i32, i32) {
    %c0_i32 = arith.constant 0 : i32
    %c0_i32_0 = arith.constant 0 : i32
    %c0_i32_1 = arith.constant 0 : i32
    return %c0_i32, %c0_i32_0 : i32, i32
  }
}

</mosaic_0001>

<bundles_post_ra>
// kernel: tudui_forward.1
= control target key start
LH: loop header
LB: loop body
LE: loop exit
PB: predicated region body
PF: predicated region fallthrough
CT: control target
= control target key end

     0   :  { %8 = vsyncpa [#allocation3], 0  ;;  %s30249_s0 = inlined_call_operand.hbm [shape: f32[2,196608], index: 0, kind: input, shape index: {}]   ;;  %s30250_s1 = inlined_call_operand.hbm [shape: bf16[10,196608], index: 1, kind: input, shape index: {}]   ;;  %s30251_s2 = inlined_call_operand.hbm [shape: f32[1,10], index: 2, kind: input, shape index: {}]   ;;  %s30252_s3 = inlined_call_operand.hbm [shape: f32[2,10], index: 3, kind: output, shape index: {}]  }
   0x1   :  { %10 = vsyncpa [#allocation3 + $0x1], 0 }
   0x2   :  { %11 = vsyncpa [#allocation6], 0 }
   0x3   :  { %13 = vsyncpa [#allocation6 + $0x1], 0 }
   0x4   :  { %14 = vsyncpa [#allocation4], 0  ;;  %s26726_s12 = smov 0   ;;  %s26728_s13 = smov 0  }
   0x5   :  { %s26730_s14 = smov 0   ;;  %s26732_s15 = smov 0  }
   0x6 LB: > { %s26745_s16 = sadd.s32 4294967295, %s26695_s15   ;;  %s26748_s17 = sadd.s32 1, %s26695_s15   ;;  %s26695_s15 = sphi %s26732_s15, %s30268_s15   ;;  %s26691_s14 = sphi %s26730_s14, %s30267_s14   ;;  %s26687_s13 = sphi %s26728_s13, %s30266_s13   ;;  %s26683_s12 = sphi %s26726_s12, %s30265_s12  }
   0x7   : > { %s24_s18 = ssub.s32 %s26695_s15, %s26748_s17  ;;  %s27_s19 = sadd.s32 1, %s26691_s14 }
   0x8   : > { %p25_p0 = scmp.eq.s32.totalorder %s24_s18, 0  ;;  %p34_p1 = scmp.ne.s32.totalorder %s26691_s14, %s26687_s13 }
   0x9   : > { %p40_p2 = scmp.ne.s32.totalorder %s26687_s13, %s26683_s12  ;;  %p30253_p3 = scmp.eq.s32.totalorder %s26745_s16, 0 }
   0xa   : > { %s26758_s20 = scalar_select %p25_p0, %s26691_s14, %s27_s19  }
   0xb   : > { %p26762_p4 = por %p30253_p3, %p40_p2  ;;  %p25496_p5 = scmp.ge.s32.totalorder %s26695_s15, 1 }
   0xc   : > { %p119_p6 = scmp.lt.s32.totalorder %s26695_s15, 3  ;;  %s26697_s23 = smov [#allocation7]  }
   0xd   : > { %s30256_s21 = scalar_select %p26762_p4, 1, 0 }
   0xe   : > { %p26769_p8 = pnand %p25496_p5, %p119_p6  ;;  %s132_s24 = sshll.u32 %s26697_s23, 4  ;;  %s133_s24 = int_to_ptr.vmem [resolvable:$true] %s132_s24 }
   0xf   : > { %p35_p9 = scmp.eq.s32.totalorder %s26695_s15, 0  ;;  %p26308_p11 = scmp.lt.s32.totalorder %s26695_s15, 2 }
  0x10   : > { %s30257_s22 = scalar_select %p26769_p8, 1, 0 }
  0x11   : > { %p26296_p10 = pneg %p26769_p8  ;;  %p36_p12 = por %p35_p9, %p34_p1 }
  0x12   : > { %s26781_s25 = sand.u32 1, %s26691_s14   ;;  %s26278_s29 = smul.u32 24576, %s26695_s15 }
  0x13   : > { %p26785_p13 = pnand %p26296_p10, %p30253_p3  ;;  %s26280_s27 = smul.u32 1536, %s26781_s25 }
  0x14   : > { %p26790_p0 = pnand %p26308_p11, %p36_p12  ;;  %s26554_s30 = scalar_lea.vmem %s133_s24, 16 }
  0x15   : > { %p26545_p2 = pneg %p26785_p13  ;;  %p26555_p5 = scmp.ne.s32.totalorder %s133_s24, %s26554_s30 }
  0x16   : > { %s26561_s4 = scalar_lea.vmem %s133_s24, 32  ;;  %p26562_p9 = scmp.lt.s32.totalorder %s133_s24, %s133_s24 }
  0x17   : > { %p26557_p1 = pnand %p26555_p5, %p26545_p2  ;;  %p26563_p7 = scmp.lt.s32.totalorder %s26561_s4, %s26554_s30 }
  0x19   : > { %p26558_p6 = pneg %p26557_p1  ;;  %p26564_p10 = por %p26563_p7, %p26562_p9 }
  0x1b   : > { %p26565_p3 = pnand %p26564_p10, %p26558_p6 }
  0x1d   : > { %26568 = shalt.err (!%p26565_p3)
}
  0x1e   : > { %26299 = dma.hbm_to_vmem [thread:$0]  (!%p26785_p13), %s30251_s2, 16, %s133_s24, [#allocation6]  }
  0x1f   : > { %s26805_s9 = scalar_lea.hbm %s30249_s0, %s26278_s29  ;;  %s147_s10 = scalar_lea.vmem [#allocation2], %s26280_s27 }
  0x20   : > { %s155_s11 = sshll.u32 %s147_s10, 4  ;;  %s26281_s12 = smul.u32 6144, %s26781_s25  ;;  %s156_s11 = int_to_ptr.vmem [resolvable:$true] %s155_s11 }
  0x21   : > { %s144_s18 = scalar_lea.sflag [#allocation3], %s26781_s25  ;;  %s26569_s19 = scalar_lea.hbm %s26805_s9, 24576 }
  0x22   : > { %p26570_p3 = scmp.ne.s32.totalorder %s26805_s9, %s26569_s19  ;;  %p26571_p7 = pneg %p26790_p0 }
  0x23   : > { %s26574_s26 = scalar_lea.hbm %s30249_s0, 49152  ;;  %p26575_p13 = scmp.lt.s32.totalorder %s26805_s9, %s30249_s0 }
  0x24   : > { %p26572_p11 = pnand %p26571_p7, %p26570_p3  ;;  %p26576_p2 = scmp.lt.s32.totalorder %s26574_s26, %s26569_s19 }
  0x26   : > { %p26573_p12 = pneg %p26572_p11  ;;  %p26577_p5 = por %p26576_p2, %p26575_p13 }
  0x28   : > { %p26578_p1 = pnand %p26577_p5, %p26573_p12 }
  0x2a   : > { %26581 = shalt.err (!%p26578_p1)
}
  0x2b   : > { %s26582_s25 = scalar_lea.vmem %s156_s11, 24576  ;;  %s26698_s27 = smov [#allocation2]  }
  0x2c   : > { %p26583_p6 = scmp.ne.s32.totalorder %s156_s11, %s26582_s25  ;;  %s26587_s4 = sshll.u32 %s26698_s27, 4  ;;  %s26588_s4 = int_to_ptr.vmem [resolvable:$false] %s26587_s4 }
  0x2d   : > { %s26589_s5 = scalar_lea.vmem %s26588_s4, 49152  ;;  %p26590_p3 = scmp.lt.s32.totalorder %s156_s11, %s26588_s4 }
  0x2e   : > { %p26585_p9 = pnand %p26583_p6, %p26571_p7  ;;  %p26591_p11 = scmp.lt.s32.totalorder %s26589_s5, %s26582_s25 }
  0x30   : > { %p26586_p10 = pneg %p26585_p9  ;;  %p26592_p4 = por %p26591_p11, %p26590_p3 }
  0x32   : > { %p26593_p8 = pnand %p26592_p4, %p26586_p10 }
  0x34   : > { %26596 = shalt.err (!%p26593_p8)
}
  0x35   : > { %26303 = dma.hbm_to_vmem [thread:$0]  (!%p26790_p0), %s26805_s9, 24576, %s156_s11, %s144_s18  }
  0x36   : > { %s162_s6 = sand.u32 1, %s26695_s15   ;;  %s166_s7 = scalar_lea.vmem [#allocation5], %s26281_s12 }
  0x37   : > { %s173_s8 = sshll.u32 %s166_s7, 4  ;;  %s26279_s10 = smul.u32 49152, %s26695_s15  ;;  %s26830_s8 = int_to_ptr.vmem [resolvable:$true] %s173_s8 }
  0x38   : > { %s26838_s26 = scalar_lea.sflag [#allocation6], %s162_s6  ;;  %s26602_s15 = scalar_lea.hbm %s30250_s1, 196608 }
  0x39   : > { %s26836_s24 = scalar_lea.hbm %s30250_s1, %s26279_s10 }
  0x3a   : > { %s26597_s29 = scalar_lea.hbm %s26836_s24, 98304  ;;  %p26603_p13 = scmp.lt.s32.totalorder %s26836_s24, %s30250_s1 }
  0x3b   : > { %p26598_p4 = scmp.ne.s32.totalorder %s26836_s24, %s26597_s29  ;;  %p26604_p2 = scmp.lt.s32.totalorder %s26602_s15, %s26597_s29 }
  0x3d   : > { %p26600_p8 = pnand %p26598_p4, %p26571_p7  ;;  %p26605_p5 = por %p26604_p2, %p26603_p13 }
  0x3f   : > { %p26601_p12 = pneg %p26600_p8 }
  0x41   : > { %p26606_p1 = pnand %p26605_p5, %p26601_p12 }
  0x43   : > { %26609 = shalt.err (!%p26606_p1)
}
  0x44   : > { %s26610_s30 = scalar_lea.vmem %s26830_s8, 98304  ;;  %s26699_s25 = smov [#allocation5]  }
  0x45   : > { %p26611_p6 = scmp.ne.s32.totalorder %s26830_s8, %s26610_s30  ;;  %s26615_s27 = sshll.u32 %s26699_s25, 4  ;;  %s26616_s27 = int_to_ptr.vmem [resolvable:$false] %s26615_s27 }
  0x46   : > { %s26617_s4 = scalar_lea.vmem %s26616_s27, 196608  ;;  %p26618_p3 = scmp.lt.s32.totalorder %s26830_s8, %s26616_s27 }
  0x47   : > { %p26613_p9 = pnand %p26611_p6, %p26571_p7  ;;  %p26619_p11 = scmp.lt.s32.totalorder %s26617_s4, %s26610_s30 }
  0x49   : > { %p26614_p10 = pneg %p26613_p9  ;;  %p26620_p4 = por %p26619_p11, %p26618_p3 }
  0x4b   : > { %p26621_p8 = pnand %p26620_p4, %p26614_p10 }
  0x4d   : > { %26624 = shalt.err (!%p26621_p8)
}
  0x4e   : > { %s26700_s5 = smov 98304   ;;  %s26701_s6 = smov 49152  }
  0x4f   : > { %s26702_s7 = smov 3072   ;;  %p30260_p7 = scmp.ne.s32.totalorder %s30257_s22, 0 }
  0x50   : > { %26306 = dma.hbm_to_vmem [thread:$0]  (!%p26790_p0), %s26836_s24, 98304, %s26830_s8, %s26838_s26, %s26700_s5, %s26701_s6, %s26702_s7  }
  0x51   : > { %185 = sbr.rel (%p30260_p7) target bundleno = 1870 (0x74e), region = 32  ;;  %s187_s10 = sand.u32 (!%p30260_p7), 1, %s26687_s13  }
  0x52   : > { %s26282_s19 = smul.u32 (!%p30260_p7), 1536, %s187_s10  ;;  %s188_s23 = scalar_lea.sflag (!%p30260_p7), [#allocation3], %s187_s10 }
  0x53   : > { %p30261_p12 = scmp.ne.s32.totalorder (!%p30260_p7), %s30256_s21, 0 }
  0x54   : > { %s26866_s29 = scalar_lea.vmem (!%p30260_p7), [#allocation2], %s26282_s19 }
  0x56   : > { %26666 = dma.done.wait (%p30261_p12), %s188_s23, 24576  }
  0x57   : > { %26668 = vsyncadd (%p30261_p12), %s188_s23, 4294942720  ;;  %s196_s9 = sand.u32 1, %s26745_s16   ;;  %s26283_s28 = smul.u32 6144, %s187_s10 }
  0x58   : > { %s197_s8 = scalar_lea.sflag [#allocation6], %s196_s9 }
  0x59   : > { %s26873_s24 = scalar_lea.vmem [#allocation5], %s26283_s28 }
  0x5a   : > { %26670 = dma.done.wait (%p30261_p12), %s197_s8, 98304  }
  0x5b   : > { %26672 = vsyncadd (%p30261_p12), %s197_s8, 4294868992  ;;  %p30262_p0 = scmp.eq.s32.totalorder %s26745_s16, 0 }
  0x5d   : > { %26674 = dma.done.wait (%p30262_p0), [#allocation6], 16   ;;  %p30263_p13 = pmov %p30262_p0 }
  0x5e   : > { %p30264_p2 = scmp.ne.s32.totalorder %s26745_s16, 0 }
  0x5f   : > { %26676 = vsyncadd (%p30263_p13), [#allocation6], 4294967280 }
  0x60   : > { %233 = sbr.rel (%p30264_p2) target bundleno = 103 (0x67), region = 48 }
  0x65   : > { %vm234_vm0 = vcmask 74752   ;;  %v26703_v0 = vmov 0.0  }
  0x66   : > { %235 = vst.msk [vmem:[#allocation8] sm:$0x3] %vm234_vm0, %v26703_v0 }
  0x67 PF: > { %v5421_v1 = vld [vmem:[%s26873_s24] sm:$0xff]  ;;  %v5422_v3 = vld [vmem:[%s26873_s24 + $0x8] sm:$0xff]  ;;  %v624_v4 = vlaneseq  ;;  %v26704_v9 = vmov 1983009808   ;;  %v5423_v11 = vld [vmem:[%s26873_s24 + $0x10] sm:$0xff]  ;;  %vm25390_vm1 = vcmask 74752  }
  0x68   : > { %v5805_v2 = vld [vmem:[%s26873_s24 + $0xc00] sm:$0x11]  ;;  %v5806_v7 = vld [vmem:[%s26873_s24 + $0xc08] sm:$0x11]  ;;  %v622_v10 = vunpack.c.l.s4 %v26704_v9  ;;  %v5807_v15 = vld [vmem:[%s26873_s24 + $0xc10] sm:$0x11] }
  0x69   : > { %v25505_v5 = vcombine.high %v5421_v1, %v5805_v2  ;;  %v25504_v6 = vcombine.low %v5421_v1, %v5805_v2  ;;  %v236_v8 = vld [vmem:[%s26866_s29] sm:$0xff]  ;;  %v25507_v12 = vcombine.high %v5422_v3, %v5806_v7  ;;  %v25506_v13 = vcombine.low %v5422_v3, %v5806_v7  ;;  %v5424_v16 = vld [vmem:[%s26873_s24 + $0x18] sm:$0xff]  ;;  %v237_v21 = vld [vmem:[%s26866_s29 + $0x8] sm:$0xff]  ;;  %p26272_p5 = scmp.ne.s32.totalorder %s26745_s16, 1 }
  0x6a   : > { %v625_v14 = vshrl.u32 %v624_v4, 7  ;;  %v5808_v17 = vld [vmem:[%s26873_s24 + $0xc18] sm:$0x11]  ;;  %v623_v18 = vunpack.c.0.s8 %v622_v10  ;;  %v620_v19 = vcombine.high %v236_v8, %v236_v8  ;;  %v25509_v20 = vcombine.high %v5423_v11, %v5807_v15  ;;  %v238_v25 = vld [vmem:[%s26866_s29 + $0x10] sm:$0xff]  ;;  %v5425_v33 = vld [vmem:[%s26873_s24 + $0x20] sm:$0xff] }
  0x6b   : > { %10043 = vmatprep.subr.bf16.mxu0 %v25505_v5  ;;  %10083 = vmatprep.subr.bf16.mxu1 %v25507_v12  ;;  %v25511_v22 = vcombine.high %v5424_v16, %v5808_v17  ;;  %v637_v23 = vcombine.high %v237_v21, %v237_v21  ;;  %v654_v30 = vcombine.high %v238_v25, %v238_v25  ;;  %v5809_v38 = vld [vmem:[%s26873_s24 + $0xc20] sm:$0x11]  ;;  %v5426_v39 = vld [vmem:[%s26873_s24 + $0x28] sm:$0xff]  ;;  %v239_v51 = vld [vmem:[%s26866_s29 + $0x18] sm:$0xff] }
  0x6c   : > { %10044 = vmatpush1.bf16.xpose.msra.mxu0 %v25504_v6  ;;  %10084 = vmatpush1.bf16.xpose.msra.mxu1 %v25506_v13  ;;  %v26895_v24 = vsub.s32 %v623_v18, %v625_v14  ;;  %v5810_v40 = vld [vmem:[%s26873_s24 + $0xc28] sm:$0x11]  ;;  %v25508_v43 = vcombine.low %v5423_v11, %v5807_v15  ;;  %v25510_v44 = vcombine.low %v5424_v16, %v5808_v17  ;;  %v5427_v55 = vld [vmem:[%s26873_s24 + $0x30] sm:$0xff]  ;;  %v5428_v59 = vld [vmem:[%s26873_s24 + $0x38] sm:$0xff] }
  0x6d   : > { %10123 = vmatprep.subr.bf16.mxu0 %v25509_v20  ;;  %10163 = vmatprep.subr.bf16.mxu1 %v25511_v22  ;;  %v25513_v49 = vcombine.high %v5425_v33, %v5809_v38  ;;  %v25515_v50 = vcombine.high %v5426_v39, %v5810_v40  ;;  %v671_v54 = vcombine.high %v239_v51, %v239_v51  ;;  %v5811_v58 = vld [vmem:[%s26873_s24 + $0xc30] sm:$0x11]  ;;  %v5812_v60 = vld [vmem:[%s26873_s24 + $0xc38] sm:$0x11]  ;;  %v240_v5 = vld [vmem:[%s26866_s29 + $0x20] sm:$0xff] }
  0x6e   : > { %v627_v26 = vrot.slane %v236_v8, %v26895_v24  ;;  %v634_v27 = vrot.slane %v620_v19, %v26895_v24  ;;  %v644_v28 = vrot.slane %v237_v21, %v26895_v24  ;;  %v651_v29 = vrot.slane %v637_v23, %v26895_v24  ;;  %v5429_v9 = vld [vmem:[%s26873_s24 + $0x40] sm:$0xff]  ;;  %v5430_v13 = vld [vmem:[%s26873_s24 + $0x48] sm:$0xff] }
  0x6f   : > { %v661_v47 = vrot.slane %v238_v25, %v26895_v24  ;;  %v668_v48 = vrot.slane %v654_v30, %v26895_v24  ;;  %v25512_v61 = vcombine.low %v5425_v33, %v5809_v38  ;;  %v25514_v62 = vcombine.low %v5426_v39, %v5810_v40  ;;  %v5813_v12 = vld [vmem:[%s26873_s24 + $0xc40] sm:$0x11]  ;;  %v5814_v14 = vld [vmem:[%s26873_s24 + $0xc48] sm:$0x11]  ;;  %v5816_v33 = vld [vmem:[%s26873_s24 + $0xc58] sm:$0x11] }
  0x70   : > { %v635_v31 = vcombine.high %v627_v26, %v627_v26  ;;  %v636_v32 = vcombine.high %v634_v27, %v634_v27  ;;  %v4652_v34 = vpack.c.bf16 %v627_v26, %v627_v26  ;;  %v4654_v35 = vpack.c.bf16 %v634_v27, %v634_v27  ;;  %v241_v23 = vld [vmem:[%s26866_s29 + $0x28] sm:$0xff] }
  0x71   : > { %v652_v36 = vcombine.high %v644_v28, %v644_v28  ;;  %v653_v37 = vcombine.high %v651_v29, %v651_v29  ;;  %v669_v52 = vcombine.high %v661_v47, %v661_v47  ;;  %v670_v53 = vcombine.high %v668_v48, %v668_v48 }
  0x72   : > { %v4653_v41 = vpack.c.bf16 %v635_v31, %v635_v31  ;;  %v4655_v42 = vpack.c.bf16 %v636_v32, %v636_v32  ;;  %v4656_v56 = vpack.c.bf16 %v644_v28, %v644_v28  ;;  %v4658_v57 = vpack.c.bf16 %v651_v29, %v651_v29  ;;  %v5431_v28 = vld [vmem:[%s26873_s24 + $0x50] sm:$0xff]  ;;  %v5432_v32 = vld [vmem:[%s26873_s24 + $0x58] sm:$0xff] }
  0x73   : > { %v4657_v45 = vpack.c.bf16 %v652_v36, %v652_v36  ;;  %v4659_v46 = vpack.c.bf16 %v653_v37, %v653_v37  ;;  %v4661_v63 = vpack.c.bf16 %v669_v52, %v669_v52  ;;  %v4663_v0 = vpack.c.bf16 %v670_v53, %v670_v53  ;;  %v5815_v31 = vld [vmem:[%s26873_s24 + $0xc50] sm:$0x11] }
  0x74   : > { %10061 = vmatprep.mubr.bf16.mxu0 %v4653_v41  ;;  %10101 = vmatprep.mubr.bf16.mxu1 %v4655_v42  ;;  %v678_v1 = vrot.slane %v239_v51, %v26895_v24  ;;  %v685_v2 = vrot.slane %v671_v54, %v26895_v24  ;;  %v25517_v3 = vcombine.high %v5427_v55, %v5811_v58  ;;  %v242_v42 = vld [vmem:[%s26866_s29 + $0x30] sm:$0xff]  ;;  %v5818_v51 = vld [vmem:[%s26873_s24 + $0xc68] sm:$0x11] }
  0x75   : > { %10062 = vmatmul.mubr.bf16.vlgmr.msra.gmra.mxu0 %v4652_v34  ;;  %10102 = vmatmul.mubr.bf16.vlgmr.msra.gmra.mxu1 %v4654_v35  ;;  %v25519_v4 = vcombine.high %v5428_v59, %v5812_v60  ;;  %v688_v8 = vcombine.high %v240_v5, %v240_v5  ;;  %v4660_v10 = vpack.c.bf16 %v661_v47, %v661_v47 }
  0x76   : > { %10124 = vmatpush1.bf16.xpose.msra.mxu0 %v25508_v43  ;;  %10164 = vmatpush1.bf16.xpose.msra.mxu1 %v25510_v44  ;;  %v686_v6 = vcombine.high %v678_v1, %v678_v1  ;;  %v687_v7 = vcombine.high %v685_v2, %v685_v2  ;;  %v4662_v11 = vpack.c.bf16 %v668_v48, %v668_v48 }
  0x77   : > { %10141 = vmatprep.mubr.bf16.mxu0 %v4657_v45  ;;  %10181 = vmatprep.mubr.bf16.mxu1 %v4659_v46  ;;  %v25516_v15 = vcombine.low %v5427_v55, %v5811_v58  ;;  %v25518_v16 = vcombine.low %v5428_v59, %v5812_v60  ;;  %v695_v19 = vrot.slane %v240_v5, %v26895_v24  ;;  %v5433_v46 = vld [vmem:[%s26873_s24 + $0x60] sm:$0xff]  ;;  %v243_v60 = vld [vmem:[%s26866_s29 + $0x38] sm:$0xff] }
  0x78   : > { %10203 = vmatprep.subr.bf16.mxu0 %v25513_v49  ;;  %10243 = vmatprep.subr.bf16.mxu1 %v25515_v50  ;;  %v4665_v17 = vpack.c.bf16 %v686_v6, %v686_v6  ;;  %v4667_v18 = vpack.c.bf16 %v687_v7, %v687_v7  ;;  %v702_v20 = vrot.slane %v688_v8, %v26895_v24  ;;  %v5817_v49 = vld [vmem:[%s26873_s24 + $0xc60] sm:$0x11]  ;;  %v5434_v50 = vld [vmem:[%s26873_s24 + $0x68] sm:$0xff]  ;;  %v5820_v5 = vld [vmem:[%s26873_s24 + $0xc78] sm:$0x11] }
  0x79   : > { %v25521_v21 = vcombine.high %v5429_v9, %v5813_v12  ;;  %v25523_v22 = vcombine.high %v5430_v13, %v5814_v14  ;;  %v703_v25 = vcombine.high %v695_v19, %v695_v19  ;;  %v705_v27 = vcombine.high %v241_v23, %v241_v23 }
  0x7a   : > { %v704_v26 = vcombine.high %v702_v20, %v702_v20  ;;  %v4664_v29 = vpack.c.bf16 %v678_v1, %v678_v1  ;;  %v4666_v30 = vpack.c.bf16 %v685_v2, %v685_v2  ;;  %v25520_v34 = vcombine.low %v5429_v9, %v5813_v12 }
  0x7b   : > { %v25522_v35 = vcombine.low %v5430_v13, %v5814_v14  ;;  %v4669_v36 = vpack.c.bf16 %v703_v25, %v703_v25  ;;  %v712_v38 = vrot.slane %v241_v23, %v26895_v24  ;;  %v719_v39 = vrot.slane %v705_v27, %v26895_v24  ;;  %v244_v14 = vld [vmem:[%s26866_s29 + $0x40] sm:$0xff]  ;;  %v5822_v23 = vld [vmem:[%s26873_s24 + $0xc88] sm:$0x11] }
  0x7c   : > { %v4671_v37 = vpack.c.bf16 %v704_v26, %v704_v26  ;;  %v25525_v40 = vcombine.high %v5431_v28, %v5815_v31  ;;  %v25527_v41 = vcombine.high %v5432_v32, %v5816_v33  ;;  %v722_v45 = vcombine.high %v242_v42, %v242_v42 }
  0x7d   : > { %10142 = vmatmul.mubr.bf16.vlgmr.msra.gmra.mxu0 %v4656_v56  ;;  %10182 = vmatmul.mubr.bf16.vlgmr.msra.gmra.mxu1 %v4658_v57  ;;  %v720_v43 = vcombine.high %v712_v38, %v712_v38  ;;  %v721_v44 = vcombine.high %v719_v39, %v719_v39  ;;  %v4668_v47 = vpack.c.bf16 %v695_v19, %v695_v19 }
  0x7e   : > { %10204 = vmatpush1.bf16.xpose.msra.mxu0 %v25512_v61  ;;  %10244 = vmatpush1.bf16.xpose.msra.mxu1 %v25514_v62  ;;  %v4670_v48 = vpack.c.bf16 %v702_v20, %v702_v20  ;;  %v25524_v52 = vcombine.low %v5431_v28, %v5815_v31  ;;  %v25526_v53 = vcombine.low %v5432_v32, %v5816_v33  ;;  %v245_v33 = vld [vmem:[%s26866_s29 + $0x48] sm:$0xff] }
  0x7f   : > { %10221 = vmatprep.mubr.bf16.mxu0 %v4661_v63  ;;  %10261 = vmatprep.mubr.bf16.mxu1 %v4663_v0  ;;  %v4673_v54 = vpack.c.bf16 %v720_v43, %v720_v43  ;;  %v4675_v55 = vpack.c.bf16 %v721_v44, %v721_v44  ;;  %v729_v56 = vrot.slane %v242_v42, %v26895_v24  ;;  %v5435_v0 = vld [vmem:[%s26873_s24 + $0x70] sm:$0xff]  ;;  %v5824_v42 = vld [vmem:[%s26873_s24 + $0xc98] sm:$0x11] }
  0x80   : > { %10283 = vmatprep.subr.bf16.mxu0 %v25517_v3  ;;  %10323 = vmatprep.subr.bf16.mxu1 %v25519_v4  ;;  %v736_v57 = vrot.slane %v722_v45, %v26895_v24  ;;  %v25529_v58 = vcombine.high %v5433_v46, %v5817_v49  ;;  %v25531_v59 = vcombine.high %v5434_v50, %v5818_v51  ;;  %v5819_v3 = vld [vmem:[%s26873_s24 + $0xc70] sm:$0x11]  ;;  %v5436_v4 = vld [vmem:[%s26873_s24 + $0x78] sm:$0xff] }
  0x81   : > { %v737_v61 = vcombine.high %v729_v56, %v729_v56  ;;  %v739_v63 = vcombine.high %v243_v60, %v243_v60  ;;  %v4672_v1 = vpack.c.bf16 %v712_v38, %v712_v38  ;;  %v4674_v2 = vpack.c.bf16 %v719_v39, %v719_v39 }
  0x82   : > { %v738_v62 = vcombine.high %v736_v57, %v736_v57  ;;  %v25528_v6 = vcombine.low %v5433_v46, %v5817_v49  ;;  %v25530_v7 = vcombine.low %v5434_v50, %v5818_v51  ;;  %v25533_v12 = vcombine.high %v5435_v0, %v5819_v3  ;;  %v246_v51 = vld [vmem:[%s26866_s29 + $0x50] sm:$0xff] }
  0x83   : > { %v4677_v8 = vpack.c.bf16 %v737_v61, %v737_v61  ;;  %v25535_v13 = vcombine.high %v5436_v4, %v5820_v5  ;;  %v4676_v19 = vpack.c.bf16 %v729_v56, %v729_v56  ;;  %v4678_v20 = vpack.c.bf16 %v736_v57, %v736_v57 }
  0x84   : > { %v4679_v9 = vpack.c.bf16 %v738_v62, %v738_v62  ;;  %v25532_v25 = vcombine.low %v5435_v0, %v5819_v3  ;;  %v25534_v26 = vcombine.low %v5436_v4, %v5820_v5  ;;  %v247_v5 = vld [vmem:[%s26866_s29 + $0x58] sm:$0xff] }
  0x85   : > { %10222 = vmatmul.mubr.bf16.vlgmr.msra.gmra.mxu0 %v4660_v10  ;;  %10262 = vmatmul.mubr.bf16.vlgmr.msra.gmra.mxu1 %v4662_v11  ;;  %v746_v10 = vrot.slane %v243_v60, %v26895_v24  ;;  %v753_v11 = vrot.slane %v739_v63, %v26895_v24  ;;  %v5826_v60 = vld [vmem:[%s26873_s24 + $0xca8] sm:$0x11] }
  0x86   : > { %10284 = vmatpush1.bf16.xpose.msra.mxu0 %v25516_v15  ;;  %10324 = vmatpush1.bf16.xpose.msra.mxu1 %v25518_v16 }
  0x87   : > { %10301 = vmatprep.mubr.bf16.mxu0 %v4665_v17  ;;  %10341 = vmatprep.mubr.bf16.mxu1 %v4667_v18  ;;  %v754_v15 = vcombine.high %v746_v10, %v746_v10  ;;  %v755_v16 = vcombine.high %v753_v11, %v753_v11  ;;  %v756_v17 = vcombine.high %v244_v14, %v244_v14  ;;  %v5437_v18 = vld [vmem:[%s26873_s24 + $0x80] sm:$0xff] }
  0x88   : > { %10363 = vmatprep.subr.bf16.mxu0 %v25521_v21  ;;  %10403 = vmatprep.subr.bf16.mxu1 %v25523_v22  ;;  %v5821_v21 = vld [vmem:[%s26873_s24 + $0xc80] sm:$0x11]  ;;  %v5438_v22 = vld [vmem:[%s26873_s24 + $0x88] sm:$0xff]  ;;  %v4680_v38 = vpack.c.bf16 %v746_v10, %v746_v10  ;;  %v4682_v39 = vpack.c.bf16 %v753_v11, %v753_v11 }
  0x89   : > { %v4681_v27 = vpack.c.bf16 %v754_v15, %v754_v15  ;;  %v4683_v28 = vpack.c.bf16 %v755_v16, %v755_v16  ;;  %v25537_v31 = vcombine.high %v5437_v18, %v5821_v21  ;;  %v25539_v32 = vcombine.high %v5438_v22, %v5822_v23 }
  0x8a   : > { %v25536_v43 = vcombine.low %v5437_v18, %v5821_v21  ;;  %v25538_v44 = vcombine.low %v5438_v22, %v5822_v23  ;;  %v248_v23 = vld [vmem:[%s26866_s29 + $0x60] sm:$0xff] }
  0x8d   : > { %10302 = vmatmul.mubr.bf16.vlgmr.msra.gmra.mxu0 %v4664_v29  ;;  %10342 = vmatmul.mubr.bf16.vlgmr.msra.gmra.mxu1 %v4666_v30  ;;  %v763_v29 = vrot.slane %v244_v14, %v26895_v24  ;;  %v770_v30 = vrot.slane %v756_v17, %v26895_v24  ;;  %v5828_v14 = vld [vmem:[%s26873_s24 + $0xcb8] sm:$0x11] }
  0x8e   : > { %10364 = vmatpush1.bf16.xpose.msra.mxu0 %v25520_v34  ;;  %10404 = vmatpush1.bf16.xpose.msra.mxu1 %v25522_v35 }
  0x8f   : > { %10381 = vmatprep.mubr.bf16.mxu0 %v4669_v36  ;;  %10421 = vmatprep.mubr.bf16.mxu1 %v4671_v37  ;;  %v771_v34 = vcombine.high %v763_v29, %v763_v29  ;;  %v772_v35 = vcombine.high %v770_v30, %v770_v30  ;;  %v773_v36 = vcombine.high %v245_v33, %v245_v33  ;;  %v5439_v37 = vld [vmem:[%s26873_s24 + $0x90] sm:$0xff] }
  0x90   : > { %10443 = vmatprep.subr.bf16.mxu0 %v25525_v40  ;;  %10483 = vmatprep.subr.bf16.mxu1 %v25527_v41  ;;  %v5823_v40 = vld [vmem:[%s26873_s24 + $0xc90] sm:$0x11]  ;;  %v5440_v41 = vld [vmem:[%s26873_s24 + $0x98] sm:$0xff]  ;;  %v4684_v56 = vpack.c.bf16 %v763_v29, %v763_v29  ;;  %v4686_v57 = vpack.c.bf16 %v770_v30, %v770_v30 }
  0x91   : > { %v4685_v45 = vpack.c.bf16 %v771_v34, %v771_v34  ;;  %v4687_v46 = vpack.c.bf16 %v772_v35, %v772_v35  ;;  %v25541_v49 = vcombine.high %v5439_v37, %v5823_v40  ;;  %v25543_v50 = vcombine.high %v5440_v41, %v5824_v42 }
  0x92   : > { %v25540_v61 = vcombine.low %v5439_v37, %v5823_v40  ;;  %v25542_v62 = vcombine.low %v5440_v41, %v5824_v42  ;;  %v249_v42 = vld [vmem:[%s26866_s29 + $0x68] sm:$0xff] }
  0x95   : > { %10382 = vmatmul.mubr.bf16.vlgmr.msra.gmra.mxu0 %v4668_v47  ;;  %10422 = vmatmul.mubr.bf16.vlgmr.msra.gmra.mxu1 %v4670_v48  ;;  %v780_v47 = vrot.slane %v245_v33, %v26895_v24  ;;  %v787_v48 = vrot.slane %v773_v36, %v26895_v24  ;;  %v5830_v33 = vld [vmem:[%s26873_s24 + $0xcc8] sm:$0x11] }
  0x96   : > { %10444 = vmatpush1.bf16.xpose.msra.mxu0 %v25524_v52  ;;  %10484 = vmatpush1.bf16.xpose.msra.mxu1 %v25526_v53 }
  0x97   : > { %10461 = vmatprep.mubr.bf16.mxu0 %v4673_v54  ;;  %10501 = vmatprep.mubr.bf16.mxu1 %v4675_v55  ;;  %v788_v52 = vcombine.high %v780_v47, %v780_v47  ;;  %v789_v53 = vcombine.high %v787_v48, %v787_v48  ;;  %v790_v54 = vcombine.high %v246_v51, %v246_v51  ;;  %v5441_v55 = vld [vmem:[%s26873_s24 + $0xa0] sm:$0xff] }
  0x98   : > { %10523 = vmatprep.subr.bf16.mxu0 %v25529_v58  ;;  %10563 = vmatprep.subr.bf16.mxu1 %v25531_v59  ;;  %v5825_v58 = vld [vmem:[%s26873_s24 + $0xca0] sm:$0x11]  ;;  %v5442_v59 = vld [vmem:[%s26873_s24 + $0xa8] sm:$0xff]  ;;  %v4688_v10 = vpack.c.bf16 %v780_v47, %v780_v47  ;;  %v4690_v11 = vpack.c.bf16 %v787_v48, %v787_v48 }
  0x99   : > { %v4689_v63 = vpack.c.bf16 %v788_v52, %v788_v52  ;;  %v4691_v0 = vpack.c.bf16 %v789_v53, %v789_v53  ;;  %v25545_v3 = vcombine.high %v5441_v55, %v5825_v58  ;;  %v25547_v4 = vcombine.high %v5442_v59, %v5826_v60 }
  0x9a   : > { %v25544_v15 = vcombine.low %v5441_v55, %v5825_v58  ;;  %v25546_v16 = vcombine.low %v5442_v59, %v5826_v60  ;;  %v250_v60 = vld [vmem:[%s26866_s29 + $0x70] sm:$0xff] }
  0x9d   : > { %10462 = vmatmul.mubr.bf16.vlgmr.msra.gmra.mxu0 %v4672_v1  ;;  %10502 = vmatmul.mubr.bf16.vlgmr.msra.gmra.mxu1 %v4674_v2  ;;  %v797_v1 = vrot.slane %v246_v51, %v26895_v24  ;;  %v804_v2 = vrot.slane %v790_v54, %v26895_v24  ;;  %v5832_v51 = vld [vmem:[%s26873_s24 + $0xcd8] sm:$0x11] }
  0x9e   : > { %10524 = vmatpush1.bf16.xpose.msra.mxu0 %v25528_v6  ;;  %10564 = vmatpush1.bf16.xpose.msra.mxu1 %v25530_v7 }
  0x9f   : > { %10541 = vmatprep.mubr.bf16.mxu0 %v4677_v8  ;;  %10581 = vmatprep.mubr.bf16.mxu1 %v4679_v9  ;;  %v805_v6 = vcombine.high %v797_v1, %v797_v1  ;;  %v806_v7 = vcombine.high %v804_v2, %v804_v2  ;;  %v807_v8 = vcombine.high %v247_v5, %v247_v5  ;;  %v5443_v9 = vld [vmem:[%s26873_s24 + $0xb0] sm:$0xff] }
  0xa0   : > { %10603 = vmatprep.subr.bf16.mxu0 %v25533_v12  ;;  %10643 = vmatprep.subr.bf16.mxu1 %v25535_v13  ;;  %v5827_v12 = vld [vmem:[%s26873_s24 + $0xcb0] sm:$0x11]  ;;  %v5444_v13 = vld [vmem:[%s26873_s24 + $0xb8] sm:$0xff]  ;;  %v4692_v29 = vpack.c.bf16 %v797_v1, %v797_v1  ;;  %v4694_v30 = vpack.c.bf16 %v804_v2, %v804_v2 }
  0xa1   : > { %v4693_v17 = vpack.c.bf16 %v805_v6, %v805_v6  ;;  %v4695_v18 = vpack.c.bf16 %v806_v7, %v806_v7  ;;  %v25549_v21 = vcombine.high %v5443_v9, %v5827_v12  ;;  %v25551_v22 = vcombine.high %v5444_v13, %v5828_v14 }
  0xa2   : > { %v25548_v34 = vcombine.low %v5443_v9, %v5827_v12  ;;  %v25550_v35 = vcombine.low %v5444_v13, %v5828_v14  ;;  %v251_v14 = vld [vmem:[%s26866_s29 + $0x78] sm:$0xff] }
  0xa5   : > { %10542 = vmatmul.mubr.bf16.vlgmr.msra.gmra.mxu0 %v4676_v19  ;;  %10582 = vmatmul.mubr.bf16.vlgmr.msra.gmra.mxu1 %v4678_v20  ;;  %v814_v19 = vrot.slane %v247_v5, %v26895_v24  ;;  %v821_v20 = vrot.slane %v807_v8, %v26895_v24  ;;  %v5834_v5 = vld [vmem:[%s26873_s24 + $0xce8] sm:$0x11] }
  0xa6   : > { %10604 = vmatpush1.bf16.xpose.msra.mxu0 %v25532_v25  ;;  %10644 = vmatpush1.bf16.xpose.msra.mxu1 %v25534_v26 }
  0xa7   : > { %10621 = vmatprep.mubr.bf16.mxu0 %v4681_v27  ;;  %10661 = vmatprep.mubr.bf16.mxu1 %v4683_v28  ;;  %v822_v25 = vcombine.high %v814_v19, %v814_v19  ;;  %v823_v26 = vcombine.high %v821_v20, %v821_v20  ;;  %v824_v27 = vcombine.high %v248_v23, %v248_v23  ;;  %v5445_v28 = vld [vmem:[%s26873_s24 + $0xc0] sm:$0xff] }
  0xa8   : > { %10683 = vmatprep.subr.bf16.mxu0 %v25537_v31  ;;  %10723 = vmatprep.subr.bf16.mxu1 %v25539_v32  ;;  %v5829_v31 = vld [vmem:[%s26873_s24 + $0xcc0] sm:$0x11]  ;;  %v5446_v32 = vld [vmem:[%s26873_s24 + $0xc8] sm:$0xff]  ;;  %v4696_v47 = vpack.c.bf16 %v814_v19, %v814_v19  ;;  %v4698_v48 = vpack.c.bf16 %v821_v20, %v821_v20 }
  0xa9   : > { %v4697_v36 = vpack.c.bf16 %v822_v25, %v822_v25  ;;  %v4699_v37 = vpack.c.bf16 %v823_v26, %v823_v26  ;;  %v25553_v40 = vcombine.high %v5445_v28, %v5829_v31  ;;  %v25555_v41 = vcombine.high %v5446_v32, %v5830_v33 }
  0xaa   : > { %v25552_v52 = vcombine.low %v5445_v28, %v5829_v31  ;;  %v25554_v53 = vcombine.low %v5446_v32, %v5830_v33  ;;  %v252_v33 = vld [vmem:[%s26866_s29 + $0x80] sm:$0xff] }
  0xad   : > { %10622 = vmatmul.mubr.bf16.vlgmr.msra.gmra.mxu0 %v4680_v38  ;;  %10662 = vmatmul.mubr.bf16.vlgmr.msra.gmra.mxu1 %v4682_v39  ;;  %v831_v38 = vrot.slane %v248_v23, %v26895_v24  ;;  %v838_v39 = vrot.slane %v824_v27, %v26895_v24  ;;  %v5836_v23 = vld [vmem:[%s26873_s24 + $0xcf8] sm:$0x11] }
  0xae   : > { %10684 = vmatpush1.bf16.xpose.msra.mxu0 %v25536_v43  ;;  %10724 = vmatpush1.bf16.xpose.msra.mxu1 %v25538_v44 }
  0xaf   : > { %10701 = vmatprep.mubr.bf16.mxu0 %v4685_v45  ;;  %10741 = vmatprep.mubr.bf16.mxu1 %v4687_v46  ;;  %v839_v43 = vcombine.high %v831_v38, %v831_v38  ;;  %v840_v44 = vcombine.high %v838_v39, %v838_v39  ;;  %v841_v45 = vcombine.high %v249_v42, %v249_v42  ;;  %v5447_v46 = vld [vmem:[%s26873_s24 + $0xd0] sm:$0xff] }
  0xb0   : > { %10763 = vmatprep.subr.bf16.mxu0 %v25541_v49  ;;  %10803 = vmatprep.subr.bf16.mxu1 %v25543_v50  ;;  %v5831_v49 = vld [vmem:[%s26873_s24 + $0xcd0] sm:$0x11]  ;;  %v5448_v50 = vld [vmem:[%s26873_s24 + $0xd8] sm:$0xff]  ;;  %v4700_v1 = vpack.c.bf16 %v831_v38, %v831_v38  ;;  %v4702_v2 = vpack.c.bf16 %v838_v39, %v838_v39 }
  0xb1   : > { %v4701_v54 = vpack.c.bf16 %v839_v43, %v839_v43  ;;  %v4703_v55 = vpack.c.bf16 %v840_v44, %v840_v44  ;;  %v25557_v58 = vcombine.high %v5447_v46, %v5831_v49  ;;  %v25559_v59 = vcombine.high %v5448_v50, %v5832_v51 }
  0xb2   : > { %v25556_v6 = vcombine.low %v5447_v46, %v5831_v49  ;;  %v25558_v7 = vcombine.low %v5448_v50, %v5832_v51  ;;  %v253_v51 = vld [vmem:[%s26866_s29 + $0x88] sm:$0xff] }
  0xb5   : > { %10702 = vmatmul.mubr.bf16.vlgmr.msra.gmra.mxu0 %v4684_v56  ;;  %10742 = vmatmul.mubr.bf16.vlgmr.msra.gmra.mxu1 %v4686_v57  ;;  %v848_v56 = vrot.slane %v249_v42, %v26895_v24  ;;  %v855_v57 = vrot.slane %v841_v45, %v26895_v24  ;;  %v5838_v42 = vld [vmem:[%s26873_s24 + $0xd08] sm:$0x11] }
  0xb6   : > { %10764 = vmatpush1.bf16.xpose.msra.mxu0 %v25540_v61  ;;  %10804 = vmatpush1.bf16.xpose.msra.mxu1 %v25542_v62 }
  0xb7   : > { %10781 = vmatprep.mubr.bf16.mxu0 %v4689_v63  ;;  %10821 = vmatprep.mubr.bf16.mxu1 %v4691_v0  ;;  %v856_v61 = vcombine.high %v848_v56, %v848_v56  ;;  %v857_v62 = vcombine.high %v855_v57, %v855_v57  ;;  %v858_v63 = vcombine.high %v250_v60, %v250_v60  ;;  %v5449_v0 = vld [vmem:[%s26873_s24 + $0xe0] sm:$0xff] }
  0xb8   : > { %10843 = vmatprep.subr.bf16.mxu0 %v25545_v3  ;;  %10883 = vmatprep.subr.bf16.mxu1 %v25547_v4  ;;  %v5833_v3 = vld [vmem:[%s26873_s24 + $0xce0] sm:$0x11]  ;;  %v5450_v4 = vld [vmem:[%s26873_s24 + $0xe8] sm:$0xff]  ;;  %v4704_v19 = vpack.c.bf16 %v848_v56, %v848_v56  ;;  %v4706_v20 = vpack.c.bf16 %v855_v57, %v855_v57 }
  0xb9   : > { %v4705_v8 = vpack.c.bf16 %v856_v61, %v856_v61  ;;  %v4707_v9 = vpack.c.bf16 %v857_v62, %v857_v62  ;;  %v25561_v12 = vcombine.high %v5449_v0, %v5833_v3  ;;  %v25563_v13 = vcombine.high %v5450_v4, %v5834_v5 }
  0xba   : > { %v25560_v25 = vcombine.low %v5449_v0, %v5833_v3  ;;  %v25562_v26 = vcombine.low %v5450_v4, %v5834_v5  ;;  %v254_v5 = vld [vmem:[%s26866_s29 + $0x90] sm:$0xff] }
  0xbd   : > { %10782 = vmatmul.mubr.bf16.vlgmr.msra.gmra.mxu0 %v4688_v10  ;;  %10822 = vmatmul.mubr.bf16.vlgmr.msra.gmra.mxu1 %v4690_v11  ;;  %v865_v10 = vrot.slane %v250_v60, %v26895_v24  ;;  %v872_v11 = vrot.slane %v858_v63, %v26895_v24  ;;  %v5840_v60 = vld [vmem:[%s26873_s24 + $0xd18] sm:$0x11] }
  0xbe   : > { %10844 = vmatpush1.bf16.xpose.msra.mxu0 %v25544_v15  ;;  %10884 = vmatpush1.bf16.xpose.msra.mxu1 %v25546_v16 }
  0xbf   : > { %10861 = vmatprep.mubr.bf16.mxu0 %v4693_v17  ;;  %10901 = vmatprep.mubr.bf16.mxu1 %v4695_v18  ;;  %v873_v15 = vcombine.high %v865_v10, %v865_v10  ;;  %v874_v16 = vcombine.high %v872_v11, %v872_v11  ;;  %v875_v17 = vcombine.high %v251_v14, %v251_v14  ;;  %v5451_v18 = vld [vmem:[%s26873_s24 + $0xf0] sm:$0xff] }
  0xc0   : > { %10923 = vmatprep.subr.bf16.mxu0 %v25549_v21  ;;  %10963 = vmatprep.subr.bf16.mxu1 %v25551_v22  ;;  %v5835_v21 = vld [vmem:[%s26873_s24 + $0xcf0] sm:$0x11]  ;;  %v5452_v22 = vld [vmem:[%s26873_s24 + $0xf8] sm:$0xff]  ;;  %v4708_v38 = vpack.c.bf16 %v865_v10, %v865_v10  ;;  %v4710_v39 = vpack.c.bf16 %v872_v11, %v872_v11 }
  0xc1   : > { %v4709_v27 = vpack.c.bf16 %v873_v15, %v873_v15  ;;  %v4711_v28 = vpack.c.bf16 %v874_v16, %v874_v16  ;;  %v25565_v31 = vcombine.high %v5451_v18, %v5835_v21  ;;  %v25567_v32 = vcombine.high %v5452_v22, %v5836_v23 }
  0xc2   : > { %v25564_v43 = vcombine.low %v5451_v18, %v5835_v21  ;;  %v25566_v44 = vcombine.low %v5452_v22, %v5836_v23  ;;  %v255_v23 = vld [vmem:[%s26866_s29 + $0x98] sm:$0xff] }
  0xc5   : > { %10862 = vmatmul.mubr.bf16.vlgmr.msra.gmra.mxu0 %v4692_v29  ;;  %10902 = vmatmul.mubr.bf16.vlgmr.msra.gmra.mxu1 %v4694_v30  ;;  %v882_v29 = vrot.slane %v251_v14, %v26895_v24  ;;  %v889_v30 = vrot.slane %v875_v17, %v26895_v24  ;;  %v5842_v14 = vld [vmem:[%s26873_s24 + $0xd28] sm:$0x11] }
  0xc6   : > { %10924 = vmatpush1.bf16.xpose.msra.mxu0 %v25548_v34  ;;  %10964 = vmatpush1.bf16.xpose.msra.mxu1 %v25550_v35 }
  0xc7   : > { %10941 = vmatprep.mubr.bf16.mxu0 %v4697_v36  ;;  %10981 = vmatprep.mubr.bf16.mxu1 %v4699_v37  ;;  %v890_v34 = vcombine.high %v882_v29, %v882_v29  ;;  %v891_v35 = vcombine.high %v889_v30, %v889_v30  ;;  %v892_v36 = vcombine.high %v252_v33, %v252_v33  ;;  %v5453_v37 = vld [vmem:[%s26873_s24 + $0x100] sm:$0xff] }
  0xc8   : > { %11003 = vmatprep.subr.bf16.mxu0 %v25553_v40  ;;  %11043 = vmatprep.subr.bf16.mxu1 %v25555_v41  ;;  %v5837_v40 = vld [vmem:[%s26873_s24 + $0xd00] sm:$0x11]  ;;  %v5454_v41 = vld [vmem:[%s26873_s24 + $0x108] sm:$0xff]  ;;  %v4712_v56 = vpack.c.bf16 %v882_v29, %v882_v29  ;;  %v4714_v57 = vpack.c.bf16 %v889_v30, %v889_v30 }
  0xc9   : > { %v4713_v45 = vpack.c.bf16 %v890_v34, %v890_v34  ;;  %v4715_v46 = vpack.c.bf16 %v891_v35, %v891_v35  ;;  %v25569_v49 = vcombine.high %v5453_v37, %v5837_v40  ;;  %v25571_v50 = vcombine.high %v5454_v41, %v5838_v42 }
  0xca   : > { %v25568_v61 = vcombine.low %v5453_v37, %v5837_v40  ;;  %v25570_v62 = vcombine.low %v5454_v41, %v5838_v42  ;;  %v256_v42 = vld [vmem:[%s26866_s29 + $0xa0] sm:$0xff] }
  0xcd   : > { %10942 = vmatmul.mubr.bf16.vlgmr.msra.gmra.mxu0 %v4696_v47  ;;  %10982 = vmatmul.mubr.bf16.vlgmr.msra.gmra.mxu1 %v4698_v48  ;;  %v899_v47 = vrot.slane %v252_v33, %v26895_v24  ;;  %v906_v48 = vrot.slane %v892_v36, %v26895_v24  ;;  %v5844_v33 = vld [vmem:[%s26873_s24 + $0xd38] sm:$0x11] }
  0xce   : > { %11004 = vmatpush1.bf16.xpose.msra.mxu0 %v25552_v52  ;;  %11044 = vmatpush1.bf16.xpose.msra.mxu1 %v25554_v53 }
  0xcf   : > { %11021 = vmatprep.mubr.bf16.mxu0 %v4701_v54  ;;  %11061 = vmatprep.mubr.bf16.mxu1 %v4703_v55  ;;  %v907_v52 = vcombine.high %v899_v47, %v899_v47  ;;  %v908_v53 = vcombine.high %v906_v48, %v906_v48  ;;  %v909_v54 = vcombine.high %v253_v51, %v253_v51  ;;  %v5455_v55 = vld [vmem:[%s26873_s24 + $0x110] sm:$0xff] }
  0xd0   : > { %11083 = vmatprep.subr.bf16.mxu0 %v25557_v58  ;;  %11123 = vmatprep.subr.bf16.mxu1 %v25559_v59  ;;  %v5839_v58 = vld [vmem:[%s26873_s24 + $0xd10] sm:$0x11]  ;;  %v5456_v59 = vld [vmem:[%s26873_s24 + $0x118] sm:$0xff]  ;;  %v4716_v10 = vpack.c.bf16 %v899_v47, %v899_v47  ;;  %v4718_v11 = vpack.c.bf16 %v906_v48, %v906_v48 }
  0xd1   : > { %v4717_v63 = vpack.c.bf16 %v907_v52, %v907_v52  ;;  %v4719_v0 = vpack.c.bf16 %v908_v53, %v908_v53  ;;  %v25573_v3 = vcombine.high %v5455_v55, %v5839_v58  ;;  %v25575_v4 = vcombine.high %v5456_v59, %v5840_v60 }
  0xd2   : > { %v25572_v15 = vcombine.low %v5455_v55, %v5839_v58  ;;  %v25574_v16 = vcombine.low %v5456_v59, %v5840_v60  ;;  %v257_v60 = vld [vmem:[%s26866_s29 + $0xa8] sm:$0xff] }
  0xd5   : > { %11022 = vmatmul.mubr.bf16.vlgmr.msra.gmra.mxu0 %v4700_v1  ;;  %11062 = vmatmul.mubr.bf16.vlgmr.msra.gmra.mxu1 %v4702_v2  ;;  %v916_v1 = vrot.slane %v253_v51, %v26895_v24  ;;  %v923_v2 = vrot.slane %v909_v54, %v26895_v24  ;;  %v5846_v51 = vld [vmem:[%s26873_s24 + $0xd48] sm:$0x11] }
  0xd6   : > { %11084 = vmatpush1.bf16.xpose.msra.mxu0 %v25556_v6  ;;  %11124 = vmatpush1.bf16.xpose.msra.mxu1 %v25558_v7 }
  0xd7   : > { %11101 = vmatprep.mubr.bf16.mxu0 %v4705_v8  ;;  %11141 = vmatprep.mubr.bf16.mxu1 %v4707_v9  ;;  %v924_v6 = vcombine.high %v916_v1, %v916_v1  ;;  %v925_v7 = vcombine.high %v923_v2, %v923_v2  ;;  %v926_v8 = vcombine.high %v254_v5, %v254_v5  ;;  %v5457_v9 = vld [vmem:[%s26873_s24 + $0x120] sm:$0xff] }
  0xd8   : > { %11163 = vmatprep.subr.bf16.mxu0 %v25561_v12  ;;  %11203 = vmatprep.subr.bf16.mxu1 %v25563_v13  ;;  %v5841_v12 = vld [vmem:[%s26873_s24 + $0xd20] sm:$0x11]  ;;  %v5458_v13 = vld [vmem:[%s26873_s24 + $0x128] sm:$0xff]  ;;  %v4720_v29 = vpack.c.bf16 %v916_v1, %v916_v1  ;;  %v4722_v30 = vpack.c.bf16 %v923_v2, %v923_v2 }
  0xd9   : > { %v4721_v17 = vpack.c.bf16 %v924_v6, %v924_v6  ;;  %v4723_v18 = vpack.c.bf16 %v925_v7, %v925_v7  ;;  %v25577_v21 = vcombine.high %v5457_v9, %v5841_v12  ;;  %v25579_v22 = vcombine.high %v5458_v13, %v5842_v14 }
  0xda   : > { %v25576_v34 = vcombine.low %v5457_v9, %v5841_v12  ;;  %v25578_v35 = vcombine.low %v5458_v13, %v5842_v14  ;;  %v258_v14 = vld [vmem:[%s26866_s29 + $0xb0] sm:$0xff] }
  0xdd   : > { %11102 = vmatmul.mubr.bf16.vlgmr.msra.gmra.mxu0 %v4704_v19  ;;  %11142 = vmatmul.mubr.bf16.vlgmr.msra.gmra.mxu1 %v4706_v20  ;;  %v933_v19 = vrot.slane %v254_v5, %v26895_v24  ;;  %v940_v20 = vrot.slane %v926_v8, %v26895_v24  ;;  %v5848_v5 = vld [vmem:[%s26873_s24 + $0xd58] sm:$0x11] }
  0xde   : > { %11164 = vmatpush1.bf16.xpose.msra.mxu0 %v25560_v25  ;;  %11204 = vmatpush1.bf16.xpose.msra.mxu1 %v25562_v26 }
  0xdf   : > { %11181 = vmatprep.mubr.bf16.mxu0 %v4709_v27  ;;  %11221 = vmatprep.mubr.bf16.mxu1 %v4711_v28  ;;  %v941_v25 = vcombine.high %v933_v19, %v933_v19  ;;  %v942_v26 = vcombine.high %v940_v20, %v940_v20  ;;  %v943_v27 = vcombine.high %v255_v23, %v255_v23  ;;  %v5459_v28 = vld [vmem:[%s26873_s24 + $0x130] sm:$0xff] }
  0xe0   : > { %11243 = vmatprep.subr.bf16.mxu0 %v25565_v31  ;;  %11283 = vmatprep.subr.bf16.mxu1 %v25567_v32  ;;  %v5843_v31 = vld [vmem:[%s26873_s24 + $0xd30] sm:$0x11]  ;;  %v5460_v32 = vld [vmem:[%s26873_s24 + $0x138] sm:$0xff]  ;;  %v4724_v47 = vpack.c.bf16 %v933_v19, %v933_v19  ;;  %v4726_v48 = vpack.c.bf16 %v940_v20, %v940_v20 }
  0xe1   : > { %v4725_v36 = vpack.c.bf16 %v941_v25, %v941_v25  ;;  %v4727_v37 = vpack.c.bf16 %v942_v26, %v942_v26  ;;  %v25581_v40 = vcombine.high %v5459_v28, %v5843_v31  ;;  %v25583_v41 = vcombine.high %v5460_v32, %v5844_v33 }
  0xe2   : > { %v25580_v52 = vcombine.low %v5459_v28, %v5843_v31  ;;  %v25582_v53 = vcombine.low %v5460_v32, %v5844_v33  ;;  %v259_v33 = vld [vmem:[%s26866_s29 + $0xb8] sm:$0xff] }
  0xe5   : > { %11182 = vmatmul.mubr.bf16.vlgmr.msra.gmra.mxu0 %v4708_v38  ;;  %11222 = vmatmul.mubr.bf16.vlgmr.msra.gmra.mxu1 %v4710_v39  ;;  %v950_v38 = vrot.slane %v255_v23, %v26895_v24  ;;  %v957_v39 = vrot.slane %v943_v27, %v26895_v24  ;;  %v5850_v23 = vld [vmem:[%s26873_s24 + $0xd68] sm:$0x11] }
  0xe6   : > { %11244 = vmatpush1.bf16.xpose.msra.mxu0 %v25564_v43  ;;  %11284 = vmatpush1.bf16.xpose.msra.mxu1 %v25566_v44 }
  0xe7   : > { %11261 = vmatprep.mubr.bf16.mxu0 %v4713_v45  ;;  %11301 = vmatprep.mubr.bf16.mxu1 %v4715_v46  ;;  %v958_v43 = vcombine.high %v950_v38, %v950_v38  ;;  %v959_v44 = vcombine.high %v957_v39, %v957_v39  ;;  %v960_v45 = vcombine.high %v256_v42, %v256_v42  ;;  %v5461_v46 = vld [vmem:[%s26873_s24 + $0x140] sm:$0xff] }
  0xe8   : > { %11323 = vmatprep.subr.bf16.mxu0 %v25569_v49  ;;  %11363 = vmatprep.subr.bf16.mxu1 %v25571_v50  ;;  %v5845_v49 = vld [vmem:[%s26873_s24 + $0xd40] sm:$0x11]  ;;  %v5462_v50 = vld [vmem:[%s26873_s24 + $0x148] sm:$0xff]  ;;  %v4728_v1 = vpack.c.bf16 %v950_v38, %v950_v38  ;;  %v4730_v2 = vpack.c.bf16 %v957_v39, %v957_v39 }
  0xe9   : > { %v4729_v54 = vpack.c.bf16 %v958_v43, %v958_v43  ;;  %v4731_v55 = vpack.c.bf16 %v959_v44, %v959_v44  ;;  %v25585_v58 = vcombine.high %v5461_v46, %v5845_v49  ;;  %v25587_v59 = vcombine.high %v5462_v50, %v5846_v51 }
  0xea   : > { %v25584_v6 = vcombine.low %v5461_v46, %v5845_v49  ;;  %v25586_v7 = vcombine.low %v5462_v50, %v5846_v51  ;;  %v260_v51 = vld [vmem:[%s26866_s29 + $0xc0] sm:$0xff] }
  0xed   : > { %11262 = vmatmul.mubr.bf16.vlgmr.msra.gmra.mxu0 %v4712_v56  ;;  %11302 = vmatmul.mubr.bf16.vlgmr.msra.gmra.mxu1 %v4714_v57  ;;  %v967_v56 = vrot.slane %v256_v42, %v26895_v24  ;;  %v974_v57 = vrot.slane %v960_v45, %v26895_v24  ;;  %v5852_v42 = vld [vmem:[%s26873_s24 + $0xd78] sm:$0x11] }
  0xee   : > { %11324 = vmatpush1.bf16.xpose.msra.mxu0 %v25568_v61  ;;  %11364 = vmatpush1.bf16.xpose.msra.mxu1 %v25570_v62 }
  0xef   : > { %11341 = vmatprep.mubr.bf16.mxu0 %v4717_v63  ;;  %11381 = vmatprep.mubr.bf16.mxu1 %v4719_v0  ;;  %v975_v61 = vcombine.high %v967_v56, %v967_v56  ;;  %v976_v62 = vcombine.high %v974_v57, %v974_v57  ;;  %v977_v63 = vcombine.high %v257_v60, %v257_v60  ;;  %v5463_v0 = vld [vmem:[%s26873_s24 + $0x150] sm:$0xff] }
  0xf0   : > { %11403 = vmatprep.subr.bf16.mxu0 %v25573_v3  ;;  %11443 = vmatprep.subr.bf16.mxu1 %v25575_v4  ;;  %v5847_v3 = vld [vmem:[%s26873_s24 + $0xd50] sm:$0x11]  ;;  %v5464_v4 = vld [vmem:[%s26873_s24 + $0x158] sm:$0xff]  ;;  %v4732_v19 = vpack.c.bf16 %v967_v56, %v967_v56  ;;  %v4734_v20 = vpack.c.bf16 %v974_v57, %v974_v57 }
  0xf1   : > { %v4733_v8 = vpack.c.bf16 %v975_v61, %v975_v61  ;;  %v4735_v9 = vpack.c.bf16 %v976_v62, %v976_v62  ;;  %v25589_v12 = vcombine.high %v5463_v0, %v5847_v3  ;;  %v25591_v13 = vcombine.high %v5464_v4, %v5848_v5 }
  0xf2   : > { %v25588_v25 = vcombine.low %v5463_v0, %v5847_v3  ;;  %v25590_v26 = vcombine.low %v5464_v4, %v5848_v5  ;;  %v261_v5 = vld [vmem:[%s26866_s29 + $0xc8] sm:$0xff] }
  0xf5   : > { %11342 = vmatmul.mubr.bf16.vlgmr.msra.gmra.mxu0 %v4716_v10  ;;  %11382 = vmatmul.mubr.bf16.vlgmr.msra.gmra.mxu1 %v4718_v11  ;;  %v984_v10 = vrot.slane %v257_v60, %v26895_v24  ;;  %v991_v11 = vrot.slane %v977_v63, %v26895_v24  ;;  %v5854_v60 = vld [vmem:[%s26873_s24 + $0xd88] sm:$0x11] }
  0xf6   : > { %11404 = vmatpush1.bf16.xpose.msra.mxu0 %v25572_v15  ;;  %11444 = vmatpush1.bf16.xpose.msra.mxu1 %v25574_v16 }
  0xf7   : > { %11421 = vmatprep.mubr.bf16.mxu0 %v4721_v17  ;;  %11461 = vmatprep.mubr.bf16.mxu1 %v4723_v18  ;;  %v992_v15 = vcombine.high %v984_v10, %v984_v10  ;;  %v993_v16 = vcombine.high %v991_v11, %v991_v11  ;;  %v994_v17 = vcombine.high %v258_v14, %v258_v14  ;;  %v5465_v18 = vld [vmem:[%s26873_s24 + $0x160] sm:$0xff] }
  0xf8   : > { %11483 = vmatprep.subr.bf16.mxu0 %v25577_v21  ;;  %11523 = vmatprep.subr.bf16.mxu1 %v25579_v22  ;;  %v5849_v21 = vld [vmem:[%s26873_s24 + $0xd60] sm:$0x11]  ;;  %v5466_v22 = vld [vmem:[%s26873_s24 + $0x168] sm:$0xff]  ;;  %v4736_v38 = vpack.c.bf16 %v984_v10, %v984_v10  ;;  %v4738_v39 = vpack.c.bf16 %v991_v11, %v991_v11 }
  0xf9   : > { %v4737_v27 = vpack.c.bf16 %v992_v15, %v992_v15  ;;  %v4739_v28 = vpack.c.bf16 %v993_v16, %v993_v16  ;;  %v25593_v31 = vcombine.high %v5465_v18, %v5849_v21  ;;  %v25595_v32 = vcombine.high %v5466_v22, %v5850_v23 }
  0xfa   : > { %v25592_v43 = vcombine.low %v5465_v18, %v5849_v21  ;;  %v25594_v44 = vcombine.low %v5466_v22, %v5850_v23  ;;  %v262_v23 = vld [vmem:[%s26866_s29 + $0xd0] sm:$0xff] }
  0xfd   : > { %11422 = vmatmul.mubr.bf16.vlgmr.msra.gmra.mxu0 %v4720_v29  ;;  %11462 = vmatmul.mubr.bf16.vlgmr.msra.gmra.mxu1 %v4722_v30  ;;  %v1001_v29 = vrot.slane %v258_v14, %v26895_v24  ;;  %v1008_v30 = vrot.slane %v994_v17, %v26895_v24  ;;  %v5856_v14 = vld [vmem:[%s26873_s24 + $0xd98] sm:$0x11] }
  0xfe   : > { %11484 = vmatpush1.bf16.xpose.msra.mxu0 %v25576_v34  ;;  %11524 = vmatpush1.bf16.xpose.msra.mxu1 %v25578_v35 }
  0xff   : > { %11501 = vmatprep.mubr.bf16.mxu0 %v4725_v36  ;;  %11541 = vmatprep.mubr.bf16.mxu1 %v4727_v37  ;;  %v1009_v34 = vcombine.high %v1001_v29, %v1001_v29  ;;  %v1010_v35 = vcombine.high %v1008_v30, %v1008_v30  ;;  %v1011_v36 = vcombine.high %v259_v33, %v259_v33  ;;  %v5467_v37 = vld [vmem:[%s26873_s24 + $0x170] sm:$0xff] }
 0x100   : > { %11563 = vmatprep.subr.bf16.mxu0 %v25581_v40  ;;  %11603 = vmatprep.subr.bf16.mxu1 %v25583_v41  ;;  %v5851_v40 = vld [vmem:[%s26873_s24 + $0xd70] sm:$0x11]  ;;  %v5468_v41 = vld [vmem:[%s26873_s24 + $0x178] sm:$0xff]  ;;  %v4740_v56 = vpack.c.bf16 %v1001_v29, %v1001_v29  ;;  %v4742_v57 = vpack.c.bf16 %v1008_v30, %v1008_v30 }
 0x101   : > { %v4741_v45 = vpack.c.bf16 %v1009_v34, %v1009_v34  ;;  %v4743_v46 = vpack.c.bf16 %v1010_v35, %v1010_v35  ;;  %v25597_v49 = vcombine.high %v5467_v37, %v5851_v40  ;;  %v25599_v50 = vcombine.high %v5468_v41, %v5852_v42 }
 0x102   : > { %v25596_v61 = vcombine.low %v5467_v37, %v5851_v40  ;;  %v25598_v62 = vcombine.low %v5468_v41, %v5852_v42  ;;  %v263_v42 = vld [vmem:[%s26866_s29 + $0xd8] sm:$0xff] }
 0x105   : > { %11502 = vmatmul.mubr.bf16.vlgmr.msra.gmra.mxu0 %v4724_v47  ;;  %11542 = vmatmul.mubr.bf16.vlgmr.msra.gmra.mxu1 %v4726_v48  ;;  %v1018_v47 = vrot.slane %v259_v33, %v26895_v24  ;;  %v1025_v48 = vrot.slane %v1011_v36, %v26895_v24  ;;  %v5858_v33 = vld [vmem:[%s26873_s24 + $0xda8] sm:$0x11] }
 0x106   : > { %11564 = vmatpush1.bf16.xpose.msra.mxu0 %v25580_v52  ;;  %11604 = vmatpush1.bf16.xpose.msra.mxu1 %v25582_v53 }
 0x107   : > { %11581 = vmatprep.mubr.bf16.mxu0 %v4729_v54  ;;  %11621 = vmatprep.mubr.bf16.mxu1 %v4731_v55  ;;  %v1026_v52 = vcombine.high %v1018_v47, %v1018_v47  ;;  %v1027_v53 = vcombine.high %v1025_v48, %v1025_v48  ;;  %v1028_v54 = vcombine.high %v260_v51, %v260_v51  ;;  %v5469_v55 = vld [vmem:[%s26873_s24 + $0x180] sm:$0xff] }
 0x108   : > { %11643 = vmatprep.subr.bf16.mxu0 %v25585_v58  ;;  %11683 = vmatprep.subr.bf16.mxu1 %v25587_v59  ;;  %v5853_v58 = vld [vmem:[%s26873_s24 + $0xd80] sm:$0x11]  ;;  %v5470_v59 = vld [vmem:[%s26873_s24 + $0x188] sm:$0xff]  ;;  %v4744_v10 = vpack.c.bf16 %v1018_v47, %v1018_v47  ;;  %v4746_v11 = vpack.c.bf16 %v1025_v48, %v1025_v48 }
 0x109   : > { %v4745_v63 = vpack.c.bf16 %v1026_v52, %v1026_v52  ;;  %v4747_v0 = vpack.c.bf16 %v1027_v53, %v1027_v53  ;;  %v25601_v3 = vcombine.high %v5469_v55, %v5853_v58  ;;  %v25603_v4 = vcombine.high %v5470_v59, %v5854_v60 }
 0x10a   : > { %v25600_v15 = vcombine.low %v5469_v55, %v5853_v58  ;;  %v25602_v16 = vcombine.low %v5470_v59, %v5854_v60  ;;  %v5860_v58 = vld [vmem:[%s26873_s24 + $0xdb8] sm:$0x11] }
 0x10d   : > { %11582 = vmatmul.mubr.bf16.vlgmr.msra.gmra.mxu0 %v4728_v1  ;;  %11622 = vmatmul.mubr.bf16.vlgmr.msra.gmra.mxu1 %v4730_v2  ;;  %v1035_v1 = vrot.slane %v260_v51, %v26895_v24  ;;  %v1042_v2 = vrot.slane %v1028_v54, %v26895_v24  ;;  %v5475_v51 = vld [vmem:[%s26873_s24 + $0x1b0] sm:$0xff] }
 0x10e   : > { %11644 = vmatpush1.bf16.xpose.msra.mxu0 %v25584_v6  ;;  %11684 = vmatpush1.bf16.xpose.msra.mxu1 %v25586_v7 }
 0x10f   : > { %11661 = vmatprep.mubr.bf16.mxu0 %v4733_v8  ;;  %11701 = vmatprep.mubr.bf16.mxu1 %v4735_v9  ;;  %v1043_v6 = vcombine.high %v1035_v1, %v1035_v1  ;;  %v1044_v7 = vcombine.high %v1042_v2, %v1042_v2  ;;  %v1045_v8 = vcombine.high %v261_v5, %v261_v5  ;;  %v5471_v9 = vld [vmem:[%s26873_s24 + $0x190] sm:$0xff] }
 0x110   : > { %11723 = vmatprep.subr.bf16.mxu0 %v25589_v12  ;;  %11763 = vmatprep.subr.bf16.mxu1 %v25591_v13  ;;  %v5855_v12 = vld [vmem:[%s26873_s24 + $0xd90] sm:$0x11]  ;;  %v5472_v13 = vld [vmem:[%s26873_s24 + $0x198] sm:$0xff]  ;;  %v4748_v29 = vpack.c.bf16 %v1035_v1, %v1035_v1  ;;  %v4750_v30 = vpack.c.bf16 %v1042_v2, %v1042_v2  ;;  %v27102_v1 = vrot.slane %v263_v42, %v26895_v24 }
 0x111   : > { %v4749_v17 = vpack.c.bf16 %v1043_v6, %v1043_v6  ;;  %v4751_v18 = vpack.c.bf16 %v1044_v7, %v1044_v7  ;;  %v25605_v21 = vcombine.high %v5471_v9, %v5855_v12  ;;  %v25607_v22 = vcombine.high %v5472_v13, %v5856_v14 }
 0x112   : > { %v25604_v34 = vcombine.low %v5471_v9, %v5855_v12  ;;  %v25606_v35 = vcombine.low %v5472_v13, %v5856_v14 }
 0x115   : > { %11662 = vmatmul.mubr.bf16.vlgmr.msra.gmra.mxu0 %v4732_v19  ;;  %11702 = vmatmul.mubr.bf16.vlgmr.msra.gmra.mxu1 %v4734_v20  ;;  %v27068_v19 = vrot.slane %v261_v5, %v26895_v24  ;;  %v27071_v20 = vrot.slane %v1045_v8, %v26895_v24  ;;  %v264_v5 = vld [vmem:[%s26866_s29 + $0xe0] sm:$0xff] }
 0x116   : > { %11724 = vmatpush1.bf16.xpose.msra.mxu0 %v25588_v25  ;;  %11764 = vmatpush1.bf16.xpose.msra.mxu1 %v25590_v26  ;;  %v1096_v13 = vcombine.high %v264_v5, %v264_v5 }
 0x117   : > { %11741 = vmatprep.mubr.bf16.mxu0 %v4737_v27  ;;  %11781 = vmatprep.mubr.bf16.mxu1 %v4739_v28  ;;  %v1060_v25 = vcombine.high %v27068_v19, %v27068_v19  ;;  %v1061_v26 = vcombine.high %v27071_v20, %v27071_v20  ;;  %v1062_v27 = vcombine.high %v262_v23, %v262_v23  ;;  %v5473_v28 = vld [vmem:[%s26873_s24 + $0x1a0] sm:$0xff] }
 0x118   : > { %11803 = vmatprep.subr.bf16.mxu0 %v25593_v31  ;;  %11843 = vmatprep.subr.bf16.mxu1 %v25595_v32  ;;  %v5857_v31 = vld [vmem:[%s26873_s24 + $0xda0] sm:$0x11]  ;;  %v5474_v32 = vld [vmem:[%s26873_s24 + $0x1a8] sm:$0xff]  ;;  %v4752_v54 = vpack.c.bf16 %v27068_v19, %v27068_v19  ;;  %v4754_v55 = vpack.c.bf16 %v27071_v20, %v27071_v20 }
 0x119   : > { %v4753_v36 = vpack.c.bf16 %v1060_v25, %v1060_v25  ;;  %v4755_v37 = vpack.c.bf16 %v1061_v26, %v1061_v26  ;;  %v25609_v40 = vcombine.high %v5473_v28, %v5857_v31  ;;  %v25611_v41 = vcombine.high %v5474_v32, %v5858_v33  ;;  %v5861_v20 = vld [vmem:[%s26873_s24 + $0xdc0] sm:$0x11] }
 0x11a   : > { %v25608_v59 = vcombine.low %v5473_v28, %v5857_v31  ;;  %v25610_v60 = vcombine.low %v5474_v32, %v5858_v33  ;;  %v27124_v31 = vrot.slane %v1096_v13, %v26895_v24  ;;  %v5865_v13 = vld [vmem:[%s26873_s24 + $0xde0] sm:$0x11] }
 0x11d   : > { %11742 = vmatmul.mubr.bf16.vlgmr.msra.gmra.mxu0 %v4736_v38  ;;  %11782 = vmatmul.mubr.bf16.vlgmr.msra.gmra.mxu1 %v4738_v39  ;;  %v27083_v38 = vrot.slane %v262_v23, %v26895_v24  ;;  %v27086_v39 = vrot.slane %v1062_v27, %v26895_v24 }
 0x11e   : > { %11804 = vmatpush1.bf16.xpose.msra.mxu0 %v25592_v43  ;;  %11844 = vmatpush1.bf16.xpose.msra.mxu1 %v25594_v44 }
 0x11f   : > { %11821 = vmatprep.mubr.bf16.mxu0 %v4741_v45  ;;  %11861 = vmatprep.mubr.bf16.mxu1 %v4743_v46  ;;  %v1077_v48 = vcombine.high %v27083_v38, %v27083_v38  ;;  %v4758_v19 = vpack.c.bf16 %v27086_v39, %v27086_v39 }
 0x120   : > { %11883 = vmatprep.subr.bf16.mxu0 %v25597_v49  ;;  %11923 = vmatprep.subr.bf16.mxu1 %v25599_v50  ;;  %v1078_v49 = vcombine.high %v27086_v39, %v27086_v39  ;;  %v1079_v50 = vcombine.high %v263_v42, %v263_v42 }
 0x122   : > { %v27105_v2 = vrot.slane %v1079_v50, %v26895_v24  ;;  %v5480_v50 = vld [vmem:[%s26873_s24 + $0x1d8] sm:$0xff] }
 0x124   : > { %v1095_v12 = vcombine.high %v27105_v2, %v27105_v2 }
 0x125   : > { %11822 = vmatmul.mubr.bf16.vlgmr.msra.gmra.mxu0 %v4740_v56  ;;  %11862 = vmatmul.mubr.bf16.vlgmr.msra.gmra.mxu1 %v4742_v57  ;;  %v5859_v56 = vld [vmem:[%s26873_s24 + $0xdb0] sm:$0x11]  ;;  %v5476_v57 = vld [vmem:[%s26873_s24 + $0x1b8] sm:$0xff] }
 0x126   : > { %11884 = vmatpush1.bf16.xpose.msra.mxu0 %v25596_v61  ;;  %11924 = vmatpush1.bf16.xpose.msra.mxu1 %v25598_v62  ;;  %v25612_v23 = vcombine.low %v5475_v51, %v5859_v56  ;;  %v25614_v25 = vcombine.low %v5476_v57, %v5860_v58 }
 0x127   : > { %11901 = vmatprep.mubr.bf16.mxu0 %v4745_v63  ;;  %11941 = vmatprep.mubr.bf16.mxu1 %v4747_v0  ;;  %v4757_v63 = vpack.c.bf16 %v1077_v48, %v1077_v48  ;;  %v4759_v0 = vpack.c.bf16 %v1078_v49, %v1078_v49  ;;  %v4762_v48 = vpack.c.bf16 %v27105_v2, %v27105_v2  ;;  %v5863_v49 = vld [vmem:[%s26873_s24 + $0xdd0] sm:$0x11] }
 0x128   : > { %11963 = vmatprep.subr.bf16.mxu0 %v25601_v3  ;;  %12003 = vmatprep.subr.bf16.mxu1 %v25603_v4  ;;  %v25613_v3 = vcombine.high %v5475_v51, %v5859_v56  ;;  %v25615_v4 = vcombine.high %v5476_v57, %v5860_v58  ;;  %v5864_v51 = vld [vmem:[%s26873_s24 + $0xdd8] sm:$0x11] }
 0x12d   : > { %11902 = vmatmul.mubr.bf16.vlgmr.msra.gmra.mxu0 %v4744_v10  ;;  %11942 = vmatmul.mubr.bf16.vlgmr.msra.gmra.mxu1 %v4746_v11  ;;  %v1094_v11 = vcombine.high %v27102_v1, %v27102_v1 }
 0x12e   : > { %11964 = vmatpush1.bf16.xpose.msra.mxu0 %v25600_v15  ;;  %12004 = vmatpush1.bf16.xpose.msra.mxu1 %v25602_v16  ;;  %v5477_v15 = vld [vmem:[%s26873_s24 + $0x1c0] sm:$0xff] }
 0x12f   : > { %11981 = vmatprep.mubr.bf16.mxu0 %v4749_v17  ;;  %12021 = vmatprep.mubr.bf16.mxu1 %v4751_v18  ;;  %v4756_v18 = vpack.c.bf16 %v27083_v38, %v27083_v38  ;;  %v4761_v28 = vpack.c.bf16 %v1094_v11, %v1094_v11  ;;  %v25617_v32 = vcombine.high %v5477_v15, %v5861_v20 }
 0x130   : > { %12043 = vmatprep.subr.bf16.mxu0 %v25605_v21  ;;  %12083 = vmatprep.subr.bf16.mxu1 %v25607_v22  ;;  %v5478_v21 = vld [vmem:[%s26873_s24 + $0x1c8] sm:$0xff] }
 0x131   : > { %v5862_v22 = vld [vmem:[%s26873_s24 + $0xdc8] sm:$0x11] }
 0x132   : > { %v25619_v33 = vcombine.high %v5478_v21, %v5862_v22 }
 0x135   : > { %v10063_v43 = vpop.f32.mrf.mxu0  ;;  %v10103_v44 = vpop.f32.mrf.mxu1  ;;  %11982 = vmatmul.mubr.bf16.vlgmr.msra.gmra.mxu0 %v4748_v29  ;;  %12022 = vmatmul.mubr.bf16.vlgmr.msra.gmra.mxu1 %v4750_v30  ;;  %v4763_v29 = vpack.c.bf16 %v1095_v12, %v1095_v12  ;;  %v27121_v30 = vrot.slane %v264_v5, %v26895_v24  ;;  %v4766_v12 = vpack.c.bf16 %v27124_v31, %v27124_v31 }
 0x136   : > { %v10104_v45 = vadd.f32 %v10103_v44, %v10063_v43  ;;  %12044 = vmatpush1.bf16.xpose.msra.mxu0 %v25604_v34  ;;  %12084 = vmatpush1.bf16.xpose.msra.mxu1 %v25606_v35  ;;  %v265_v34 = vld [vmem:[%s26866_s29 + $0xe8] sm:$0xff]  ;;  %v5479_v44 = vld [vmem:[%s26873_s24 + $0x1d0] sm:$0xff] }
 0x137   : > { %v10065_v46 = vpop.f32.mrf.mxu0  ;;  %v10105_v47 = vpop.f32.mrf.mxu1  ;;  %12061 = vmatprep.mubr.bf16.mxu0 %v4753_v36  ;;  %12101 = vmatprep.mubr.bf16.mxu1 %v4755_v37  ;;  %v1113_v42 = vcombine.high %v265_v34, %v265_v34  ;;  %v27140_v58 = vrot.slane %v265_v34, %v26895_v24  ;;  %v4764_v11 = vpack.c.bf16 %v27121_v30, %v27121_v30 }
 0x138   : > { %12123 = vmatprep.subr.bf16.mxu0 %v25609_v40  ;;  %12163 = vmatprep.subr.bf16.mxu1 %v25611_v41  ;;  %v1111_v40 = vcombine.high %v27121_v30, %v27121_v30  ;;  %v1112_v41 = vcombine.high %v27124_v31, %v27124_v31  ;;  %v4760_v47 = vpack.c.bf16 %v27102_v1, %v27102_v1 }
 0x139   : > { %v10066_v52 = vpop.f32.mrf.mxu0  ;;  %v10106_v53 = vpop.f32.mrf.mxu1 }
 0x13a   : > { %v25616_v52 = vcombine.low %v5477_v15, %v5861_v20  ;;  %v25618_v53 = vcombine.low %v5478_v21, %v5862_v22  ;;  %v4765_v56 = vpack.c.bf16 %v1111_v40, %v1111_v40  ;;  %v4767_v57 = vpack.c.bf16 %v1112_v41, %v1112_v41  ;;  %v5866_v15 = vld [vmem:[%s26873_s24 + $0xde8] sm:$0x11] }
 0x13b   : > { %v10067_v61 = vpop.f32.mrf.mxu0  ;;  %v10107_v62 = vpop.f32.mrf.mxu1  ;;  %v4768_v40 = vpack.c.bf16 %v27140_v58, %v27140_v58 }
 0x13c   : > { %v25623_v61 = vcombine.high %v5480_v50, %v5864_v51  ;;  %v266_v62 = vld [vmem:[%s26866_s29 + $0xf0] sm:$0xff] }
 0x13d   : > { %v10143_v6 = vpop.f32.mrf.mxu0  ;;  %v10183_v7 = vpop.f32.mrf.mxu1  ;;  %12062 = vmatmul.mubr.bf16.vlgmr.msra.gmra.mxu0 %v4752_v54  ;;  %12102 = vmatmul.mubr.bf16.vlgmr.msra.gmra.mxu1 %v4754_v55  ;;  %v27159_v22 = vrot.slane %v266_v62, %v26895_v24 }
 0x13e   : > { %v10144_v8 = vadd.f32 %v10143_v6, %v10104_v45  ;;  %12124 = vmatpush1.bf16.xpose.msra.mxu0 %v25608_v59  ;;  %12164 = vmatpush1.bf16.xpose.msra.mxu1 %v25610_v60  ;;  %v27143_v59 = vrot.slane %v1113_v42, %v26895_v24  ;;  %v25621_v60 = vcombine.high %v5479_v44, %v5863_v49  ;;  %v5867_v42 = vld [vmem:[%s26873_s24 + $0xdf0] sm:$0x11] }
 0x13f   : > { %v10145_v9 = vpop.f32.mrf.mxu0  ;;  %v10185_v10 = vpop.f32.mrf.mxu1  ;;  %12141 = vmatprep.mubr.bf16.mxu0 %v4757_v63  ;;  %12181 = vmatprep.mubr.bf16.mxu1 %v4759_v0  ;;  %v1130_v6 = vcombine.high %v266_v62, %v266_v62 }
 0x140   : > { %v10184_v14 = vadd.f32 %v10183_v7, %v10144_v8  ;;  %12203 = vmatprep.subr.bf16.mxu0 %v25613_v3  ;;  %12243 = vmatprep.subr.bf16.mxu1 %v25615_v4  ;;  %v1128_v4 = vcombine.high %v27140_v58, %v27140_v58  ;;  %v1129_v5 = vcombine.high %v27143_v59, %v27143_v59  ;;  %v5481_v8 = vld [vmem:[%s26873_s24 + $0x1e0] sm:$0xff] }
 0x141   : > { %v10146_v16 = vpop.f32.mrf.mxu0  ;;  %v10186_v17 = vpop.f32.mrf.mxu1  ;;  %v4770_v41 = vpack.c.bf16 %v27143_v59, %v27143_v59 }
 0x142   : > { %v25620_v16 = vcombine.low %v5479_v44, %v5863_v49  ;;  %v25622_v17 = vcombine.low %v5480_v50, %v5864_v51  ;;  %v4769_v20 = vpack.c.bf16 %v1128_v4, %v1128_v4  ;;  %v4771_v21 = vpack.c.bf16 %v1129_v5, %v1129_v5  ;;  %v5868_v44 = vld [vmem:[%s26873_s24 + $0xdf8] sm:$0x11] }
 0x143   : > { %v10147_v26 = vpop.f32.mrf.mxu0  ;;  %v10187_v27 = vpop.f32.mrf.mxu1  ;;  %v4772_v4 = vpack.c.bf16 %v27159_v22, %v27159_v22 }
 0x144   : > { %v267_v27 = vld [vmem:[%s26866_s29 + $0xf8] sm:$0xff] }
 0x145   : > { %v10223_v35 = vpop.f32.mrf.mxu0  ;;  %v10263_v36 = vpop.f32.mrf.mxu1  ;;  %12142 = vmatmul.mubr.bf16.vlgmr.msra.gmra.mxu0 %v4756_v18  ;;  %12182 = vmatmul.mubr.bf16.vlgmr.msra.gmra.mxu1 %v4758_v19  ;;  %v27178_v51 = vrot.slane %v267_v27, %v26895_v24 }
 0x146   : > { %v10224_v37 = vadd.f32 %v10223_v35, %v10184_v14  ;;  %12204 = vmatpush1.bf16.xpose.msra.mxu0 %v25612_v23  ;;  %12244 = vmatpush1.bf16.xpose.msra.mxu1 %v25614_v25  ;;  %v5482_v14 = vld [vmem:[%s26873_s24 + $0x1e8] sm:$0xff]  ;;  %v27162_v23 = vrot.slane %v1130_v6, %v26895_v24  ;;  %v25625_v25 = vcombine.high %v5481_v8, %v5865_v13  ;;  %v5869_v6 = vld [vmem:[%s26873_s24 + $0xe00] sm:$0x11] }
 0x147   : > { %v10225_v38 = vpop.f32.mrf.mxu0  ;;  %v10265_v39 = vpop.f32.mrf.mxu1  ;;  %12221 = vmatprep.mubr.bf16.mxu0 %v4761_v28  ;;  %12261 = vmatprep.mubr.bf16.mxu1 %v4763_v29  ;;  %v25627_v26 = vcombine.high %v5482_v14, %v5866_v15  ;;  %v1147_v35 = vcombine.high %v267_v27, %v267_v27 }
 0x148   : > { %v10264_v43 = vadd.f32 %v10263_v36, %v10224_v37  ;;  %12283 = vmatprep.subr.bf16.mxu0 %v25617_v32  ;;  %12323 = vmatprep.subr.bf16.mxu1 %v25619_v33  ;;  %v1145_v33 = vcombine.high %v27159_v22, %v27159_v22  ;;  %v1146_v34 = vcombine.high %v27162_v23, %v27162_v23  ;;  %v5483_v37 = vld [vmem:[%s26873_s24 + $0x1f0] sm:$0xff] }
 0x149   : > { %v10226_v45 = vpop.f32.mrf.mxu0  ;;  %v10266_v46 = vpop.f32.mrf.mxu1  ;;  %v4774_v5 = vpack.c.bf16 %v27162_v23, %v27162_v23 }
 0x14a   : > { %v25624_v45 = vcombine.low %v5481_v8, %v5865_v13  ;;  %v25626_v46 = vcombine.low %v5482_v14, %v5866_v15  ;;  %v4773_v49 = vpack.c.bf16 %v1145_v33, %v1145_v33  ;;  %v4775_v50 = vpack.c.bf16 %v1146_v34, %v1146_v34  ;;  %v5870_v8 = vld [vmem:[%s26873_s24 + $0xe08] sm:$0x11] }
 0x14b   : > { %v10227_v54 = vpop.f32.mrf.mxu0  ;;  %v10267_v55 = vpop.f32.mrf.mxu1  ;;  %v4776_v33 = vpack.c.bf16 %v27178_v51, %v27178_v51 }
 0x14c   : > { %v268_v55 = vld [vmem:[%s26866_s29 + $0x100] sm:$0xff] }
 0x14d   : > { %v10303_v63 = vpop.f32.mrf.mxu0  ;;  %v10343_v0 = vpop.f32.mrf.mxu1  ;;  %12222 = vmatmul.mubr.bf16.vlgmr.msra.gmra.mxu0 %v4760_v47  ;;  %12262 = vmatmul.mubr.bf16.vlgmr.msra.gmra.mxu1 %v4762_v48  ;;  %v27197_v15 = vrot.slane %v268_v55, %v26895_v24 }
 0x14e   : > { %v10304_v1 = vadd.f32 %v10303_v63, %v10264_v43  ;;  %12284 = vmatpush1.bf16.xpose.msra.mxu0 %v25616_v52  ;;  %12324 = vmatpush1.bf16.xpose.msra.mxu1 %v25618_v53  ;;  %v5484_v43 = vld [vmem:[%s26873_s24 + $0x1f8] sm:$0xff]  ;;  %v27181_v52 = vrot.slane %v1147_v35, %v26895_v24  ;;  %v25629_v53 = vcombine.high %v5483_v37, %v5867_v42  ;;  %v5871_v35 = vld [vmem:[%s26873_s24 + $0xe10] sm:$0x11] }
 0x14f   : > { %v10305_v2 = vpop.f32.mrf.mxu0  ;;  %v10345_v3 = vpop.f32.mrf.mxu1  ;;  %12301 = vmatprep.mubr.bf16.mxu0 %v4765_v56  ;;  %12341 = vmatprep.mubr.bf16.mxu1 %v4767_v57  ;;  %v25631_v54 = vcombine.high %v5484_v43, %v5868_v44  ;;  %v1164_v63 = vcombine.high %v268_v55, %v268_v55 }
 0x150   : > { %v10344_v7 = vadd.f32 %v10343_v0, %v10304_v1  ;;  %12363 = vmatprep.subr.bf16.mxu0 %v25621_v60  ;;  %12403 = vmatprep.subr.bf16.mxu1 %v25623_v61  ;;  %v1162_v61 = vcombine.high %v27178_v51, %v27178_v51  ;;  %v1163_v62 = vcombine.high %v27181_v52, %v27181_v52  ;;  %v5485_v1 = vld [vmem:[%s26873_s24 + $0x200] sm:$0xff] }
 0x151   : > { %v10306_v9 = vpop.f32.mrf.mxu0  ;;  %v10346_v10 = vpop.f32.mrf.mxu1  ;;  %v4778_v34 = vpack.c.bf16 %v27181_v52, %v27181_v52 }
 0x152   : > { %v25628_v9 = vcombine.low %v5483_v37, %v5867_v42  ;;  %v25630_v10 = vcombine.low %v5484_v43, %v5868_v44  ;;  %v4777_v13 = vpack.c.bf16 %v1162_v61, %v1162_v61  ;;  %v4779_v14 = vpack.c.bf16 %v1163_v62, %v1163_v62  ;;  %v5872_v37 = vld [vmem:[%s26873_s24 + $0xe18] sm:$0x11] }
 0x153   : > { %v10307_v18 = vpop.f32.mrf.mxu0  ;;  %v10347_v19 = vpop.f32.mrf.mxu1  ;;  %v4780_v61 = vpack.c.bf16 %v27197_v15, %v27197_v15 }
 0x154   : > { %v269_v19 = vld [vmem:[%s26866_s29 + $0x108] sm:$0xff] }
 0x155   : > { %v10383_v28 = vpop.f32.mrf.mxu0  ;;  %v10423_v29 = vpop.f32.mrf.mxu1  ;;  %12302 = vmatmul.mubr.bf16.vlgmr.msra.gmra.mxu0 %v4764_v11  ;;  %12342 = vmatmul.mubr.bf16.vlgmr.msra.gmra.mxu1 %v4766_v12  ;;  %v27216_v44 = vrot.slane %v269_v19, %v26895_v24 }
 0x156   : > { %v10384_v30 = vadd.f32 %v10383_v28, %v10344_v7  ;;  %12364 = vmatpush1.bf16.xpose.msra.mxu0 %v25620_v16  ;;  %12404 = vmatpush1.bf16.xpose.msra.mxu1 %v25622_v17  ;;  %v5486_v7 = vld [vmem:[%s26873_s24 + $0x208] sm:$0xff]  ;;  %v27200_v16 = vrot.slane %v1164_v63, %v26895_v24  ;;  %v25633_v17 = vcombine.high %v5485_v1, %v5869_v6  ;;  %v5873_v63 = vld [vmem:[%s26873_s24 + $0xe20] sm:$0x11] }
 0x157   : > { %v10385_v31 = vpop.f32.mrf.mxu0  ;;  %v10425_v32 = vpop.f32.mrf.mxu1  ;;  %12381 = vmatprep.mubr.bf16.mxu0 %v4769_v20  ;;  %12421 = vmatprep.mubr.bf16.mxu1 %v4771_v21  ;;  %v25635_v18 = vcombine.high %v5486_v7, %v5870_v8  ;;  %v1181_v28 = vcombine.high %v269_v19, %v269_v19 }
 0x158   : > { %v10424_v36 = vadd.f32 %v10423_v29, %v10384_v30  ;;  %12443 = vmatprep.subr.bf16.mxu0 %v25625_v25  ;;  %12483 = vmatprep.subr.bf16.mxu1 %v25627_v26  ;;  %v1179_v26 = vcombine.high %v27197_v15, %v27197_v15  ;;  %v1180_v27 = vcombine.high %v27200_v16, %v27200_v16  ;;  %v5487_v30 = vld [vmem:[%s26873_s24 + $0x210] sm:$0xff] }
 0x159   : > { %v10386_v38 = vpop.f32.mrf.mxu0  ;;  %v10426_v39 = vpop.f32.mrf.mxu1  ;;  %v4782_v62 = vpack.c.bf16 %v27200_v16, %v27200_v16 }
 0x15a   : > { %v25632_v38 = vcombine.low %v5485_v1, %v5869_v6  ;;  %v25634_v39 = vcombine.low %v5486_v7, %v5870_v8  ;;  %v4781_v42 = vpack.c.bf16 %v1179_v26, %v1179_v26  ;;  %v4783_v43 = vpack.c.bf16 %v1180_v27, %v1180_v27  ;;  %v5874_v1 = vld [vmem:[%s26873_s24 + $0xe28] sm:$0x11] }
 0x15b   : > { %v10387_v47 = vpop.f32.mrf.mxu0  ;;  %v10427_v48 = vpop.f32.mrf.mxu1  ;;  %v4784_v26 = vpack.c.bf16 %v27216_v44, %v27216_v44 }
 0x15c   : > { %v270_v48 = vld [vmem:[%s26866_s29 + $0x110] sm:$0xff] }
 0x15d   : > { %v10463_v56 = vpop.f32.mrf.mxu0  ;;  %v10503_v57 = vpop.f32.mrf.mxu1  ;;  %12382 = vmatmul.mubr.bf16.vlgmr.msra.gmra.mxu0 %v4768_v40  ;;  %12422 = vmatmul.mubr.bf16.vlgmr.msra.gmra.mxu1 %v4770_v41  ;;  %v27235_v8 = vrot.slane %v270_v48, %v26895_v24 }
 0x15e   : > { %v10464_v58 = vadd.f32 %v10463_v56, %v10424_v36  ;;  %12444 = vmatpush1.bf16.xpose.msra.mxu0 %v25624_v45  ;;  %12484 = vmatpush1.bf16.xpose.msra.mxu1 %v25626_v46  ;;  %v5488_v36 = vld [vmem:[%s26873_s24 + $0x218] sm:$0xff]  ;;  %v27219_v45 = vrot.slane %v1181_v28, %v26895_v24  ;;  %v25637_v46 = vcombine.high %v5487_v30, %v5871_v35  ;;  %v5875_v28 = vld [vmem:[%s26873_s24 + $0xe30] sm:$0x11] }
 0x15f   : > { %v10465_v59 = vpop.f32.mrf.mxu0  ;;  %v10505_v60 = vpop.f32.mrf.mxu1  ;;  %12461 = vmatprep.mubr.bf16.mxu0 %v4773_v49  ;;  %12501 = vmatprep.mubr.bf16.mxu1 %v4775_v50  ;;  %v25639_v47 = vcombine.high %v5488_v36, %v5872_v37  ;;  %v1198_v56 = vcombine.high %v270_v48, %v270_v48 }
 0x160   : > { %v10504_v0 = vadd.f32 %v10503_v57, %v10464_v58  ;;  %12523 = vmatprep.subr.bf16.mxu0 %v25629_v53  ;;  %12563 = vmatprep.subr.bf16.mxu1 %v25631_v54  ;;  %v1196_v54 = vcombine.high %v27216_v44, %v27216_v44  ;;  %v1197_v55 = vcombine.high %v27219_v45, %v27219_v45  ;;  %v5489_v58 = vld [vmem:[%s26873_s24 + $0x220] sm:$0xff] }
 0x161   : > { %v10466_v2 = vpop.f32.mrf.mxu0  ;;  %v10506_v3 = vpop.f32.mrf.mxu1  ;;  %v4786_v27 = vpack.c.bf16 %v27219_v45, %v27219_v45 }
 0x162   : > { %v25636_v2 = vcombine.low %v5487_v30, %v5871_v35  ;;  %v25638_v3 = vcombine.low %v5488_v36, %v5872_v37  ;;  %v4785_v6 = vpack.c.bf16 %v1196_v54, %v1196_v54  ;;  %v4787_v7 = vpack.c.bf16 %v1197_v55, %v1197_v55  ;;  %v5876_v30 = vld [vmem:[%s26873_s24 + $0xe38] sm:$0x11] }
 0x163   : > { %v10467_v11 = vpop.f32.mrf.mxu0  ;;  %v10507_v12 = vpop.f32.mrf.mxu1  ;;  %v4788_v54 = vpack.c.bf16 %v27235_v8, %v27235_v8 }
 0x164   : > { %v271_v12 = vld [vmem:[%s26866_s29 + $0x118] sm:$0xff] }
 0x165   : > { %v10543_v20 = vpop.f32.mrf.mxu0  ;;  %v10583_v21 = vpop.f32.mrf.mxu1  ;;  %12462 = vmatmul.mubr.bf16.vlgmr.msra.gmra.mxu0 %v4772_v4  ;;  %12502 = vmatmul.mubr.bf16.vlgmr.msra.gmra.mxu1 %v4774_v5  ;;  %v27254_v37 = vrot.slane %v271_v12, %v26895_v24 }
 0x166   : > { %v10544_v22 = vadd.f32 %v10543_v20, %v10504_v0  ;;  %12524 = vmatpush1.bf16.xpose.msra.mxu0 %v25628_v9  ;;  %12564 = vmatpush1.bf16.xpose.msra.mxu1 %v25630_v10  ;;  %v5490_v0 = vld [vmem:[%s26873_s24 + $0x228] sm:$0xff]  ;;  %v27238_v9 = vrot.slane %v1198_v56, %v26895_v24  ;;  %v25641_v10 = vcombine.high %v5489_v58, %v5873_v63  ;;  %v5877_v56 = vld [vmem:[%s26873_s24 + $0xe40] sm:$0x11] }
 0x167   : > { %v10545_v23 = vpop.f32.mrf.mxu0  ;;  %v10585_v25 = vpop.f32.mrf.mxu1  ;;  %12541 = vmatprep.mubr.bf16.mxu0 %v4777_v13  ;;  %12581 = vmatprep.mubr.bf16.mxu1 %v4779_v14  ;;  %v25643_v11 = vcombine.high %v5490_v0, %v5874_v1  ;;  %v1215_v20 = vcombine.high %v271_v12, %v271_v12 }
 0x168   : > { %v10584_v29 = vadd.f32 %v10583_v21, %v10544_v22  ;;  %12603 = vmatprep.subr.bf16.mxu0 %v25633_v17  ;;  %12643 = vmatprep.subr.bf16.mxu1 %v25635_v18  ;;  %v1213_v18 = vcombine.high %v27235_v8, %v27235_v8  ;;  %v1214_v19 = vcombine.high %v27238_v9, %v27238_v9  ;;  %v5491_v22 = vld [vmem:[%s26873_s24 + $0x230] sm:$0xff] }
 0x169   : > { %v10546_v31 = vpop.f32.mrf.mxu0  ;;  %v10586_v32 = vpop.f32.mrf.mxu1  ;;  %v4790_v55 = vpack.c.bf16 %v27238_v9, %v27238_v9 }
 0x16a   : > { %v25640_v31 = vcombine.low %v5489_v58, %v5873_v63  ;;  %v25642_v32 = vcombine.low %v5490_v0, %v5874_v1  ;;  %v4789_v35 = vpack.c.bf16 %v1213_v18, %v1213_v18  ;;  %v4791_v36 = vpack.c.bf16 %v1214_v19, %v1214_v19  ;;  %v5878_v58 = vld [vmem:[%s26873_s24 + $0xe48] sm:$0x11] }
 0x16b   : > { %v10547_v40 = vpop.f32.mrf.mxu0  ;;  %v10587_v41 = vpop.f32.mrf.mxu1  ;;  %v4792_v18 = vpack.c.bf16 %v27254_v37, %v27254_v37 }
 0x16c   : > { %v272_v41 = vld [vmem:[%s26866_s29 + $0x120] sm:$0xff] }
 0x16d   : > { %v10623_v49 = vpop.f32.mrf.mxu0  ;;  %v10663_v50 = vpop.f32.mrf.mxu1  ;;  %12542 = vmatmul.mubr.bf16.vlgmr.msra.gmra.mxu0 %v4776_v33  ;;  %12582 = vmatmul.mubr.bf16.vlgmr.msra.gmra.mxu1 %v4778_v34  ;;  %v27273_v1 = vrot.slane %v272_v41, %v26895_v24 }
 0x16e   : > { %v10624_v51 = vadd.f32 %v10623_v49, %v10584_v29  ;;  %12604 = vmatpush1.bf16.xpose.msra.mxu0 %v25632_v38  ;;  %12644 = vmatpush1.bf16.xpose.msra.mxu1 %v25634_v39  ;;  %v5492_v29 = vld [vmem:[%s26873_s24 + $0x238] sm:$0xff]  ;;  %v27257_v38 = vrot.slane %v1215_v20, %v26895_v24  ;;  %v25645_v39 = vcombine.high %v5491_v22, %v5875_v28  ;;  %v5879_v20 = vld [vmem:[%s26873_s24 + $0xe50] sm:$0x11] }
 0x16f   : > { %v10625_v52 = vpop.f32.mrf.mxu0  ;;  %v10665_v53 = vpop.f32.mrf.mxu1  ;;  %12621 = vmatprep.mubr.bf16.mxu0 %v4781_v42  ;;  %12661 = vmatprep.mubr.bf16.mxu1 %v4783_v43  ;;  %v25647_v40 = vcombine.high %v5492_v29, %v5876_v30  ;;  %v1232_v49 = vcombine.high %v272_v41, %v272_v41 }
 0x170   : > { %v10664_v57 = vadd.f32 %v10663_v50, %v10624_v51  ;;  %12683 = vmatprep.subr.bf16.mxu0 %v25637_v46  ;;  %12723 = vmatprep.subr.bf16.mxu1 %v25639_v47  ;;  %v1230_v47 = vcombine.high %v27254_v37, %v27254_v37  ;;  %v1231_v48 = vcombine.high %v27257_v38, %v27257_v38  ;;  %v5493_v51 = vld [vmem:[%s26873_s24 + $0x240] sm:$0xff] }
 0x171   : > { %v10626_v59 = vpop.f32.mrf.mxu0  ;;  %v10666_v60 = vpop.f32.mrf.mxu1  ;;  %v4794_v19 = vpack.c.bf16 %v27257_v38, %v27257_v38 }
 0x172   : > { %v25644_v59 = vcombine.low %v5491_v22, %v5875_v28  ;;  %v25646_v60 = vcombine.low %v5492_v29, %v5876_v30  ;;  %v4793_v63 = vpack.c.bf16 %v1230_v47, %v1230_v47  ;;  %v4795_v0 = vpack.c.bf16 %v1231_v48, %v1231_v48  ;;  %v5880_v22 = vld [vmem:[%s26873_s24 + $0xe58] sm:$0x11] }
 0x173   : > { %v10627_v4 = vpop.f32.mrf.mxu0  ;;  %v10667_v5 = vpop.f32.mrf.mxu1  ;;  %v4796_v47 = vpack.c.bf16 %v27273_v1, %v27273_v1 }
 0x174   : > { %v273_v5 = vld [vmem:[%s26866_s29 + $0x128] sm:$0xff] }
 0x175   : > { %v10703_v13 = vpop.f32.mrf.mxu0  ;;  %v10743_v14 = vpop.f32.mrf.mxu1  ;;  %12622 = vmatmul.mubr.bf16.vlgmr.msra.gmra.mxu0 %v4780_v61  ;;  %12662 = vmatmul.mubr.bf16.vlgmr.msra.gmra.mxu1 %v4782_v62  ;;  %v27292_v30 = vrot.slane %v273_v5, %v26895_v24 }
 0x176   : > { %v10704_v15 = vadd.f32 %v10703_v13, %v10664_v57  ;;  %12684 = vmatpush1.bf16.xpose.msra.mxu0 %v25636_v2  ;;  %12724 = vmatpush1.bf16.xpose.msra.mxu1 %v25638_v3  ;;  %v5494_v57 = vld [vmem:[%s26873_s24 + $0x248] sm:$0xff]  ;;  %v27276_v2 = vrot.slane %v1232_v49, %v26895_v24  ;;  %v25649_v3 = vcombine.high %v5493_v51, %v5877_v56  ;;  %v5881_v49 = vld [vmem:[%s26873_s24 + $0xe60] sm:$0x11] }
 0x177   : > { %v10705_v16 = vpop.f32.mrf.mxu0  ;;  %v10745_v17 = vpop.f32.mrf.mxu1  ;;  %12701 = vmatprep.mubr.bf16.mxu0 %v4785_v6  ;;  %12741 = vmatprep.mubr.bf16.mxu1 %v4787_v7  ;;  %v25651_v4 = vcombine.high %v5494_v57, %v5878_v58  ;;  %v1249_v13 = vcombine.high %v273_v5, %v273_v5 }
 0x178   : > { %v10744_v21 = vadd.f32 %v10743_v14, %v10704_v15  ;;  %12763 = vmatprep.subr.bf16.mxu0 %v25641_v10  ;;  %12803 = vmatprep.subr.bf16.mxu1 %v25643_v11  ;;  %v1247_v11 = vcombine.high %v27273_v1, %v27273_v1  ;;  %v1248_v12 = vcombine.high %v27276_v2, %v27276_v2  ;;  %v5495_v15 = vld [vmem:[%s26873_s24 + $0x250] sm:$0xff] }
 0x179   : > { %v10706_v23 = vpop.f32.mrf.mxu0  ;;  %v10746_v25 = vpop.f32.mrf.mxu1  ;;  %v4798_v48 = vpack.c.bf16 %v27276_v2, %v27276_v2 }
 0x17a   : > { %v25648_v23 = vcombine.low %v5493_v51, %v5877_v56  ;;  %v25650_v25 = vcombine.low %v5494_v57, %v5878_v58  ;;  %v4797_v28 = vpack.c.bf16 %v1247_v11, %v1247_v11  ;;  %v4799_v29 = vpack.c.bf16 %v1248_v12, %v1248_v12  ;;  %v5882_v51 = vld [vmem:[%s26873_s24 + $0xe68] sm:$0x11] }
 0x17b   : > { %v10707_v33 = vpop.f32.mrf.mxu0  ;;  %v10747_v34 = vpop.f32.mrf.mxu1  ;;  %v4800_v11 = vpack.c.bf16 %v27292_v30, %v27292_v30 }
 0x17c   : > { %v274_v34 = vld [vmem:[%s26866_s29 + $0x130] sm:$0xff] }
 0x17d   : > { %v10783_v42 = vpop.f32.mrf.mxu0  ;;  %v10823_v43 = vpop.f32.mrf.mxu1  ;;  %12702 = vmatmul.mubr.bf16.vlgmr.msra.gmra.mxu0 %v4784_v26  ;;  %12742 = vmatmul.mubr.bf16.vlgmr.msra.gmra.mxu1 %v4786_v27  ;;  %v27311_v58 = vrot.slane %v274_v34, %v26895_v24 }
 0x17e   : > { %v10784_v44 = vadd.f32 %v10783_v42, %v10744_v21  ;;  %12764 = vmatpush1.bf16.xpose.msra.mxu0 %v25640_v31  ;;  %12804 = vmatpush1.bf16.xpose.msra.mxu1 %v25642_v32  ;;  %v5496_v21 = vld [vmem:[%s26873_s24 + $0x258] sm:$0xff]  ;;  %v27295_v31 = vrot.slane %v1249_v13, %v26895_v24  ;;  %v25653_v32 = vcombine.high %v5495_v15, %v5879_v20  ;;  %v5883_v13 = vld [vmem:[%s26873_s24 + $0xe70] sm:$0x11] }
 0x17f   : > { %v10785_v45 = vpop.f32.mrf.mxu0  ;;  %v10825_v46 = vpop.f32.mrf.mxu1  ;;  %12781 = vmatprep.mubr.bf16.mxu0 %v4789_v35  ;;  %12821 = vmatprep.mubr.bf16.mxu1 %v4791_v36  ;;  %v25655_v33 = vcombine.high %v5496_v21, %v5880_v22  ;;  %v1266_v42 = vcombine.high %v274_v34, %v274_v34 }
 0x180   : > { %v10824_v50 = vadd.f32 %v10823_v43, %v10784_v44  ;;  %12843 = vmatprep.subr.bf16.mxu0 %v25645_v39  ;;  %12883 = vmatprep.subr.bf16.mxu1 %v25647_v40  ;;  %v1264_v40 = vcombine.high %v27292_v30, %v27292_v30  ;;  %v1265_v41 = vcombine.high %v27295_v31, %v27295_v31  ;;  %v5497_v44 = vld [vmem:[%s26873_s24 + $0x260] sm:$0xff] }
 0x181   : > { %v10786_v52 = vpop.f32.mrf.mxu0  ;;  %v10826_v53 = vpop.f32.mrf.mxu1  ;;  %v4802_v12 = vpack.c.bf16 %v27295_v31, %v27295_v31 }
 0x182   : > { %v25652_v52 = vcombine.low %v5495_v15, %v5879_v20  ;;  %v25654_v53 = vcombine.low %v5496_v21, %v5880_v22  ;;  %v4801_v56 = vpack.c.bf16 %v1264_v40, %v1264_v40  ;;  %v4803_v57 = vpack.c.bf16 %v1265_v41, %v1265_v41  ;;  %v5884_v15 = vld [vmem:[%s26873_s24 + $0xe78] sm:$0x11] }
 0x183   : > { %v10787_v61 = vpop.f32.mrf.mxu0  ;;  %v10827_v62 = vpop.f32.mrf.mxu1  ;;  %v4804_v40 = vpack.c.bf16 %v27311_v58, %v27311_v58 }
 0x184   : > { %v275_v62 = vld [vmem:[%s26866_s29 + $0x138] sm:$0xff] }
 0x185   : > { %v10863_v6 = vpop.f32.mrf.mxu0  ;;  %v10903_v7 = vpop.f32.mrf.mxu1  ;;  %12782 = vmatmul.mubr.bf16.vlgmr.msra.gmra.mxu0 %v4788_v54  ;;  %12822 = vmatmul.mubr.bf16.vlgmr.msra.gmra.mxu1 %v4790_v55  ;;  %v27330_v22 = vrot.slane %v275_v62, %v26895_v24 }
 0x186   : > { %v10864_v8 = vadd.f32 %v10863_v6, %v10824_v50  ;;  %12844 = vmatpush1.bf16.xpose.msra.mxu0 %v25644_v59  ;;  %12884 = vmatpush1.bf16.xpose.msra.mxu1 %v25646_v60  ;;  %v5498_v50 = vld [vmem:[%s26873_s24 + $0x268] sm:$0xff]  ;;  %v27314_v59 = vrot.slane %v1266_v42, %v26895_v24  ;;  %v25657_v60 = vcombine.high %v5497_v44, %v5881_v49  ;;  %v5885_v42 = vld [vmem:[%s26873_s24 + $0xe80] sm:$0x11] }
 0x187   : > { %v10865_v9 = vpop.f32.mrf.mxu0  ;;  %v10905_v10 = vpop.f32.mrf.mxu1  ;;  %12861 = vmatprep.mubr.bf16.mxu0 %v4793_v63  ;;  %12901 = vmatprep.mubr.bf16.mxu1 %v4795_v0  ;;  %v25659_v61 = vcombine.high %v5498_v50, %v5882_v51  ;;  %v1283_v6 = vcombine.high %v275_v62, %v275_v62 }
 0x188   : > { %v10904_v14 = vadd.f32 %v10903_v7, %v10864_v8  ;;  %12923 = vmatprep.subr.bf16.mxu0 %v25649_v3  ;;  %12963 = vmatprep.subr.bf16.mxu1 %v25651_v4  ;;  %v1281_v4 = vcombine.high %v27311_v58, %v27311_v58  ;;  %v1282_v5 = vcombine.high %v27314_v59, %v27314_v59  ;;  %v5499_v8 = vld [vmem:[%s26873_s24 + $0x270] sm:$0xff] }
 0x189   : > { %v10866_v16 = vpop.f32.mrf.mxu0  ;;  %v10906_v17 = vpop.f32.mrf.mxu1  ;;  %v4806_v41 = vpack.c.bf16 %v27314_v59, %v27314_v59 }
 0x18a   : > { %v25656_v16 = vcombine.low %v5497_v44, %v5881_v49  ;;  %v25658_v17 = vcombine.low %v5498_v50, %v5882_v51  ;;  %v4805_v20 = vpack.c.bf16 %v1281_v4, %v1281_v4  ;;  %v4807_v21 = vpack.c.bf16 %v1282_v5, %v1282_v5  ;;  %v5886_v44 = vld [vmem:[%s26873_s24 + $0xe88] sm:$0x11] }
 0x18b   : > { %v10867_v26 = vpop.f32.mrf.mxu0  ;;  %v10907_v27 = vpop.f32.mrf.mxu1  ;;  %v4808_v4 = vpack.c.bf16 %v27330_v22, %v27330_v22 }
 0x18c   : > { %v276_v27 = vld [vmem:[%s26866_s29 + $0x140] sm:$0xff] }
 0x18d   : > { %v10943_v35 = vpop.f32.mrf.mxu0  ;;  %v10983_v36 = vpop.f32.mrf.mxu1  ;;  %12862 = vmatmul.mubr.bf16.vlgmr.msra.gmra.mxu0 %v4792_v18  ;;  %12902 = vmatmul.mubr.bf16.vlgmr.msra.gmra.mxu1 %v4794_v19  ;;  %v27349_v51 = vrot.slane %v276_v27, %v26895_v24 }
 0x18e   : > { %v10944_v37 = vadd.f32 %v10943_v35, %v10904_v14  ;;  %12924 = vmatpush1.bf16.xpose.msra.mxu0 %v25648_v23  ;;  %12964 = vmatpush1.bf16.xpose.msra.mxu1 %v25650_v25  ;;  %v5500_v14 = vld [vmem:[%s26873_s24 + $0x278] sm:$0xff]  ;;  %v27333_v23 = vrot.slane %v1283_v6, %v26895_v24  ;;  %v25661_v25 = vcombine.high %v5499_v8, %v5883_v13  ;;  %v5887_v6 = vld [vmem:[%s26873_s24 + $0xe90] sm:$0x11] }
 0x18f   : > { %v10945_v38 = vpop.f32.mrf.mxu0  ;;  %v10985_v39 = vpop.f32.mrf.mxu1  ;;  %12941 = vmatprep.mubr.bf16.mxu0 %v4797_v28  ;;  %12981 = vmatprep.mubr.bf16.mxu1 %v4799_v29  ;;  %v25663_v26 = vcombine.high %v5500_v14, %v5884_v15  ;;  %v1300_v35 = vcombine.high %v276_v27, %v276_v27 }
 0x190   : > { %v10984_v43 = vadd.f32 %v10983_v36, %v10944_v37  ;;  %13003 = vmatprep.subr.bf16.mxu0 %v25653_v32  ;;  %13043 = vmatprep.subr.bf16.mxu1 %v25655_v33  ;;  %v1298_v33 = vcombine.high %v27330_v22, %v27330_v22  ;;  %v1299_v34 = vcombine.high %v27333_v23, %v27333_v23  ;;  %v5501_v37 = vld [vmem:[%s26873_s24 + $0x280] sm:$0xff] }
 0x191   : > { %v10946_v45 = vpop.f32.mrf.mxu0  ;;  %v10986_v46 = vpop.f32.mrf.mxu1  ;;  %v4810_v5 = vpack.c.bf16 %v27333_v23, %v27333_v23 }
 0x192   : > { %v25660_v45 = vcombine.low %v5499_v8, %v5883_v13  ;;  %v25662_v46 = vcombine.low %v5500_v14, %v5884_v15  ;;  %v4809_v49 = vpack.c.bf16 %v1298_v33, %v1298_v33  ;;  %v4811_v50 = vpack.c.bf16 %v1299_v34, %v1299_v34  ;;  %v5888_v8 = vld [vmem:[%s26873_s24 + $0xe98] sm:$0x11] }
 0x193   : > { %v10947_v54 = vpop.f32.mrf.mxu0  ;;  %v10987_v55 = vpop.f32.mrf.mxu1  ;;  %v4812_v33 = vpack.c.bf16 %v27349_v51, %v27349_v51 }
 0x194   : > { %v277_v55 = vld [vmem:[%s26866_s29 + $0x148] sm:$0xff] }
 0x195   : > { %v11023_v63 = vpop.f32.mrf.mxu0  ;;  %v11063_v0 = vpop.f32.mrf.mxu1  ;;  %12942 = vmatmul.mubr.bf16.vlgmr.msra.gmra.mxu0 %v4796_v47  ;;  %12982 = vmatmul.mubr.bf16.vlgmr.msra.gmra.mxu1 %v4798_v48  ;;  %v27368_v15 = vrot.slane %v277_v55, %v26895_v24 }
 0x196   : > { %v11024_v1 = vadd.f32 %v11023_v63, %v10984_v43  ;;  %13004 = vmatpush1.bf16.xpose.msra.mxu0 %v25652_v52  ;;  %13044 = vmatpush1.bf16.xpose.msra.mxu1 %v25654_v53  ;;  %v5502_v43 = vld [vmem:[%s26873_s24 + $0x288] sm:$0xff]  ;;  %v27352_v52 = vrot.slane %v1300_v35, %v26895_v24  ;;  %v25665_v53 = vcombine.high %v5501_v37, %v5885_v42  ;;  %v5889_v35 = vld [vmem:[%s26873_s24 + $0xea0] sm:$0x11] }
 0x197   : > { %v11025_v2 = vpop.f32.mrf.mxu0  ;;  %v11065_v3 = vpop.f32.mrf.mxu1  ;;  %13021 = vmatprep.mubr.bf16.mxu0 %v4801_v56  ;;  %13061 = vmatprep.mubr.bf16.mxu1 %v4803_v57  ;;  %v25667_v54 = vcombine.high %v5502_v43, %v5886_v44  ;;  %v1317_v63 = vcombine.high %v277_v55, %v277_v55 }
 0x198   : > { %v11064_v7 = vadd.f32 %v11063_v0, %v11024_v1  ;;  %13083 = vmatprep.subr.bf16.mxu0 %v25657_v60  ;;  %13123 = vmatprep.subr.bf16.mxu1 %v25659_v61  ;;  %v1315_v61 = vcombine.high %v27349_v51, %v27349_v51  ;;  %v1316_v62 = vcombine.high %v27352_v52, %v27352_v52  ;;  %v5503_v1 = vld [vmem:[%s26873_s24 + $0x290] sm:$0xff] }
 0x199   : > { %v11026_v9 = vpop.f32.mrf.mxu0  ;;  %v11066_v10 = vpop.f32.mrf.mxu1  ;;  %v4814_v34 = vpack.c.bf16 %v27352_v52, %v27352_v52 }
 0x19a   : > { %v25664_v9 = vcombine.low %v5501_v37, %v5885_v42  ;;  %v25666_v10 = vcombine.low %v5502_v43, %v5886_v44  ;;  %v4813_v13 = vpack.c.bf16 %v1315_v61, %v1315_v61  ;;  %v4815_v14 = vpack.c.bf16 %v1316_v62, %v1316_v62  ;;  %v5890_v37 = vld [vmem:[%s26873_s24 + $0xea8] sm:$0x11] }
 0x19b   : > { %v11027_v18 = vpop.f32.mrf.mxu0  ;;  %v11067_v19 = vpop.f32.mrf.mxu1  ;;  %v4816_v61 = vpack.c.bf16 %v27368_v15, %v27368_v15 }
 0x19c   : > { %v278_v19 = vld [vmem:[%s26866_s29 + $0x150] sm:$0xff] }
 0x19d   : > { %v11103_v28 = vpop.f32.mrf.mxu0  ;;  %v11143_v29 = vpop.f32.mrf.mxu1  ;;  %13022 = vmatmul.mubr.bf16.vlgmr.msra.gmra.mxu0 %v4800_v11  ;;  %13062 = vmatmul.mubr.bf16.vlgmr.msra.gmra.mxu1 %v4802_v12  ;;  %v27387_v44 = vrot.slane %v278_v19, %v26895_v24 }
 0x19e   : > { %v11104_v30 = vadd.f32 %v11103_v28, %v11064_v7  ;;  %13084 = vmatpush1.bf16.xpose.msra.mxu0 %v25656_v16  ;;  %13124 = vmatpush1.bf16.xpose.msra.mxu1 %v25658_v17  ;;  %v5504_v7 = vld [vmem:[%s26873_s24 + $0x298] sm:$0xff]  ;;  %v27371_v16 = vrot.slane %v1317_v63, %v26895_v24  ;;  %v25669_v17 = vcombine.high %v5503_v1, %v5887_v6  ;;  %v5891_v63 = vld [vmem:[%s26873_s24 + $0xeb0] sm:$0x11] }
 0x19f   : > { %v11105_v31 = vpop.f32.mrf.mxu0  ;;  %v11145_v32 = vpop.f32.mrf.mxu1  ;;  %13101 = vmatprep.mubr.bf16.mxu0 %v4805_v20  ;;  %13141 = vmatprep.mubr.bf16.mxu1 %v4807_v21  ;;  %v25671_v18 = vcombine.high %v5504_v7, %v5888_v8  ;;  %v1334_v28 = vcombine.high %v278_v19, %v278_v19 }
 0x1a0   : > { %v11144_v36 = vadd.f32 %v11143_v29, %v11104_v30  ;;  %13163 = vmatprep.subr.bf16.mxu0 %v25661_v25  ;;  %13203 = vmatprep.subr.bf16.mxu1 %v25663_v26  ;;  %v1332_v26 = vcombine.high %v27368_v15, %v27368_v15  ;;  %v1333_v27 = vcombine.high %v27371_v16, %v27371_v16  ;;  %v5505_v30 = vld [vmem:[%s26873_s24 + $0x2a0] sm:$0xff] }
 0x1a1   : > { %v11106_v38 = vpop.f32.mrf.mxu0  ;;  %v11146_v39 = vpop.f32.mrf.mxu1  ;;  %v4818_v62 = vpack.c.bf16 %v27371_v16, %v27371_v16 }
 0x1a2   : > { %v25668_v38 = vcombine.low %v5503_v1, %v5887_v6  ;;  %v25670_v39 = vcombine.low %v5504_v7, %v5888_v8  ;;  %v4817_v42 = vpack.c.bf16 %v1332_v26, %v1332_v26  ;;  %v4819_v43 = vpack.c.bf16 %v1333_v27, %v1333_v27  ;;  %v5892_v1 = vld [vmem:[%s26873_s24 + $0xeb8] sm:$0x11] }
 0x1a3   : > { %v11107_v47 = vpop.f32.mrf.mxu0  ;;  %v11147_v48 = vpop.f32.mrf.mxu1  ;;  %v4820_v26 = vpack.c.bf16 %v27387_v44, %v27387_v44 }
 0x1a4   : > { %v279_v48 = vld [vmem:[%s26866_s29 + $0x158] sm:$0xff] }
 0x1a5   : > { %v11183_v56 = vpop.f32.mrf.mxu0  ;;  %v11223_v57 = vpop.f32.mrf.mxu1  ;;  %13102 = vmatmul.mubr.bf16.vlgmr.msra.gmra.mxu0 %v4804_v40  ;;  %13142 = vmatmul.mubr.bf16.vlgmr.msra.gmra.mxu1 %v4806_v41  ;;  %v27406_v8 = vrot.slane %v279_v48, %v26895_v24 }
 0x1a6   : > { %v11184_v58 = vadd.f32 %v11183_v56, %v11144_v36  ;;  %13164 = vmatpush1.bf16.xpose.msra.mxu0 %v25660_v45  ;;  %13204 = vmatpush1.bf16.xpose.msra.mxu1 %v25662_v46  ;;  %v5506_v36 = vld [vmem:[%s26873_s24 + $0x2a8] sm:$0xff]  ;;  %v27390_v45 = vrot.slane %v1334_v28, %v26895_v24  ;;  %v25673_v46 = vcombine.high %v5505_v30, %v5889_v35  ;;  %v5893_v28 = vld [vmem:[%s26873_s24 + $0xec0] sm:$0x11] }
 0x1a7   : > { %v11185_v59 = vpop.f32.mrf.mxu0  ;;  %v11225_v60 = vpop.f32.mrf.mxu1  ;;  %13181 = vmatprep.mubr.bf16.mxu0 %v4809_v49  ;;  %13221 = vmatprep.mubr.bf16.mxu1 %v4811_v50  ;;  %v25675_v47 = vcombine.high %v5506_v36, %v5890_v37  ;;  %v1351_v56 = vcombine.high %v279_v48, %v279_v48 }
 0x1a8   : > { %v11224_v0 = vadd.f32 %v11223_v57, %v11184_v58  ;;  %13243 = vmatprep.subr.bf16.mxu0 %v25665_v53  ;;  %13283 = vmatprep.subr.bf16.mxu1 %v25667_v54  ;;  %v1349_v54 = vcombine.high %v27387_v44, %v27387_v44  ;;  %v1350_v55 = vcombine.high %v27390_v45, %v27390_v45  ;;  %v5507_v58 = vld [vmem:[%s26873_s24 + $0x2b0] sm:$0xff] }
 0x1a9   : > { %v11186_v2 = vpop.f32.mrf.mxu0  ;;  %v11226_v3 = vpop.f32.mrf.mxu1  ;;  %v4822_v27 = vpack.c.bf16 %v27390_v45, %v27390_v45 }
 0x1aa   : > { %v25672_v2 = vcombine.low %v5505_v30, %v5889_v35  ;;  %v25674_v3 = vcombine.low %v5506_v36, %v5890_v37  ;;  %v4821_v6 = vpack.c.bf16 %v1349_v54, %v1349_v54  ;;  %v4823_v7 = vpack.c.bf16 %v1350_v55, %v1350_v55  ;;  %v5894_v30 = vld [vmem:[%s26873_s24 + $0xec8] sm:$0x11] }
 0x1ab   : > { %v11187_v11 = vpop.f32.mrf.mxu0  ;;  %v11227_v12 = vpop.f32.mrf.mxu1  ;;  %v4824_v54 = vpack.c.bf16 %v27406_v8, %v27406_v8 }
 0x1ac   : > { %v280_v12 = vld [vmem:[%s26866_s29 + $0x160] sm:$0xff] }
 0x1ad   : > { %v11263_v20 = vpop.f32.mrf.mxu0  ;;  %v11303_v21 = vpop.f32.mrf.mxu1  ;;  %13182 = vmatmul.mubr.bf16.vlgmr.msra.gmra.mxu0 %v4808_v4  ;;  %13222 = vmatmul.mubr.bf16.vlgmr.msra.gmra.mxu1 %v4810_v5  ;;  %v27425_v37 = vrot.slane %v280_v12, %v26895_v24 }
 0x1ae   : > { %v11264_v22 = vadd.f32 %v11263_v20, %v11224_v0  ;;  %13244 = vmatpush1.bf16.xpose.msra.mxu0 %v25664_v9  ;;  %13284 = vmatpush1.bf16.xpose.msra.mxu1 %v25666_v10  ;;  %v5508_v0 = vld [vmem:[%s26873_s24 + $0x2b8] sm:$0xff]  ;;  %v27409_v9 = vrot.slane %v1351_v56, %v26895_v24  ;;  %v25677_v10 = vcombine.high %v5507_v58, %v5891_v63  ;;  %v5895_v56 = vld [vmem:[%s26873_s24 + $0xed0] sm:$0x11] }
 0x1af   : > { %v11265_v23 = vpop.f32.mrf.mxu0  ;;  %v11305_v25 = vpop.f32.mrf.mxu1  ;;  %13261 = vmatprep.mubr.bf16.mxu0 %v4813_v13  ;;  %13301 = vmatprep.mubr.bf16.mxu1 %v4815_v14  ;;  %v25679_v11 = vcombine.high %v5508_v0, %v5892_v1  ;;  %v1368_v20 = vcombine.high %v280_v12, %v280_v12 }
 0x1b0   : > { %v11304_v29 = vadd.f32 %v11303_v21, %v11264_v22  ;;  %13323 = vmatprep.subr.bf16.mxu0 %v25669_v17  ;;  %13363 = vmatprep.subr.bf16.mxu1 %v25671_v18  ;;  %v1366_v18 = vcombine.high %v27406_v8, %v27406_v8  ;;  %v1367_v19 = vcombine.high %v27409_v9, %v27409_v9  ;;  %v5509_v22 = vld [vmem:[%s26873_s24 + $0x2c0] sm:$0xff] }
 0x1b1   : > { %v11266_v31 = vpop.f32.mrf.mxu0  ;;  %v11306_v32 = vpop.f32.mrf.mxu1  ;;  %v4826_v55 = vpack.c.bf16 %v27409_v9, %v27409_v9 }
 0x1b2   : > { %v25676_v31 = vcombine.low %v5507_v58, %v5891_v63  ;;  %v25678_v32 = vcombine.low %v5508_v0, %v5892_v1  ;;  %v4825_v35 = vpack.c.bf16 %v1366_v18, %v1366_v18  ;;  %v4827_v36 = vpack.c.bf16 %v1367_v19, %v1367_v19  ;;  %v5896_v58 = vld [vmem:[%s26873_s24 + $0xed8] sm:$0x11] }
 0x1b3   : > { %v11267_v40 = vpop.f32.mrf.mxu0  ;;  %v11307_v41 = vpop.f32.mrf.mxu1  ;;  %v4828_v18 = vpack.c.bf16 %v27425_v37, %v27425_v37 }
 0x1b4   : > { %v281_v41 = vld [vmem:[%s26866_s29 + $0x168] sm:$0xff] }
 0x1b5   : > { %v11343_v49 = vpop.f32.mrf.mxu0  ;;  %v11383_v50 = vpop.f32.mrf.mxu1  ;;  %13262 = vmatmul.mubr.bf16.vlgmr.msra.gmra.mxu0 %v4812_v33  ;;  %13302 = vmatmul.mubr.bf16.vlgmr.msra.gmra.mxu1 %v4814_v34  ;;  %v27444_v1 = vrot.slane %v281_v41, %v26895_v24 }
 0x1b6   : > { %v11344_v51 = vadd.f32 %v11343_v49, %v11304_v29  ;;  %13324 = vmatpush1.bf16.xpose.msra.mxu0 %v25668_v38  ;;  %13364 = vmatpush1.bf16.xpose.msra.mxu1 %v25670_v39  ;;  %v5510_v29 = vld [vmem:[%s26873_s24 + $0x2c8] sm:$0xff]  ;;  %v27428_v38 = vrot.slane %v1368_v20, %v26895_v24  ;;  %v25681_v39 = vcombine.high %v5509_v22, %v5893_v28  ;;  %v5897_v20 = vld [vmem:[%s26873_s24 + $0xee0] sm:$0x11] }
 0x1b7   : > { %v11345_v52 = vpop.f32.mrf.mxu0  ;;  %v11385_v53 = vpop.f32.mrf.mxu1  ;;  %13341 = vmatprep.mubr.bf16.mxu0 %v4817_v42  ;;  %13381 = vmatprep.mubr.bf16.mxu1 %v4819_v43  ;;  %v25683_v40 = vcombine.high %v5510_v29, %v5894_v30  ;;  %v1385_v49 = vcombine.high %v281_v41, %v281_v41 }
 0x1b8   : > { %v11384_v57 = vadd.f32 %v11383_v50, %v11344_v51  ;;  %13403 = vmatprep.subr.bf16.mxu0 %v25673_v46  ;;  %13443 = vmatprep.subr.bf16.mxu1 %v25675_v47  ;;  %v1383_v47 = vcombine.high %v27425_v37, %v27425_v37  ;;  %v1384_v48 = vcombine.high %v27428_v38, %v27428_v38  ;;  %v5511_v51 = vld [vmem:[%s26873_s24 + $0x2d0] sm:$0xff] }
 0x1b9   : > { %v11346_v59 = vpop.f32.mrf.mxu0  ;;  %v11386_v60 = vpop.f32.mrf.mxu1  ;;  %v4830_v19 = vpack.c.bf16 %v27428_v38, %v27428_v38 }
 0x1ba   : > { %v25680_v59 = vcombine.low %v5509_v22, %v5893_v28  ;;  %v25682_v60 = vcombine.low %v5510_v29, %v5894_v30  ;;  %v4829_v63 = vpack.c.bf16 %v1383_v47, %v1383_v47  ;;  %v4831_v0 = vpack.c.bf16 %v1384_v48, %v1384_v48  ;;  %v5898_v22 = vld [vmem:[%s26873_s24 + $0xee8] sm:$0x11] }
 0x1bb   : > { %v11347_v4 = vpop.f32.mrf.mxu0  ;;  %v11387_v5 = vpop.f32.mrf.mxu1  ;;  %v4832_v47 = vpack.c.bf16 %v27444_v1, %v27444_v1 }
 0x1bc   : > { %v282_v5 = vld [vmem:[%s26866_s29 + $0x170] sm:$0xff] }
 0x1bd   : > { %v11423_v13 = vpop.f32.mrf.mxu0  ;;  %v11463_v14 = vpop.f32.mrf.mxu1  ;;  %13342 = vmatmul.mubr.bf16.vlgmr.msra.gmra.mxu0 %v4816_v61  ;;  %13382 = vmatmul.mubr.bf16.vlgmr.msra.gmra.mxu1 %v4818_v62  ;;  %v27463_v30 = vrot.slane %v282_v5, %v26895_v24 }
 0x1be   : > { %v11424_v15 = vadd.f32 %v11423_v13, %v11384_v57  ;;  %13404 = vmatpush1.bf16.xpose.msra.mxu0 %v25672_v2  ;;  %13444 = vmatpush1.bf16.xpose.msra.mxu1 %v25674_v3  ;;  %v5512_v57 = vld [vmem:[%s26873_s24 + $0x2d8] sm:$0xff]  ;;  %v27447_v2 = vrot.slane %v1385_v49, %v26895_v24  ;;  %v25685_v3 = vcombine.high %v5511_v51, %v5895_v56  ;;  %v5899_v49 = vld [vmem:[%s26873_s24 + $0xef0] sm:$0x11] }
 0x1bf   : > { %v11425_v16 = vpop.f32.mrf.mxu0  ;;  %v11465_v17 = vpop.f32.mrf.mxu1  ;;  %13421 = vmatprep.mubr.bf16.mxu0 %v4821_v6  ;;  %13461 = vmatprep.mubr.bf16.mxu1 %v4823_v7  ;;  %v25687_v4 = vcombine.high %v5512_v57, %v5896_v58  ;;  %v1402_v13 = vcombine.high %v282_v5, %v282_v5 }
 0x1c0   : > { %v11464_v21 = vadd.f32 %v11463_v14, %v11424_v15  ;;  %13483 = vmatprep.subr.bf16.mxu0 %v25677_v10  ;;  %13523 = vmatprep.subr.bf16.mxu1 %v25679_v11  ;;  %v1400_v11 = vcombine.high %v27444_v1, %v27444_v1  ;;  %v1401_v12 = vcombine.high %v27447_v2, %v27447_v2  ;;  %v5513_v15 = vld [vmem:[%s26873_s24 + $0x2e0] sm:$0xff] }
 0x1c1   : > { %v11426_v23 = vpop.f32.mrf.mxu0  ;;  %v11466_v25 = vpop.f32.mrf.mxu1  ;;  %v4834_v48 = vpack.c.bf16 %v27447_v2, %v27447_v2 }
 0x1c2   : > { %v25684_v23 = vcombine.low %v5511_v51, %v5895_v56  ;;  %v25686_v25 = vcombine.low %v5512_v57, %v5896_v58  ;;  %v4833_v28 = vpack.c.bf16 %v1400_v11, %v1400_v11  ;;  %v4835_v29 = vpack.c.bf16 %v1401_v12, %v1401_v12  ;;  %v5900_v51 = vld [vmem:[%s26873_s24 + $0xef8] sm:$0x11] }
 0x1c3   : > { %v11427_v33 = vpop.f32.mrf.mxu0  ;;  %v11467_v34 = vpop.f32.mrf.mxu1  ;;  %v4836_v11 = vpack.c.bf16 %v27463_v30, %v27463_v30 }
 0x1c4   : > { %v283_v34 = vld [vmem:[%s26866_s29 + $0x178] sm:$0xff] }
 0x1c5   : > { %v11503_v42 = vpop.f32.mrf.mxu0  ;;  %v11543_v43 = vpop.f32.mrf.mxu1  ;;  %13422 = vmatmul.mubr.bf16.vlgmr.msra.gmra.mxu0 %v4820_v26  ;;  %13462 = vmatmul.mubr.bf16.vlgmr.msra.gmra.mxu1 %v4822_v27  ;;  %v27482_v58 = vrot.slane %v283_v34, %v26895_v24 }
 0x1c6   : > { %v11504_v44 = vadd.f32 %v11503_v42, %v11464_v21  ;;  %13484 = vmatpush1.bf16.xpose.msra.mxu0 %v25676_v31  ;;  %13524 = vmatpush1.bf16.xpose.msra.mxu1 %v25678_v32  ;;  %v5514_v21 = vld [vmem:[%s26873_s24 + $0x2e8] sm:$0xff]  ;;  %v27466_v31 = vrot.slane %v1402_v13, %v26895_v24  ;;  %v25689_v32 = vcombine.high %v5513_v15, %v5897_v20  ;;  %v5901_v13 = vld [vmem:[%s26873_s24 + $0xf00] sm:$0x11] }
 0x1c7   : > { %v11505_v45 = vpop.f32.mrf.mxu0  ;;  %v11545_v46 = vpop.f32.mrf.mxu1  ;;  %13501 = vmatprep.mubr.bf16.mxu0 %v4825_v35  ;;  %13541 = vmatprep.mubr.bf16.mxu1 %v4827_v36  ;;  %v25691_v33 = vcombine.high %v5514_v21, %v5898_v22  ;;  %v1419_v42 = vcombine.high %v283_v34, %v283_v34 }
 0x1c8   : > { %v11544_v50 = vadd.f32 %v11543_v43, %v11504_v44  ;;  %13563 = vmatprep.subr.bf16.mxu0 %v25681_v39  ;;  %13603 = vmatprep.subr.bf16.mxu1 %v25683_v40  ;;  %v1417_v40 = vcombine.high %v27463_v30, %v27463_v30  ;;  %v1418_v41 = vcombine.high %v27466_v31, %v27466_v31  ;;  %v5515_v44 = vld [vmem:[%s26873_s24 + $0x2f0] sm:$0xff] }
 0x1c9   : > { %v11506_v52 = vpop.f32.mrf.mxu0  ;;  %v11546_v53 = vpop.f32.mrf.mxu1  ;;  %v4838_v12 = vpack.c.bf16 %v27466_v31, %v27466_v31 }
 0x1ca   : > { %v25688_v52 = vcombine.low %v5513_v15, %v5897_v20  ;;  %v25690_v53 = vcombine.low %v5514_v21, %v5898_v22  ;;  %v4837_v56 = vpack.c.bf16 %v1417_v40, %v1417_v40  ;;  %v4839_v57 = vpack.c.bf16 %v1418_v41, %v1418_v41  ;;  %v5902_v15 = vld [vmem:[%s26873_s24 + $0xf08] sm:$0x11] }
 0x1cb   : > { %v11507_v61 = vpop.f32.mrf.mxu0  ;;  %v11547_v62 = vpop.f32.mrf.mxu1  ;;  %v4840_v40 = vpack.c.bf16 %v27482_v58, %v27482_v58 }
 0x1cc   : > { %v284_v62 = vld [vmem:[%s26866_s29 + $0x180] sm:$0xff] }
 0x1cd   : > { %v11583_v6 = vpop.f32.mrf.mxu0  ;;  %v11623_v7 = vpop.f32.mrf.mxu1  ;;  %13502 = vmatmul.mubr.bf16.vlgmr.msra.gmra.mxu0 %v4824_v54  ;;  %13542 = vmatmul.mubr.bf16.vlgmr.msra.gmra.mxu1 %v4826_v55  ;;  %v27501_v22 = vrot.slane %v284_v62, %v26895_v24 }
 0x1ce   : > { %v11584_v8 = vadd.f32 %v11583_v6, %v11544_v50  ;;  %13564 = vmatpush1.bf16.xpose.msra.mxu0 %v25680_v59  ;;  %13604 = vmatpush1.bf16.xpose.msra.mxu1 %v25682_v60  ;;  %v5516_v50 = vld [vmem:[%s26873_s24 + $0x2f8] sm:$0xff]  ;;  %v27485_v59 = vrot.slane %v1419_v42, %v26895_v24  ;;  %v25693_v60 = vcombine.high %v5515_v44, %v5899_v49  ;;  %v5903_v42 = vld [vmem:[%s26873_s24 + $0xf10] sm:$0x11] }
 0x1cf   : > { %v11585_v9 = vpop.f32.mrf.mxu0  ;;  %v11625_v10 = vpop.f32.mrf.mxu1  ;;  %13581 = vmatprep.mubr.bf16.mxu0 %v4829_v63  ;;  %13621 = vmatprep.mubr.bf16.mxu1 %v4831_v0  ;;  %v25695_v61 = vcombine.high %v5516_v50, %v5900_v51  ;;  %v1436_v6 = vcombine.high %v284_v62, %v284_v62 }
 0x1d0   : > { %v11624_v14 = vadd.f32 %v11623_v7, %v11584_v8  ;;  %13643 = vmatprep.subr.bf16.mxu0 %v25685_v3  ;;  %13683 = vmatprep.subr.bf16.mxu1 %v25687_v4  ;;  %v1434_v4 = vcombine.high %v27482_v58, %v27482_v58  ;;  %v1435_v5 = vcombine.high %v27485_v59, %v27485_v59  ;;  %v5517_v8 = vld [vmem:[%s26873_s24 + $0x300] sm:$0xff] }
 0x1d1   : > { %v11586_v16 = vpop.f32.mrf.mxu0  ;;  %v11626_v17 = vpop.f32.mrf.mxu1  ;;  %v4842_v41 = vpack.c.bf16 %v27485_v59, %v27485_v59 }
 0x1d2   : > { %v25692_v16 = vcombine.low %v5515_v44, %v5899_v49  ;;  %v25694_v17 = vcombine.low %v5516_v50, %v5900_v51  ;;  %v4841_v20 = vpack.c.bf16 %v1434_v4, %v1434_v4  ;;  %v4843_v21 = vpack.c.bf16 %v1435_v5, %v1435_v5  ;;  %v5904_v44 = vld [vmem:[%s26873_s24 + $0xf18] sm:$0x11] }
 0x1d3   : > { %v11587_v26 = vpop.f32.mrf.mxu0  ;;  %v11627_v27 = vpop.f32.mrf.mxu1  ;;  %v4844_v4 = vpack.c.bf16 %v27501_v22, %v27501_v22 }
 0x1d4   : > { %v285_v27 = vld [vmem:[%s26866_s29 + $0x188] sm:$0xff] }
 0x1d5   : > { %v11663_v35 = vpop.f32.mrf.mxu0  ;;  %v11703_v36 = vpop.f32.mrf.mxu1  ;;  %13582 = vmatmul.mubr.bf16.vlgmr.msra.gmra.mxu0 %v4828_v18  ;;  %13622 = vmatmul.mubr.bf16.vlgmr.msra.gmra.mxu1 %v4830_v19  ;;  %v27520_v51 = vrot.slane %v285_v27, %v26895_v24 }
 0x1d6   : > { %v11664_v37 = vadd.f32 %v11663_v35, %v11624_v14  ;;  %13644 = vmatpush1.bf16.xpose.msra.mxu0 %v25684_v23  ;;  %13684 = vmatpush1.bf16.xpose.msra.mxu1 %v25686_v25  ;;  %v5518_v14 = vld [vmem:[%s26873_s24 + $0x308] sm:$0xff]  ;;  %v27504_v23 = vrot.slane %v1436_v6, %v26895_v24  ;;  %v25697_v25 = vcombine.high %v5517_v8, %v5901_v13  ;;  %v5905_v6 = vld [vmem:[%s26873_s24 + $0xf20] sm:$0x11] }
 0x1d7   : > { %v11665_v38 = vpop.f32.mrf.mxu0  ;;  %v11705_v39 = vpop.f32.mrf.mxu1  ;;  %13661 = vmatprep.mubr.bf16.mxu0 %v4833_v28  ;;  %13701 = vmatprep.mubr.bf16.mxu1 %v4835_v29  ;;  %v25699_v26 = vcombine.high %v5518_v14, %v5902_v15  ;;  %v1453_v35 = vcombine.high %v285_v27, %v285_v27 }
 0x1d8   : > { %v11704_v43 = vadd.f32 %v11703_v36, %v11664_v37  ;;  %13723 = vmatprep.subr.bf16.mxu0 %v25689_v32  ;;  %13763 = vmatprep.subr.bf16.mxu1 %v25691_v33  ;;  %v1451_v33 = vcombine.high %v27501_v22, %v27501_v22  ;;  %v1452_v34 = vcombine.high %v27504_v23, %v27504_v23  ;;  %v5519_v37 = vld [vmem:[%s26873_s24 + $0x310] sm:$0xff] }
 0x1d9   : > { %v11666_v45 = vpop.f32.mrf.mxu0  ;;  %v11706_v46 = vpop.f32.mrf.mxu1  ;;  %v4846_v5 = vpack.c.bf16 %v27504_v23, %v27504_v23 }
 0x1da   : > { %v25696_v45 = vcombine.low %v5517_v8, %v5901_v13  ;;  %v25698_v46 = vcombine.low %v5518_v14, %v5902_v15  ;;  %v4845_v49 = vpack.c.bf16 %v1451_v33, %v1451_v33  ;;  %v4847_v50 = vpack.c.bf16 %v1452_v34, %v1452_v34  ;;  %v5906_v8 = vld [vmem:[%s26873_s24 + $0xf28] sm:$0x11] }
 0x1db   : > { %v11667_v54 = vpop.f32.mrf.mxu0  ;;  %v11707_v55 = vpop.f32.mrf.mxu1  ;;  %v4848_v33 = vpack.c.bf16 %v27520_v51, %v27520_v51 }
 0x1dc   : > { %v286_v55 = vld [vmem:[%s26866_s29 + $0x190] sm:$0xff] }
 0x1dd   : > { %v11743_v63 = vpop.f32.mrf.mxu0  ;;  %v11783_v0 = vpop.f32.mrf.mxu1  ;;  %13662 = vmatmul.mubr.bf16.vlgmr.msra.gmra.mxu0 %v4832_v47  ;;  %13702 = vmatmul.mubr.bf16.vlgmr.msra.gmra.mxu1 %v4834_v48  ;;  %v27539_v15 = vrot.slane %v286_v55, %v26895_v24 }
 0x1de   : > { %v11744_v1 = vadd.f32 %v11743_v63, %v11704_v43  ;;  %13724 = vmatpush1.bf16.xpose.msra.mxu0 %v25688_v52  ;;  %13764 = vmatpush1.bf16.xpose.msra.mxu1 %v25690_v53  ;;  %v5520_v43 = vld [vmem:[%s26873_s24 + $0x318] sm:$0xff]  ;;  %v27523_v52 = vrot.slane %v1453_v35, %v26895_v24  ;;  %v25701_v53 = vcombine.high %v5519_v37, %v5903_v42  ;;  %v5907_v35 = vld [vmem:[%s26873_s24 + $0xf30] sm:$0x11] }
 0x1df   : > { %v11745_v2 = vpop.f32.mrf.mxu0  ;;  %v11785_v3 = vpop.f32.mrf.mxu1  ;;  %13741 = vmatprep.mubr.bf16.mxu0 %v4837_v56  ;;  %13781 = vmatprep.mubr.bf16.mxu1 %v4839_v57  ;;  %v25703_v54 = vcombine.high %v5520_v43, %v5904_v44  ;;  %v1470_v63 = vcombine.high %v286_v55, %v286_v55 }
 0x1e0   : > { %v11784_v7 = vadd.f32 %v11783_v0, %v11744_v1  ;;  %13803 = vmatprep.subr.bf16.mxu0 %v25693_v60  ;;  %13843 = vmatprep.subr.bf16.mxu1 %v25695_v61  ;;  %v1468_v61 = vcombine.high %v27520_v51, %v27520_v51  ;;  %v1469_v62 = vcombine.high %v27523_v52, %v27523_v52  ;;  %v5521_v1 = vld [vmem:[%s26873_s24 + $0x320] sm:$0xff] }
 0x1e1   : > { %v11746_v9 = vpop.f32.mrf.mxu0  ;;  %v11786_v10 = vpop.f32.mrf.mxu1  ;;  %v4850_v34 = vpack.c.bf16 %v27523_v52, %v27523_v52 }
 0x1e2   : > { %v25700_v9 = vcombine.low %v5519_v37, %v5903_v42  ;;  %v25702_v10 = vcombine.low %v5520_v43, %v5904_v44  ;;  %v4849_v13 = vpack.c.bf16 %v1468_v61, %v1468_v61  ;;  %v4851_v14 = vpack.c.bf16 %v1469_v62, %v1469_v62  ;;  %v5908_v37 = vld [vmem:[%s26873_s24 + $0xf38] sm:$0x11] }
 0x1e3   : > { %v11747_v18 = vpop.f32.mrf.mxu0  ;;  %v11787_v19 = vpop.f32.mrf.mxu1  ;;  %v4852_v61 = vpack.c.bf16 %v27539_v15, %v27539_v15 }
 0x1e4   : > { %v287_v19 = vld [vmem:[%s26866_s29 + $0x198] sm:$0xff] }
 0x1e5   : > { %v11823_v28 = vpop.f32.mrf.mxu0  ;;  %v11863_v29 = vpop.f32.mrf.mxu1  ;;  %13742 = vmatmul.mubr.bf16.vlgmr.msra.gmra.mxu0 %v4836_v11  ;;  %13782 = vmatmul.mubr.bf16.vlgmr.msra.gmra.mxu1 %v4838_v12  ;;  %v27558_v44 = vrot.slane %v287_v19, %v26895_v24 }
 0x1e6   : > { %v11824_v30 = vadd.f32 %v11823_v28, %v11784_v7  ;;  %13804 = vmatpush1.bf16.xpose.msra.mxu0 %v25692_v16  ;;  %13844 = vmatpush1.bf16.xpose.msra.mxu1 %v25694_v17  ;;  %v5522_v7 = vld [vmem:[%s26873_s24 + $0x328] sm:$0xff]  ;;  %v27542_v16 = vrot.slane %v1470_v63, %v26895_v24  ;;  %v25705_v17 = vcombine.high %v5521_v1, %v5905_v6  ;;  %v5909_v63 = vld [vmem:[%s26873_s24 + $0xf40] sm:$0x11] }
 0x1e7   : > { %v11825_v31 = vpop.f32.mrf.mxu0  ;;  %v11865_v32 = vpop.f32.mrf.mxu1  ;;  %13821 = vmatprep.mubr.bf16.mxu0 %v4841_v20  ;;  %13861 = vmatprep.mubr.bf16.mxu1 %v4843_v21  ;;  %v25707_v18 = vcombine.high %v5522_v7, %v5906_v8  ;;  %v1487_v28 = vcombine.high %v287_v19, %v287_v19 }
 0x1e8   : > { %v11864_v36 = vadd.f32 %v11863_v29, %v11824_v30  ;;  %13883 = vmatprep.subr.bf16.mxu0 %v25697_v25  ;;  %13923 = vmatprep.subr.bf16.mxu1 %v25699_v26  ;;  %v1485_v26 = vcombine.high %v27539_v15, %v27539_v15  ;;  %v1486_v27 = vcombine.high %v27542_v16, %v27542_v16  ;;  %v5523_v30 = vld [vmem:[%s26873_s24 + $0x330] sm:$0xff] }
 0x1e9   : > { %v11826_v38 = vpop.f32.mrf.mxu0  ;;  %v11866_v39 = vpop.f32.mrf.mxu1  ;;  %v4854_v62 = vpack.c.bf16 %v27542_v16, %v27542_v16 }
 0x1ea   : > { %v25704_v38 = vcombine.low %v5521_v1, %v5905_v6  ;;  %v25706_v39 = vcombine.low %v5522_v7, %v5906_v8  ;;  %v4853_v42 = vpack.c.bf16 %v1485_v26, %v1485_v26  ;;  %v4855_v43 = vpack.c.bf16 %v1486_v27, %v1486_v27  ;;  %v5910_v1 = vld [vmem:[%s26873_s24 + $0xf48] sm:$0x11] }
 0x1eb   : > { %v11827_v47 = vpop.f32.mrf.mxu0  ;;  %v11867_v48 = vpop.f32.mrf.mxu1  ;;  %v4856_v26 = vpack.c.bf16 %v27558_v44, %v27558_v44 }
 0x1ec   : > { %v288_v48 = vld [vmem:[%s26866_s29 + $0x1a0] sm:$0xff] }
 0x1ed   : > { %v11903_v56 = vpop.f32.mrf.mxu0  ;;  %v11943_v57 = vpop.f32.mrf.mxu1  ;;  %13822 = vmatmul.mubr.bf16.vlgmr.msra.gmra.mxu0 %v4840_v40  ;;  %13862 = vmatmul.mubr.bf16.vlgmr.msra.gmra.mxu1 %v4842_v41  ;;  %v27577_v8 = vrot.slane %v288_v48, %v26895_v24 }
 0x1ee   : > { %v11904_v58 = vadd.f32 %v11903_v56, %v11864_v36  ;;  %13884 = vmatpush1.bf16.xpose.msra.mxu0 %v25696_v45  ;;  %13924 = vmatpush1.bf16.xpose.msra.mxu1 %v25698_v46  ;;  %v5524_v36 = vld [vmem:[%s26873_s24 + $0x338] sm:$0xff]  ;;  %v27561_v45 = vrot.slane %v1487_v28, %v26895_v24  ;;  %v25709_v46 = vcombine.high %v5523_v30, %v5907_v35  ;;  %v5911_v28 = vld [vmem:[%s26873_s24 + $0xf50] sm:$0x11] }
 0x1ef   : > { %v11905_v59 = vpop.f32.mrf.mxu0  ;;  %v11945_v60 = vpop.f32.mrf.mxu1  ;;  %13901 = vmatprep.mubr.bf16.mxu0 %v4845_v49  ;;  %13941 = vmatprep.mubr.bf16.mxu1 %v4847_v50  ;;  %v25711_v47 = vcombine.high %v5524_v36, %v5908_v37  ;;  %v1504_v56 = vcombine.high %v288_v48, %v288_v48 }
 0x1f0   : > { %v11944_v0 = vadd.f32 %v11943_v57, %v11904_v58  ;;  %13963 = vmatprep.subr.bf16.mxu0 %v25701_v53  ;;  %14003 = vmatprep.subr.bf16.mxu1 %v25703_v54  ;;  %v1502_v54 = vcombine.high %v27558_v44, %v27558_v44  ;;  %v1503_v55 = vcombine.high %v27561_v45, %v27561_v45  ;;  %v5525_v58 = vld [vmem:[%s26873_s24 + $0x340] sm:$0xff] }
 0x1f1   : > { %v11906_v2 = vpop.f32.mrf.mxu0  ;;  %v11946_v3 = vpop.f32.mrf.mxu1  ;;  %v4858_v27 = vpack.c.bf16 %v27561_v45, %v27561_v45 }
 0x1f2   : > { %v25708_v2 = vcombine.low %v5523_v30, %v5907_v35  ;;  %v25710_v3 = vcombine.low %v5524_v36, %v5908_v37  ;;  %v4857_v6 = vpack.c.bf16 %v1502_v54, %v1502_v54  ;;  %v4859_v7 = vpack.c.bf16 %v1503_v55, %v1503_v55  ;;  %v5912_v30 = vld [vmem:[%s26873_s24 + $0xf58] sm:$0x11] }
 0x1f3   : > { %v11907_v11 = vpop.f32.mrf.mxu0  ;;  %v11947_v12 = vpop.f32.mrf.mxu1  ;;  %v4860_v54 = vpack.c.bf16 %v27577_v8, %v27577_v8 }
 0x1f4   : > { %v289_v12 = vld [vmem:[%s26866_s29 + $0x1a8] sm:$0xff] }
 0x1f5   : > { %v11983_v20 = vpop.f32.mrf.mxu0  ;;  %v12023_v21 = vpop.f32.mrf.mxu1  ;;  %13902 = vmatmul.mubr.bf16.vlgmr.msra.gmra.mxu0 %v4844_v4  ;;  %13942 = vmatmul.mubr.bf16.vlgmr.msra.gmra.mxu1 %v4846_v5  ;;  %v27596_v37 = vrot.slane %v289_v12, %v26895_v24 }
 0x1f6   : > { %v11984_v22 = vadd.f32 %v11983_v20, %v11944_v0  ;;  %13964 = vmatpush1.bf16.xpose.msra.mxu0 %v25700_v9  ;;  %14004 = vmatpush1.bf16.xpose.msra.mxu1 %v25702_v10  ;;  %v5526_v0 = vld [vmem:[%s26873_s24 + $0x348] sm:$0xff]  ;;  %v27580_v9 = vrot.slane %v1504_v56, %v26895_v24  ;;  %v25713_v10 = vcombine.high %v5525_v58, %v5909_v63  ;;  %v5913_v56 = vld [vmem:[%s26873_s24 + $0xf60] sm:$0x11] }
 0x1f7   : > { %v11985_v23 = vpop.f32.mrf.mxu0  ;;  %v12025_v25 = vpop.f32.mrf.mxu1  ;;  %13981 = vmatprep.mubr.bf16.mxu0 %v4849_v13  ;;  %14021 = vmatprep.mubr.bf16.mxu1 %v4851_v14  ;;  %v25715_v11 = vcombine.high %v5526_v0, %v5910_v1  ;;  %v1521_v20 = vcombine.high %v289_v12, %v289_v12 }
 0x1f8   : > { %v12024_v29 = vadd.f32 %v12023_v21, %v11984_v22  ;;  %14043 = vmatprep.subr.bf16.mxu0 %v25705_v17  ;;  %14083 = vmatprep.subr.bf16.mxu1 %v25707_v18  ;;  %v1519_v18 = vcombine.high %v27577_v8, %v27577_v8  ;;  %v1520_v19 = vcombine.high %v27580_v9, %v27580_v9  ;;  %v5527_v22 = vld [vmem:[%s26873_s24 + $0x350] sm:$0xff] }
 0x1f9   : > { %v11986_v31 = vpop.f32.mrf.mxu0  ;;  %v12026_v32 = vpop.f32.mrf.mxu1  ;;  %v4862_v55 = vpack.c.bf16 %v27580_v9, %v27580_v9 }
 0x1fa   : > { %v25712_v31 = vcombine.low %v5525_v58, %v5909_v63  ;;  %v25714_v32 = vcombine.low %v5526_v0, %v5910_v1  ;;  %v4861_v35 = vpack.c.bf16 %v1519_v18, %v1519_v18  ;;  %v4863_v36 = vpack.c.bf16 %v1520_v19, %v1520_v19  ;;  %v5914_v58 = vld [vmem:[%s26873_s24 + $0xf68] sm:$0x11] }
 0x1fb   : > { %v11987_v40 = vpop.f32.mrf.mxu0  ;;  %v12027_v41 = vpop.f32.mrf.mxu1  ;;  %v4864_v18 = vpack.c.bf16 %v27596_v37, %v27596_v37 }
 0x1fc   : > { %v290_v41 = vld [vmem:[%s26866_s29 + $0x1b0] sm:$0xff] }
 0x1fd   : > { %v12063_v49 = vpop.f32.mrf.mxu0  ;;  %v12103_v50 = vpop.f32.mrf.mxu1  ;;  %13982 = vmatmul.mubr.bf16.vlgmr.msra.gmra.mxu0 %v4848_v33  ;;  %14022 = vmatmul.mubr.bf16.vlgmr.msra.gmra.mxu1 %v4850_v34  ;;  %v27615_v1 = vrot.slane %v290_v41, %v26895_v24 }
 0x1fe   : > { %v12064_v51 = vadd.f32 %v12063_v49, %v12024_v29  ;;  %14044 = vmatpush1.bf16.xpose.msra.mxu0 %v25704_v38  ;;  %14084 = vmatpush1.bf16.xpose.msra.mxu1 %v25706_v39  ;;  %v5528_v29 = vld [vmem:[%s26873_s24 + $0x358] sm:$0xff]  ;;  %v27599_v38 = vrot.slane %v1521_v20, %v26895_v24  ;;  %v25717_v39 = vcombine.high %v5527_v22, %v5911_v28  ;;  %v5915_v20 = vld [vmem:[%s26873_s24 + $0xf70] sm:$0x11] }
 0x1ff   : > { %v12065_v52 = vpop.f32.mrf.mxu0  ;;  %v12105_v53 = vpop.f32.mrf.mxu1  ;;  %14061 = vmatprep.mubr.bf16.mxu0 %v4853_v42  ;;  %14101 = vmatprep.mubr.bf16.mxu1 %v4855_v43  ;;  %v25719_v40 = vcombine.high %v5528_v29, %v5912_v30  ;;  %v1538_v49 = vcombine.high %v290_v41, %v290_v41 }
 0x200   : > { %v12104_v57 = vadd.f32 %v12103_v50, %v12064_v51  ;;  %14123 = vmatprep.subr.bf16.mxu0 %v25709_v46  ;;  %14163 = vmatprep.subr.bf16.mxu1 %v25711_v47  ;;  %v1536_v47 = vcombine.high %v27596_v37, %v27596_v37  ;;  %v1537_v48 = vcombine.high %v27599_v38, %v27599_v38  ;;  %v5529_v51 = vld [vmem:[%s26873_s24 + $0x360] sm:$0xff] }
 0x201   : > { %v12066_v59 = vpop.f32.mrf.mxu0  ;;  %v12106_v60 = vpop.f32.mrf.mxu1  ;;  %v4866_v19 = vpack.c.bf16 %v27599_v38, %v27599_v38 }
 0x202   : > { %v25716_v59 = vcombine.low %v5527_v22, %v5911_v28  ;;  %v25718_v60 = vcombine.low %v5528_v29, %v5912_v30  ;;  %v4865_v63 = vpack.c.bf16 %v1536_v47, %v1536_v47  ;;  %v4867_v0 = vpack.c.bf16 %v1537_v48, %v1537_v48  ;;  %v5916_v22 = vld [vmem:[%s26873_s24 + $0xf78] sm:$0x11] }
 0x203   : > { %v12067_v4 = vpop.f32.mrf.mxu0  ;;  %v12107_v5 = vpop.f32.mrf.mxu1  ;;  %v4868_v47 = vpack.c.bf16 %v27615_v1, %v27615_v1 }
 0x204   : > { %v291_v5 = vld [vmem:[%s26866_s29 + $0x1b8] sm:$0xff] }
 0x205   : > { %v12143_v13 = vpop.f32.mrf.mxu0  ;;  %v12183_v14 = vpop.f32.mrf.mxu1  ;;  %14062 = vmatmul.mubr.bf16.vlgmr.msra.gmra.mxu0 %v4852_v61  ;;  %14102 = vmatmul.mubr.bf16.vlgmr.msra.gmra.mxu1 %v4854_v62  ;;  %v27634_v30 = vrot.slane %v291_v5, %v26895_v24 }
 0x206   : > { %v12144_v15 = vadd.f32 %v12143_v13, %v12104_v57  ;;  %14124 = vmatpush1.bf16.xpose.msra.mxu0 %v25708_v2  ;;  %14164 = vmatpush1.bf16.xpose.msra.mxu1 %v25710_v3  ;;  %v5530_v57 = vld [vmem:[%s26873_s24 + $0x368] sm:$0xff]  ;;  %v27618_v2 = vrot.slane %v1538_v49, %v26895_v24  ;;  %v25721_v3 = vcombine.high %v5529_v51, %v5913_v56  ;;  %v5917_v49 = vld [vmem:[%s26873_s24 + $0xf80] sm:$0x11] }
 0x207   : > { %v12145_v16 = vpop.f32.mrf.mxu0  ;;  %v12185_v17 = vpop.f32.mrf.mxu1  ;;  %14141 = vmatprep.mubr.bf16.mxu0 %v4857_v6  ;;  %14181 = vmatprep.mubr.bf16.mxu1 %v4859_v7  ;;  %v25723_v4 = vcombine.high %v5530_v57, %v5914_v58  ;;  %v1555_v13 = vcombine.high %v291_v5, %v291_v5 }
 0x208   : > { %v12184_v21 = vadd.f32 %v12183_v14, %v12144_v15  ;;  %14203 = vmatprep.subr.bf16.mxu0 %v25713_v10  ;;  %14243 = vmatprep.subr.bf16.mxu1 %v25715_v11  ;;  %v1553_v11 = vcombine.high %v27615_v1, %v27615_v1  ;;  %v1554_v12 = vcombine.high %v27618_v2, %v27618_v2  ;;  %v5531_v15 = vld [vmem:[%s26873_s24 + $0x370] sm:$0xff] }
 0x209   : > { %v12146_v23 = vpop.f32.mrf.mxu0  ;;  %v12186_v25 = vpop.f32.mrf.mxu1  ;;  %v4870_v48 = vpack.c.bf16 %v27618_v2, %v27618_v2 }
 0x20a   : > { %v25720_v23 = vcombine.low %v5529_v51, %v5913_v56  ;;  %v25722_v25 = vcombine.low %v5530_v57, %v5914_v58  ;;  %v4869_v28 = vpack.c.bf16 %v1553_v11, %v1553_v11  ;;  %v4871_v29 = vpack.c.bf16 %v1554_v12, %v1554_v12  ;;  %v5918_v51 = vld [vmem:[%s26873_s24 + $0xf88] sm:$0x11] }
 0x20b   : > { %v12147_v33 = vpop.f32.mrf.mxu0  ;;  %v12187_v34 = vpop.f32.mrf.mxu1  ;;  %v4872_v11 = vpack.c.bf16 %v27634_v30, %v27634_v30 }
 0x20c   : > { %v292_v34 = vld [vmem:[%s26866_s29 + $0x1c0] sm:$0xff] }
 0x20d   : > { %v12223_v42 = vpop.f32.mrf.mxu0  ;;  %v12263_v43 = vpop.f32.mrf.mxu1  ;;  %14142 = vmatmul.mubr.bf16.vlgmr.msra.gmra.mxu0 %v4856_v26  ;;  %14182 = vmatmul.mubr.bf16.vlgmr.msra.gmra.mxu1 %v4858_v27  ;;  %v27653_v58 = vrot.slane %v292_v34, %v26895_v24 }
 0x20e   : > { %v12224_v44 = vadd.f32 %v12223_v42, %v12184_v21  ;;  %14204 = vmatpush1.bf16.xpose.msra.mxu0 %v25712_v31  ;;  %14244 = vmatpush1.bf16.xpose.msra.mxu1 %v25714_v32  ;;  %v5532_v21 = vld [vmem:[%s26873_s24 + $0x378] sm:$0xff]  ;;  %v27637_v31 = vrot.slane %v1555_v13, %v26895_v24  ;;  %v25725_v32 = vcombine.high %v5531_v15, %v5915_v20  ;;  %v5919_v13 = vld [vmem:[%s26873_s24 + $0xf90] sm:$0x11] }
 0x20f   : > { %v12225_v45 = vpop.f32.mrf.mxu0  ;;  %v12265_v46 = vpop.f32.mrf.mxu1  ;;  %14221 = vmatprep.mubr.bf16.mxu0 %v4861_v35  ;;  %14261 = vmatprep.mubr.bf16.mxu1 %v4863_v36  ;;  %v25727_v33 = vcombine.high %v5532_v21, %v5916_v22  ;;  %v1572_v42 = vcombine.high %v292_v34, %v292_v34 }
 0x210   : > { %v12264_v50 = vadd.f32 %v12263_v43, %v12224_v44  ;;  %14283 = vmatprep.subr.bf16.mxu0 %v25717_v39  ;;  %14323 = vmatprep.subr.bf16.mxu1 %v25719_v40  ;;  %v1570_v40 = vcombine.high %v27634_v30, %v27634_v30  ;;  %v1571_v41 = vcombine.high %v27637_v31, %v27637_v31  ;;  %v5533_v44 = vld [vmem:[%s26873_s24 + $0x380] sm:$0xff] }
 0x211   : > { %v12226_v52 = vpop.f32.mrf.mxu0  ;;  %v12266_v53 = vpop.f32.mrf.mxu1  ;;  %v4874_v12 = vpack.c.bf16 %v27637_v31, %v27637_v31 }
 0x212   : > { %v25724_v52 = vcombine.low %v5531_v15, %v5915_v20  ;;  %v25726_v53 = vcombine.low %v5532_v21, %v5916_v22  ;;  %v4873_v56 = vpack.c.bf16 %v1570_v40, %v1570_v40  ;;  %v4875_v57 = vpack.c.bf16 %v1571_v41, %v1571_v41  ;;  %v5920_v15 = vld [vmem:[%s26873_s24 + $0xf98] sm:$0x11] }
 0x213   : > { %v12227_v61 = vpop.f32.mrf.mxu0  ;;  %v12267_v62 = vpop.f32.mrf.mxu1  ;;  %v4876_v40 = vpack.c.bf16 %v27653_v58, %v27653_v58 }
 0x214   : > { %v293_v62 = vld [vmem:[%s26866_s29 + $0x1c8] sm:$0xff] }
 0x215   : > { %v12303_v6 = vpop.f32.mrf.mxu0  ;;  %v12343_v7 = vpop.f32.mrf.mxu1  ;;  %14222 = vmatmul.mubr.bf16.vlgmr.msra.gmra.mxu0 %v4860_v54  ;;  %14262 = vmatmul.mubr.bf16.vlgmr.msra.gmra.mxu1 %v4862_v55  ;;  %v27672_v22 = vrot.slane %v293_v62, %v26895_v24 }
 0x216   : > { %v12304_v8 = vadd.f32 %v12303_v6, %v12264_v50  ;;  %14284 = vmatpush1.bf16.xpose.msra.mxu0 %v25716_v59  ;;  %14324 = vmatpush1.bf16.xpose.msra.mxu1 %v25718_v60  ;;  %v5534_v50 = vld [vmem:[%s26873_s24 + $0x388] sm:$0xff]  ;;  %v27656_v59 = vrot.slane %v1572_v42, %v26895_v24  ;;  %v25729_v60 = vcombine.high %v5533_v44, %v5917_v49  ;;  %v5921_v42 = vld [vmem:[%s26873_s24 + $0xfa0] sm:$0x11] }
 0x217   : > { %v12305_v9 = vpop.f32.mrf.mxu0  ;;  %v12345_v10 = vpop.f32.mrf.mxu1  ;;  %14301 = vmatprep.mubr.bf16.mxu0 %v4865_v63  ;;  %14341 = vmatprep.mubr.bf16.mxu1 %v4867_v0  ;;  %v25731_v61 = vcombine.high %v5534_v50, %v5918_v51  ;;  %v1589_v6 = vcombine.high %v293_v62, %v293_v62 }
 0x218   : > { %v12344_v14 = vadd.f32 %v12343_v7, %v12304_v8  ;;  %14363 = vmatprep.subr.bf16.mxu0 %v25721_v3  ;;  %14403 = vmatprep.subr.bf16.mxu1 %v25723_v4  ;;  %v1587_v4 = vcombine.high %v27653_v58, %v27653_v58  ;;  %v1588_v5 = vcombine.high %v27656_v59, %v27656_v59  ;;  %v5535_v8 = vld [vmem:[%s26873_s24 + $0x390] sm:$0xff] }
 0x219   : > { %v12306_v16 = vpop.f32.mrf.mxu0  ;;  %v12346_v17 = vpop.f32.mrf.mxu1  ;;  %v4878_v41 = vpack.c.bf16 %v27656_v59, %v27656_v59 }
 0x21a   : > { %v25728_v16 = vcombine.low %v5533_v44, %v5917_v49  ;;  %v25730_v17 = vcombine.low %v5534_v50, %v5918_v51  ;;  %v4877_v20 = vpack.c.bf16 %v1587_v4, %v1587_v4  ;;  %v4879_v21 = vpack.c.bf16 %v1588_v5, %v1588_v5  ;;  %v5922_v44 = vld [vmem:[%s26873_s24 + $0xfa8] sm:$0x11] }
 0x21b   : > { %v12307_v26 = vpop.f32.mrf.mxu0  ;;  %v12347_v27 = vpop.f32.mrf.mxu1  ;;  %v4880_v4 = vpack.c.bf16 %v27672_v22, %v27672_v22 }
 0x21c   : > { %v294_v27 = vld [vmem:[%s26866_s29 + $0x1d0] sm:$0xff] }
 0x21d   : > { %v12383_v35 = vpop.f32.mrf.mxu0  ;;  %v12423_v36 = vpop.f32.mrf.mxu1  ;;  %14302 = vmatmul.mubr.bf16.vlgmr.msra.gmra.mxu0 %v4864_v18  ;;  %14342 = vmatmul.mubr.bf16.vlgmr.msra.gmra.mxu1 %v4866_v19  ;;  %v27691_v51 = vrot.slane %v294_v27, %v26895_v24 }
 0x21e   : > { %v12384_v37 = vadd.f32 %v12383_v35, %v12344_v14  ;;  %14364 = vmatpush1.bf16.xpose.msra.mxu0 %v25720_v23  ;;  %14404 = vmatpush1.bf16.xpose.msra.mxu1 %v25722_v25  ;;  %v5536_v14 = vld [vmem:[%s26873_s24 + $0x398] sm:$0xff]  ;;  %v27675_v23 = vrot.slane %v1589_v6, %v26895_v24  ;;  %v25733_v25 = vcombine.high %v5535_v8, %v5919_v13  ;;  %v5923_v6 = vld [vmem:[%s26873_s24 + $0xfb0] sm:$0x11] }
 0x21f   : > { %v12385_v38 = vpop.f32.mrf.mxu0  ;;  %v12425_v39 = vpop.f32.mrf.mxu1  ;;  %14381 = vmatprep.mubr.bf16.mxu0 %v4869_v28  ;;  %14421 = vmatprep.mubr.bf16.mxu1 %v4871_v29  ;;  %v25735_v26 = vcombine.high %v5536_v14, %v5920_v15  ;;  %v1606_v35 = vcombine.high %v294_v27, %v294_v27 }
 0x220   : > { %v12424_v43 = vadd.f32 %v12423_v36, %v12384_v37  ;;  %14443 = vmatprep.subr.bf16.mxu0 %v25725_v32  ;;  %14483 = vmatprep.subr.bf16.mxu1 %v25727_v33  ;;  %v1604_v33 = vcombine.high %v27672_v22, %v27672_v22  ;;  %v1605_v34 = vcombine.high %v27675_v23, %v27675_v23  ;;  %v5537_v37 = vld [vmem:[%s26873_s24 + $0x3a0] sm:$0xff] }
 0x221   : > { %v12386_v45 = vpop.f32.mrf.mxu0  ;;  %v12426_v46 = vpop.f32.mrf.mxu1  ;;  %v4882_v5 = vpack.c.bf16 %v27675_v23, %v27675_v23 }
 0x222   : > { %v25732_v45 = vcombine.low %v5535_v8, %v5919_v13  ;;  %v25734_v46 = vcombine.low %v5536_v14, %v5920_v15  ;;  %v4881_v49 = vpack.c.bf16 %v1604_v33, %v1604_v33  ;;  %v4883_v50 = vpack.c.bf16 %v1605_v34, %v1605_v34  ;;  %v5924_v8 = vld [vmem:[%s26873_s24 + $0xfb8] sm:$0x11] }
 0x223   : > { %v12387_v54 = vpop.f32.mrf.mxu0  ;;  %v12427_v55 = vpop.f32.mrf.mxu1  ;;  %v4884_v33 = vpack.c.bf16 %v27691_v51, %v27691_v51 }
 0x224   : > { %v295_v55 = vld [vmem:[%s26866_s29 + $0x1d8] sm:$0xff] }
 0x225   : > { %v12463_v63 = vpop.f32.mrf.mxu0  ;;  %v12503_v0 = vpop.f32.mrf.mxu1  ;;  %14382 = vmatmul.mubr.bf16.vlgmr.msra.gmra.mxu0 %v4868_v47  ;;  %14422 = vmatmul.mubr.bf16.vlgmr.msra.gmra.mxu1 %v4870_v48  ;;  %v27710_v15 = vrot.slane %v295_v55, %v26895_v24 }
 0x226   : > { %v12464_v1 = vadd.f32 %v12463_v63, %v12424_v43  ;;  %14444 = vmatpush1.bf16.xpose.msra.mxu0 %v25724_v52  ;;  %14484 = vmatpush1.bf16.xpose.msra.mxu1 %v25726_v53  ;;  %v5538_v43 = vld [vmem:[%s26873_s24 + $0x3a8] sm:$0xff]  ;;  %v27694_v52 = vrot.slane %v1606_v35, %v26895_v24  ;;  %v25737_v53 = vcombine.high %v5537_v37, %v5921_v42  ;;  %v5925_v35 = vld [vmem:[%s26873_s24 + $0xfc0] sm:$0x11] }
 0x227   : > { %v12465_v2 = vpop.f32.mrf.mxu0  ;;  %v12505_v3 = vpop.f32.mrf.mxu1  ;;  %14461 = vmatprep.mubr.bf16.mxu0 %v4873_v56  ;;  %14501 = vmatprep.mubr.bf16.mxu1 %v4875_v57  ;;  %v25739_v54 = vcombine.high %v5538_v43, %v5922_v44  ;;  %v1623_v63 = vcombine.high %v295_v55, %v295_v55 }
 0x228   : > { %v12504_v7 = vadd.f32 %v12503_v0, %v12464_v1  ;;  %14523 = vmatprep.subr.bf16.mxu0 %v25729_v60  ;;  %14563 = vmatprep.subr.bf16.mxu1 %v25731_v61  ;;  %v1621_v61 = vcombine.high %v27691_v51, %v27691_v51  ;;  %v1622_v62 = vcombine.high %v27694_v52, %v27694_v52  ;;  %v5539_v1 = vld [vmem:[%s26873_s24 + $0x3b0] sm:$0xff] }
 0x229   : > { %v12466_v9 = vpop.f32.mrf.mxu0  ;;  %v12506_v10 = vpop.f32.mrf.mxu1  ;;  %v4886_v34 = vpack.c.bf16 %v27694_v52, %v27694_v52 }
 0x22a   : > { %v25736_v9 = vcombine.low %v5537_v37, %v5921_v42  ;;  %v25738_v10 = vcombine.low %v5538_v43, %v5922_v44  ;;  %v4885_v13 = vpack.c.bf16 %v1621_v61, %v1621_v61  ;;  %v4887_v14 = vpack.c.bf16 %v1622_v62, %v1622_v62  ;;  %v5926_v37 = vld [vmem:[%s26873_s24 + $0xfc8] sm:$0x11] }
 0x22b   : > { %v12467_v18 = vpop.f32.mrf.mxu0  ;;  %v12507_v19 = vpop.f32.mrf.mxu1  ;;  %v4888_v61 = vpack.c.bf16 %v27710_v15, %v27710_v15 }
 0x22c   : > { %v296_v19 = vld [vmem:[%s26866_s29 + $0x1e0] sm:$0xff] }
 0x22d   : > { %v12543_v28 = vpop.f32.mrf.mxu0  ;;  %v12583_v29 = vpop.f32.mrf.mxu1  ;;  %14462 = vmatmul.mubr.bf16.vlgmr.msra.gmra.mxu0 %v4872_v11  ;;  %14502 = vmatmul.mubr.bf16.vlgmr.msra.gmra.mxu1 %v4874_v12  ;;  %v27729_v44 = vrot.slane %v296_v19, %v26895_v24 }
 0x22e   : > { %v12544_v30 = vadd.f32 %v12543_v28, %v12504_v7  ;;  %14524 = vmatpush1.bf16.xpose.msra.mxu0 %v25728_v16  ;;  %14564 = vmatpush1.bf16.xpose.msra.mxu1 %v25730_v17  ;;  %v5540_v7 = vld [vmem:[%s26873_s24 + $0x3b8] sm:$0xff]  ;;  %v27713_v16 = vrot.slane %v1623_v63, %v26895_v24  ;;  %v25741_v17 = vcombine.high %v5539_v1, %v5923_v6  ;;  %v5927_v63 = vld [vmem:[%s26873_s24 + $0xfd0] sm:$0x11] }
 0x22f   : > { %v12545_v31 = vpop.f32.mrf.mxu0  ;;  %v12585_v32 = vpop.f32.mrf.mxu1  ;;  %14541 = vmatprep.mubr.bf16.mxu0 %v4877_v20  ;;  %14581 = vmatprep.mubr.bf16.mxu1 %v4879_v21  ;;  %v25743_v18 = vcombine.high %v5540_v7, %v5924_v8  ;;  %v1640_v28 = vcombine.high %v296_v19, %v296_v19 }
 0x230   : > { %v12584_v36 = vadd.f32 %v12583_v29, %v12544_v30  ;;  %14603 = vmatprep.subr.bf16.mxu0 %v25733_v25  ;;  %14643 = vmatprep.subr.bf16.mxu1 %v25735_v26  ;;  %v1638_v26 = vcombine.high %v27710_v15, %v27710_v15  ;;  %v1639_v27 = vcombine.high %v27713_v16, %v27713_v16  ;;  %v5541_v30 = vld [vmem:[%s26873_s24 + $0x3c0] sm:$0xff] }
 0x231   : > { %v12546_v38 = vpop.f32.mrf.mxu0  ;;  %v12586_v39 = vpop.f32.mrf.mxu1  ;;  %v4890_v62 = vpack.c.bf16 %v27713_v16, %v27713_v16 }
 0x232   : > { %v25740_v38 = vcombine.low %v5539_v1, %v5923_v6  ;;  %v25742_v39 = vcombine.low %v5540_v7, %v5924_v8  ;;  %v4889_v42 = vpack.c.bf16 %v1638_v26, %v1638_v26  ;;  %v4891_v43 = vpack.c.bf16 %v1639_v27, %v1639_v27  ;;  %v5928_v1 = vld [vmem:[%s26873_s24 + $0xfd8] sm:$0x11] }
 0x233   : > { %v12547_v47 = vpop.f32.mrf.mxu0  ;;  %v12587_v48 = vpop.f32.mrf.mxu1  ;;  %v4892_v26 = vpack.c.bf16 %v27729_v44, %v27729_v44 }
 0x234   : > { %v297_v48 = vld [vmem:[%s26866_s29 + $0x1e8] sm:$0xff] }
 0x235   : > { %v12623_v56 = vpop.f32.mrf.mxu0  ;;  %v12663_v57 = vpop.f32.mrf.mxu1  ;;  %14542 = vmatmul.mubr.bf16.vlgmr.msra.gmra.mxu0 %v4876_v40  ;;  %14582 = vmatmul.mubr.bf16.vlgmr.msra.gmra.mxu1 %v4878_v41  ;;  %v27748_v8 = vrot.slane %v297_v48, %v26895_v24 }
 0x236   : > { %v12624_v58 = vadd.f32 %v12623_v56, %v12584_v36  ;;  %14604 = vmatpush1.bf16.xpose.msra.mxu0 %v25732_v45  ;;  %14644 = vmatpush1.bf16.xpose.msra.mxu1 %v25734_v46  ;;  %v5542_v36 = vld [vmem:[%s26873_s24 + $0x3c8] sm:$0xff]  ;;  %v27732_v45 = vrot.slane %v1640_v28, %v26895_v24  ;;  %v25745_v46 = vcombine.high %v5541_v30, %v5925_v35  ;;  %v5929_v28 = vld [vmem:[%s26873_s24 + $0xfe0] sm:$0x11] }
 0x237   : > { %v12625_v59 = vpop.f32.mrf.mxu0  ;;  %v12665_v60 = vpop.f32.mrf.mxu1  ;;  %14621 = vmatprep.mubr.bf16.mxu0 %v4881_v49  ;;  %14661 = vmatprep.mubr.bf16.mxu1 %v4883_v50  ;;  %v25747_v47 = vcombine.high %v5542_v36, %v5926_v37  ;;  %v1657_v56 = vcombine.high %v297_v48, %v297_v48 }
 0x238   : > { %v12664_v0 = vadd.f32 %v12663_v57, %v12624_v58  ;;  %14683 = vmatprep.subr.bf16.mxu0 %v25737_v53  ;;  %14723 = vmatprep.subr.bf16.mxu1 %v25739_v54  ;;  %v1655_v54 = vcombine.high %v27729_v44, %v27729_v44  ;;  %v1656_v55 = vcombine.high %v27732_v45, %v27732_v45  ;;  %v5543_v58 = vld [vmem:[%s26873_s24 + $0x3d0] sm:$0xff] }
 0x239   : > { %v12626_v2 = vpop.f32.mrf.mxu0  ;;  %v12666_v3 = vpop.f32.mrf.mxu1  ;;  %v4894_v27 = vpack.c.bf16 %v27732_v45, %v27732_v45 }
 0x23a   : > { %v25744_v2 = vcombine.low %v5541_v30, %v5925_v35  ;;  %v25746_v3 = vcombine.low %v5542_v36, %v5926_v37  ;;  %v4893_v6 = vpack.c.bf16 %v1655_v54, %v1655_v54  ;;  %v4895_v7 = vpack.c.bf16 %v1656_v55, %v1656_v55  ;;  %v5930_v30 = vld [vmem:[%s26873_s24 + $0xfe8] sm:$0x11] }
 0x23b   : > { %v12627_v11 = vpop.f32.mrf.mxu0  ;;  %v12667_v12 = vpop.f32.mrf.mxu1  ;;  %v4896_v54 = vpack.c.bf16 %v27748_v8, %v27748_v8 }
 0x23c   : > { %v298_v12 = vld [vmem:[%s26866_s29 + $0x1f0] sm:$0xff] }
 0x23d   : > { %v12703_v20 = vpop.f32.mrf.mxu0  ;;  %v12743_v21 = vpop.f32.mrf.mxu1  ;;  %14622 = vmatmul.mubr.bf16.vlgmr.msra.gmra.mxu0 %v4880_v4  ;;  %14662 = vmatmul.mubr.bf16.vlgmr.msra.gmra.mxu1 %v4882_v5  ;;  %v27767_v37 = vrot.slane %v298_v12, %v26895_v24 }
 0x23e   : > { %v12704_v22 = vadd.f32 %v12703_v20, %v12664_v0  ;;  %14684 = vmatpush1.bf16.xpose.msra.mxu0 %v25736_v9  ;;  %14724 = vmatpush1.bf16.xpose.msra.mxu1 %v25738_v10  ;;  %v5544_v0 = vld [vmem:[%s26873_s24 + $0x3d8] sm:$0xff]  ;;  %v27751_v9 = vrot.slane %v1657_v56, %v26895_v24  ;;  %v25749_v10 = vcombine.high %v5543_v58, %v5927_v63  ;;  %v5931_v56 = vld [vmem:[%s26873_s24 + $0xff0] sm:$0x11] }
 0x23f   : > { %v12705_v23 = vpop.f32.mrf.mxu0  ;;  %v12745_v25 = vpop.f32.mrf.mxu1  ;;  %14701 = vmatprep.mubr.bf16.mxu0 %v4885_v13  ;;  %14741 = vmatprep.mubr.bf16.mxu1 %v4887_v14  ;;  %v25751_v11 = vcombine.high %v5544_v0, %v5928_v1  ;;  %v1674_v20 = vcombine.high %v298_v12, %v298_v12 }
 0x240   : > { %v12744_v29 = vadd.f32 %v12743_v21, %v12704_v22  ;;  %14763 = vmatprep.subr.bf16.mxu0 %v25741_v17  ;;  %14803 = vmatprep.subr.bf16.mxu1 %v25743_v18  ;;  %v1672_v18 = vcombine.high %v27748_v8, %v27748_v8  ;;  %v1673_v19 = vcombine.high %v27751_v9, %v27751_v9  ;;  %v5545_v22 = vld [vmem:[%s26873_s24 + $0x3e0] sm:$0xff] }
 0x241   : > { %v12706_v31 = vpop.f32.mrf.mxu0  ;;  %v12746_v32 = vpop.f32.mrf.mxu1  ;;  %v4898_v55 = vpack.c.bf16 %v27751_v9, %v27751_v9 }
 0x242   : > { %v25748_v31 = vcombine.low %v5543_v58, %v5927_v63  ;;  %v25750_v32 = vcombine.low %v5544_v0, %v5928_v1  ;;  %v4897_v35 = vpack.c.bf16 %v1672_v18, %v1672_v18  ;;  %v4899_v36 = vpack.c.bf16 %v1673_v19, %v1673_v19  ;;  %v5932_v58 = vld [vmem:[%s26873_s24 + $0xff8] sm:$0x11] }
 0x243   : > { %v12707_v40 = vpop.f32.mrf.mxu0  ;;  %v12747_v41 = vpop.f32.mrf.mxu1  ;;  %v4900_v18 = vpack.c.bf16 %v27767_v37, %v27767_v37 }
 0x244   : > { %v299_v41 = vld [vmem:[%s26866_s29 + $0x1f8] sm:$0xff] }
 0x245   : > { %v12783_v49 = vpop.f32.mrf.mxu0  ;;  %v12823_v50 = vpop.f32.mrf.mxu1  ;;  %14702 = vmatmul.mubr.bf16.vlgmr.msra.gmra.mxu0 %v4884_v33  ;;  %14742 = vmatmul.mubr.bf16.vlgmr.msra.gmra.mxu1 %v4886_v34  ;;  %v27786_v1 = vrot.slane %v299_v41, %v26895_v24 }
 0x246   : > { %v12784_v51 = vadd.f32 %v12783_v49, %v12744_v29  ;;  %14764 = vmatpush1.bf16.xpose.msra.mxu0 %v25740_v38  ;;  %14804 = vmatpush1.bf16.xpose.msra.mxu1 %v25742_v39  ;;  %v5546_v29 = vld [vmem:[%s26873_s24 + $0x3e8] sm:$0xff]  ;;  %v27770_v38 = vrot.slane %v1674_v20, %v26895_v24  ;;  %v25753_v39 = vcombine.high %v5545_v22, %v5929_v28  ;;  %v5933_v20 = vld [vmem:[%s26873_s24 + $0x1000] sm:$0x11] }
 0x247   : > { %v12785_v52 = vpop.f32.mrf.mxu0  ;;  %v12825_v53 = vpop.f32.mrf.mxu1  ;;  %14781 = vmatprep.mubr.bf16.mxu0 %v4889_v42  ;;  %14821 = vmatprep.mubr.bf16.mxu1 %v4891_v43  ;;  %v25755_v40 = vcombine.high %v5546_v29, %v5930_v30  ;;  %v1691_v49 = vcombine.high %v299_v41, %v299_v41 }
 0x248   : > { %v12824_v57 = vadd.f32 %v12823_v50, %v12784_v51  ;;  %14843 = vmatprep.subr.bf16.mxu0 %v25745_v46  ;;  %14883 = vmatprep.subr.bf16.mxu1 %v25747_v47  ;;  %v1689_v47 = vcombine.high %v27767_v37, %v27767_v37  ;;  %v1690_v48 = vcombine.high %v27770_v38, %v27770_v38  ;;  %v5547_v51 = vld [vmem:[%s26873_s24 + $0x3f0] sm:$0xff] }
 0x249   : > { %v12786_v59 = vpop.f32.mrf.mxu0  ;;  %v12826_v60 = vpop.f32.mrf.mxu1  ;;  %v4902_v19 = vpack.c.bf16 %v27770_v38, %v27770_v38 }
 0x24a   : > { %v25752_v59 = vcombine.low %v5545_v22, %v5929_v28  ;;  %v25754_v60 = vcombine.low %v5546_v29, %v5930_v30  ;;  %v4901_v63 = vpack.c.bf16 %v1689_v47, %v1689_v47  ;;  %v4903_v0 = vpack.c.bf16 %v1690_v48, %v1690_v48  ;;  %v5934_v22 = vld [vmem:[%s26873_s24 + $0x1008] sm:$0x11] }
 0x24b   : > { %v12787_v4 = vpop.f32.mrf.mxu0  ;;  %v12827_v5 = vpop.f32.mrf.mxu1  ;;  %v4904_v47 = vpack.c.bf16 %v27786_v1, %v27786_v1 }
 0x24c   : > { %v300_v5 = vld [vmem:[%s26866_s29 + $0x200] sm:$0xff] }
 0x24d   : > { %v12863_v13 = vpop.f32.mrf.mxu0  ;;  %v12903_v14 = vpop.f32.mrf.mxu1  ;;  %14782 = vmatmul.mubr.bf16.vlgmr.msra.gmra.mxu0 %v4888_v61  ;;  %14822 = vmatmul.mubr.bf16.vlgmr.msra.gmra.mxu1 %v4890_v62  ;;  %v27805_v30 = vrot.slane %v300_v5, %v26895_v24 }
 0x24e   : > { %v12864_v15 = vadd.f32 %v12863_v13, %v12824_v57  ;;  %14844 = vmatpush1.bf16.xpose.msra.mxu0 %v25744_v2  ;;  %14884 = vmatpush1.bf16.xpose.msra.mxu1 %v25746_v3  ;;  %v5548_v57 = vld [vmem:[%s26873_s24 + $0x3f8] sm:$0xff]  ;;  %v27789_v2 = vrot.slane %v1691_v49, %v26895_v24  ;;  %v25757_v3 = vcombine.high %v5547_v51, %v5931_v56  ;;  %v5935_v49 = vld [vmem:[%s26873_s24 + $0x1010] sm:$0x11] }
 0x24f   : > { %v12865_v16 = vpop.f32.mrf.mxu0  ;;  %v12905_v17 = vpop.f32.mrf.mxu1  ;;  %14861 = vmatprep.mubr.bf16.mxu0 %v4893_v6  ;;  %14901 = vmatprep.mubr.bf16.mxu1 %v4895_v7  ;;  %v25759_v4 = vcombine.high %v5548_v57, %v5932_v58  ;;  %v1708_v13 = vcombine.high %v300_v5, %v300_v5 }
 0x250   : > { %v12904_v21 = vadd.f32 %v12903_v14, %v12864_v15  ;;  %14923 = vmatprep.subr.bf16.mxu0 %v25749_v10  ;;  %14963 = vmatprep.subr.bf16.mxu1 %v25751_v11  ;;  %v1706_v11 = vcombine.high %v27786_v1, %v27786_v1  ;;  %v1707_v12 = vcombine.high %v27789_v2, %v27789_v2  ;;  %v5549_v15 = vld [vmem:[%s26873_s24 + $0x400] sm:$0xff] }
 0x251   : > { %v12866_v23 = vpop.f32.mrf.mxu0  ;;  %v12906_v25 = vpop.f32.mrf.mxu1  ;;  %v4906_v48 = vpack.c.bf16 %v27789_v2, %v27789_v2 }
 0x252   : > { %v25756_v23 = vcombine.low %v5547_v51, %v5931_v56  ;;  %v25758_v25 = vcombine.low %v5548_v57, %v5932_v58  ;;  %v4905_v28 = vpack.c.bf16 %v1706_v11, %v1706_v11  ;;  %v4907_v29 = vpack.c.bf16 %v1707_v12, %v1707_v12  ;;  %v5936_v51 = vld [vmem:[%s26873_s24 + $0x1018] sm:$0x11] }
 0x253   : > { %v12867_v33 = vpop.f32.mrf.mxu0  ;;  %v12907_v34 = vpop.f32.mrf.mxu1  ;;  %v4908_v11 = vpack.c.bf16 %v27805_v30, %v27805_v30 }
 0x254   : > { %v301_v34 = vld [vmem:[%s26866_s29 + $0x208] sm:$0xff] }
 0x255   : > { %v12943_v42 = vpop.f32.mrf.mxu0  ;;  %v12983_v43 = vpop.f32.mrf.mxu1  ;;  %14862 = vmatmul.mubr.bf16.vlgmr.msra.gmra.mxu0 %v4892_v26  ;;  %14902 = vmatmul.mubr.bf16.vlgmr.msra.gmra.mxu1 %v4894_v27  ;;  %v27824_v58 = vrot.slane %v301_v34, %v26895_v24 }
 0x256   : > { %v12944_v44 = vadd.f32 %v12943_v42, %v12904_v21  ;;  %14924 = vmatpush1.bf16.xpose.msra.mxu0 %v25748_v31  ;;  %14964 = vmatpush1.bf16.xpose.msra.mxu1 %v25750_v32  ;;  %v5550_v21 = vld [vmem:[%s26873_s24 + $0x408] sm:$0xff]  ;;  %v27808_v31 = vrot.slane %v1708_v13, %v26895_v24  ;;  %v25761_v32 = vcombine.high %v5549_v15, %v5933_v20  ;;  %v5937_v13 = vld [vmem:[%s26873_s24 + $0x1020] sm:$0x11] }
 0x257   : > { %v12945_v45 = vpop.f32.mrf.mxu0  ;;  %v12985_v46 = vpop.f32.mrf.mxu1  ;;  %14941 = vmatprep.mubr.bf16.mxu0 %v4897_v35  ;;  %14981 = vmatprep.mubr.bf16.mxu1 %v4899_v36  ;;  %v25763_v33 = vcombine.high %v5550_v21, %v5934_v22  ;;  %v1725_v42 = vcombine.high %v301_v34, %v301_v34 }
 0x258   : > { %v12984_v50 = vadd.f32 %v12983_v43, %v12944_v44  ;;  %15003 = vmatprep.subr.bf16.mxu0 %v25753_v39  ;;  %15043 = vmatprep.subr.bf16.mxu1 %v25755_v40  ;;  %v1723_v40 = vcombine.high %v27805_v30, %v27805_v30  ;;  %v1724_v41 = vcombine.high %v27808_v31, %v27808_v31  ;;  %v5551_v44 = vld [vmem:[%s26873_s24 + $0x410] sm:$0xff] }
 0x259   : > { %v12946_v52 = vpop.f32.mrf.mxu0  ;;  %v12986_v53 = vpop.f32.mrf.mxu1  ;;  %v4910_v12 = vpack.c.bf16 %v27808_v31, %v27808_v31 }
 0x25a   : > { %v25760_v52 = vcombine.low %v5549_v15, %v5933_v20  ;;  %v25762_v53 = vcombine.low %v5550_v21, %v5934_v22  ;;  %v4909_v56 = vpack.c.bf16 %v1723_v40, %v1723_v40  ;;  %v4911_v57 = vpack.c.bf16 %v1724_v41, %v1724_v41  ;;  %v5938_v15 = vld [vmem:[%s26873_s24 + $0x1028] sm:$0x11] }
 0x25b   : > { %v12947_v61 = vpop.f32.mrf.mxu0  ;;  %v12987_v62 = vpop.f32.mrf.mxu1  ;;  %v4912_v40 = vpack.c.bf16 %v27824_v58, %v27824_v58 }
 0x25c   : > { %v302_v62 = vld [vmem:[%s26866_s29 + $0x210] sm:$0xff] }
 0x25d   : > { %v13023_v6 = vpop.f32.mrf.mxu0  ;;  %v13063_v7 = vpop.f32.mrf.mxu1  ;;  %14942 = vmatmul.mubr.bf16.vlgmr.msra.gmra.mxu0 %v4896_v54  ;;  %14982 = vmatmul.mubr.bf16.vlgmr.msra.gmra.mxu1 %v4898_v55  ;;  %v27843_v22 = vrot.slane %v302_v62, %v26895_v24 }
 0x25e   : > { %v13024_v8 = vadd.f32 %v13023_v6, %v12984_v50  ;;  %15004 = vmatpush1.bf16.xpose.msra.mxu0 %v25752_v59  ;;  %15044 = vmatpush1.bf16.xpose.msra.mxu1 %v25754_v60  ;;  %v5552_v50 = vld [vmem:[%s26873_s24 + $0x418] sm:$0xff]  ;;  %v27827_v59 = vrot.slane %v1725_v42, %v26895_v24  ;;  %v25765_v60 = vcombine.high %v5551_v44, %v5935_v49  ;;  %v5939_v42 = vld [vmem:[%s26873_s24 + $0x1030] sm:$0x11] }
 0x25f   : > { %v13025_v9 = vpop.f32.mrf.mxu0  ;;  %v13065_v10 = vpop.f32.mrf.mxu1  ;;  %15021 = vmatprep.mubr.bf16.mxu0 %v4901_v63  ;;  %15061 = vmatprep.mubr.bf16.mxu1 %v4903_v0  ;;  %v25767_v61 = vcombine.high %v5552_v50, %v5936_v51  ;;  %v1742_v6 = vcombine.high %v302_v62, %v302_v62 }
 0x260   : > { %v13064_v14 = vadd.f32 %v13063_v7, %v13024_v8  ;;  %15083 = vmatprep.subr.bf16.mxu0 %v25757_v3  ;;  %15123 = vmatprep.subr.bf16.mxu1 %v25759_v4  ;;  %v1740_v4 = vcombine.high %v27824_v58, %v27824_v58  ;;  %v1741_v5 = vcombine.high %v27827_v59, %v27827_v59  ;;  %v5553_v8 = vld [vmem:[%s26873_s24 + $0x420] sm:$0xff] }
 0x261   : > { %v13026_v16 = vpop.f32.mrf.mxu0  ;;  %v13066_v17 = vpop.f32.mrf.mxu1  ;;  %v4914_v41 = vpack.c.bf16 %v27827_v59, %v27827_v59 }
 0x262   : > { %v25764_v16 = vcombine.low %v5551_v44, %v5935_v49  ;;  %v25766_v17 = vcombine.low %v5552_v50, %v5936_v51  ;;  %v4913_v20 = vpack.c.bf16 %v1740_v4, %v1740_v4  ;;  %v4915_v21 = vpack.c.bf16 %v1741_v5, %v1741_v5  ;;  %v5940_v44 = vld [vmem:[%s26873_s24 + $0x1038] sm:$0x11] }
 0x263   : > { %v13027_v26 = vpop.f32.mrf.mxu0  ;;  %v13067_v27 = vpop.f32.mrf.mxu1  ;;  %v4916_v4 = vpack.c.bf16 %v27843_v22, %v27843_v22 }
 0x264   : > { %v303_v27 = vld [vmem:[%s26866_s29 + $0x218] sm:$0xff] }
 0x265   : > { %v13103_v35 = vpop.f32.mrf.mxu0  ;;  %v13143_v36 = vpop.f32.mrf.mxu1  ;;  %15022 = vmatmul.mubr.bf16.vlgmr.msra.gmra.mxu0 %v4900_v18  ;;  %15062 = vmatmul.mubr.bf16.vlgmr.msra.gmra.mxu1 %v4902_v19  ;;  %v27862_v51 = vrot.slane %v303_v27, %v26895_v24 }
 0x266   : > { %v13104_v37 = vadd.f32 %v13103_v35, %v13064_v14  ;;  %15084 = vmatpush1.bf16.xpose.msra.mxu0 %v25756_v23  ;;  %15124 = vmatpush1.bf16.xpose.msra.mxu1 %v25758_v25  ;;  %v5554_v14 = vld [vmem:[%s26873_s24 + $0x428] sm:$0xff]  ;;  %v27846_v23 = vrot.slane %v1742_v6, %v26895_v24  ;;  %v25769_v25 = vcombine.high %v5553_v8, %v5937_v13  ;;  %v5941_v6 = vld [vmem:[%s26873_s24 + $0x1040] sm:$0x11] }
 0x267   : > { %v13105_v38 = vpop.f32.mrf.mxu0  ;;  %v13145_v39 = vpop.f32.mrf.mxu1  ;;  %15101 = vmatprep.mubr.bf16.mxu0 %v4905_v28  ;;  %15141 = vmatprep.mubr.bf16.mxu1 %v4907_v29  ;;  %v25771_v26 = vcombine.high %v5554_v14, %v5938_v15  ;;  %v1759_v35 = vcombine.high %v303_v27, %v303_v27 }
 0x268   : > { %v13144_v43 = vadd.f32 %v13143_v36, %v13104_v37  ;;  %15163 = vmatprep.subr.bf16.mxu0 %v25761_v32  ;;  %15203 = vmatprep.subr.bf16.mxu1 %v25763_v33  ;;  %v1757_v33 = vcombine.high %v27843_v22, %v27843_v22  ;;  %v1758_v34 = vcombine.high %v27846_v23, %v27846_v23  ;;  %v5555_v37 = vld [vmem:[%s26873_s24 + $0x430] sm:$0xff] }
 0x269   : > { %v13106_v45 = vpop.f32.mrf.mxu0  ;;  %v13146_v46 = vpop.f32.mrf.mxu1  ;;  %v4918_v5 = vpack.c.bf16 %v27846_v23, %v27846_v23 }
 0x26a   : > { %v25768_v45 = vcombine.low %v5553_v8, %v5937_v13  ;;  %v25770_v46 = vcombine.low %v5554_v14, %v5938_v15  ;;  %v4917_v49 = vpack.c.bf16 %v1757_v33, %v1757_v33  ;;  %v4919_v50 = vpack.c.bf16 %v1758_v34, %v1758_v34  ;;  %v5942_v8 = vld [vmem:[%s26873_s24 + $0x1048] sm:$0x11] }
 0x26b   : > { %v13107_v54 = vpop.f32.mrf.mxu0  ;;  %v13147_v55 = vpop.f32.mrf.mxu1  ;;  %v4920_v33 = vpack.c.bf16 %v27862_v51, %v27862_v51 }
 0x26c   : > { %v304_v55 = vld [vmem:[%s26866_s29 + $0x220] sm:$0xff] }
 0x26d   : > { %v13183_v63 = vpop.f32.mrf.mxu0  ;;  %v13223_v0 = vpop.f32.mrf.mxu1  ;;  %15102 = vmatmul.mubr.bf16.vlgmr.msra.gmra.mxu0 %v4904_v47  ;;  %15142 = vmatmul.mubr.bf16.vlgmr.msra.gmra.mxu1 %v4906_v48  ;;  %v27881_v15 = vrot.slane %v304_v55, %v26895_v24 }
 0x26e   : > { %v13184_v1 = vadd.f32 %v13183_v63, %v13144_v43  ;;  %15164 = vmatpush1.bf16.xpose.msra.mxu0 %v25760_v52  ;;  %15204 = vmatpush1.bf16.xpose.msra.mxu1 %v25762_v53  ;;  %v5556_v43 = vld [vmem:[%s26873_s24 + $0x438] sm:$0xff]  ;;  %v27865_v52 = vrot.slane %v1759_v35, %v26895_v24  ;;  %v25773_v53 = vcombine.high %v5555_v37, %v5939_v42  ;;  %v5943_v35 = vld [vmem:[%s26873_s24 + $0x1050] sm:$0x11] }
 0x26f   : > { %v13185_v2 = vpop.f32.mrf.mxu0  ;;  %v13225_v3 = vpop.f32.mrf.mxu1  ;;  %15181 = vmatprep.mubr.bf16.mxu0 %v4909_v56  ;;  %15221 = vmatprep.mubr.bf16.mxu1 %v4911_v57  ;;  %v25775_v54 = vcombine.high %v5556_v43, %v5940_v44  ;;  %v1776_v63 = vcombine.high %v304_v55, %v304_v55 }
 0x270   : > { %v13224_v7 = vadd.f32 %v13223_v0, %v13184_v1  ;;  %15243 = vmatprep.subr.bf16.mxu0 %v25765_v60  ;;  %15283 = vmatprep.subr.bf16.mxu1 %v25767_v61  ;;  %v1774_v61 = vcombine.high %v27862_v51, %v27862_v51  ;;  %v1775_v62 = vcombine.high %v27865_v52, %v27865_v52  ;;  %v5557_v1 = vld [vmem:[%s26873_s24 + $0x440] sm:$0xff] }
 0x271   : > { %v13186_v9 = vpop.f32.mrf.mxu0  ;;  %v13226_v10 = vpop.f32.mrf.mxu1  ;;  %v4922_v34 = vpack.c.bf16 %v27865_v52, %v27865_v52 }
 0x272   : > { %v25772_v9 = vcombine.low %v5555_v37, %v5939_v42  ;;  %v25774_v10 = vcombine.low %v5556_v43, %v5940_v44  ;;  %v4921_v13 = vpack.c.bf16 %v1774_v61, %v1774_v61  ;;  %v4923_v14 = vpack.c.bf16 %v1775_v62, %v1775_v62  ;;  %v5944_v37 = vld [vmem:[%s26873_s24 + $0x1058] sm:$0x11] }
 0x273   : > { %v13187_v18 = vpop.f32.mrf.mxu0  ;;  %v13227_v19 = vpop.f32.mrf.mxu1  ;;  %v4924_v61 = vpack.c.bf16 %v27881_v15, %v27881_v15 }
 0x274   : > { %v305_v19 = vld [vmem:[%s26866_s29 + $0x228] sm:$0xff] }
 0x275   : > { %v13263_v28 = vpop.f32.mrf.mxu0  ;;  %v13303_v29 = vpop.f32.mrf.mxu1  ;;  %15182 = vmatmul.mubr.bf16.vlgmr.msra.gmra.mxu0 %v4908_v11  ;;  %15222 = vmatmul.mubr.bf16.vlgmr.msra.gmra.mxu1 %v4910_v12  ;;  %v27900_v44 = vrot.slane %v305_v19, %v26895_v24 }
 0x276   : > { %v13264_v30 = vadd.f32 %v13263_v28, %v13224_v7  ;;  %15244 = vmatpush1.bf16.xpose.msra.mxu0 %v25764_v16  ;;  %15284 = vmatpush1.bf16.xpose.msra.mxu1 %v25766_v17  ;;  %v5558_v7 = vld [vmem:[%s26873_s24 + $0x448] sm:$0xff]  ;;  %v27884_v16 = vrot.slane %v1776_v63, %v26895_v24  ;;  %v25777_v17 = vcombine.high %v5557_v1, %v5941_v6  ;;  %v5945_v63 = vld [vmem:[%s26873_s24 + $0x1060] sm:$0x11] }
 0x277   : > { %v13265_v31 = vpop.f32.mrf.mxu0  ;;  %v13305_v32 = vpop.f32.mrf.mxu1  ;;  %15261 = vmatprep.mubr.bf16.mxu0 %v4913_v20  ;;  %15301 = vmatprep.mubr.bf16.mxu1 %v4915_v21  ;;  %v25779_v18 = vcombine.high %v5558_v7, %v5942_v8  ;;  %v1793_v28 = vcombine.high %v305_v19, %v305_v19 }
 0x278   : > { %v13304_v36 = vadd.f32 %v13303_v29, %v13264_v30  ;;  %15323 = vmatprep.subr.bf16.mxu0 %v25769_v25  ;;  %15363 = vmatprep.subr.bf16.mxu1 %v25771_v26  ;;  %v1791_v26 = vcombine.high %v27881_v15, %v27881_v15  ;;  %v1792_v27 = vcombine.high %v27884_v16, %v27884_v16  ;;  %v5559_v30 = vld [vmem:[%s26873_s24 + $0x450] sm:$0xff] }
 0x279   : > { %v13266_v38 = vpop.f32.mrf.mxu0  ;;  %v13306_v39 = vpop.f32.mrf.mxu1  ;;  %v4926_v62 = vpack.c.bf16 %v27884_v16, %v27884_v16 }
 0x27a   : > { %v25776_v38 = vcombine.low %v5557_v1, %v5941_v6  ;;  %v25778_v39 = vcombine.low %v5558_v7, %v5942_v8  ;;  %v4925_v42 = vpack.c.bf16 %v1791_v26, %v1791_v26  ;;  %v4927_v43 = vpack.c.bf16 %v1792_v27, %v1792_v27  ;;  %v5946_v1 = vld [vmem:[%s26873_s24 + $0x1068] sm:$0x11] }
 0x27b   : > { %v13267_v47 = vpop.f32.mrf.mxu0  ;;  %v13307_v48 = vpop.f32.mrf.mxu1  ;;  %v4928_v26 = vpack.c.bf16 %v27900_v44, %v27900_v44 }
 0x27c   : > { %v306_v48 = vld [vmem:[%s26866_s29 + $0x230] sm:$0xff] }
 0x27d   : > { %v13343_v56 = vpop.f32.mrf.mxu0  ;;  %v13383_v57 = vpop.f32.mrf.mxu1  ;;  %15262 = vmatmul.mubr.bf16.vlgmr.msra.gmra.mxu0 %v4912_v40  ;;  %15302 = vmatmul.mubr.bf16.vlgmr.msra.gmra.mxu1 %v4914_v41  ;;  %v27919_v8 = vrot.slane %v306_v48, %v26895_v24 }
 0x27e   : > { %v13344_v58 = vadd.f32 %v13343_v56, %v13304_v36  ;;  %15324 = vmatpush1.bf16.xpose.msra.mxu0 %v25768_v45  ;;  %15364 = vmatpush1.bf16.xpose.msra.mxu1 %v25770_v46  ;;  %v5560_v36 = vld [vmem:[%s26873_s24 + $0x458] sm:$0xff]  ;;  %v27903_v45 = vrot.slane %v1793_v28, %v26895_v24  ;;  %v25781_v46 = vcombine.high %v5559_v30, %v5943_v35  ;;  %v5947_v28 = vld [vmem:[%s26873_s24 + $0x1070] sm:$0x11] }
 0x27f   : > { %v13345_v59 = vpop.f32.mrf.mxu0  ;;  %v13385_v60 = vpop.f32.mrf.mxu1  ;;  %15341 = vmatprep.mubr.bf16.mxu0 %v4917_v49  ;;  %15381 = vmatprep.mubr.bf16.mxu1 %v4919_v50  ;;  %v25783_v47 = vcombine.high %v5560_v36, %v5944_v37  ;;  %v1810_v56 = vcombine.high %v306_v48, %v306_v48 }
 0x280   : > { %v13384_v0 = vadd.f32 %v13383_v57, %v13344_v58  ;;  %15403 = vmatprep.subr.bf16.mxu0 %v25773_v53  ;;  %15443 = vmatprep.subr.bf16.mxu1 %v25775_v54  ;;  %v1808_v54 = vcombine.high %v27900_v44, %v27900_v44  ;;  %v1809_v55 = vcombine.high %v27903_v45, %v27903_v45  ;;  %v5561_v58 = vld [vmem:[%s26873_s24 + $0x460] sm:$0xff] }
 0x281   : > { %v13346_v2 = vpop.f32.mrf.mxu0  ;;  %v13386_v3 = vpop.f32.mrf.mxu1  ;;  %v4930_v27 = vpack.c.bf16 %v27903_v45, %v27903_v45 }
 0x282   : > { %v25780_v2 = vcombine.low %v5559_v30, %v5943_v35  ;;  %v25782_v3 = vcombine.low %v5560_v36, %v5944_v37  ;;  %v4929_v6 = vpack.c.bf16 %v1808_v54, %v1808_v54  ;;  %v4931_v7 = vpack.c.bf16 %v1809_v55, %v1809_v55  ;;  %v5948_v30 = vld [vmem:[%s26873_s24 + $0x1078] sm:$0x11] }
 0x283   : > { %v13347_v11 = vpop.f32.mrf.mxu0  ;;  %v13387_v12 = vpop.f32.mrf.mxu1  ;;  %v4932_v54 = vpack.c.bf16 %v27919_v8, %v27919_v8 }
 0x284   : > { %v307_v12 = vld [vmem:[%s26866_s29 + $0x238] sm:$0xff] }
 0x285   : > { %v13423_v20 = vpop.f32.mrf.mxu0  ;;  %v13463_v21 = vpop.f32.mrf.mxu1  ;;  %15342 = vmatmul.mubr.bf16.vlgmr.msra.gmra.mxu0 %v4916_v4  ;;  %15382 = vmatmul.mubr.bf16.vlgmr.msra.gmra.mxu1 %v4918_v5  ;;  %v27938_v37 = vrot.slane %v307_v12, %v26895_v24 }
 0x286   : > { %v13424_v22 = vadd.f32 %v13423_v20, %v13384_v0  ;;  %15404 = vmatpush1.bf16.xpose.msra.mxu0 %v25772_v9  ;;  %15444 = vmatpush1.bf16.xpose.msra.mxu1 %v25774_v10  ;;  %v5562_v0 = vld [vmem:[%s26873_s24 + $0x468] sm:$0xff]  ;;  %v27922_v9 = vrot.slane %v1810_v56, %v26895_v24  ;;  %v25785_v10 = vcombine.high %v5561_v58, %v5945_v63  ;;  %v5949_v56 = vld [vmem:[%s26873_s24 + $0x1080] sm:$0x11] }
 0x287   : > { %v13425_v23 = vpop.f32.mrf.mxu0  ;;  %v13465_v25 = vpop.f32.mrf.mxu1  ;;  %15421 = vmatprep.mubr.bf16.mxu0 %v4921_v13  ;;  %15461 = vmatprep.mubr.bf16.mxu1 %v4923_v14  ;;  %v25787_v11 = vcombine.high %v5562_v0, %v5946_v1  ;;  %v1827_v20 = vcombine.high %v307_v12, %v307_v12 }
 0x288   : > { %v13464_v29 = vadd.f32 %v13463_v21, %v13424_v22  ;;  %15483 = vmatprep.subr.bf16.mxu0 %v25777_v17  ;;  %15523 = vmatprep.subr.bf16.mxu1 %v25779_v18  ;;  %v1825_v18 = vcombine.high %v27919_v8, %v27919_v8  ;;  %v1826_v19 = vcombine.high %v27922_v9, %v27922_v9  ;;  %v5563_v22 = vld [vmem:[%s26873_s24 + $0x470] sm:$0xff] }
 0x289   : > { %v13426_v31 = vpop.f32.mrf.mxu0  ;;  %v13466_v32 = vpop.f32.mrf.mxu1  ;;  %v4934_v55 = vpack.c.bf16 %v27922_v9, %v27922_v9 }
 0x28a   : > { %v25784_v31 = vcombine.low %v5561_v58, %v5945_v63  ;;  %v25786_v32 = vcombine.low %v5562_v0, %v5946_v1  ;;  %v4933_v35 = vpack.c.bf16 %v1825_v18, %v1825_v18  ;;  %v4935_v36 = vpack.c.bf16 %v1826_v19, %v1826_v19  ;;  %v5950_v58 = vld [vmem:[%s26873_s24 + $0x1088] sm:$0x11] }
 0x28b   : > { %v13427_v40 = vpop.f32.mrf.mxu0  ;;  %v13467_v41 = vpop.f32.mrf.mxu1  ;;  %v4936_v18 = vpack.c.bf16 %v27938_v37, %v27938_v37 }
 0x28c   : > { %v308_v41 = vld [vmem:[%s26866_s29 + $0x240] sm:$0xff] }
 0x28d   : > { %v13503_v49 = vpop.f32.mrf.mxu0  ;;  %v13543_v50 = vpop.f32.mrf.mxu1  ;;  %15422 = vmatmul.mubr.bf16.vlgmr.msra.gmra.mxu0 %v4920_v33  ;;  %15462 = vmatmul.mubr.bf16.vlgmr.msra.gmra.mxu1 %v4922_v34  ;;  %v27957_v1 = vrot.slane %v308_v41, %v26895_v24 }
 0x28e   : > { %v13504_v51 = vadd.f32 %v13503_v49, %v13464_v29  ;;  %15484 = vmatpush1.bf16.xpose.msra.mxu0 %v25776_v38  ;;  %15524 = vmatpush1.bf16.xpose.msra.mxu1 %v25778_v39  ;;  %v5564_v29 = vld [vmem:[%s26873_s24 + $0x478] sm:$0xff]  ;;  %v27941_v38 = vrot.slane %v1827_v20, %v26895_v24  ;;  %v25789_v39 = vcombine.high %v5563_v22, %v5947_v28  ;;  %v5951_v20 = vld [vmem:[%s26873_s24 + $0x1090] sm:$0x11] }
 0x28f   : > { %v13505_v52 = vpop.f32.mrf.mxu0  ;;  %v13545_v53 = vpop.f32.mrf.mxu1  ;;  %15501 = vmatprep.mubr.bf16.mxu0 %v4925_v42  ;;  %15541 = vmatprep.mubr.bf16.mxu1 %v4927_v43  ;;  %v25791_v40 = vcombine.high %v5564_v29, %v5948_v30  ;;  %v1844_v49 = vcombine.high %v308_v41, %v308_v41 }
 0x290   : > { %v13544_v57 = vadd.f32 %v13543_v50, %v13504_v51  ;;  %15563 = vmatprep.subr.bf16.mxu0 %v25781_v46  ;;  %15603 = vmatprep.subr.bf16.mxu1 %v25783_v47  ;;  %v1842_v47 = vcombine.high %v27938_v37, %v27938_v37  ;;  %v1843_v48 = vcombine.high %v27941_v38, %v27941_v38  ;;  %v5565_v51 = vld [vmem:[%s26873_s24 + $0x480] sm:$0xff] }
 0x291   : > { %v13506_v59 = vpop.f32.mrf.mxu0  ;;  %v13546_v60 = vpop.f32.mrf.mxu1  ;;  %v4938_v19 = vpack.c.bf16 %v27941_v38, %v27941_v38 }
 0x292   : > { %v25788_v59 = vcombine.low %v5563_v22, %v5947_v28  ;;  %v25790_v60 = vcombine.low %v5564_v29, %v5948_v30  ;;  %v4937_v63 = vpack.c.bf16 %v1842_v47, %v1842_v47  ;;  %v4939_v0 = vpack.c.bf16 %v1843_v48, %v1843_v48  ;;  %v5952_v22 = vld [vmem:[%s26873_s24 + $0x1098] sm:$0x11] }
 0x293   : > { %v13507_v4 = vpop.f32.mrf.mxu0  ;;  %v13547_v5 = vpop.f32.mrf.mxu1  ;;  %v4940_v47 = vpack.c.bf16 %v27957_v1, %v27957_v1 }
 0x294   : > { %v309_v5 = vld [vmem:[%s26866_s29 + $0x248] sm:$0xff] }
 0x295   : > { %v13583_v13 = vpop.f32.mrf.mxu0  ;;  %v13623_v14 = vpop.f32.mrf.mxu1  ;;  %15502 = vmatmul.mubr.bf16.vlgmr.msra.gmra.mxu0 %v4924_v61  ;;  %15542 = vmatmul.mubr.bf16.vlgmr.msra.gmra.mxu1 %v4926_v62  ;;  %v27976_v30 = vrot.slane %v309_v5, %v26895_v24 }
 0x296   : > { %v13584_v15 = vadd.f32 %v13583_v13, %v13544_v57  ;;  %15564 = vmatpush1.bf16.xpose.msra.mxu0 %v25780_v2  ;;  %15604 = vmatpush1.bf16.xpose.msra.mxu1 %v25782_v3  ;;  %v5566_v57 = vld [vmem:[%s26873_s24 + $0x488] sm:$0xff]  ;;  %v27960_v2 = vrot.slane %v1844_v49, %v26895_v24  ;;  %v25793_v3 = vcombine.high %v5565_v51, %v5949_v56  ;;  %v5953_v49 = vld [vmem:[%s26873_s24 + $0x10a0] sm:$0x11] }
 0x297   : > { %v13585_v16 = vpop.f32.mrf.mxu0  ;;  %v13625_v17 = vpop.f32.mrf.mxu1  ;;  %15581 = vmatprep.mubr.bf16.mxu0 %v4929_v6  ;;  %15621 = vmatprep.mubr.bf16.mxu1 %v4931_v7  ;;  %v25795_v4 = vcombine.high %v5566_v57, %v5950_v58  ;;  %v1861_v13 = vcombine.high %v309_v5, %v309_v5 }
 0x298   : > { %v13624_v21 = vadd.f32 %v13623_v14, %v13584_v15  ;;  %15643 = vmatprep.subr.bf16.mxu0 %v25785_v10  ;;  %15683 = vmatprep.subr.bf16.mxu1 %v25787_v11  ;;  %v1859_v11 = vcombine.high %v27957_v1, %v27957_v1  ;;  %v1860_v12 = vcombine.high %v27960_v2, %v27960_v2  ;;  %v5567_v15 = vld [vmem:[%s26873_s24 + $0x490] sm:$0xff] }
 0x299   : > { %v13586_v23 = vpop.f32.mrf.mxu0  ;;  %v13626_v25 = vpop.f32.mrf.mxu1  ;;  %v4942_v48 = vpack.c.bf16 %v27960_v2, %v27960_v2 }
 0x29a   : > { %v25792_v23 = vcombine.low %v5565_v51, %v5949_v56  ;;  %v25794_v25 = vcombine.low %v5566_v57, %v5950_v58  ;;  %v4941_v28 = vpack.c.bf16 %v1859_v11, %v1859_v11  ;;  %v4943_v29 = vpack.c.bf16 %v1860_v12, %v1860_v12  ;;  %v5954_v51 = vld [vmem:[%s26873_s24 + $0x10a8] sm:$0x11] }
 0x29b   : > { %v13587_v33 = vpop.f32.mrf.mxu0  ;;  %v13627_v34 = vpop.f32.mrf.mxu1  ;;  %v4944_v11 = vpack.c.bf16 %v27976_v30, %v27976_v30 }
 0x29c   : > { %v310_v34 = vld [vmem:[%s26866_s29 + $0x250] sm:$0xff] }
 0x29d   : > { %v13663_v42 = vpop.f32.mrf.mxu0  ;;  %v13703_v43 = vpop.f32.mrf.mxu1  ;;  %15582 = vmatmul.mubr.bf16.vlgmr.msra.gmra.mxu0 %v4928_v26  ;;  %15622 = vmatmul.mubr.bf16.vlgmr.msra.gmra.mxu1 %v4930_v27  ;;  %v27995_v58 = vrot.slane %v310_v34, %v26895_v24 }
 0x29e   : > { %v13664_v44 = vadd.f32 %v13663_v42, %v13624_v21  ;;  %15644 = vmatpush1.bf16.xpose.msra.mxu0 %v25784_v31  ;;  %15684 = vmatpush1.bf16.xpose.msra.mxu1 %v25786_v32  ;;  %v5568_v21 = vld [vmem:[%s26873_s24 + $0x498] sm:$0xff]  ;;  %v27979_v31 = vrot.slane %v1861_v13, %v26895_v24  ;;  %v25797_v32 = vcombine.high %v5567_v15, %v5951_v20  ;;  %v5955_v13 = vld [vmem:[%s26873_s24 + $0x10b0] sm:$0x11] }
 0x29f   : > { %v13665_v45 = vpop.f32.mrf.mxu0  ;;  %v13705_v46 = vpop.f32.mrf.mxu1  ;;  %15661 = vmatprep.mubr.bf16.mxu0 %v4933_v35  ;;  %15701 = vmatprep.mubr.bf16.mxu1 %v4935_v36  ;;  %v25799_v33 = vcombine.high %v5568_v21, %v5952_v22  ;;  %v1878_v42 = vcombine.high %v310_v34, %v310_v34 }
 0x2a0   : > { %v13704_v50 = vadd.f32 %v13703_v43, %v13664_v44  ;;  %15723 = vmatprep.subr.bf16.mxu0 %v25789_v39  ;;  %15763 = vmatprep.subr.bf16.mxu1 %v25791_v40  ;;  %v1876_v40 = vcombine.high %v27976_v30, %v27976_v30  ;;  %v1877_v41 = vcombine.high %v27979_v31, %v27979_v31  ;;  %v5569_v44 = vld [vmem:[%s26873_s24 + $0x4a0] sm:$0xff] }
 0x2a1   : > { %v13666_v52 = vpop.f32.mrf.mxu0  ;;  %v13706_v53 = vpop.f32.mrf.mxu1  ;;  %v4946_v12 = vpack.c.bf16 %v27979_v31, %v27979_v31 }
 0x2a2   : > { %v25796_v52 = vcombine.low %v5567_v15, %v5951_v20  ;;  %v25798_v53 = vcombine.low %v5568_v21, %v5952_v22  ;;  %v4945_v56 = vpack.c.bf16 %v1876_v40, %v1876_v40  ;;  %v4947_v57 = vpack.c.bf16 %v1877_v41, %v1877_v41  ;;  %v5956_v15 = vld [vmem:[%s26873_s24 + $0x10b8] sm:$0x11] }
 0x2a3   : > { %v13667_v61 = vpop.f32.mrf.mxu0  ;;  %v13707_v62 = vpop.f32.mrf.mxu1  ;;  %v4948_v40 = vpack.c.bf16 %v27995_v58, %v27995_v58 }
 0x2a4   : > { %v311_v62 = vld [vmem:[%s26866_s29 + $0x258] sm:$0xff] }
 0x2a5   : > { %v13743_v6 = vpop.f32.mrf.mxu0  ;;  %v13783_v7 = vpop.f32.mrf.mxu1  ;;  %15662 = vmatmul.mubr.bf16.vlgmr.msra.gmra.mxu0 %v4932_v54  ;;  %15702 = vmatmul.mubr.bf16.vlgmr.msra.gmra.mxu1 %v4934_v55  ;;  %v28014_v22 = vrot.slane %v311_v62, %v26895_v24 }
 0x2a6   : > { %v13744_v8 = vadd.f32 %v13743_v6, %v13704_v50  ;;  %15724 = vmatpush1.bf16.xpose.msra.mxu0 %v25788_v59  ;;  %15764 = vmatpush1.bf16.xpose.msra.mxu1 %v25790_v60  ;;  %v5570_v50 = vld [vmem:[%s26873_s24 + $0x4a8] sm:$0xff]  ;;  %v27998_v59 = vrot.slane %v1878_v42, %v26895_v24  ;;  %v25801_v60 = vcombine.high %v5569_v44, %v5953_v49  ;;  %v5957_v42 = vld [vmem:[%s26873_s24 + $0x10c0] sm:$0x11] }
 0x2a7   : > { %v13745_v9 = vpop.f32.mrf.mxu0  ;;  %v13785_v10 = vpop.f32.mrf.mxu1  ;;  %15741 = vmatprep.mubr.bf16.mxu0 %v4937_v63  ;;  %15781 = vmatprep.mubr.bf16.mxu1 %v4939_v0  ;;  %v25803_v61 = vcombine.high %v5570_v50, %v5954_v51  ;;  %v1895_v6 = vcombine.high %v311_v62, %v311_v62 }
 0x2a8   : > { %v13784_v14 = vadd.f32 %v13783_v7, %v13744_v8  ;;  %15803 = vmatprep.subr.bf16.mxu0 %v25793_v3  ;;  %15843 = vmatprep.subr.bf16.mxu1 %v25795_v4  ;;  %v1893_v4 = vcombine.high %v27995_v58, %v27995_v58  ;;  %v1894_v5 = vcombine.high %v27998_v59, %v27998_v59  ;;  %v5571_v8 = vld [vmem:[%s26873_s24 + $0x4b0] sm:$0xff] }
 0x2a9   : > { %v13746_v16 = vpop.f32.mrf.mxu0  ;;  %v13786_v17 = vpop.f32.mrf.mxu1  ;;  %v4950_v41 = vpack.c.bf16 %v27998_v59, %v27998_v59 }
 0x2aa   : > { %v25800_v16 = vcombine.low %v5569_v44, %v5953_v49  ;;  %v25802_v17 = vcombine.low %v5570_v50, %v5954_v51  ;;  %v4949_v20 = vpack.c.bf16 %v1893_v4, %v1893_v4  ;;  %v4951_v21 = vpack.c.bf16 %v1894_v5, %v1894_v5  ;;  %v5958_v44 = vld [vmem:[%s26873_s24 + $0x10c8] sm:$0x11] }
 0x2ab   : > { %v13747_v26 = vpop.f32.mrf.mxu0  ;;  %v13787_v27 = vpop.f32.mrf.mxu1  ;;  %v4952_v4 = vpack.c.bf16 %v28014_v22, %v28014_v22 }
 0x2ac   : > { %v312_v27 = vld [vmem:[%s26866_s29 + $0x260] sm:$0xff] }
 0x2ad   : > { %v13823_v35 = vpop.f32.mrf.mxu0  ;;  %v13863_v36 = vpop.f32.mrf.mxu1  ;;  %15742 = vmatmul.mubr.bf16.vlgmr.msra.gmra.mxu0 %v4936_v18  ;;  %15782 = vmatmul.mubr.bf16.vlgmr.msra.gmra.mxu1 %v4938_v19  ;;  %v28033_v51 = vrot.slane %v312_v27, %v26895_v24 }
 0x2ae   : > { %v13824_v37 = vadd.f32 %v13823_v35, %v13784_v14  ;;  %15804 = vmatpush1.bf16.xpose.msra.mxu0 %v25792_v23  ;;  %15844 = vmatpush1.bf16.xpose.msra.mxu1 %v25794_v25  ;;  %v5572_v14 = vld [vmem:[%s26873_s24 + $0x4b8] sm:$0xff]  ;;  %v28017_v23 = vrot.slane %v1895_v6, %v26895_v24  ;;  %v25805_v25 = vcombine.high %v5571_v8, %v5955_v13  ;;  %v5959_v6 = vld [vmem:[%s26873_s24 + $0x10d0] sm:$0x11] }
 0x2af   : > { %v13825_v38 = vpop.f32.mrf.mxu0  ;;  %v13865_v39 = vpop.f32.mrf.mxu1  ;;  %15821 = vmatprep.mubr.bf16.mxu0 %v4941_v28  ;;  %15861 = vmatprep.mubr.bf16.mxu1 %v4943_v29  ;;  %v25807_v26 = vcombine.high %v5572_v14, %v5956_v15  ;;  %v1912_v35 = vcombine.high %v312_v27, %v312_v27 }
 0x2b0   : > { %v13864_v43 = vadd.f32 %v13863_v36, %v13824_v37  ;;  %15883 = vmatprep.subr.bf16.mxu0 %v25797_v32  ;;  %15923 = vmatprep.subr.bf16.mxu1 %v25799_v33  ;;  %v1910_v33 = vcombine.high %v28014_v22, %v28014_v22  ;;  %v1911_v34 = vcombine.high %v28017_v23, %v28017_v23  ;;  %v5573_v37 = vld [vmem:[%s26873_s24 + $0x4c0] sm:$0xff] }
 0x2b1   : > { %v13826_v45 = vpop.f32.mrf.mxu0  ;;  %v13866_v46 = vpop.f32.mrf.mxu1  ;;  %v4954_v5 = vpack.c.bf16 %v28017_v23, %v28017_v23 }
 0x2b2   : > { %v25804_v45 = vcombine.low %v5571_v8, %v5955_v13  ;;  %v25806_v46 = vcombine.low %v5572_v14, %v5956_v15  ;;  %v4953_v49 = vpack.c.bf16 %v1910_v33, %v1910_v33  ;;  %v4955_v50 = vpack.c.bf16 %v1911_v34, %v1911_v34  ;;  %v5960_v8 = vld [vmem:[%s26873_s24 + $0x10d8] sm:$0x11] }
 0x2b3   : > { %v13827_v54 = vpop.f32.mrf.mxu0  ;;  %v13867_v55 = vpop.f32.mrf.mxu1  ;;  %v4956_v33 = vpack.c.bf16 %v28033_v51, %v28033_v51 }
 0x2b4   : > { %v313_v55 = vld [vmem:[%s26866_s29 + $0x268] sm:$0xff] }
 0x2b5   : > { %v13903_v63 = vpop.f32.mrf.mxu0  ;;  %v13943_v0 = vpop.f32.mrf.mxu1  ;;  %15822 = vmatmul.mubr.bf16.vlgmr.msra.gmra.mxu0 %v4940_v47  ;;  %15862 = vmatmul.mubr.bf16.vlgmr.msra.gmra.mxu1 %v4942_v48  ;;  %v28052_v15 = vrot.slane %v313_v55, %v26895_v24 }
 0x2b6   : > { %v13904_v1 = vadd.f32 %v13903_v63, %v13864_v43  ;;  %15884 = vmatpush1.bf16.xpose.msra.mxu0 %v25796_v52  ;;  %15924 = vmatpush1.bf16.xpose.msra.mxu1 %v25798_v53  ;;  %v5574_v43 = vld [vmem:[%s26873_s24 + $0x4c8] sm:$0xff]  ;;  %v28036_v52 = vrot.slane %v1912_v35, %v26895_v24  ;;  %v25809_v53 = vcombine.high %v5573_v37, %v5957_v42  ;;  %v5961_v35 = vld [vmem:[%s26873_s24 + $0x10e0] sm:$0x11] }
 0x2b7   : > { %v13905_v2 = vpop.f32.mrf.mxu0  ;;  %v13945_v3 = vpop.f32.mrf.mxu1  ;;  %15901 = vmatprep.mubr.bf16.mxu0 %v4945_v56  ;;  %15941 = vmatprep.mubr.bf16.mxu1 %v4947_v57  ;;  %v25811_v54 = vcombine.high %v5574_v43, %v5958_v44  ;;  %v1929_v63 = vcombine.high %v313_v55, %v313_v55 }
 0x2b8   : > { %v13944_v7 = vadd.f32 %v13943_v0, %v13904_v1  ;;  %15963 = vmatprep.subr.bf16.mxu0 %v25801_v60  ;;  %16003 = vmatprep.subr.bf16.mxu1 %v25803_v61  ;;  %v1927_v61 = vcombine.high %v28033_v51, %v28033_v51  ;;  %v1928_v62 = vcombine.high %v28036_v52, %v28036_v52  ;;  %v5575_v1 = vld [vmem:[%s26873_s24 + $0x4d0] sm:$0xff] }
 0x2b9   : > { %v13906_v9 = vpop.f32.mrf.mxu0  ;;  %v13946_v10 = vpop.f32.mrf.mxu1  ;;  %v4958_v34 = vpack.c.bf16 %v28036_v52, %v28036_v52 }
 0x2ba   : > { %v25808_v9 = vcombine.low %v5573_v37, %v5957_v42  ;;  %v25810_v10 = vcombine.low %v5574_v43, %v5958_v44  ;;  %v4957_v13 = vpack.c.bf16 %v1927_v61, %v1927_v61  ;;  %v4959_v14 = vpack.c.bf16 %v1928_v62, %v1928_v62  ;;  %v5962_v37 = vld [vmem:[%s26873_s24 + $0x10e8] sm:$0x11] }
 0x2bb   : > { %v13907_v18 = vpop.f32.mrf.mxu0  ;;  %v13947_v19 = vpop.f32.mrf.mxu1  ;;  %v4960_v61 = vpack.c.bf16 %v28052_v15, %v28052_v15 }
 0x2bc   : > { %v314_v19 = vld [vmem:[%s26866_s29 + $0x270] sm:$0xff] }
 0x2bd   : > { %v13983_v28 = vpop.f32.mrf.mxu0  ;;  %v14023_v29 = vpop.f32.mrf.mxu1  ;;  %15902 = vmatmul.mubr.bf16.vlgmr.msra.gmra.mxu0 %v4944_v11  ;;  %15942 = vmatmul.mubr.bf16.vlgmr.msra.gmra.mxu1 %v4946_v12  ;;  %v28071_v44 = vrot.slane %v314_v19, %v26895_v24 }
 0x2be   : > { %v13984_v30 = vadd.f32 %v13983_v28, %v13944_v7  ;;  %15964 = vmatpush1.bf16.xpose.msra.mxu0 %v25800_v16  ;;  %16004 = vmatpush1.bf16.xpose.msra.mxu1 %v25802_v17  ;;  %v5576_v7 = vld [vmem:[%s26873_s24 + $0x4d8] sm:$0xff]  ;;  %v28055_v16 = vrot.slane %v1929_v63, %v26895_v24  ;;  %v25813_v17 = vcombine.high %v5575_v1, %v5959_v6  ;;  %v5963_v63 = vld [vmem:[%s26873_s24 + $0x10f0] sm:$0x11] }
 0x2bf   : > { %v13985_v31 = vpop.f32.mrf.mxu0  ;;  %v14025_v32 = vpop.f32.mrf.mxu1  ;;  %15981 = vmatprep.mubr.bf16.mxu0 %v4949_v20  ;;  %16021 = vmatprep.mubr.bf16.mxu1 %v4951_v21  ;;  %v25815_v18 = vcombine.high %v5576_v7, %v5960_v8  ;;  %v1946_v28 = vcombine.high %v314_v19, %v314_v19 }
 0x2c0   : > { %v14024_v36 = vadd.f32 %v14023_v29, %v13984_v30  ;;  %16043 = vmatprep.subr.bf16.mxu0 %v25805_v25  ;;  %16083 = vmatprep.subr.bf16.mxu1 %v25807_v26  ;;  %v1944_v26 = vcombine.high %v28052_v15, %v28052_v15  ;;  %v1945_v27 = vcombine.high %v28055_v16, %v28055_v16  ;;  %v5577_v30 = vld [vmem:[%s26873_s24 + $0x4e0] sm:$0xff] }
 0x2c1   : > { %v13986_v38 = vpop.f32.mrf.mxu0  ;;  %v14026_v39 = vpop.f32.mrf.mxu1  ;;  %v4962_v62 = vpack.c.bf16 %v28055_v16, %v28055_v16 }
 0x2c2   : > { %v25812_v38 = vcombine.low %v5575_v1, %v5959_v6  ;;  %v25814_v39 = vcombine.low %v5576_v7, %v5960_v8  ;;  %v4961_v42 = vpack.c.bf16 %v1944_v26, %v1944_v26  ;;  %v4963_v43 = vpack.c.bf16 %v1945_v27, %v1945_v27  ;;  %v5964_v1 = vld [vmem:[%s26873_s24 + $0x10f8] sm:$0x11] }
 0x2c3   : > { %v13987_v47 = vpop.f32.mrf.mxu0  ;;  %v14027_v48 = vpop.f32.mrf.mxu1  ;;  %v4964_v26 = vpack.c.bf16 %v28071_v44, %v28071_v44 }
 0x2c4   : > { %v315_v48 = vld [vmem:[%s26866_s29 + $0x278] sm:$0xff] }
 0x2c5   : > { %v14063_v56 = vpop.f32.mrf.mxu0  ;;  %v14103_v57 = vpop.f32.mrf.mxu1  ;;  %15982 = vmatmul.mubr.bf16.vlgmr.msra.gmra.mxu0 %v4948_v40  ;;  %16022 = vmatmul.mubr.bf16.vlgmr.msra.gmra.mxu1 %v4950_v41  ;;  %v28090_v8 = vrot.slane %v315_v48, %v26895_v24 }
 0x2c6   : > { %v14064_v58 = vadd.f32 %v14063_v56, %v14024_v36  ;;  %16044 = vmatpush1.bf16.xpose.msra.mxu0 %v25804_v45  ;;  %16084 = vmatpush1.bf16.xpose.msra.mxu1 %v25806_v46  ;;  %v5578_v36 = vld [vmem:[%s26873_s24 + $0x4e8] sm:$0xff]  ;;  %v28074_v45 = vrot.slane %v1946_v28, %v26895_v24  ;;  %v25817_v46 = vcombine.high %v5577_v30, %v5961_v35  ;;  %v5965_v28 = vld [vmem:[%s26873_s24 + $0x1100] sm:$0x11] }
 0x2c7   : > { %v14065_v59 = vpop.f32.mrf.mxu0  ;;  %v14105_v60 = vpop.f32.mrf.mxu1  ;;  %16061 = vmatprep.mubr.bf16.mxu0 %v4953_v49  ;;  %16101 = vmatprep.mubr.bf16.mxu1 %v4955_v50  ;;  %v25819_v47 = vcombine.high %v5578_v36, %v5962_v37  ;;  %v1963_v56 = vcombine.high %v315_v48, %v315_v48 }
 0x2c8   : > { %v14104_v0 = vadd.f32 %v14103_v57, %v14064_v58  ;;  %16123 = vmatprep.subr.bf16.mxu0 %v25809_v53  ;;  %16163 = vmatprep.subr.bf16.mxu1 %v25811_v54  ;;  %v1961_v54 = vcombine.high %v28071_v44, %v28071_v44  ;;  %v1962_v55 = vcombine.high %v28074_v45, %v28074_v45  ;;  %v5579_v58 = vld [vmem:[%s26873_s24 + $0x4f0] sm:$0xff] }
 0x2c9   : > { %v14066_v2 = vpop.f32.mrf.mxu0  ;;  %v14106_v3 = vpop.f32.mrf.mxu1  ;;  %v4966_v27 = vpack.c.bf16 %v28074_v45, %v28074_v45 }
 0x2ca   : > { %v25816_v2 = vcombine.low %v5577_v30, %v5961_v35  ;;  %v25818_v3 = vcombine.low %v5578_v36, %v5962_v37  ;;  %v4965_v6 = vpack.c.bf16 %v1961_v54, %v1961_v54  ;;  %v4967_v7 = vpack.c.bf16 %v1962_v55, %v1962_v55  ;;  %v5966_v30 = vld [vmem:[%s26873_s24 + $0x1108] sm:$0x11] }
 0x2cb   : > { %v14067_v11 = vpop.f32.mrf.mxu0  ;;  %v14107_v12 = vpop.f32.mrf.mxu1  ;;  %v4968_v54 = vpack.c.bf16 %v28090_v8, %v28090_v8 }
 0x2cc   : > { %v316_v12 = vld [vmem:[%s26866_s29 + $0x280] sm:$0xff] }
 0x2cd   : > { %v14143_v20 = vpop.f32.mrf.mxu0  ;;  %v14183_v21 = vpop.f32.mrf.mxu1  ;;  %16062 = vmatmul.mubr.bf16.vlgmr.msra.gmra.mxu0 %v4952_v4  ;;  %16102 = vmatmul.mubr.bf16.vlgmr.msra.gmra.mxu1 %v4954_v5  ;;  %v28109_v37 = vrot.slane %v316_v12, %v26895_v24 }
 0x2ce   : > { %v14144_v22 = vadd.f32 %v14143_v20, %v14104_v0  ;;  %16124 = vmatpush1.bf16.xpose.msra.mxu0 %v25808_v9  ;;  %16164 = vmatpush1.bf16.xpose.msra.mxu1 %v25810_v10  ;;  %v5580_v0 = vld [vmem:[%s26873_s24 + $0x4f8] sm:$0xff]  ;;  %v28093_v9 = vrot.slane %v1963_v56, %v26895_v24  ;;  %v25821_v10 = vcombine.high %v5579_v58, %v5963_v63  ;;  %v5967_v56 = vld [vmem:[%s26873_s24 + $0x1110] sm:$0x11] }
 0x2cf   : > { %v14145_v23 = vpop.f32.mrf.mxu0  ;;  %v14185_v25 = vpop.f32.mrf.mxu1  ;;  %16141 = vmatprep.mubr.bf16.mxu0 %v4957_v13  ;;  %16181 = vmatprep.mubr.bf16.mxu1 %v4959_v14  ;;  %v25823_v11 = vcombine.high %v5580_v0, %v5964_v1  ;;  %v1980_v20 = vcombine.high %v316_v12, %v316_v12 }
 0x2d0   : > { %v14184_v29 = vadd.f32 %v14183_v21, %v14144_v22  ;;  %16203 = vmatprep.subr.bf16.mxu0 %v25813_v17  ;;  %16243 = vmatprep.subr.bf16.mxu1 %v25815_v18  ;;  %v1978_v18 = vcombine.high %v28090_v8, %v28090_v8  ;;  %v1979_v19 = vcombine.high %v28093_v9, %v28093_v9  ;;  %v5581_v22 = vld [vmem:[%s26873_s24 + $0x500] sm:$0xff] }
 0x2d1   : > { %v14146_v31 = vpop.f32.mrf.mxu0  ;;  %v14186_v32 = vpop.f32.mrf.mxu1  ;;  %v4970_v55 = vpack.c.bf16 %v28093_v9, %v28093_v9 }
 0x2d2   : > { %v25820_v31 = vcombine.low %v5579_v58, %v5963_v63  ;;  %v25822_v32 = vcombine.low %v5580_v0, %v5964_v1  ;;  %v4969_v35 = vpack.c.bf16 %v1978_v18, %v1978_v18  ;;  %v4971_v36 = vpack.c.bf16 %v1979_v19, %v1979_v19  ;;  %v5968_v58 = vld [vmem:[%s26873_s24 + $0x1118] sm:$0x11] }
 0x2d3   : > { %v14147_v40 = vpop.f32.mrf.mxu0  ;;  %v14187_v41 = vpop.f32.mrf.mxu1  ;;  %v4972_v18 = vpack.c.bf16 %v28109_v37, %v28109_v37 }
 0x2d4   : > { %v317_v41 = vld [vmem:[%s26866_s29 + $0x288] sm:$0xff] }
 0x2d5   : > { %v14223_v49 = vpop.f32.mrf.mxu0  ;;  %v14263_v50 = vpop.f32.mrf.mxu1  ;;  %16142 = vmatmul.mubr.bf16.vlgmr.msra.gmra.mxu0 %v4956_v33  ;;  %16182 = vmatmul.mubr.bf16.vlgmr.msra.gmra.mxu1 %v4958_v34  ;;  %v28128_v1 = vrot.slane %v317_v41, %v26895_v24 }
 0x2d6   : > { %v14224_v51 = vadd.f32 %v14223_v49, %v14184_v29  ;;  %16204 = vmatpush1.bf16.xpose.msra.mxu0 %v25812_v38  ;;  %16244 = vmatpush1.bf16.xpose.msra.mxu1 %v25814_v39  ;;  %v5582_v29 = vld [vmem:[%s26873_s24 + $0x508] sm:$0xff]  ;;  %v28112_v38 = vrot.slane %v1980_v20, %v26895_v24  ;;  %v25825_v39 = vcombine.high %v5581_v22, %v5965_v28  ;;  %v5969_v20 = vld [vmem:[%s26873_s24 + $0x1120] sm:$0x11] }
 0x2d7   : > { %v14225_v52 = vpop.f32.mrf.mxu0  ;;  %v14265_v53 = vpop.f32.mrf.mxu1  ;;  %16221 = vmatprep.mubr.bf16.mxu0 %v4961_v42  ;;  %16261 = vmatprep.mubr.bf16.mxu1 %v4963_v43  ;;  %v25827_v40 = vcombine.high %v5582_v29, %v5966_v30  ;;  %v1997_v49 = vcombine.high %v317_v41, %v317_v41 }
 0x2d8   : > { %v14264_v57 = vadd.f32 %v14263_v50, %v14224_v51  ;;  %16283 = vmatprep.subr.bf16.mxu0 %v25817_v46  ;;  %16323 = vmatprep.subr.bf16.mxu1 %v25819_v47  ;;  %v1995_v47 = vcombine.high %v28109_v37, %v28109_v37  ;;  %v1996_v48 = vcombine.high %v28112_v38, %v28112_v38  ;;  %v5583_v51 = vld [vmem:[%s26873_s24 + $0x510] sm:$0xff] }
 0x2d9   : > { %v14226_v59 = vpop.f32.mrf.mxu0  ;;  %v14266_v60 = vpop.f32.mrf.mxu1  ;;  %v4974_v19 = vpack.c.bf16 %v28112_v38, %v28112_v38 }
 0x2da   : > { %v25824_v59 = vcombine.low %v5581_v22, %v5965_v28  ;;  %v25826_v60 = vcombine.low %v5582_v29, %v5966_v30  ;;  %v4973_v63 = vpack.c.bf16 %v1995_v47, %v1995_v47  ;;  %v4975_v0 = vpack.c.bf16 %v1996_v48, %v1996_v48  ;;  %v5970_v22 = vld [vmem:[%s26873_s24 + $0x1128] sm:$0x11] }
 0x2db   : > { %v14227_v4 = vpop.f32.mrf.mxu0  ;;  %v14267_v5 = vpop.f32.mrf.mxu1  ;;  %v4976_v47 = vpack.c.bf16 %v28128_v1, %v28128_v1 }
 0x2dc   : > { %v318_v5 = vld [vmem:[%s26866_s29 + $0x290] sm:$0xff] }
 0x2dd   : > { %v14303_v13 = vpop.f32.mrf.mxu0  ;;  %v14343_v14 = vpop.f32.mrf.mxu1  ;;  %16222 = vmatmul.mubr.bf16.vlgmr.msra.gmra.mxu0 %v4960_v61  ;;  %16262 = vmatmul.mubr.bf16.vlgmr.msra.gmra.mxu1 %v4962_v62  ;;  %v28147_v30 = vrot.slane %v318_v5, %v26895_v24 }
 0x2de   : > { %v14304_v15 = vadd.f32 %v14303_v13, %v14264_v57  ;;  %16284 = vmatpush1.bf16.xpose.msra.mxu0 %v25816_v2  ;;  %16324 = vmatpush1.bf16.xpose.msra.mxu1 %v25818_v3  ;;  %v5584_v57 = vld [vmem:[%s26873_s24 + $0x518] sm:$0xff]  ;;  %v28131_v2 = vrot.slane %v1997_v49, %v26895_v24  ;;  %v25829_v3 = vcombine.high %v5583_v51, %v5967_v56  ;;  %v5971_v49 = vld [vmem:[%s26873_s24 + $0x1130] sm:$0x11] }
 0x2df   : > { %v14305_v16 = vpop.f32.mrf.mxu0  ;;  %v14345_v17 = vpop.f32.mrf.mxu1  ;;  %16301 = vmatprep.mubr.bf16.mxu0 %v4965_v6  ;;  %16341 = vmatprep.mubr.bf16.mxu1 %v4967_v7  ;;  %v25831_v4 = vcombine.high %v5584_v57, %v5968_v58  ;;  %v2014_v13 = vcombine.high %v318_v5, %v318_v5 }
 0x2e0   : > { %v14344_v21 = vadd.f32 %v14343_v14, %v14304_v15  ;;  %16363 = vmatprep.subr.bf16.mxu0 %v25821_v10  ;;  %16403 = vmatprep.subr.bf16.mxu1 %v25823_v11  ;;  %v2012_v11 = vcombine.high %v28128_v1, %v28128_v1  ;;  %v2013_v12 = vcombine.high %v28131_v2, %v28131_v2  ;;  %v5585_v15 = vld [vmem:[%s26873_s24 + $0x520] sm:$0xff] }
 0x2e1   : > { %v14306_v23 = vpop.f32.mrf.mxu0  ;;  %v14346_v25 = vpop.f32.mrf.mxu1  ;;  %v4978_v48 = vpack.c.bf16 %v28131_v2, %v28131_v2 }
 0x2e2   : > { %v25828_v23 = vcombine.low %v5583_v51, %v5967_v56  ;;  %v25830_v25 = vcombine.low %v5584_v57, %v5968_v58  ;;  %v4977_v28 = vpack.c.bf16 %v2012_v11, %v2012_v11  ;;  %v4979_v29 = vpack.c.bf16 %v2013_v12, %v2013_v12  ;;  %v5972_v51 = vld [vmem:[%s26873_s24 + $0x1138] sm:$0x11] }
 0x2e3   : > { %v14307_v33 = vpop.f32.mrf.mxu0  ;;  %v14347_v34 = vpop.f32.mrf.mxu1  ;;  %v4980_v11 = vpack.c.bf16 %v28147_v30, %v28147_v30 }
 0x2e4   : > { %v319_v34 = vld [vmem:[%s26866_s29 + $0x298] sm:$0xff] }
 0x2e5   : > { %v14383_v42 = vpop.f32.mrf.mxu0  ;;  %v14423_v43 = vpop.f32.mrf.mxu1  ;;  %16302 = vmatmul.mubr.bf16.vlgmr.msra.gmra.mxu0 %v4964_v26  ;;  %16342 = vmatmul.mubr.bf16.vlgmr.msra.gmra.mxu1 %v4966_v27  ;;  %v28166_v58 = vrot.slane %v319_v34, %v26895_v24 }
 0x2e6   : > { %v14384_v44 = vadd.f32 %v14383_v42, %v14344_v21  ;;  %16364 = vmatpush1.bf16.xpose.msra.mxu0 %v25820_v31  ;;  %16404 = vmatpush1.bf16.xpose.msra.mxu1 %v25822_v32  ;;  %v5586_v21 = vld [vmem:[%s26873_s24 + $0x528] sm:$0xff]  ;;  %v28150_v31 = vrot.slane %v2014_v13, %v26895_v24  ;;  %v25833_v32 = vcombine.high %v5585_v15, %v5969_v20  ;;  %v5973_v13 = vld [vmem:[%s26873_s24 + $0x1140] sm:$0x11] }
 0x2e7   : > { %v14385_v45 = vpop.f32.mrf.mxu0  ;;  %v14425_v46 = vpop.f32.mrf.mxu1  ;;  %16381 = vmatprep.mubr.bf16.mxu0 %v4969_v35  ;;  %16421 = vmatprep.mubr.bf16.mxu1 %v4971_v36  ;;  %v25835_v33 = vcombine.high %v5586_v21, %v5970_v22  ;;  %v2031_v42 = vcombine.high %v319_v34, %v319_v34 }
 0x2e8   : > { %v14424_v50 = vadd.f32 %v14423_v43, %v14384_v44  ;;  %16443 = vmatprep.subr.bf16.mxu0 %v25825_v39  ;;  %16483 = vmatprep.subr.bf16.mxu1 %v25827_v40  ;;  %v2029_v40 = vcombine.high %v28147_v30, %v28147_v30  ;;  %v2030_v41 = vcombine.high %v28150_v31, %v28150_v31  ;;  %v5587_v44 = vld [vmem:[%s26873_s24 + $0x530] sm:$0xff] }
 0x2e9   : > { %v14386_v52 = vpop.f32.mrf.mxu0  ;;  %v14426_v53 = vpop.f32.mrf.mxu1  ;;  %v4982_v12 = vpack.c.bf16 %v28150_v31, %v28150_v31 }
 0x2ea   : > { %v25832_v52 = vcombine.low %v5585_v15, %v5969_v20  ;;  %v25834_v53 = vcombine.low %v5586_v21, %v5970_v22  ;;  %v4981_v56 = vpack.c.bf16 %v2029_v40, %v2029_v40  ;;  %v4983_v57 = vpack.c.bf16 %v2030_v41, %v2030_v41  ;;  %v5974_v15 = vld [vmem:[%s26873_s24 + $0x1148] sm:$0x11] }
 0x2eb   : > { %v14387_v61 = vpop.f32.mrf.mxu0  ;;  %v14427_v62 = vpop.f32.mrf.mxu1  ;;  %v4984_v40 = vpack.c.bf16 %v28166_v58, %v28166_v58 }
 0x2ec   : > { %v320_v62 = vld [vmem:[%s26866_s29 + $0x2a0] sm:$0xff] }
 0x2ed   : > { %v14463_v6 = vpop.f32.mrf.mxu0  ;;  %v14503_v7 = vpop.f32.mrf.mxu1  ;;  %16382 = vmatmul.mubr.bf16.vlgmr.msra.gmra.mxu0 %v4968_v54  ;;  %16422 = vmatmul.mubr.bf16.vlgmr.msra.gmra.mxu1 %v4970_v55  ;;  %v28185_v22 = vrot.slane %v320_v62, %v26895_v24 }
 0x2ee   : > { %v14464_v8 = vadd.f32 %v14463_v6, %v14424_v50  ;;  %16444 = vmatpush1.bf16.xpose.msra.mxu0 %v25824_v59  ;;  %16484 = vmatpush1.bf16.xpose.msra.mxu1 %v25826_v60  ;;  %v5588_v50 = vld [vmem:[%s26873_s24 + $0x538] sm:$0xff]  ;;  %v28169_v59 = vrot.slane %v2031_v42, %v26895_v24  ;;  %v25837_v60 = vcombine.high %v5587_v44, %v5971_v49  ;;  %v5975_v42 = vld [vmem:[%s26873_s24 + $0x1150] sm:$0x11] }
 0x2ef   : > { %v14465_v9 = vpop.f32.mrf.mxu0  ;;  %v14505_v10 = vpop.f32.mrf.mxu1  ;;  %16461 = vmatprep.mubr.bf16.mxu0 %v4973_v63  ;;  %16501 = vmatprep.mubr.bf16.mxu1 %v4975_v0  ;;  %v25839_v61 = vcombine.high %v5588_v50, %v5972_v51  ;;  %v2048_v6 = vcombine.high %v320_v62, %v320_v62 }
 0x2f0   : > { %v14504_v14 = vadd.f32 %v14503_v7, %v14464_v8  ;;  %16523 = vmatprep.subr.bf16.mxu0 %v25829_v3  ;;  %16563 = vmatprep.subr.bf16.mxu1 %v25831_v4  ;;  %v2046_v4 = vcombine.high %v28166_v58, %v28166_v58  ;;  %v2047_v5 = vcombine.high %v28169_v59, %v28169_v59  ;;  %v5589_v8 = vld [vmem:[%s26873_s24 + $0x540] sm:$0xff] }
 0x2f1   : > { %v14466_v16 = vpop.f32.mrf.mxu0  ;;  %v14506_v17 = vpop.f32.mrf.mxu1  ;;  %v4986_v41 = vpack.c.bf16 %v28169_v59, %v28169_v59 }
 0x2f2   : > { %v25836_v16 = vcombine.low %v5587_v44, %v5971_v49  ;;  %v25838_v17 = vcombine.low %v5588_v50, %v5972_v51  ;;  %v4985_v20 = vpack.c.bf16 %v2046_v4, %v2046_v4  ;;  %v4987_v21 = vpack.c.bf16 %v2047_v5, %v2047_v5  ;;  %v5976_v44 = vld [vmem:[%s26873_s24 + $0x1158] sm:$0x11] }
 0x2f3   : > { %v14467_v26 = vpop.f32.mrf.mxu0  ;;  %v14507_v27 = vpop.f32.mrf.mxu1  ;;  %v4988_v4 = vpack.c.bf16 %v28185_v22, %v28185_v22 }
 0x2f4   : > { %v321_v27 = vld [vmem:[%s26866_s29 + $0x2a8] sm:$0xff] }
 0x2f5   : > { %v14543_v35 = vpop.f32.mrf.mxu0  ;;  %v14583_v36 = vpop.f32.mrf.mxu1  ;;  %16462 = vmatmul.mubr.bf16.vlgmr.msra.gmra.mxu0 %v4972_v18  ;;  %16502 = vmatmul.mubr.bf16.vlgmr.msra.gmra.mxu1 %v4974_v19  ;;  %v28204_v51 = vrot.slane %v321_v27, %v26895_v24 }
 0x2f6   : > { %v14544_v37 = vadd.f32 %v14543_v35, %v14504_v14  ;;  %16524 = vmatpush1.bf16.xpose.msra.mxu0 %v25828_v23  ;;  %16564 = vmatpush1.bf16.xpose.msra.mxu1 %v25830_v25  ;;  %v5590_v14 = vld [vmem:[%s26873_s24 + $0x548] sm:$0xff]  ;;  %v28188_v23 = vrot.slane %v2048_v6, %v26895_v24  ;;  %v25841_v25 = vcombine.high %v5589_v8, %v5973_v13  ;;  %v5977_v6 = vld [vmem:[%s26873_s24 + $0x1160] sm:$0x11] }
 0x2f7   : > { %v14545_v38 = vpop.f32.mrf.mxu0  ;;  %v14585_v39 = vpop.f32.mrf.mxu1  ;;  %16541 = vmatprep.mubr.bf16.mxu0 %v4977_v28  ;;  %16581 = vmatprep.mubr.bf16.mxu1 %v4979_v29  ;;  %v25843_v26 = vcombine.high %v5590_v14, %v5974_v15  ;;  %v2065_v35 = vcombine.high %v321_v27, %v321_v27 }
 0x2f8   : > { %v14584_v43 = vadd.f32 %v14583_v36, %v14544_v37  ;;  %16603 = vmatprep.subr.bf16.mxu0 %v25833_v32  ;;  %16643 = vmatprep.subr.bf16.mxu1 %v25835_v33  ;;  %v2063_v33 = vcombine.high %v28185_v22, %v28185_v22  ;;  %v2064_v34 = vcombine.high %v28188_v23, %v28188_v23  ;;  %v5591_v37 = vld [vmem:[%s26873_s24 + $0x550] sm:$0xff] }
 0x2f9   : > { %v14546_v45 = vpop.f32.mrf.mxu0  ;;  %v14586_v46 = vpop.f32.mrf.mxu1  ;;  %v4990_v5 = vpack.c.bf16 %v28188_v23, %v28188_v23 }
 0x2fa   : > { %v25840_v45 = vcombine.low %v5589_v8, %v5973_v13  ;;  %v25842_v46 = vcombine.low %v5590_v14, %v5974_v15  ;;  %v4989_v49 = vpack.c.bf16 %v2063_v33, %v2063_v33  ;;  %v4991_v50 = vpack.c.bf16 %v2064_v34, %v2064_v34  ;;  %v5978_v8 = vld [vmem:[%s26873_s24 + $0x1168] sm:$0x11] }
 0x2fb   : > { %v14547_v54 = vpop.f32.mrf.mxu0  ;;  %v14587_v55 = vpop.f32.mrf.mxu1  ;;  %v4992_v33 = vpack.c.bf16 %v28204_v51, %v28204_v51 }
 0x2fc   : > { %v322_v55 = vld [vmem:[%s26866_s29 + $0x2b0] sm:$0xff] }
 0x2fd   : > { %v14623_v63 = vpop.f32.mrf.mxu0  ;;  %v14663_v0 = vpop.f32.mrf.mxu1  ;;  %16542 = vmatmul.mubr.bf16.vlgmr.msra.gmra.mxu0 %v4976_v47  ;;  %16582 = vmatmul.mubr.bf16.vlgmr.msra.gmra.mxu1 %v4978_v48  ;;  %v28223_v15 = vrot.slane %v322_v55, %v26895_v24 }
 0x2fe   : > { %v14624_v1 = vadd.f32 %v14623_v63, %v14584_v43  ;;  %16604 = vmatpush1.bf16.xpose.msra.mxu0 %v25832_v52  ;;  %16644 = vmatpush1.bf16.xpose.msra.mxu1 %v25834_v53  ;;  %v5592_v43 = vld [vmem:[%s26873_s24 + $0x558] sm:$0xff]  ;;  %v28207_v52 = vrot.slane %v2065_v35, %v26895_v24  ;;  %v25845_v53 = vcombine.high %v5591_v37, %v5975_v42  ;;  %v5979_v35 = vld [vmem:[%s26873_s24 + $0x1170] sm:$0x11] }
 0x2ff   : > { %v14625_v2 = vpop.f32.mrf.mxu0  ;;  %v14665_v3 = vpop.f32.mrf.mxu1  ;;  %16621 = vmatprep.mubr.bf16.mxu0 %v4981_v56  ;;  %16661 = vmatprep.mubr.bf16.mxu1 %v4983_v57  ;;  %v25847_v54 = vcombine.high %v5592_v43, %v5976_v44  ;;  %v2082_v63 = vcombine.high %v322_v55, %v322_v55 }
 0x300   : > { %v14664_v7 = vadd.f32 %v14663_v0, %v14624_v1  ;;  %16683 = vmatprep.subr.bf16.mxu0 %v25837_v60  ;;  %16723 = vmatprep.subr.bf16.mxu1 %v25839_v61  ;;  %v2080_v61 = vcombine.high %v28204_v51, %v28204_v51  ;;  %v2081_v62 = vcombine.high %v28207_v52, %v28207_v52  ;;  %v5593_v1 = vld [vmem:[%s26873_s24 + $0x560] sm:$0xff] }
 0x301   : > { %v14626_v9 = vpop.f32.mrf.mxu0  ;;  %v14666_v10 = vpop.f32.mrf.mxu1  ;;  %v4994_v34 = vpack.c.bf16 %v28207_v52, %v28207_v52 }
 0x302   : > { %v25844_v9 = vcombine.low %v5591_v37, %v5975_v42  ;;  %v25846_v10 = vcombine.low %v5592_v43, %v5976_v44  ;;  %v4993_v13 = vpack.c.bf16 %v2080_v61, %v2080_v61  ;;  %v4995_v14 = vpack.c.bf16 %v2081_v62, %v2081_v62  ;;  %v5980_v37 = vld [vmem:[%s26873_s24 + $0x1178] sm:$0x11] }
 0x303   : > { %v14627_v18 = vpop.f32.mrf.mxu0  ;;  %v14667_v19 = vpop.f32.mrf.mxu1  ;;  %v4996_v61 = vpack.c.bf16 %v28223_v15, %v28223_v15 }
 0x304   : > { %v323_v19 = vld [vmem:[%s26866_s29 + $0x2b8] sm:$0xff] }
 0x305   : > { %v14703_v28 = vpop.f32.mrf.mxu0  ;;  %v14743_v29 = vpop.f32.mrf.mxu1  ;;  %16622 = vmatmul.mubr.bf16.vlgmr.msra.gmra.mxu0 %v4980_v11  ;;  %16662 = vmatmul.mubr.bf16.vlgmr.msra.gmra.mxu1 %v4982_v12  ;;  %v28242_v44 = vrot.slane %v323_v19, %v26895_v24 }
 0x306   : > { %v14704_v30 = vadd.f32 %v14703_v28, %v14664_v7  ;;  %16684 = vmatpush1.bf16.xpose.msra.mxu0 %v25836_v16  ;;  %16724 = vmatpush1.bf16.xpose.msra.mxu1 %v25838_v17  ;;  %v5594_v7 = vld [vmem:[%s26873_s24 + $0x568] sm:$0xff]  ;;  %v28226_v16 = vrot.slane %v2082_v63, %v26895_v24  ;;  %v25849_v17 = vcombine.high %v5593_v1, %v5977_v6  ;;  %v5981_v63 = vld [vmem:[%s26873_s24 + $0x1180] sm:$0x11] }
 0x307   : > { %v14705_v31 = vpop.f32.mrf.mxu0  ;;  %v14745_v32 = vpop.f32.mrf.mxu1  ;;  %16701 = vmatprep.mubr.bf16.mxu0 %v4985_v20  ;;  %16741 = vmatprep.mubr.bf16.mxu1 %v4987_v21  ;;  %v25851_v18 = vcombine.high %v5594_v7, %v5978_v8  ;;  %v2099_v28 = vcombine.high %v323_v19, %v323_v19 }
 0x308   : > { %v14744_v36 = vadd.f32 %v14743_v29, %v14704_v30  ;;  %16763 = vmatprep.subr.bf16.mxu0 %v25841_v25  ;;  %16803 = vmatprep.subr.bf16.mxu1 %v25843_v26  ;;  %v2097_v26 = vcombine.high %v28223_v15, %v28223_v15  ;;  %v2098_v27 = vcombine.high %v28226_v16, %v28226_v16  ;;  %v5595_v30 = vld [vmem:[%s26873_s24 + $0x570] sm:$0xff] }
 0x309   : > { %v14706_v38 = vpop.f32.mrf.mxu0  ;;  %v14746_v39 = vpop.f32.mrf.mxu1  ;;  %v4998_v62 = vpack.c.bf16 %v28226_v16, %v28226_v16 }
 0x30a   : > { %v25848_v38 = vcombine.low %v5593_v1, %v5977_v6  ;;  %v25850_v39 = vcombine.low %v5594_v7, %v5978_v8  ;;  %v4997_v42 = vpack.c.bf16 %v2097_v26, %v2097_v26  ;;  %v4999_v43 = vpack.c.bf16 %v2098_v27, %v2098_v27  ;;  %v5982_v1 = vld [vmem:[%s26873_s24 + $0x1188] sm:$0x11] }
 0x30b   : > { %v14707_v47 = vpop.f32.mrf.mxu0  ;;  %v14747_v48 = vpop.f32.mrf.mxu1  ;;  %v5000_v26 = vpack.c.bf16 %v28242_v44, %v28242_v44 }
 0x30c   : > { %v324_v48 = vld [vmem:[%s26866_s29 + $0x2c0] sm:$0xff] }
 0x30d   : > { %v14783_v56 = vpop.f32.mrf.mxu0  ;;  %v14823_v57 = vpop.f32.mrf.mxu1  ;;  %16702 = vmatmul.mubr.bf16.vlgmr.msra.gmra.mxu0 %v4984_v40  ;;  %16742 = vmatmul.mubr.bf16.vlgmr.msra.gmra.mxu1 %v4986_v41  ;;  %v28261_v8 = vrot.slane %v324_v48, %v26895_v24 }
 0x30e   : > { %v14784_v58 = vadd.f32 %v14783_v56, %v14744_v36  ;;  %16764 = vmatpush1.bf16.xpose.msra.mxu0 %v25840_v45  ;;  %16804 = vmatpush1.bf16.xpose.msra.mxu1 %v25842_v46  ;;  %v5596_v36 = vld [vmem:[%s26873_s24 + $0x578] sm:$0xff]  ;;  %v28245_v45 = vrot.slane %v2099_v28, %v26895_v24  ;;  %v25853_v46 = vcombine.high %v5595_v30, %v5979_v35  ;;  %v5983_v28 = vld [vmem:[%s26873_s24 + $0x1190] sm:$0x11] }
 0x30f   : > { %v14785_v59 = vpop.f32.mrf.mxu0  ;;  %v14825_v60 = vpop.f32.mrf.mxu1  ;;  %16781 = vmatprep.mubr.bf16.mxu0 %v4989_v49  ;;  %16821 = vmatprep.mubr.bf16.mxu1 %v4991_v50  ;;  %v25855_v47 = vcombine.high %v5596_v36, %v5980_v37  ;;  %v2116_v56 = vcombine.high %v324_v48, %v324_v48 }
 0x310   : > { %v14824_v0 = vadd.f32 %v14823_v57, %v14784_v58  ;;  %16843 = vmatprep.subr.bf16.mxu0 %v25845_v53  ;;  %16883 = vmatprep.subr.bf16.mxu1 %v25847_v54  ;;  %v2114_v54 = vcombine.high %v28242_v44, %v28242_v44  ;;  %v2115_v55 = vcombine.high %v28245_v45, %v28245_v45  ;;  %v5597_v58 = vld [vmem:[%s26873_s24 + $0x580] sm:$0xff] }
 0x311   : > { %v14786_v2 = vpop.f32.mrf.mxu0  ;;  %v14826_v3 = vpop.f32.mrf.mxu1  ;;  %v5002_v27 = vpack.c.bf16 %v28245_v45, %v28245_v45 }
 0x312   : > { %v25852_v2 = vcombine.low %v5595_v30, %v5979_v35  ;;  %v25854_v3 = vcombine.low %v5596_v36, %v5980_v37  ;;  %v5001_v6 = vpack.c.bf16 %v2114_v54, %v2114_v54  ;;  %v5003_v7 = vpack.c.bf16 %v2115_v55, %v2115_v55  ;;  %v5984_v30 = vld [vmem:[%s26873_s24 + $0x1198] sm:$0x11] }
 0x313   : > { %v14787_v11 = vpop.f32.mrf.mxu0  ;;  %v14827_v12 = vpop.f32.mrf.mxu1  ;;  %v5004_v54 = vpack.c.bf16 %v28261_v8, %v28261_v8 }
 0x314   : > { %v325_v12 = vld [vmem:[%s26866_s29 + $0x2c8] sm:$0xff] }
 0x315   : > { %v14863_v20 = vpop.f32.mrf.mxu0  ;;  %v14903_v21 = vpop.f32.mrf.mxu1  ;;  %16782 = vmatmul.mubr.bf16.vlgmr.msra.gmra.mxu0 %v4988_v4  ;;  %16822 = vmatmul.mubr.bf16.vlgmr.msra.gmra.mxu1 %v4990_v5  ;;  %v28280_v37 = vrot.slane %v325_v12, %v26895_v24 }
 0x316   : > { %v14864_v22 = vadd.f32 %v14863_v20, %v14824_v0  ;;  %16844 = vmatpush1.bf16.xpose.msra.mxu0 %v25844_v9  ;;  %16884 = vmatpush1.bf16.xpose.msra.mxu1 %v25846_v10  ;;  %v5598_v0 = vld [vmem:[%s26873_s24 + $0x588] sm:$0xff]  ;;  %v28264_v9 = vrot.slane %v2116_v56, %v26895_v24  ;;  %v25857_v10 = vcombine.high %v5597_v58, %v5981_v63  ;;  %v5985_v56 = vld [vmem:[%s26873_s24 + $0x11a0] sm:$0x11] }
 0x317   : > { %v14865_v23 = vpop.f32.mrf.mxu0  ;;  %v14905_v25 = vpop.f32.mrf.mxu1  ;;  %16861 = vmatprep.mubr.bf16.mxu0 %v4993_v13  ;;  %16901 = vmatprep.mubr.bf16.mxu1 %v4995_v14  ;;  %v25859_v11 = vcombine.high %v5598_v0, %v5982_v1  ;;  %v2133_v20 = vcombine.high %v325_v12, %v325_v12 }
 0x318   : > { %v14904_v29 = vadd.f32 %v14903_v21, %v14864_v22  ;;  %16923 = vmatprep.subr.bf16.mxu0 %v25849_v17  ;;  %16963 = vmatprep.subr.bf16.mxu1 %v25851_v18  ;;  %v2131_v18 = vcombine.high %v28261_v8, %v28261_v8  ;;  %v2132_v19 = vcombine.high %v28264_v9, %v28264_v9  ;;  %v5599_v22 = vld [vmem:[%s26873_s24 + $0x590] sm:$0xff] }
 0x319   : > { %v14866_v31 = vpop.f32.mrf.mxu0  ;;  %v14906_v32 = vpop.f32.mrf.mxu1  ;;  %v5006_v55 = vpack.c.bf16 %v28264_v9, %v28264_v9 }
 0x31a   : > { %v25856_v31 = vcombine.low %v5597_v58, %v5981_v63  ;;  %v25858_v32 = vcombine.low %v5598_v0, %v5982_v1  ;;  %v5005_v35 = vpack.c.bf16 %v2131_v18, %v2131_v18  ;;  %v5007_v36 = vpack.c.bf16 %v2132_v19, %v2132_v19  ;;  %v5986_v58 = vld [vmem:[%s26873_s24 + $0x11a8] sm:$0x11] }
 0x31b   : > { %v14867_v40 = vpop.f32.mrf.mxu0  ;;  %v14907_v41 = vpop.f32.mrf.mxu1  ;;  %v5008_v18 = vpack.c.bf16 %v28280_v37, %v28280_v37 }
 0x31c   : > { %v326_v41 = vld [vmem:[%s26866_s29 + $0x2d0] sm:$0xff] }
 0x31d   : > { %v14943_v49 = vpop.f32.mrf.mxu0  ;;  %v14983_v50 = vpop.f32.mrf.mxu1  ;;  %16862 = vmatmul.mubr.bf16.vlgmr.msra.gmra.mxu0 %v4992_v33  ;;  %16902 = vmatmul.mubr.bf16.vlgmr.msra.gmra.mxu1 %v4994_v34  ;;  %v28299_v1 = vrot.slane %v326_v41, %v26895_v24 }
 0x31e   : > { %v14944_v51 = vadd.f32 %v14943_v49, %v14904_v29  ;;  %16924 = vmatpush1.bf16.xpose.msra.mxu0 %v25848_v38  ;;  %16964 = vmatpush1.bf16.xpose.msra.mxu1 %v25850_v39  ;;  %v5600_v29 = vld [vmem:[%s26873_s24 + $0x598] sm:$0xff]  ;;  %v28283_v38 = vrot.slane %v2133_v20, %v26895_v24  ;;  %v25861_v39 = vcombine.high %v5599_v22, %v5983_v28  ;;  %v5987_v20 = vld [vmem:[%s26873_s24 + $0x11b0] sm:$0x11] }
 0x31f   : > { %v14945_v52 = vpop.f32.mrf.mxu0  ;;  %v14985_v53 = vpop.f32.mrf.mxu1  ;;  %16941 = vmatprep.mubr.bf16.mxu0 %v4997_v42  ;;  %16981 = vmatprep.mubr.bf16.mxu1 %v4999_v43  ;;  %v25863_v40 = vcombine.high %v5600_v29, %v5984_v30  ;;  %v2150_v49 = vcombine.high %v326_v41, %v326_v41 }
 0x320   : > { %v14984_v57 = vadd.f32 %v14983_v50, %v14944_v51  ;;  %17003 = vmatprep.subr.bf16.mxu0 %v25853_v46  ;;  %17043 = vmatprep.subr.bf16.mxu1 %v25855_v47  ;;  %v2148_v47 = vcombine.high %v28280_v37, %v28280_v37  ;;  %v2149_v48 = vcombine.high %v28283_v38, %v28283_v38  ;;  %v5601_v51 = vld [vmem:[%s26873_s24 + $0x5a0] sm:$0xff] }
 0x321   : > { %v14946_v59 = vpop.f32.mrf.mxu0  ;;  %v14986_v60 = vpop.f32.mrf.mxu1  ;;  %v5010_v19 = vpack.c.bf16 %v28283_v38, %v28283_v38 }
 0x322   : > { %v25860_v59 = vcombine.low %v5599_v22, %v5983_v28  ;;  %v25862_v60 = vcombine.low %v5600_v29, %v5984_v30  ;;  %v5009_v63 = vpack.c.bf16 %v2148_v47, %v2148_v47  ;;  %v5011_v0 = vpack.c.bf16 %v2149_v48, %v2149_v48  ;;  %v5988_v22 = vld [vmem:[%s26873_s24 + $0x11b8] sm:$0x11] }
 0x323   : > { %v14947_v4 = vpop.f32.mrf.mxu0  ;;  %v14987_v5 = vpop.f32.mrf.mxu1  ;;  %v5012_v47 = vpack.c.bf16 %v28299_v1, %v28299_v1 }
 0x324   : > { %v327_v5 = vld [vmem:[%s26866_s29 + $0x2d8] sm:$0xff] }
 0x325   : > { %v15023_v13 = vpop.f32.mrf.mxu0  ;;  %v15063_v14 = vpop.f32.mrf.mxu1  ;;  %16942 = vmatmul.mubr.bf16.vlgmr.msra.gmra.mxu0 %v4996_v61  ;;  %16982 = vmatmul.mubr.bf16.vlgmr.msra.gmra.mxu1 %v4998_v62  ;;  %v28318_v30 = vrot.slane %v327_v5, %v26895_v24 }
 0x326   : > { %v15024_v15 = vadd.f32 %v15023_v13, %v14984_v57  ;;  %17004 = vmatpush1.bf16.xpose.msra.mxu0 %v25852_v2  ;;  %17044 = vmatpush1.bf16.xpose.msra.mxu1 %v25854_v3  ;;  %v5602_v57 = vld [vmem:[%s26873_s24 + $0x5a8] sm:$0xff]  ;;  %v28302_v2 = vrot.slane %v2150_v49, %v26895_v24  ;;  %v25865_v3 = vcombine.high %v5601_v51, %v5985_v56  ;;  %v5989_v49 = vld [vmem:[%s26873_s24 + $0x11c0] sm:$0x11] }
 0x327   : > { %v15025_v16 = vpop.f32.mrf.mxu0  ;;  %v15065_v17 = vpop.f32.mrf.mxu1  ;;  %17021 = vmatprep.mubr.bf16.mxu0 %v5001_v6  ;;  %17061 = vmatprep.mubr.bf16.mxu1 %v5003_v7  ;;  %v25867_v4 = vcombine.high %v5602_v57, %v5986_v58  ;;  %v2167_v13 = vcombine.high %v327_v5, %v327_v5 }
 0x328   : > { %v15064_v21 = vadd.f32 %v15063_v14, %v15024_v15  ;;  %17083 = vmatprep.subr.bf16.mxu0 %v25857_v10  ;;  %17123 = vmatprep.subr.bf16.mxu1 %v25859_v11  ;;  %v2165_v11 = vcombine.high %v28299_v1, %v28299_v1  ;;  %v2166_v12 = vcombine.high %v28302_v2, %v28302_v2  ;;  %v5603_v15 = vld [vmem:[%s26873_s24 + $0x5b0] sm:$0xff] }
 0x329   : > { %v15026_v23 = vpop.f32.mrf.mxu0  ;;  %v15066_v25 = vpop.f32.mrf.mxu1  ;;  %v5014_v48 = vpack.c.bf16 %v28302_v2, %v28302_v2 }
 0x32a   : > { %v25864_v23 = vcombine.low %v5601_v51, %v5985_v56  ;;  %v25866_v25 = vcombine.low %v5602_v57, %v5986_v58  ;;  %v5013_v28 = vpack.c.bf16 %v2165_v11, %v2165_v11  ;;  %v5015_v29 = vpack.c.bf16 %v2166_v12, %v2166_v12  ;;  %v5990_v51 = vld [vmem:[%s26873_s24 + $0x11c8] sm:$0x11] }
 0x32b   : > { %v15027_v33 = vpop.f32.mrf.mxu0  ;;  %v15067_v34 = vpop.f32.mrf.mxu1  ;;  %v5016_v11 = vpack.c.bf16 %v28318_v30, %v28318_v30 }
 0x32c   : > { %v328_v34 = vld [vmem:[%s26866_s29 + $0x2e0] sm:$0xff] }
 0x32d   : > { %v15103_v42 = vpop.f32.mrf.mxu0  ;;  %v15143_v43 = vpop.f32.mrf.mxu1  ;;  %17022 = vmatmul.mubr.bf16.vlgmr.msra.gmra.mxu0 %v5000_v26  ;;  %17062 = vmatmul.mubr.bf16.vlgmr.msra.gmra.mxu1 %v5002_v27  ;;  %v28337_v58 = vrot.slane %v328_v34, %v26895_v24 }
 0x32e   : > { %v15104_v44 = vadd.f32 %v15103_v42, %v15064_v21  ;;  %17084 = vmatpush1.bf16.xpose.msra.mxu0 %v25856_v31  ;;  %17124 = vmatpush1.bf16.xpose.msra.mxu1 %v25858_v32  ;;  %v5604_v21 = vld [vmem:[%s26873_s24 + $0x5b8] sm:$0xff]  ;;  %v28321_v31 = vrot.slane %v2167_v13, %v26895_v24  ;;  %v25869_v32 = vcombine.high %v5603_v15, %v5987_v20  ;;  %v5991_v13 = vld [vmem:[%s26873_s24 + $0x11d0] sm:$0x11] }
 0x32f   : > { %v15105_v45 = vpop.f32.mrf.mxu0  ;;  %v15145_v46 = vpop.f32.mrf.mxu1  ;;  %17101 = vmatprep.mubr.bf16.mxu0 %v5005_v35  ;;  %17141 = vmatprep.mubr.bf16.mxu1 %v5007_v36  ;;  %v25871_v33 = vcombine.high %v5604_v21, %v5988_v22  ;;  %v2184_v42 = vcombine.high %v328_v34, %v328_v34 }
 0x330   : > { %v15144_v50 = vadd.f32 %v15143_v43, %v15104_v44  ;;  %17163 = vmatprep.subr.bf16.mxu0 %v25861_v39  ;;  %17203 = vmatprep.subr.bf16.mxu1 %v25863_v40  ;;  %v2182_v40 = vcombine.high %v28318_v30, %v28318_v30  ;;  %v2183_v41 = vcombine.high %v28321_v31, %v28321_v31  ;;  %v5605_v44 = vld [vmem:[%s26873_s24 + $0x5c0] sm:$0xff] }
 0x331   : > { %v15106_v52 = vpop.f32.mrf.mxu0  ;;  %v15146_v53 = vpop.f32.mrf.mxu1  ;;  %v5018_v12 = vpack.c.bf16 %v28321_v31, %v28321_v31 }
 0x332   : > { %v25868_v52 = vcombine.low %v5603_v15, %v5987_v20  ;;  %v25870_v53 = vcombine.low %v5604_v21, %v5988_v22  ;;  %v5017_v56 = vpack.c.bf16 %v2182_v40, %v2182_v40  ;;  %v5019_v57 = vpack.c.bf16 %v2183_v41, %v2183_v41  ;;  %v5992_v15 = vld [vmem:[%s26873_s24 + $0x11d8] sm:$0x11] }
 0x333   : > { %v15107_v61 = vpop.f32.mrf.mxu0  ;;  %v15147_v62 = vpop.f32.mrf.mxu1  ;;  %v5020_v40 = vpack.c.bf16 %v28337_v58, %v28337_v58 }
 0x334   : > { %v329_v62 = vld [vmem:[%s26866_s29 + $0x2e8] sm:$0xff] }
 0x335   : > { %v15183_v6 = vpop.f32.mrf.mxu0  ;;  %v15223_v7 = vpop.f32.mrf.mxu1  ;;  %17102 = vmatmul.mubr.bf16.vlgmr.msra.gmra.mxu0 %v5004_v54  ;;  %17142 = vmatmul.mubr.bf16.vlgmr.msra.gmra.mxu1 %v5006_v55  ;;  %v28356_v22 = vrot.slane %v329_v62, %v26895_v24 }
 0x336   : > { %v15184_v8 = vadd.f32 %v15183_v6, %v15144_v50  ;;  %17164 = vmatpush1.bf16.xpose.msra.mxu0 %v25860_v59  ;;  %17204 = vmatpush1.bf16.xpose.msra.mxu1 %v25862_v60  ;;  %v5606_v50 = vld [vmem:[%s26873_s24 + $0x5c8] sm:$0xff]  ;;  %v28340_v59 = vrot.slane %v2184_v42, %v26895_v24  ;;  %v25873_v60 = vcombine.high %v5605_v44, %v5989_v49  ;;  %v5993_v42 = vld [vmem:[%s26873_s24 + $0x11e0] sm:$0x11] }
 0x337   : > { %v15185_v9 = vpop.f32.mrf.mxu0  ;;  %v15225_v10 = vpop.f32.mrf.mxu1  ;;  %17181 = vmatprep.mubr.bf16.mxu0 %v5009_v63  ;;  %17221 = vmatprep.mubr.bf16.mxu1 %v5011_v0  ;;  %v25875_v61 = vcombine.high %v5606_v50, %v5990_v51  ;;  %v2201_v6 = vcombine.high %v329_v62, %v329_v62 }
 0x338   : > { %v15224_v14 = vadd.f32 %v15223_v7, %v15184_v8  ;;  %17243 = vmatprep.subr.bf16.mxu0 %v25865_v3  ;;  %17283 = vmatprep.subr.bf16.mxu1 %v25867_v4  ;;  %v2199_v4 = vcombine.high %v28337_v58, %v28337_v58  ;;  %v2200_v5 = vcombine.high %v28340_v59, %v28340_v59  ;;  %v5607_v8 = vld [vmem:[%s26873_s24 + $0x5d0] sm:$0xff] }
 0x339   : > { %v15186_v16 = vpop.f32.mrf.mxu0  ;;  %v15226_v17 = vpop.f32.mrf.mxu1  ;;  %v5022_v41 = vpack.c.bf16 %v28340_v59, %v28340_v59 }
 0x33a   : > { %v25872_v16 = vcombine.low %v5605_v44, %v5989_v49  ;;  %v25874_v17 = vcombine.low %v5606_v50, %v5990_v51  ;;  %v5021_v20 = vpack.c.bf16 %v2199_v4, %v2199_v4  ;;  %v5023_v21 = vpack.c.bf16 %v2200_v5, %v2200_v5  ;;  %v5994_v44 = vld [vmem:[%s26873_s24 + $0x11e8] sm:$0x11] }
 0x33b   : > { %v15187_v26 = vpop.f32.mrf.mxu0  ;;  %v15227_v27 = vpop.f32.mrf.mxu1  ;;  %v5024_v4 = vpack.c.bf16 %v28356_v22, %v28356_v22 }
 0x33c   : > { %v330_v27 = vld [vmem:[%s26866_s29 + $0x2f0] sm:$0xff] }
 0x33d   : > { %v15263_v35 = vpop.f32.mrf.mxu0  ;;  %v15303_v36 = vpop.f32.mrf.mxu1  ;;  %17182 = vmatmul.mubr.bf16.vlgmr.msra.gmra.mxu0 %v5008_v18  ;;  %17222 = vmatmul.mubr.bf16.vlgmr.msra.gmra.mxu1 %v5010_v19  ;;  %v28375_v51 = vrot.slane %v330_v27, %v26895_v24 }
 0x33e   : > { %v15264_v37 = vadd.f32 %v15263_v35, %v15224_v14  ;;  %17244 = vmatpush1.bf16.xpose.msra.mxu0 %v25864_v23  ;;  %17284 = vmatpush1.bf16.xpose.msra.mxu1 %v25866_v25  ;;  %v5608_v14 = vld [vmem:[%s26873_s24 + $0x5d8] sm:$0xff]  ;;  %v28359_v23 = vrot.slane %v2201_v6, %v26895_v24  ;;  %v25877_v25 = vcombine.high %v5607_v8, %v5991_v13  ;;  %v5995_v6 = vld [vmem:[%s26873_s24 + $0x11f0] sm:$0x11] }
 0x33f   : > { %v15265_v38 = vpop.f32.mrf.mxu0  ;;  %v15305_v39 = vpop.f32.mrf.mxu1  ;;  %17261 = vmatprep.mubr.bf16.mxu0 %v5013_v28  ;;  %17301 = vmatprep.mubr.bf16.mxu1 %v5015_v29  ;;  %v25879_v26 = vcombine.high %v5608_v14, %v5992_v15  ;;  %v2218_v35 = vcombine.high %v330_v27, %v330_v27 }
 0x340   : > { %v15304_v43 = vadd.f32 %v15303_v36, %v15264_v37  ;;  %17323 = vmatprep.subr.bf16.mxu0 %v25869_v32  ;;  %17363 = vmatprep.subr.bf16.mxu1 %v25871_v33  ;;  %v2216_v33 = vcombine.high %v28356_v22, %v28356_v22  ;;  %v2217_v34 = vcombine.high %v28359_v23, %v28359_v23  ;;  %v5609_v37 = vld [vmem:[%s26873_s24 + $0x5e0] sm:$0xff] }
 0x341   : > { %v15266_v45 = vpop.f32.mrf.mxu0  ;;  %v15306_v46 = vpop.f32.mrf.mxu1  ;;  %v5026_v5 = vpack.c.bf16 %v28359_v23, %v28359_v23 }
 0x342   : > { %v25876_v45 = vcombine.low %v5607_v8, %v5991_v13  ;;  %v25878_v46 = vcombine.low %v5608_v14, %v5992_v15  ;;  %v5025_v49 = vpack.c.bf16 %v2216_v33, %v2216_v33  ;;  %v5027_v50 = vpack.c.bf16 %v2217_v34, %v2217_v34  ;;  %v5996_v8 = vld [vmem:[%s26873_s24 + $0x11f8] sm:$0x11] }
 0x343   : > { %v15267_v54 = vpop.f32.mrf.mxu0  ;;  %v15307_v55 = vpop.f32.mrf.mxu1  ;;  %v5028_v33 = vpack.c.bf16 %v28375_v51, %v28375_v51 }
 0x344   : > { %v331_v55 = vld [vmem:[%s26866_s29 + $0x2f8] sm:$0xff] }
 0x345   : > { %v15343_v63 = vpop.f32.mrf.mxu0  ;;  %v15383_v0 = vpop.f32.mrf.mxu1  ;;  %17262 = vmatmul.mubr.bf16.vlgmr.msra.gmra.mxu0 %v5012_v47  ;;  %17302 = vmatmul.mubr.bf16.vlgmr.msra.gmra.mxu1 %v5014_v48  ;;  %v28394_v15 = vrot.slane %v331_v55, %v26895_v24 }
 0x346   : > { %v15344_v1 = vadd.f32 %v15343_v63, %v15304_v43  ;;  %17324 = vmatpush1.bf16.xpose.msra.mxu0 %v25868_v52  ;;  %17364 = vmatpush1.bf16.xpose.msra.mxu1 %v25870_v53  ;;  %v5610_v43 = vld [vmem:[%s26873_s24 + $0x5e8] sm:$0xff]  ;;  %v28378_v52 = vrot.slane %v2218_v35, %v26895_v24  ;;  %v25881_v53 = vcombine.high %v5609_v37, %v5993_v42  ;;  %v5997_v35 = vld [vmem:[%s26873_s24 + $0x1200] sm:$0x11] }
 0x347   : > { %v15345_v2 = vpop.f32.mrf.mxu0  ;;  %v15385_v3 = vpop.f32.mrf.mxu1  ;;  %17341 = vmatprep.mubr.bf16.mxu0 %v5017_v56  ;;  %17381 = vmatprep.mubr.bf16.mxu1 %v5019_v57  ;;  %v25883_v54 = vcombine.high %v5610_v43, %v5994_v44  ;;  %v2235_v63 = vcombine.high %v331_v55, %v331_v55 }
 0x348   : > { %v15384_v7 = vadd.f32 %v15383_v0, %v15344_v1  ;;  %17403 = vmatprep.subr.bf16.mxu0 %v25873_v60  ;;  %17443 = vmatprep.subr.bf16.mxu1 %v25875_v61  ;;  %v2233_v61 = vcombine.high %v28375_v51, %v28375_v51  ;;  %v2234_v62 = vcombine.high %v28378_v52, %v28378_v52  ;;  %v5611_v1 = vld [vmem:[%s26873_s24 + $0x5f0] sm:$0xff] }
 0x349   : > { %v15346_v9 = vpop.f32.mrf.mxu0  ;;  %v15386_v10 = vpop.f32.mrf.mxu1  ;;  %v5030_v34 = vpack.c.bf16 %v28378_v52, %v28378_v52 }
 0x34a   : > { %v25880_v9 = vcombine.low %v5609_v37, %v5993_v42  ;;  %v25882_v10 = vcombine.low %v5610_v43, %v5994_v44  ;;  %v5029_v13 = vpack.c.bf16 %v2233_v61, %v2233_v61  ;;  %v5031_v14 = vpack.c.bf16 %v2234_v62, %v2234_v62  ;;  %v5998_v37 = vld [vmem:[%s26873_s24 + $0x1208] sm:$0x11] }
 0x34b   : > { %v15347_v18 = vpop.f32.mrf.mxu0  ;;  %v15387_v19 = vpop.f32.mrf.mxu1  ;;  %v5032_v61 = vpack.c.bf16 %v28394_v15, %v28394_v15 }
 0x34c   : > { %v332_v19 = vld [vmem:[%s26866_s29 + $0x300] sm:$0xff] }
 0x34d   : > { %v15423_v28 = vpop.f32.mrf.mxu0  ;;  %v15463_v29 = vpop.f32.mrf.mxu1  ;;  %17342 = vmatmul.mubr.bf16.vlgmr.msra.gmra.mxu0 %v5016_v11  ;;  %17382 = vmatmul.mubr.bf16.vlgmr.msra.gmra.mxu1 %v5018_v12  ;;  %v28413_v44 = vrot.slane %v332_v19, %v26895_v24 }
 0x34e   : > { %v15424_v30 = vadd.f32 %v15423_v28, %v15384_v7  ;;  %17404 = vmatpush1.bf16.xpose.msra.mxu0 %v25872_v16  ;;  %17444 = vmatpush1.bf16.xpose.msra.mxu1 %v25874_v17  ;;  %v5612_v7 = vld [vmem:[%s26873_s24 + $0x5f8] sm:$0xff]  ;;  %v28397_v16 = vrot.slane %v2235_v63, %v26895_v24  ;;  %v25885_v17 = vcombine.high %v5611_v1, %v5995_v6  ;;  %v5999_v63 = vld [vmem:[%s26873_s24 + $0x1210] sm:$0x11] }
 0x34f   : > { %v15425_v31 = vpop.f32.mrf.mxu0  ;;  %v15465_v32 = vpop.f32.mrf.mxu1  ;;  %17421 = vmatprep.mubr.bf16.mxu0 %v5021_v20  ;;  %17461 = vmatprep.mubr.bf16.mxu1 %v5023_v21  ;;  %v25887_v18 = vcombine.high %v5612_v7, %v5996_v8  ;;  %v2252_v28 = vcombine.high %v332_v19, %v332_v19 }
 0x350   : > { %v15464_v36 = vadd.f32 %v15463_v29, %v15424_v30  ;;  %17483 = vmatprep.subr.bf16.mxu0 %v25877_v25  ;;  %17523 = vmatprep.subr.bf16.mxu1 %v25879_v26  ;;  %v2250_v26 = vcombine.high %v28394_v15, %v28394_v15  ;;  %v2251_v27 = vcombine.high %v28397_v16, %v28397_v16  ;;  %v5613_v30 = vld [vmem:[%s26873_s24 + $0x600] sm:$0xff] }
 0x351   : > { %v15426_v38 = vpop.f32.mrf.mxu0  ;;  %v15466_v39 = vpop.f32.mrf.mxu1  ;;  %v5034_v62 = vpack.c.bf16 %v28397_v16, %v28397_v16 }
 0x352   : > { %v25884_v38 = vcombine.low %v5611_v1, %v5995_v6  ;;  %v25886_v39 = vcombine.low %v5612_v7, %v5996_v8  ;;  %v5033_v42 = vpack.c.bf16 %v2250_v26, %v2250_v26  ;;  %v5035_v43 = vpack.c.bf16 %v2251_v27, %v2251_v27  ;;  %v6000_v1 = vld [vmem:[%s26873_s24 + $0x1218] sm:$0x11] }
 0x353   : > { %v15427_v47 = vpop.f32.mrf.mxu0  ;;  %v15467_v48 = vpop.f32.mrf.mxu1  ;;  %v5036_v26 = vpack.c.bf16 %v28413_v44, %v28413_v44 }
 0x354   : > { %v333_v48 = vld [vmem:[%s26866_s29 + $0x308] sm:$0xff] }
 0x355   : > { %v15503_v56 = vpop.f32.mrf.mxu0  ;;  %v15543_v57 = vpop.f32.mrf.mxu1  ;;  %17422 = vmatmul.mubr.bf16.vlgmr.msra.gmra.mxu0 %v5020_v40  ;;  %17462 = vmatmul.mubr.bf16.vlgmr.msra.gmra.mxu1 %v5022_v41  ;;  %v28432_v8 = vrot.slane %v333_v48, %v26895_v24 }
 0x356   : > { %v15504_v58 = vadd.f32 %v15503_v56, %v15464_v36  ;;  %17484 = vmatpush1.bf16.xpose.msra.mxu0 %v25876_v45  ;;  %17524 = vmatpush1.bf16.xpose.msra.mxu1 %v25878_v46  ;;  %v5614_v36 = vld [vmem:[%s26873_s24 + $0x608] sm:$0xff]  ;;  %v28416_v45 = vrot.slane %v2252_v28, %v26895_v24  ;;  %v25889_v46 = vcombine.high %v5613_v30, %v5997_v35  ;;  %v6001_v28 = vld [vmem:[%s26873_s24 + $0x1220] sm:$0x11] }
 0x357   : > { %v15505_v59 = vpop.f32.mrf.mxu0  ;;  %v15545_v60 = vpop.f32.mrf.mxu1  ;;  %17501 = vmatprep.mubr.bf16.mxu0 %v5025_v49  ;;  %17541 = vmatprep.mubr.bf16.mxu1 %v5027_v50  ;;  %v25891_v47 = vcombine.high %v5614_v36, %v5998_v37  ;;  %v2269_v56 = vcombine.high %v333_v48, %v333_v48 }
 0x358   : > { %v15544_v0 = vadd.f32 %v15543_v57, %v15504_v58  ;;  %17563 = vmatprep.subr.bf16.mxu0 %v25881_v53  ;;  %17603 = vmatprep.subr.bf16.mxu1 %v25883_v54  ;;  %v2267_v54 = vcombine.high %v28413_v44, %v28413_v44  ;;  %v2268_v55 = vcombine.high %v28416_v45, %v28416_v45  ;;  %v5615_v58 = vld [vmem:[%s26873_s24 + $0x610] sm:$0xff] }
 0x359   : > { %v15506_v2 = vpop.f32.mrf.mxu0  ;;  %v15546_v3 = vpop.f32.mrf.mxu1  ;;  %v5038_v27 = vpack.c.bf16 %v28416_v45, %v28416_v45 }
 0x35a   : > { %v25888_v2 = vcombine.low %v5613_v30, %v5997_v35  ;;  %v25890_v3 = vcombine.low %v5614_v36, %v5998_v37  ;;  %v5037_v6 = vpack.c.bf16 %v2267_v54, %v2267_v54  ;;  %v5039_v7 = vpack.c.bf16 %v2268_v55, %v2268_v55  ;;  %v6002_v30 = vld [vmem:[%s26873_s24 + $0x1228] sm:$0x11] }
 0x35b   : > { %v15507_v11 = vpop.f32.mrf.mxu0  ;;  %v15547_v12 = vpop.f32.mrf.mxu1  ;;  %v5040_v54 = vpack.c.bf16 %v28432_v8, %v28432_v8 }
 0x35c   : > { %v334_v12 = vld [vmem:[%s26866_s29 + $0x310] sm:$0xff] }
 0x35d   : > { %v15583_v20 = vpop.f32.mrf.mxu0  ;;  %v15623_v21 = vpop.f32.mrf.mxu1  ;;  %17502 = vmatmul.mubr.bf16.vlgmr.msra.gmra.mxu0 %v5024_v4  ;;  %17542 = vmatmul.mubr.bf16.vlgmr.msra.gmra.mxu1 %v5026_v5  ;;  %v28451_v37 = vrot.slane %v334_v12, %v26895_v24 }
 0x35e   : > { %v15584_v22 = vadd.f32 %v15583_v20, %v15544_v0  ;;  %17564 = vmatpush1.bf16.xpose.msra.mxu0 %v25880_v9  ;;  %17604 = vmatpush1.bf16.xpose.msra.mxu1 %v25882_v10  ;;  %v5616_v0 = vld [vmem:[%s26873_s24 + $0x618] sm:$0xff]  ;;  %v28435_v9 = vrot.slane %v2269_v56, %v26895_v24  ;;  %v25893_v10 = vcombine.high %v5615_v58, %v5999_v63  ;;  %v6003_v56 = vld [vmem:[%s26873_s24 + $0x1230] sm:$0x11] }
 0x35f   : > { %v15585_v23 = vpop.f32.mrf.mxu0  ;;  %v15625_v25 = vpop.f32.mrf.mxu1  ;;  %17581 = vmatprep.mubr.bf16.mxu0 %v5029_v13  ;;  %17621 = vmatprep.mubr.bf16.mxu1 %v5031_v14  ;;  %v25895_v11 = vcombine.high %v5616_v0, %v6000_v1  ;;  %v2286_v20 = vcombine.high %v334_v12, %v334_v12 }
 0x360   : > { %v15624_v29 = vadd.f32 %v15623_v21, %v15584_v22  ;;  %17643 = vmatprep.subr.bf16.mxu0 %v25885_v17  ;;  %17683 = vmatprep.subr.bf16.mxu1 %v25887_v18  ;;  %v2284_v18 = vcombine.high %v28432_v8, %v28432_v8  ;;  %v2285_v19 = vcombine.high %v28435_v9, %v28435_v9  ;;  %v5617_v22 = vld [vmem:[%s26873_s24 + $0x620] sm:$0xff] }
 0x361   : > { %v15586_v31 = vpop.f32.mrf.mxu0  ;;  %v15626_v32 = vpop.f32.mrf.mxu1  ;;  %v5042_v55 = vpack.c.bf16 %v28435_v9, %v28435_v9 }
 0x362   : > { %v25892_v31 = vcombine.low %v5615_v58, %v5999_v63  ;;  %v25894_v32 = vcombine.low %v5616_v0, %v6000_v1  ;;  %v5041_v35 = vpack.c.bf16 %v2284_v18, %v2284_v18  ;;  %v5043_v36 = vpack.c.bf16 %v2285_v19, %v2285_v19  ;;  %v6004_v58 = vld [vmem:[%s26873_s24 + $0x1238] sm:$0x11] }
 0x363   : > { %v15587_v40 = vpop.f32.mrf.mxu0  ;;  %v15627_v41 = vpop.f32.mrf.mxu1  ;;  %v5044_v18 = vpack.c.bf16 %v28451_v37, %v28451_v37 }
 0x364   : > { %v335_v41 = vld [vmem:[%s26866_s29 + $0x318] sm:$0xff] }
 0x365   : > { %v15663_v49 = vpop.f32.mrf.mxu0  ;;  %v15703_v50 = vpop.f32.mrf.mxu1  ;;  %17582 = vmatmul.mubr.bf16.vlgmr.msra.gmra.mxu0 %v5028_v33  ;;  %17622 = vmatmul.mubr.bf16.vlgmr.msra.gmra.mxu1 %v5030_v34  ;;  %v28470_v1 = vrot.slane %v335_v41, %v26895_v24 }
 0x366   : > { %v15664_v51 = vadd.f32 %v15663_v49, %v15624_v29  ;;  %17644 = vmatpush1.bf16.xpose.msra.mxu0 %v25884_v38  ;;  %17684 = vmatpush1.bf16.xpose.msra.mxu1 %v25886_v39  ;;  %v5618_v29 = vld [vmem:[%s26873_s24 + $0x628] sm:$0xff]  ;;  %v28454_v38 = vrot.slane %v2286_v20, %v26895_v24  ;;  %v25897_v39 = vcombine.high %v5617_v22, %v6001_v28  ;;  %v6005_v20 = vld [vmem:[%s26873_s24 + $0x1240] sm:$0x11] }
 0x367   : > { %v15665_v52 = vpop.f32.mrf.mxu0  ;;  %v15705_v53 = vpop.f32.mrf.mxu1  ;;  %17661 = vmatprep.mubr.bf16.mxu0 %v5033_v42  ;;  %17701 = vmatprep.mubr.bf16.mxu1 %v5035_v43  ;;  %v25899_v40 = vcombine.high %v5618_v29, %v6002_v30  ;;  %v2303_v49 = vcombine.high %v335_v41, %v335_v41 }
 0x368   : > { %v15704_v57 = vadd.f32 %v15703_v50, %v15664_v51  ;;  %17723 = vmatprep.subr.bf16.mxu0 %v25889_v46  ;;  %17763 = vmatprep.subr.bf16.mxu1 %v25891_v47  ;;  %v2301_v47 = vcombine.high %v28451_v37, %v28451_v37  ;;  %v2302_v48 = vcombine.high %v28454_v38, %v28454_v38  ;;  %v5619_v51 = vld [vmem:[%s26873_s24 + $0x630] sm:$0xff] }
 0x369   : > { %v15666_v59 = vpop.f32.mrf.mxu0  ;;  %v15706_v60 = vpop.f32.mrf.mxu1  ;;  %v5046_v19 = vpack.c.bf16 %v28454_v38, %v28454_v38 }
 0x36a   : > { %v25896_v59 = vcombine.low %v5617_v22, %v6001_v28  ;;  %v25898_v60 = vcombine.low %v5618_v29, %v6002_v30  ;;  %v5045_v63 = vpack.c.bf16 %v2301_v47, %v2301_v47  ;;  %v5047_v0 = vpack.c.bf16 %v2302_v48, %v2302_v48  ;;  %v6006_v22 = vld [vmem:[%s26873_s24 + $0x1248] sm:$0x11] }
 0x36b   : > { %v15667_v4 = vpop.f32.mrf.mxu0  ;;  %v15707_v5 = vpop.f32.mrf.mxu1  ;;  %v5048_v47 = vpack.c.bf16 %v28470_v1, %v28470_v1 }
 0x36c   : > { %v336_v5 = vld [vmem:[%s26866_s29 + $0x320] sm:$0xff] }
 0x36d   : > { %v15743_v13 = vpop.f32.mrf.mxu0  ;;  %v15783_v14 = vpop.f32.mrf.mxu1  ;;  %17662 = vmatmul.mubr.bf16.vlgmr.msra.gmra.mxu0 %v5032_v61  ;;  %17702 = vmatmul.mubr.bf16.vlgmr.msra.gmra.mxu1 %v5034_v62  ;;  %v28489_v30 = vrot.slane %v336_v5, %v26895_v24 }
 0x36e   : > { %v15744_v15 = vadd.f32 %v15743_v13, %v15704_v57  ;;  %17724 = vmatpush1.bf16.xpose.msra.mxu0 %v25888_v2  ;;  %17764 = vmatpush1.bf16.xpose.msra.mxu1 %v25890_v3  ;;  %v5620_v57 = vld [vmem:[%s26873_s24 + $0x638] sm:$0xff]  ;;  %v28473_v2 = vrot.slane %v2303_v49, %v26895_v24  ;;  %v25901_v3 = vcombine.high %v5619_v51, %v6003_v56  ;;  %v6007_v49 = vld [vmem:[%s26873_s24 + $0x1250] sm:$0x11] }
 0x36f   : > { %v15745_v16 = vpop.f32.mrf.mxu0  ;;  %v15785_v17 = vpop.f32.mrf.mxu1  ;;  %17741 = vmatprep.mubr.bf16.mxu0 %v5037_v6  ;;  %17781 = vmatprep.mubr.bf16.mxu1 %v5039_v7  ;;  %v25903_v4 = vcombine.high %v5620_v57, %v6004_v58  ;;  %v2320_v13 = vcombine.high %v336_v5, %v336_v5 }
 0x370   : > { %v15784_v21 = vadd.f32 %v15783_v14, %v15744_v15  ;;  %17803 = vmatprep.subr.bf16.mxu0 %v25893_v10  ;;  %17843 = vmatprep.subr.bf16.mxu1 %v25895_v11  ;;  %v2318_v11 = vcombine.high %v28470_v1, %v28470_v1  ;;  %v2319_v12 = vcombine.high %v28473_v2, %v28473_v2  ;;  %v5621_v15 = vld [vmem:[%s26873_s24 + $0x640] sm:$0xff] }
 0x371   : > { %v15746_v23 = vpop.f32.mrf.mxu0  ;;  %v15786_v25 = vpop.f32.mrf.mxu1  ;;  %v5050_v48 = vpack.c.bf16 %v28473_v2, %v28473_v2 }
 0x372   : > { %v25900_v23 = vcombine.low %v5619_v51, %v6003_v56  ;;  %v25902_v25 = vcombine.low %v5620_v57, %v6004_v58  ;;  %v5049_v28 = vpack.c.bf16 %v2318_v11, %v2318_v11  ;;  %v5051_v29 = vpack.c.bf16 %v2319_v12, %v2319_v12  ;;  %v6008_v51 = vld [vmem:[%s26873_s24 + $0x1258] sm:$0x11] }
 0x373   : > { %v15747_v33 = vpop.f32.mrf.mxu0  ;;  %v15787_v34 = vpop.f32.mrf.mxu1  ;;  %v5052_v11 = vpack.c.bf16 %v28489_v30, %v28489_v30 }
 0x374   : > { %v337_v34 = vld [vmem:[%s26866_s29 + $0x328] sm:$0xff] }
 0x375   : > { %v15823_v42 = vpop.f32.mrf.mxu0  ;;  %v15863_v43 = vpop.f32.mrf.mxu1  ;;  %17742 = vmatmul.mubr.bf16.vlgmr.msra.gmra.mxu0 %v5036_v26  ;;  %17782 = vmatmul.mubr.bf16.vlgmr.msra.gmra.mxu1 %v5038_v27  ;;  %v28508_v58 = vrot.slane %v337_v34, %v26895_v24 }
 0x376   : > { %v15824_v44 = vadd.f32 %v15823_v42, %v15784_v21  ;;  %17804 = vmatpush1.bf16.xpose.msra.mxu0 %v25892_v31  ;;  %17844 = vmatpush1.bf16.xpose.msra.mxu1 %v25894_v32  ;;  %v5622_v21 = vld [vmem:[%s26873_s24 + $0x648] sm:$0xff]  ;;  %v28492_v31 = vrot.slane %v2320_v13, %v26895_v24  ;;  %v25905_v32 = vcombine.high %v5621_v15, %v6005_v20  ;;  %v6009_v13 = vld [vmem:[%s26873_s24 + $0x1260] sm:$0x11] }
 0x377   : > { %v15825_v45 = vpop.f32.mrf.mxu0  ;;  %v15865_v46 = vpop.f32.mrf.mxu1  ;;  %17821 = vmatprep.mubr.bf16.mxu0 %v5041_v35  ;;  %17861 = vmatprep.mubr.bf16.mxu1 %v5043_v36  ;;  %v25907_v33 = vcombine.high %v5622_v21, %v6006_v22  ;;  %v2337_v42 = vcombine.high %v337_v34, %v337_v34 }
 0x378   : > { %v15864_v50 = vadd.f32 %v15863_v43, %v15824_v44  ;;  %17883 = vmatprep.subr.bf16.mxu0 %v25897_v39  ;;  %17923 = vmatprep.subr.bf16.mxu1 %v25899_v40  ;;  %v2335_v40 = vcombine.high %v28489_v30, %v28489_v30  ;;  %v2336_v41 = vcombine.high %v28492_v31, %v28492_v31  ;;  %v5623_v44 = vld [vmem:[%s26873_s24 + $0x650] sm:$0xff] }
 0x379   : > { %v15826_v52 = vpop.f32.mrf.mxu0  ;;  %v15866_v53 = vpop.f32.mrf.mxu1  ;;  %v5054_v12 = vpack.c.bf16 %v28492_v31, %v28492_v31 }
 0x37a   : > { %v25904_v52 = vcombine.low %v5621_v15, %v6005_v20  ;;  %v25906_v53 = vcombine.low %v5622_v21, %v6006_v22  ;;  %v5053_v56 = vpack.c.bf16 %v2335_v40, %v2335_v40  ;;  %v5055_v57 = vpack.c.bf16 %v2336_v41, %v2336_v41  ;;  %v6010_v15 = vld [vmem:[%s26873_s24 + $0x1268] sm:$0x11] }
 0x37b   : > { %v15827_v61 = vpop.f32.mrf.mxu0  ;;  %v15867_v62 = vpop.f32.mrf.mxu1  ;;  %v5056_v40 = vpack.c.bf16 %v28508_v58, %v28508_v58 }
 0x37c   : > { %v338_v62 = vld [vmem:[%s26866_s29 + $0x330] sm:$0xff] }
 0x37d   : > { %v15903_v6 = vpop.f32.mrf.mxu0  ;;  %v15943_v7 = vpop.f32.mrf.mxu1  ;;  %17822 = vmatmul.mubr.bf16.vlgmr.msra.gmra.mxu0 %v5040_v54  ;;  %17862 = vmatmul.mubr.bf16.vlgmr.msra.gmra.mxu1 %v5042_v55  ;;  %v28527_v22 = vrot.slane %v338_v62, %v26895_v24 }
 0x37e   : > { %v15904_v8 = vadd.f32 %v15903_v6, %v15864_v50  ;;  %17884 = vmatpush1.bf16.xpose.msra.mxu0 %v25896_v59  ;;  %17924 = vmatpush1.bf16.xpose.msra.mxu1 %v25898_v60  ;;  %v5624_v50 = vld [vmem:[%s26873_s24 + $0x658] sm:$0xff]  ;;  %v28511_v59 = vrot.slane %v2337_v42, %v26895_v24  ;;  %v25909_v60 = vcombine.high %v5623_v44, %v6007_v49  ;;  %v6011_v42 = vld [vmem:[%s26873_s24 + $0x1270] sm:$0x11] }
 0x37f   : > { %v15905_v9 = vpop.f32.mrf.mxu0  ;;  %v15945_v10 = vpop.f32.mrf.mxu1  ;;  %17901 = vmatprep.mubr.bf16.mxu0 %v5045_v63  ;;  %17941 = vmatprep.mubr.bf16.mxu1 %v5047_v0  ;;  %v25911_v61 = vcombine.high %v5624_v50, %v6008_v51  ;;  %v2354_v6 = vcombine.high %v338_v62, %v338_v62 }
 0x380   : > { %v15944_v14 = vadd.f32 %v15943_v7, %v15904_v8  ;;  %17963 = vmatprep.subr.bf16.mxu0 %v25901_v3  ;;  %18003 = vmatprep.subr.bf16.mxu1 %v25903_v4  ;;  %v2352_v4 = vcombine.high %v28508_v58, %v28508_v58  ;;  %v2353_v5 = vcombine.high %v28511_v59, %v28511_v59  ;;  %v5625_v8 = vld [vmem:[%s26873_s24 + $0x660] sm:$0xff] }
 0x381   : > { %v15906_v16 = vpop.f32.mrf.mxu0  ;;  %v15946_v17 = vpop.f32.mrf.mxu1  ;;  %v5058_v41 = vpack.c.bf16 %v28511_v59, %v28511_v59 }
 0x382   : > { %v25908_v16 = vcombine.low %v5623_v44, %v6007_v49  ;;  %v25910_v17 = vcombine.low %v5624_v50, %v6008_v51  ;;  %v5057_v20 = vpack.c.bf16 %v2352_v4, %v2352_v4  ;;  %v5059_v21 = vpack.c.bf16 %v2353_v5, %v2353_v5  ;;  %v6012_v44 = vld [vmem:[%s26873_s24 + $0x1278] sm:$0x11] }
 0x383   : > { %v15907_v26 = vpop.f32.mrf.mxu0  ;;  %v15947_v27 = vpop.f32.mrf.mxu1  ;;  %v5060_v4 = vpack.c.bf16 %v28527_v22, %v28527_v22 }
 0x384   : > { %v339_v27 = vld [vmem:[%s26866_s29 + $0x338] sm:$0xff] }
 0x385   : > { %v15983_v35 = vpop.f32.mrf.mxu0  ;;  %v16023_v36 = vpop.f32.mrf.mxu1  ;;  %17902 = vmatmul.mubr.bf16.vlgmr.msra.gmra.mxu0 %v5044_v18  ;;  %17942 = vmatmul.mubr.bf16.vlgmr.msra.gmra.mxu1 %v5046_v19  ;;  %v28546_v51 = vrot.slane %v339_v27, %v26895_v24 }
 0x386   : > { %v15984_v37 = vadd.f32 %v15983_v35, %v15944_v14  ;;  %17964 = vmatpush1.bf16.xpose.msra.mxu0 %v25900_v23  ;;  %18004 = vmatpush1.bf16.xpose.msra.mxu1 %v25902_v25  ;;  %v5626_v14 = vld [vmem:[%s26873_s24 + $0x668] sm:$0xff]  ;;  %v28530_v23 = vrot.slane %v2354_v6, %v26895_v24  ;;  %v25913_v25 = vcombine.high %v5625_v8, %v6009_v13  ;;  %v6013_v6 = vld [vmem:[%s26873_s24 + $0x1280] sm:$0x11] }
 0x387   : > { %v15985_v38 = vpop.f32.mrf.mxu0  ;;  %v16025_v39 = vpop.f32.mrf.mxu1  ;;  %17981 = vmatprep.mubr.bf16.mxu0 %v5049_v28  ;;  %18021 = vmatprep.mubr.bf16.mxu1 %v5051_v29  ;;  %v25915_v26 = vcombine.high %v5626_v14, %v6010_v15  ;;  %v2371_v35 = vcombine.high %v339_v27, %v339_v27 }
 0x388   : > { %v16024_v43 = vadd.f32 %v16023_v36, %v15984_v37  ;;  %18043 = vmatprep.subr.bf16.mxu0 %v25905_v32  ;;  %18083 = vmatprep.subr.bf16.mxu1 %v25907_v33  ;;  %v2369_v33 = vcombine.high %v28527_v22, %v28527_v22  ;;  %v2370_v34 = vcombine.high %v28530_v23, %v28530_v23  ;;  %v5627_v37 = vld [vmem:[%s26873_s24 + $0x670] sm:$0xff] }
 0x389   : > { %v15986_v45 = vpop.f32.mrf.mxu0  ;;  %v16026_v46 = vpop.f32.mrf.mxu1  ;;  %v5062_v5 = vpack.c.bf16 %v28530_v23, %v28530_v23 }
 0x38a   : > { %v25912_v45 = vcombine.low %v5625_v8, %v6009_v13  ;;  %v25914_v46 = vcombine.low %v5626_v14, %v6010_v15  ;;  %v5061_v49 = vpack.c.bf16 %v2369_v33, %v2369_v33  ;;  %v5063_v50 = vpack.c.bf16 %v2370_v34, %v2370_v34  ;;  %v6014_v8 = vld [vmem:[%s26873_s24 + $0x1288] sm:$0x11] }
 0x38b   : > { %v15987_v54 = vpop.f32.mrf.mxu0  ;;  %v16027_v55 = vpop.f32.mrf.mxu1  ;;  %v5064_v33 = vpack.c.bf16 %v28546_v51, %v28546_v51 }
 0x38c   : > { %v340_v55 = vld [vmem:[%s26866_s29 + $0x340] sm:$0xff] }
 0x38d   : > { %v16063_v63 = vpop.f32.mrf.mxu0  ;;  %v16103_v0 = vpop.f32.mrf.mxu1  ;;  %17982 = vmatmul.mubr.bf16.vlgmr.msra.gmra.mxu0 %v5048_v47  ;;  %18022 = vmatmul.mubr.bf16.vlgmr.msra.gmra.mxu1 %v5050_v48  ;;  %v28565_v15 = vrot.slane %v340_v55, %v26895_v24 }
 0x38e   : > { %v16064_v1 = vadd.f32 %v16063_v63, %v16024_v43  ;;  %18044 = vmatpush1.bf16.xpose.msra.mxu0 %v25904_v52  ;;  %18084 = vmatpush1.bf16.xpose.msra.mxu1 %v25906_v53  ;;  %v5628_v43 = vld [vmem:[%s26873_s24 + $0x678] sm:$0xff]  ;;  %v28549_v52 = vrot.slane %v2371_v35, %v26895_v24  ;;  %v25917_v53 = vcombine.high %v5627_v37, %v6011_v42  ;;  %v6015_v35 = vld [vmem:[%s26873_s24 + $0x1290] sm:$0x11] }
 0x38f   : > { %v16065_v2 = vpop.f32.mrf.mxu0  ;;  %v16105_v3 = vpop.f32.mrf.mxu1  ;;  %18061 = vmatprep.mubr.bf16.mxu0 %v5053_v56  ;;  %18101 = vmatprep.mubr.bf16.mxu1 %v5055_v57  ;;  %v25919_v54 = vcombine.high %v5628_v43, %v6012_v44  ;;  %v2388_v63 = vcombine.high %v340_v55, %v340_v55 }
 0x390   : > { %v16104_v7 = vadd.f32 %v16103_v0, %v16064_v1  ;;  %18123 = vmatprep.subr.bf16.mxu0 %v25909_v60  ;;  %18163 = vmatprep.subr.bf16.mxu1 %v25911_v61  ;;  %v2386_v61 = vcombine.high %v28546_v51, %v28546_v51  ;;  %v2387_v62 = vcombine.high %v28549_v52, %v28549_v52  ;;  %v5629_v1 = vld [vmem:[%s26873_s24 + $0x680] sm:$0xff] }
 0x391   : > { %v16066_v9 = vpop.f32.mrf.mxu0  ;;  %v16106_v10 = vpop.f32.mrf.mxu1  ;;  %v5066_v34 = vpack.c.bf16 %v28549_v52, %v28549_v52 }
 0x392   : > { %v25916_v9 = vcombine.low %v5627_v37, %v6011_v42  ;;  %v25918_v10 = vcombine.low %v5628_v43, %v6012_v44  ;;  %v5065_v13 = vpack.c.bf16 %v2386_v61, %v2386_v61  ;;  %v5067_v14 = vpack.c.bf16 %v2387_v62, %v2387_v62  ;;  %v6016_v37 = vld [vmem:[%s26873_s24 + $0x1298] sm:$0x11] }
 0x393   : > { %v16067_v18 = vpop.f32.mrf.mxu0  ;;  %v16107_v19 = vpop.f32.mrf.mxu1  ;;  %v5068_v61 = vpack.c.bf16 %v28565_v15, %v28565_v15 }
 0x394   : > { %v341_v19 = vld [vmem:[%s26866_s29 + $0x348] sm:$0xff] }
 0x395   : > { %v16143_v28 = vpop.f32.mrf.mxu0  ;;  %v16183_v29 = vpop.f32.mrf.mxu1  ;;  %18062 = vmatmul.mubr.bf16.vlgmr.msra.gmra.mxu0 %v5052_v11  ;;  %18102 = vmatmul.mubr.bf16.vlgmr.msra.gmra.mxu1 %v5054_v12  ;;  %v28584_v44 = vrot.slane %v341_v19, %v26895_v24 }
 0x396   : > { %v16144_v30 = vadd.f32 %v16143_v28, %v16104_v7  ;;  %18124 = vmatpush1.bf16.xpose.msra.mxu0 %v25908_v16  ;;  %18164 = vmatpush1.bf16.xpose.msra.mxu1 %v25910_v17  ;;  %v5630_v7 = vld [vmem:[%s26873_s24 + $0x688] sm:$0xff]  ;;  %v28568_v16 = vrot.slane %v2388_v63, %v26895_v24  ;;  %v25921_v17 = vcombine.high %v5629_v1, %v6013_v6  ;;  %v6017_v63 = vld [vmem:[%s26873_s24 + $0x12a0] sm:$0x11] }
 0x397   : > { %v16145_v31 = vpop.f32.mrf.mxu0  ;;  %v16185_v32 = vpop.f32.mrf.mxu1  ;;  %18141 = vmatprep.mubr.bf16.mxu0 %v5057_v20  ;;  %18181 = vmatprep.mubr.bf16.mxu1 %v5059_v21  ;;  %v25923_v18 = vcombine.high %v5630_v7, %v6014_v8  ;;  %v2405_v28 = vcombine.high %v341_v19, %v341_v19 }
 0x398   : > { %v16184_v36 = vadd.f32 %v16183_v29, %v16144_v30  ;;  %18203 = vmatprep.subr.bf16.mxu0 %v25913_v25  ;;  %18243 = vmatprep.subr.bf16.mxu1 %v25915_v26  ;;  %v2403_v26 = vcombine.high %v28565_v15, %v28565_v15  ;;  %v2404_v27 = vcombine.high %v28568_v16, %v28568_v16  ;;  %v5631_v30 = vld [vmem:[%s26873_s24 + $0x690] sm:$0xff] }
 0x399   : > { %v16146_v38 = vpop.f32.mrf.mxu0  ;;  %v16186_v39 = vpop.f32.mrf.mxu1  ;;  %v5070_v62 = vpack.c.bf16 %v28568_v16, %v28568_v16 }
 0x39a   : > { %v25920_v38 = vcombine.low %v5629_v1, %v6013_v6  ;;  %v25922_v39 = vcombine.low %v5630_v7, %v6014_v8  ;;  %v5069_v42 = vpack.c.bf16 %v2403_v26, %v2403_v26  ;;  %v5071_v43 = vpack.c.bf16 %v2404_v27, %v2404_v27  ;;  %v6018_v1 = vld [vmem:[%s26873_s24 + $0x12a8] sm:$0x11] }
 0x39b   : > { %v16147_v47 = vpop.f32.mrf.mxu0  ;;  %v16187_v48 = vpop.f32.mrf.mxu1  ;;  %v5072_v26 = vpack.c.bf16 %v28584_v44, %v28584_v44 }
 0x39c   : > { %v342_v48 = vld [vmem:[%s26866_s29 + $0x350] sm:$0xff] }
 0x39d   : > { %v16223_v56 = vpop.f32.mrf.mxu0  ;;  %v16263_v57 = vpop.f32.mrf.mxu1  ;;  %18142 = vmatmul.mubr.bf16.vlgmr.msra.gmra.mxu0 %v5056_v40  ;;  %18182 = vmatmul.mubr.bf16.vlgmr.msra.gmra.mxu1 %v5058_v41  ;;  %v28603_v8 = vrot.slane %v342_v48, %v26895_v24 }
 0x39e   : > { %v16224_v58 = vadd.f32 %v16223_v56, %v16184_v36  ;;  %18204 = vmatpush1.bf16.xpose.msra.mxu0 %v25912_v45  ;;  %18244 = vmatpush1.bf16.xpose.msra.mxu1 %v25914_v46  ;;  %v5632_v36 = vld [vmem:[%s26873_s24 + $0x698] sm:$0xff]  ;;  %v28587_v45 = vrot.slane %v2405_v28, %v26895_v24  ;;  %v25925_v46 = vcombine.high %v5631_v30, %v6015_v35  ;;  %v6019_v28 = vld [vmem:[%s26873_s24 + $0x12b0] sm:$0x11] }
 0x39f   : > { %v16225_v59 = vpop.f32.mrf.mxu0  ;;  %v16265_v60 = vpop.f32.mrf.mxu1  ;;  %18221 = vmatprep.mubr.bf16.mxu0 %v5061_v49  ;;  %18261 = vmatprep.mubr.bf16.mxu1 %v5063_v50  ;;  %v25927_v47 = vcombine.high %v5632_v36, %v6016_v37  ;;  %v2422_v56 = vcombine.high %v342_v48, %v342_v48 }
 0x3a0   : > { %v16264_v0 = vadd.f32 %v16263_v57, %v16224_v58  ;;  %18283 = vmatprep.subr.bf16.mxu0 %v25917_v53  ;;  %18323 = vmatprep.subr.bf16.mxu1 %v25919_v54  ;;  %v2420_v54 = vcombine.high %v28584_v44, %v28584_v44  ;;  %v2421_v55 = vcombine.high %v28587_v45, %v28587_v45  ;;  %v5633_v58 = vld [vmem:[%s26873_s24 + $0x6a0] sm:$0xff] }
 0x3a1   : > { %v16226_v2 = vpop.f32.mrf.mxu0  ;;  %v16266_v3 = vpop.f32.mrf.mxu1  ;;  %v5074_v27 = vpack.c.bf16 %v28587_v45, %v28587_v45 }
 0x3a2   : > { %v25924_v2 = vcombine.low %v5631_v30, %v6015_v35  ;;  %v25926_v3 = vcombine.low %v5632_v36, %v6016_v37  ;;  %v5073_v6 = vpack.c.bf16 %v2420_v54, %v2420_v54  ;;  %v5075_v7 = vpack.c.bf16 %v2421_v55, %v2421_v55  ;;  %v6020_v30 = vld [vmem:[%s26873_s24 + $0x12b8] sm:$0x11] }
 0x3a3   : > { %v16227_v11 = vpop.f32.mrf.mxu0  ;;  %v16267_v12 = vpop.f32.mrf.mxu1  ;;  %v5076_v54 = vpack.c.bf16 %v28603_v8, %v28603_v8 }
 0x3a4   : > { %v343_v12 = vld [vmem:[%s26866_s29 + $0x358] sm:$0xff] }
 0x3a5   : > { %v16303_v20 = vpop.f32.mrf.mxu0  ;;  %v16343_v21 = vpop.f32.mrf.mxu1  ;;  %18222 = vmatmul.mubr.bf16.vlgmr.msra.gmra.mxu0 %v5060_v4  ;;  %18262 = vmatmul.mubr.bf16.vlgmr.msra.gmra.mxu1 %v5062_v5  ;;  %v28622_v37 = vrot.slane %v343_v12, %v26895_v24 }
 0x3a6   : > { %v16304_v22 = vadd.f32 %v16303_v20, %v16264_v0  ;;  %18284 = vmatpush1.bf16.xpose.msra.mxu0 %v25916_v9  ;;  %18324 = vmatpush1.bf16.xpose.msra.mxu1 %v25918_v10  ;;  %v5634_v0 = vld [vmem:[%s26873_s24 + $0x6a8] sm:$0xff]  ;;  %v28606_v9 = vrot.slane %v2422_v56, %v26895_v24  ;;  %v25929_v10 = vcombine.high %v5633_v58, %v6017_v63  ;;  %v6021_v56 = vld [vmem:[%s26873_s24 + $0x12c0] sm:$0x11] }
 0x3a7   : > { %v16305_v23 = vpop.f32.mrf.mxu0  ;;  %v16345_v25 = vpop.f32.mrf.mxu1  ;;  %18301 = vmatprep.mubr.bf16.mxu0 %v5065_v13  ;;  %18341 = vmatprep.mubr.bf16.mxu1 %v5067_v14  ;;  %v25931_v11 = vcombine.high %v5634_v0, %v6018_v1  ;;  %v2439_v20 = vcombine.high %v343_v12, %v343_v12 }
 0x3a8   : > { %v16344_v29 = vadd.f32 %v16343_v21, %v16304_v22  ;;  %18363 = vmatprep.subr.bf16.mxu0 %v25921_v17  ;;  %18403 = vmatprep.subr.bf16.mxu1 %v25923_v18  ;;  %v2437_v18 = vcombine.high %v28603_v8, %v28603_v8  ;;  %v2438_v19 = vcombine.high %v28606_v9, %v28606_v9  ;;  %v5635_v22 = vld [vmem:[%s26873_s24 + $0x6b0] sm:$0xff] }
 0x3a9   : > { %v16306_v31 = vpop.f32.mrf.mxu0  ;;  %v16346_v32 = vpop.f32.mrf.mxu1  ;;  %v5078_v55 = vpack.c.bf16 %v28606_v9, %v28606_v9 }
 0x3aa   : > { %v25928_v31 = vcombine.low %v5633_v58, %v6017_v63  ;;  %v25930_v32 = vcombine.low %v5634_v0, %v6018_v1  ;;  %v5077_v35 = vpack.c.bf16 %v2437_v18, %v2437_v18  ;;  %v5079_v36 = vpack.c.bf16 %v2438_v19, %v2438_v19  ;;  %v6022_v58 = vld [vmem:[%s26873_s24 + $0x12c8] sm:$0x11] }
 0x3ab   : > { %v16307_v40 = vpop.f32.mrf.mxu0  ;;  %v16347_v41 = vpop.f32.mrf.mxu1  ;;  %v5080_v18 = vpack.c.bf16 %v28622_v37, %v28622_v37 }
 0x3ac   : > { %v344_v41 = vld [vmem:[%s26866_s29 + $0x360] sm:$0xff] }
 0x3ad   : > { %v16383_v49 = vpop.f32.mrf.mxu0  ;;  %v16423_v50 = vpop.f32.mrf.mxu1  ;;  %18302 = vmatmul.mubr.bf16.vlgmr.msra.gmra.mxu0 %v5064_v33  ;;  %18342 = vmatmul.mubr.bf16.vlgmr.msra.gmra.mxu1 %v5066_v34  ;;  %v28641_v1 = vrot.slane %v344_v41, %v26895_v24 }
 0x3ae   : > { %v16384_v51 = vadd.f32 %v16383_v49, %v16344_v29  ;;  %18364 = vmatpush1.bf16.xpose.msra.mxu0 %v25920_v38  ;;  %18404 = vmatpush1.bf16.xpose.msra.mxu1 %v25922_v39  ;;  %v5636_v29 = vld [vmem:[%s26873_s24 + $0x6b8] sm:$0xff]  ;;  %v28625_v38 = vrot.slane %v2439_v20, %v26895_v24  ;;  %v25933_v39 = vcombine.high %v5635_v22, %v6019_v28  ;;  %v6023_v20 = vld [vmem:[%s26873_s24 + $0x12d0] sm:$0x11] }
 0x3af   : > { %v16385_v52 = vpop.f32.mrf.mxu0  ;;  %v16425_v53 = vpop.f32.mrf.mxu1  ;;  %18381 = vmatprep.mubr.bf16.mxu0 %v5069_v42  ;;  %18421 = vmatprep.mubr.bf16.mxu1 %v5071_v43  ;;  %v25935_v40 = vcombine.high %v5636_v29, %v6020_v30  ;;  %v2456_v49 = vcombine.high %v344_v41, %v344_v41 }
 0x3b0   : > { %v16424_v57 = vadd.f32 %v16423_v50, %v16384_v51  ;;  %18443 = vmatprep.subr.bf16.mxu0 %v25925_v46  ;;  %18483 = vmatprep.subr.bf16.mxu1 %v25927_v47  ;;  %v2454_v47 = vcombine.high %v28622_v37, %v28622_v37  ;;  %v2455_v48 = vcombine.high %v28625_v38, %v28625_v38  ;;  %v5637_v51 = vld [vmem:[%s26873_s24 + $0x6c0] sm:$0xff] }
 0x3b1   : > { %v16386_v59 = vpop.f32.mrf.mxu0  ;;  %v16426_v60 = vpop.f32.mrf.mxu1  ;;  %v5082_v19 = vpack.c.bf16 %v28625_v38, %v28625_v38 }
 0x3b2   : > { %v25932_v59 = vcombine.low %v5635_v22, %v6019_v28  ;;  %v25934_v60 = vcombine.low %v5636_v29, %v6020_v30  ;;  %v5081_v63 = vpack.c.bf16 %v2454_v47, %v2454_v47  ;;  %v5083_v0 = vpack.c.bf16 %v2455_v48, %v2455_v48  ;;  %v6024_v22 = vld [vmem:[%s26873_s24 + $0x12d8] sm:$0x11] }
 0x3b3   : > { %v16387_v4 = vpop.f32.mrf.mxu0  ;;  %v16427_v5 = vpop.f32.mrf.mxu1  ;;  %v5084_v47 = vpack.c.bf16 %v28641_v1, %v28641_v1 }
 0x3b4   : > { %v345_v5 = vld [vmem:[%s26866_s29 + $0x368] sm:$0xff] }
 0x3b5   : > { %v16463_v13 = vpop.f32.mrf.mxu0  ;;  %v16503_v14 = vpop.f32.mrf.mxu1  ;;  %18382 = vmatmul.mubr.bf16.vlgmr.msra.gmra.mxu0 %v5068_v61  ;;  %18422 = vmatmul.mubr.bf16.vlgmr.msra.gmra.mxu1 %v5070_v62  ;;  %v28660_v30 = vrot.slane %v345_v5, %v26895_v24 }
 0x3b6   : > { %v16464_v15 = vadd.f32 %v16463_v13, %v16424_v57  ;;  %18444 = vmatpush1.bf16.xpose.msra.mxu0 %v25924_v2  ;;  %18484 = vmatpush1.bf16.xpose.msra.mxu1 %v25926_v3  ;;  %v5638_v57 = vld [vmem:[%s26873_s24 + $0x6c8] sm:$0xff]  ;;  %v28644_v2 = vrot.slane %v2456_v49, %v26895_v24  ;;  %v25937_v3 = vcombine.high %v5637_v51, %v6021_v56  ;;  %v6025_v49 = vld [vmem:[%s26873_s24 + $0x12e0] sm:$0x11] }
 0x3b7   : > { %v16465_v16 = vpop.f32.mrf.mxu0  ;;  %v16505_v17 = vpop.f32.mrf.mxu1  ;;  %18461 = vmatprep.mubr.bf16.mxu0 %v5073_v6  ;;  %18501 = vmatprep.mubr.bf16.mxu1 %v5075_v7  ;;  %v25939_v4 = vcombine.high %v5638_v57, %v6022_v58  ;;  %v2473_v13 = vcombine.high %v345_v5, %v345_v5 }
 0x3b8   : > { %v16504_v21 = vadd.f32 %v16503_v14, %v16464_v15  ;;  %18523 = vmatprep.subr.bf16.mxu0 %v25929_v10  ;;  %18563 = vmatprep.subr.bf16.mxu1 %v25931_v11  ;;  %v2471_v11 = vcombine.high %v28641_v1, %v28641_v1  ;;  %v2472_v12 = vcombine.high %v28644_v2, %v28644_v2  ;;  %v5639_v15 = vld [vmem:[%s26873_s24 + $0x6d0] sm:$0xff] }
 0x3b9   : > { %v16466_v23 = vpop.f32.mrf.mxu0  ;;  %v16506_v25 = vpop.f32.mrf.mxu1  ;;  %v5086_v48 = vpack.c.bf16 %v28644_v2, %v28644_v2 }
 0x3ba   : > { %v25936_v23 = vcombine.low %v5637_v51, %v6021_v56  ;;  %v25938_v25 = vcombine.low %v5638_v57, %v6022_v58  ;;  %v5085_v28 = vpack.c.bf16 %v2471_v11, %v2471_v11  ;;  %v5087_v29 = vpack.c.bf16 %v2472_v12, %v2472_v12  ;;  %v6026_v51 = vld [vmem:[%s26873_s24 + $0x12e8] sm:$0x11] }
 0x3bb   : > { %v16467_v33 = vpop.f32.mrf.mxu0  ;;  %v16507_v34 = vpop.f32.mrf.mxu1  ;;  %v5088_v11 = vpack.c.bf16 %v28660_v30, %v28660_v30 }
 0x3bc   : > { %v346_v34 = vld [vmem:[%s26866_s29 + $0x370] sm:$0xff] }
 0x3bd   : > { %v16543_v42 = vpop.f32.mrf.mxu0  ;;  %v16583_v43 = vpop.f32.mrf.mxu1  ;;  %18462 = vmatmul.mubr.bf16.vlgmr.msra.gmra.mxu0 %v5072_v26  ;;  %18502 = vmatmul.mubr.bf16.vlgmr.msra.gmra.mxu1 %v5074_v27  ;;  %v28679_v58 = vrot.slane %v346_v34, %v26895_v24 }
 0x3be   : > { %v16544_v44 = vadd.f32 %v16543_v42, %v16504_v21  ;;  %18524 = vmatpush1.bf16.xpose.msra.mxu0 %v25928_v31  ;;  %18564 = vmatpush1.bf16.xpose.msra.mxu1 %v25930_v32  ;;  %v5640_v21 = vld [vmem:[%s26873_s24 + $0x6d8] sm:$0xff]  ;;  %v28663_v31 = vrot.slane %v2473_v13, %v26895_v24  ;;  %v25941_v32 = vcombine.high %v5639_v15, %v6023_v20  ;;  %v6027_v13 = vld [vmem:[%s26873_s24 + $0x12f0] sm:$0x11] }
 0x3bf   : > { %v16545_v45 = vpop.f32.mrf.mxu0  ;;  %v16585_v46 = vpop.f32.mrf.mxu1  ;;  %18541 = vmatprep.mubr.bf16.mxu0 %v5077_v35  ;;  %18581 = vmatprep.mubr.bf16.mxu1 %v5079_v36  ;;  %v25943_v33 = vcombine.high %v5640_v21, %v6024_v22  ;;  %v2490_v42 = vcombine.high %v346_v34, %v346_v34 }
 0x3c0   : > { %v16584_v50 = vadd.f32 %v16583_v43, %v16544_v44  ;;  %18603 = vmatprep.subr.bf16.mxu0 %v25933_v39  ;;  %18643 = vmatprep.subr.bf16.mxu1 %v25935_v40  ;;  %v2488_v40 = vcombine.high %v28660_v30, %v28660_v30  ;;  %v2489_v41 = vcombine.high %v28663_v31, %v28663_v31  ;;  %v5641_v44 = vld [vmem:[%s26873_s24 + $0x6e0] sm:$0xff] }
 0x3c1   : > { %v16546_v52 = vpop.f32.mrf.mxu0  ;;  %v16586_v53 = vpop.f32.mrf.mxu1  ;;  %v5090_v12 = vpack.c.bf16 %v28663_v31, %v28663_v31 }
 0x3c2   : > { %v25940_v52 = vcombine.low %v5639_v15, %v6023_v20  ;;  %v25942_v53 = vcombine.low %v5640_v21, %v6024_v22  ;;  %v5089_v56 = vpack.c.bf16 %v2488_v40, %v2488_v40  ;;  %v5091_v57 = vpack.c.bf16 %v2489_v41, %v2489_v41  ;;  %v6028_v15 = vld [vmem:[%s26873_s24 + $0x12f8] sm:$0x11] }
 0x3c3   : > { %v16547_v61 = vpop.f32.mrf.mxu0  ;;  %v16587_v62 = vpop.f32.mrf.mxu1  ;;  %v5092_v40 = vpack.c.bf16 %v28679_v58, %v28679_v58 }
 0x3c4   : > { %v347_v62 = vld [vmem:[%s26866_s29 + $0x378] sm:$0xff] }
 0x3c5   : > { %v16623_v6 = vpop.f32.mrf.mxu0  ;;  %v16663_v7 = vpop.f32.mrf.mxu1  ;;  %18542 = vmatmul.mubr.bf16.vlgmr.msra.gmra.mxu0 %v5076_v54  ;;  %18582 = vmatmul.mubr.bf16.vlgmr.msra.gmra.mxu1 %v5078_v55  ;;  %v28698_v22 = vrot.slane %v347_v62, %v26895_v24 }
 0x3c6   : > { %v16624_v8 = vadd.f32 %v16623_v6, %v16584_v50  ;;  %18604 = vmatpush1.bf16.xpose.msra.mxu0 %v25932_v59  ;;  %18644 = vmatpush1.bf16.xpose.msra.mxu1 %v25934_v60  ;;  %v5642_v50 = vld [vmem:[%s26873_s24 + $0x6e8] sm:$0xff]  ;;  %v28682_v59 = vrot.slane %v2490_v42, %v26895_v24  ;;  %v25945_v60 = vcombine.high %v5641_v44, %v6025_v49  ;;  %v6029_v42 = vld [vmem:[%s26873_s24 + $0x1300] sm:$0x11] }
 0x3c7   : > { %v16625_v9 = vpop.f32.mrf.mxu0  ;;  %v16665_v10 = vpop.f32.mrf.mxu1  ;;  %18621 = vmatprep.mubr.bf16.mxu0 %v5081_v63  ;;  %18661 = vmatprep.mubr.bf16.mxu1 %v5083_v0  ;;  %v25947_v61 = vcombine.high %v5642_v50, %v6026_v51  ;;  %v2507_v6 = vcombine.high %v347_v62, %v347_v62 }
 0x3c8   : > { %v16664_v14 = vadd.f32 %v16663_v7, %v16624_v8  ;;  %18683 = vmatprep.subr.bf16.mxu0 %v25937_v3  ;;  %18723 = vmatprep.subr.bf16.mxu1 %v25939_v4  ;;  %v2505_v4 = vcombine.high %v28679_v58, %v28679_v58  ;;  %v2506_v5 = vcombine.high %v28682_v59, %v28682_v59  ;;  %v5643_v8 = vld [vmem:[%s26873_s24 + $0x6f0] sm:$0xff] }
 0x3c9   : > { %v16626_v16 = vpop.f32.mrf.mxu0  ;;  %v16666_v17 = vpop.f32.mrf.mxu1  ;;  %v5094_v41 = vpack.c.bf16 %v28682_v59, %v28682_v59 }
 0x3ca   : > { %v25944_v16 = vcombine.low %v5641_v44, %v6025_v49  ;;  %v25946_v17 = vcombine.low %v5642_v50, %v6026_v51  ;;  %v5093_v20 = vpack.c.bf16 %v2505_v4, %v2505_v4  ;;  %v5095_v21 = vpack.c.bf16 %v2506_v5, %v2506_v5  ;;  %v6030_v44 = vld [vmem:[%s26873_s24 + $0x1308] sm:$0x11] }
 0x3cb   : > { %v16627_v26 = vpop.f32.mrf.mxu0  ;;  %v16667_v27 = vpop.f32.mrf.mxu1  ;;  %v5096_v4 = vpack.c.bf16 %v28698_v22, %v28698_v22 }
 0x3cc   : > { %v348_v27 = vld [vmem:[%s26866_s29 + $0x380] sm:$0xff] }
 0x3cd   : > { %v16703_v35 = vpop.f32.mrf.mxu0  ;;  %v16743_v36 = vpop.f32.mrf.mxu1  ;;  %18622 = vmatmul.mubr.bf16.vlgmr.msra.gmra.mxu0 %v5080_v18  ;;  %18662 = vmatmul.mubr.bf16.vlgmr.msra.gmra.mxu1 %v5082_v19  ;;  %v28717_v51 = vrot.slane %v348_v27, %v26895_v24 }
 0x3ce   : > { %v16704_v37 = vadd.f32 %v16703_v35, %v16664_v14  ;;  %18684 = vmatpush1.bf16.xpose.msra.mxu0 %v25936_v23  ;;  %18724 = vmatpush1.bf16.xpose.msra.mxu1 %v25938_v25  ;;  %v5644_v14 = vld [vmem:[%s26873_s24 + $0x6f8] sm:$0xff]  ;;  %v28701_v23 = vrot.slane %v2507_v6, %v26895_v24  ;;  %v25949_v25 = vcombine.high %v5643_v8, %v6027_v13  ;;  %v6031_v6 = vld [vmem:[%s26873_s24 + $0x1310] sm:$0x11] }
 0x3cf   : > { %v16705_v38 = vpop.f32.mrf.mxu0  ;;  %v16745_v39 = vpop.f32.mrf.mxu1  ;;  %18701 = vmatprep.mubr.bf16.mxu0 %v5085_v28  ;;  %18741 = vmatprep.mubr.bf16.mxu1 %v5087_v29  ;;  %v25951_v26 = vcombine.high %v5644_v14, %v6028_v15  ;;  %v2524_v35 = vcombine.high %v348_v27, %v348_v27 }
 0x3d0   : > { %v16744_v43 = vadd.f32 %v16743_v36, %v16704_v37  ;;  %18763 = vmatprep.subr.bf16.mxu0 %v25941_v32  ;;  %18803 = vmatprep.subr.bf16.mxu1 %v25943_v33  ;;  %v2522_v33 = vcombine.high %v28698_v22, %v28698_v22  ;;  %v2523_v34 = vcombine.high %v28701_v23, %v28701_v23  ;;  %v5645_v37 = vld [vmem:[%s26873_s24 + $0x700] sm:$0xff] }
 0x3d1   : > { %v16706_v45 = vpop.f32.mrf.mxu0  ;;  %v16746_v46 = vpop.f32.mrf.mxu1  ;;  %v5098_v5 = vpack.c.bf16 %v28701_v23, %v28701_v23 }
 0x3d2   : > { %v25948_v45 = vcombine.low %v5643_v8, %v6027_v13  ;;  %v25950_v46 = vcombine.low %v5644_v14, %v6028_v15  ;;  %v5097_v49 = vpack.c.bf16 %v2522_v33, %v2522_v33  ;;  %v5099_v50 = vpack.c.bf16 %v2523_v34, %v2523_v34  ;;  %v6032_v8 = vld [vmem:[%s26873_s24 + $0x1318] sm:$0x11] }
 0x3d3   : > { %v16707_v54 = vpop.f32.mrf.mxu0  ;;  %v16747_v55 = vpop.f32.mrf.mxu1  ;;  %v5100_v33 = vpack.c.bf16 %v28717_v51, %v28717_v51 }
 0x3d4   : > { %v349_v55 = vld [vmem:[%s26866_s29 + $0x388] sm:$0xff] }
 0x3d5   : > { %v16783_v63 = vpop.f32.mrf.mxu0  ;;  %v16823_v0 = vpop.f32.mrf.mxu1  ;;  %18702 = vmatmul.mubr.bf16.vlgmr.msra.gmra.mxu0 %v5084_v47  ;;  %18742 = vmatmul.mubr.bf16.vlgmr.msra.gmra.mxu1 %v5086_v48  ;;  %v28736_v15 = vrot.slane %v349_v55, %v26895_v24 }
 0x3d6   : > { %v16784_v1 = vadd.f32 %v16783_v63, %v16744_v43  ;;  %18764 = vmatpush1.bf16.xpose.msra.mxu0 %v25940_v52  ;;  %18804 = vmatpush1.bf16.xpose.msra.mxu1 %v25942_v53  ;;  %v5646_v43 = vld [vmem:[%s26873_s24 + $0x708] sm:$0xff]  ;;  %v28720_v52 = vrot.slane %v2524_v35, %v26895_v24  ;;  %v25953_v53 = vcombine.high %v5645_v37, %v6029_v42  ;;  %v6033_v35 = vld [vmem:[%s26873_s24 + $0x1320] sm:$0x11] }
 0x3d7   : > { %v16785_v2 = vpop.f32.mrf.mxu0  ;;  %v16825_v3 = vpop.f32.mrf.mxu1  ;;  %18781 = vmatprep.mubr.bf16.mxu0 %v5089_v56  ;;  %18821 = vmatprep.mubr.bf16.mxu1 %v5091_v57  ;;  %v25955_v54 = vcombine.high %v5646_v43, %v6030_v44  ;;  %v2541_v63 = vcombine.high %v349_v55, %v349_v55 }
 0x3d8   : > { %v16824_v7 = vadd.f32 %v16823_v0, %v16784_v1  ;;  %18843 = vmatprep.subr.bf16.mxu0 %v25945_v60  ;;  %18883 = vmatprep.subr.bf16.mxu1 %v25947_v61  ;;  %v2539_v61 = vcombine.high %v28717_v51, %v28717_v51  ;;  %v2540_v62 = vcombine.high %v28720_v52, %v28720_v52  ;;  %v5647_v1 = vld [vmem:[%s26873_s24 + $0x710] sm:$0xff] }
 0x3d9   : > { %v16786_v9 = vpop.f32.mrf.mxu0  ;;  %v16826_v10 = vpop.f32.mrf.mxu1  ;;  %v5102_v34 = vpack.c.bf16 %v28720_v52, %v28720_v52 }
 0x3da   : > { %v25952_v9 = vcombine.low %v5645_v37, %v6029_v42  ;;  %v25954_v10 = vcombine.low %v5646_v43, %v6030_v44  ;;  %v5101_v13 = vpack.c.bf16 %v2539_v61, %v2539_v61  ;;  %v5103_v14 = vpack.c.bf16 %v2540_v62, %v2540_v62  ;;  %v6034_v37 = vld [vmem:[%s26873_s24 + $0x1328] sm:$0x11] }
 0x3db   : > { %v16787_v18 = vpop.f32.mrf.mxu0  ;;  %v16827_v19 = vpop.f32.mrf.mxu1  ;;  %v5104_v61 = vpack.c.bf16 %v28736_v15, %v28736_v15 }
 0x3dc   : > { %v350_v19 = vld [vmem:[%s26866_s29 + $0x390] sm:$0xff] }
 0x3dd   : > { %v16863_v28 = vpop.f32.mrf.mxu0  ;;  %v16903_v29 = vpop.f32.mrf.mxu1  ;;  %18782 = vmatmul.mubr.bf16.vlgmr.msra.gmra.mxu0 %v5088_v11  ;;  %18822 = vmatmul.mubr.bf16.vlgmr.msra.gmra.mxu1 %v5090_v12  ;;  %v28755_v44 = vrot.slane %v350_v19, %v26895_v24 }
 0x3de   : > { %v16864_v30 = vadd.f32 %v16863_v28, %v16824_v7  ;;  %18844 = vmatpush1.bf16.xpose.msra.mxu0 %v25944_v16  ;;  %18884 = vmatpush1.bf16.xpose.msra.mxu1 %v25946_v17  ;;  %v5648_v7 = vld [vmem:[%s26873_s24 + $0x718] sm:$0xff]  ;;  %v28739_v16 = vrot.slane %v2541_v63, %v26895_v24  ;;  %v25957_v17 = vcombine.high %v5647_v1, %v6031_v6  ;;  %v6035_v63 = vld [vmem:[%s26873_s24 + $0x1330] sm:$0x11] }
 0x3df   : > { %v16865_v31 = vpop.f32.mrf.mxu0  ;;  %v16905_v32 = vpop.f32.mrf.mxu1  ;;  %18861 = vmatprep.mubr.bf16.mxu0 %v5093_v20  ;;  %18901 = vmatprep.mubr.bf16.mxu1 %v5095_v21  ;;  %v25959_v18 = vcombine.high %v5648_v7, %v6032_v8  ;;  %v2558_v28 = vcombine.high %v350_v19, %v350_v19 }
 0x3e0   : > { %v16904_v36 = vadd.f32 %v16903_v29, %v16864_v30  ;;  %18923 = vmatprep.subr.bf16.mxu0 %v25949_v25  ;;  %18963 = vmatprep.subr.bf16.mxu1 %v25951_v26  ;;  %v2556_v26 = vcombine.high %v28736_v15, %v28736_v15  ;;  %v2557_v27 = vcombine.high %v28739_v16, %v28739_v16  ;;  %v5649_v30 = vld [vmem:[%s26873_s24 + $0x720] sm:$0xff] }
 0x3e1   : > { %v16866_v38 = vpop.f32.mrf.mxu0  ;;  %v16906_v39 = vpop.f32.mrf.mxu1  ;;  %v5106_v62 = vpack.c.bf16 %v28739_v16, %v28739_v16 }
 0x3e2   : > { %v25956_v38 = vcombine.low %v5647_v1, %v6031_v6  ;;  %v25958_v39 = vcombine.low %v5648_v7, %v6032_v8  ;;  %v5105_v42 = vpack.c.bf16 %v2556_v26, %v2556_v26  ;;  %v5107_v43 = vpack.c.bf16 %v2557_v27, %v2557_v27  ;;  %v6036_v1 = vld [vmem:[%s26873_s24 + $0x1338] sm:$0x11] }
 0x3e3   : > { %v16867_v47 = vpop.f32.mrf.mxu0  ;;  %v16907_v48 = vpop.f32.mrf.mxu1  ;;  %v5108_v26 = vpack.c.bf16 %v28755_v44, %v28755_v44 }
 0x3e4   : > { %v351_v48 = vld [vmem:[%s26866_s29 + $0x398] sm:$0xff] }
 0x3e5   : > { %v16943_v56 = vpop.f32.mrf.mxu0  ;;  %v16983_v57 = vpop.f32.mrf.mxu1  ;;  %18862 = vmatmul.mubr.bf16.vlgmr.msra.gmra.mxu0 %v5092_v40  ;;  %18902 = vmatmul.mubr.bf16.vlgmr.msra.gmra.mxu1 %v5094_v41  ;;  %v28774_v8 = vrot.slane %v351_v48, %v26895_v24 }
 0x3e6   : > { %v16944_v58 = vadd.f32 %v16943_v56, %v16904_v36  ;;  %18924 = vmatpush1.bf16.xpose.msra.mxu0 %v25948_v45  ;;  %18964 = vmatpush1.bf16.xpose.msra.mxu1 %v25950_v46  ;;  %v5650_v36 = vld [vmem:[%s26873_s24 + $0x728] sm:$0xff]  ;;  %v28758_v45 = vrot.slane %v2558_v28, %v26895_v24  ;;  %v25961_v46 = vcombine.high %v5649_v30, %v6033_v35  ;;  %v6037_v28 = vld [vmem:[%s26873_s24 + $0x1340] sm:$0x11] }
 0x3e7   : > { %v16945_v59 = vpop.f32.mrf.mxu0  ;;  %v16985_v60 = vpop.f32.mrf.mxu1  ;;  %18941 = vmatprep.mubr.bf16.mxu0 %v5097_v49  ;;  %18981 = vmatprep.mubr.bf16.mxu1 %v5099_v50  ;;  %v25963_v47 = vcombine.high %v5650_v36, %v6034_v37  ;;  %v2575_v56 = vcombine.high %v351_v48, %v351_v48 }
 0x3e8   : > { %v16984_v0 = vadd.f32 %v16983_v57, %v16944_v58  ;;  %19003 = vmatprep.subr.bf16.mxu0 %v25953_v53  ;;  %19043 = vmatprep.subr.bf16.mxu1 %v25955_v54  ;;  %v2573_v54 = vcombine.high %v28755_v44, %v28755_v44  ;;  %v2574_v55 = vcombine.high %v28758_v45, %v28758_v45  ;;  %v5651_v58 = vld [vmem:[%s26873_s24 + $0x730] sm:$0xff] }
 0x3e9   : > { %v16946_v2 = vpop.f32.mrf.mxu0  ;;  %v16986_v3 = vpop.f32.mrf.mxu1  ;;  %v5110_v27 = vpack.c.bf16 %v28758_v45, %v28758_v45 }
 0x3ea   : > { %v25960_v2 = vcombine.low %v5649_v30, %v6033_v35  ;;  %v25962_v3 = vcombine.low %v5650_v36, %v6034_v37  ;;  %v5109_v6 = vpack.c.bf16 %v2573_v54, %v2573_v54  ;;  %v5111_v7 = vpack.c.bf16 %v2574_v55, %v2574_v55  ;;  %v6038_v30 = vld [vmem:[%s26873_s24 + $0x1348] sm:$0x11] }
 0x3eb   : > { %v16947_v11 = vpop.f32.mrf.mxu0  ;;  %v16987_v12 = vpop.f32.mrf.mxu1  ;;  %v5112_v54 = vpack.c.bf16 %v28774_v8, %v28774_v8 }
 0x3ec   : > { %v352_v12 = vld [vmem:[%s26866_s29 + $0x3a0] sm:$0xff] }
 0x3ed   : > { %v17023_v20 = vpop.f32.mrf.mxu0  ;;  %v17063_v21 = vpop.f32.mrf.mxu1  ;;  %18942 = vmatmul.mubr.bf16.vlgmr.msra.gmra.mxu0 %v5096_v4  ;;  %18982 = vmatmul.mubr.bf16.vlgmr.msra.gmra.mxu1 %v5098_v5  ;;  %v28793_v37 = vrot.slane %v352_v12, %v26895_v24 }
 0x3ee   : > { %v17024_v22 = vadd.f32 %v17023_v20, %v16984_v0  ;;  %19004 = vmatpush1.bf16.xpose.msra.mxu0 %v25952_v9  ;;  %19044 = vmatpush1.bf16.xpose.msra.mxu1 %v25954_v10  ;;  %v5652_v0 = vld [vmem:[%s26873_s24 + $0x738] sm:$0xff]  ;;  %v28777_v9 = vrot.slane %v2575_v56, %v26895_v24  ;;  %v25965_v10 = vcombine.high %v5651_v58, %v6035_v63  ;;  %v6039_v56 = vld [vmem:[%s26873_s24 + $0x1350] sm:$0x11] }
 0x3ef   : > { %v17025_v23 = vpop.f32.mrf.mxu0  ;;  %v17065_v25 = vpop.f32.mrf.mxu1  ;;  %19021 = vmatprep.mubr.bf16.mxu0 %v5101_v13  ;;  %19061 = vmatprep.mubr.bf16.mxu1 %v5103_v14  ;;  %v25967_v11 = vcombine.high %v5652_v0, %v6036_v1  ;;  %v2592_v20 = vcombine.high %v352_v12, %v352_v12 }
 0x3f0   : > { %v17064_v29 = vadd.f32 %v17063_v21, %v17024_v22  ;;  %19083 = vmatprep.subr.bf16.mxu0 %v25957_v17  ;;  %19123 = vmatprep.subr.bf16.mxu1 %v25959_v18  ;;  %v2590_v18 = vcombine.high %v28774_v8, %v28774_v8  ;;  %v2591_v19 = vcombine.high %v28777_v9, %v28777_v9  ;;  %v5653_v22 = vld [vmem:[%s26873_s24 + $0x740] sm:$0xff] }
 0x3f1   : > { %v17026_v31 = vpop.f32.mrf.mxu0  ;;  %v17066_v32 = vpop.f32.mrf.mxu1  ;;  %v5114_v55 = vpack.c.bf16 %v28777_v9, %v28777_v9 }
 0x3f2   : > { %v25964_v31 = vcombine.low %v5651_v58, %v6035_v63  ;;  %v25966_v32 = vcombine.low %v5652_v0, %v6036_v1  ;;  %v5113_v35 = vpack.c.bf16 %v2590_v18, %v2590_v18  ;;  %v5115_v36 = vpack.c.bf16 %v2591_v19, %v2591_v19  ;;  %v6040_v58 = vld [vmem:[%s26873_s24 + $0x1358] sm:$0x11] }
 0x3f3   : > { %v17027_v40 = vpop.f32.mrf.mxu0  ;;  %v17067_v41 = vpop.f32.mrf.mxu1  ;;  %v5116_v18 = vpack.c.bf16 %v28793_v37, %v28793_v37 }
 0x3f4   : > { %v353_v41 = vld [vmem:[%s26866_s29 + $0x3a8] sm:$0xff] }
 0x3f5   : > { %v17103_v49 = vpop.f32.mrf.mxu0  ;;  %v17143_v50 = vpop.f32.mrf.mxu1  ;;  %19022 = vmatmul.mubr.bf16.vlgmr.msra.gmra.mxu0 %v5100_v33  ;;  %19062 = vmatmul.mubr.bf16.vlgmr.msra.gmra.mxu1 %v5102_v34  ;;  %v28812_v1 = vrot.slane %v353_v41, %v26895_v24 }
 0x3f6   : > { %v17104_v51 = vadd.f32 %v17103_v49, %v17064_v29  ;;  %19084 = vmatpush1.bf16.xpose.msra.mxu0 %v25956_v38  ;;  %19124 = vmatpush1.bf16.xpose.msra.mxu1 %v25958_v39  ;;  %v5654_v29 = vld [vmem:[%s26873_s24 + $0x748] sm:$0xff]  ;;  %v28796_v38 = vrot.slane %v2592_v20, %v26895_v24  ;;  %v25969_v39 = vcombine.high %v5653_v22, %v6037_v28  ;;  %v6041_v20 = vld [vmem:[%s26873_s24 + $0x1360] sm:$0x11] }
 0x3f7   : > { %v17105_v52 = vpop.f32.mrf.mxu0  ;;  %v17145_v53 = vpop.f32.mrf.mxu1  ;;  %19101 = vmatprep.mubr.bf16.mxu0 %v5105_v42  ;;  %19141 = vmatprep.mubr.bf16.mxu1 %v5107_v43  ;;  %v25971_v40 = vcombine.high %v5654_v29, %v6038_v30  ;;  %v2609_v49 = vcombine.high %v353_v41, %v353_v41 }
 0x3f8   : > { %v17144_v57 = vadd.f32 %v17143_v50, %v17104_v51  ;;  %19163 = vmatprep.subr.bf16.mxu0 %v25961_v46  ;;  %19203 = vmatprep.subr.bf16.mxu1 %v25963_v47  ;;  %v2607_v47 = vcombine.high %v28793_v37, %v28793_v37  ;;  %v2608_v48 = vcombine.high %v28796_v38, %v28796_v38  ;;  %v5655_v51 = vld [vmem:[%s26873_s24 + $0x750] sm:$0xff] }
 0x3f9   : > { %v17106_v59 = vpop.f32.mrf.mxu0  ;;  %v17146_v60 = vpop.f32.mrf.mxu1  ;;  %v5118_v19 = vpack.c.bf16 %v28796_v38, %v28796_v38 }
 0x3fa   : > { %v25968_v59 = vcombine.low %v5653_v22, %v6037_v28  ;;  %v25970_v60 = vcombine.low %v5654_v29, %v6038_v30  ;;  %v5117_v63 = vpack.c.bf16 %v2607_v47, %v2607_v47  ;;  %v5119_v0 = vpack.c.bf16 %v2608_v48, %v2608_v48  ;;  %v6042_v22 = vld [vmem:[%s26873_s24 + $0x1368] sm:$0x11] }
 0x3fb   : > { %v17107_v4 = vpop.f32.mrf.mxu0  ;;  %v17147_v5 = vpop.f32.mrf.mxu1  ;;  %v5120_v47 = vpack.c.bf16 %v28812_v1, %v28812_v1 }
 0x3fc   : > { %v354_v5 = vld [vmem:[%s26866_s29 + $0x3b0] sm:$0xff] }
 0x3fd   : > { %v17183_v13 = vpop.f32.mrf.mxu0  ;;  %v17223_v14 = vpop.f32.mrf.mxu1  ;;  %19102 = vmatmul.mubr.bf16.vlgmr.msra.gmra.mxu0 %v5104_v61  ;;  %19142 = vmatmul.mubr.bf16.vlgmr.msra.gmra.mxu1 %v5106_v62  ;;  %v28831_v30 = vrot.slane %v354_v5, %v26895_v24 }
 0x3fe   : > { %v17184_v15 = vadd.f32 %v17183_v13, %v17144_v57  ;;  %19164 = vmatpush1.bf16.xpose.msra.mxu0 %v25960_v2  ;;  %19204 = vmatpush1.bf16.xpose.msra.mxu1 %v25962_v3  ;;  %v5656_v57 = vld [vmem:[%s26873_s24 + $0x758] sm:$0xff]  ;;  %v28815_v2 = vrot.slane %v2609_v49, %v26895_v24  ;;  %v25973_v3 = vcombine.high %v5655_v51, %v6039_v56  ;;  %v6043_v49 = vld [vmem:[%s26873_s24 + $0x1370] sm:$0x11] }
 0x3ff   : > { %v17185_v16 = vpop.f32.mrf.mxu0  ;;  %v17225_v17 = vpop.f32.mrf.mxu1  ;;  %19181 = vmatprep.mubr.bf16.mxu0 %v5109_v6  ;;  %19221 = vmatprep.mubr.bf16.mxu1 %v5111_v7  ;;  %v25975_v4 = vcombine.high %v5656_v57, %v6040_v58  ;;  %v2626_v13 = vcombine.high %v354_v5, %v354_v5 }
 0x400   : > { %v17224_v21 = vadd.f32 %v17223_v14, %v17184_v15  ;;  %19243 = vmatprep.subr.bf16.mxu0 %v25965_v10  ;;  %19283 = vmatprep.subr.bf16.mxu1 %v25967_v11  ;;  %v2624_v11 = vcombine.high %v28812_v1, %v28812_v1  ;;  %v2625_v12 = vcombine.high %v28815_v2, %v28815_v2  ;;  %v5657_v15 = vld [vmem:[%s26873_s24 + $0x760] sm:$0xff] }
 0x401   : > { %v17186_v23 = vpop.f32.mrf.mxu0  ;;  %v17226_v25 = vpop.f32.mrf.mxu1  ;;  %v5122_v48 = vpack.c.bf16 %v28815_v2, %v28815_v2 }
 0x402   : > { %v25972_v23 = vcombine.low %v5655_v51, %v6039_v56  ;;  %v25974_v25 = vcombine.low %v5656_v57, %v6040_v58  ;;  %v5121_v28 = vpack.c.bf16 %v2624_v11, %v2624_v11  ;;  %v5123_v29 = vpack.c.bf16 %v2625_v12, %v2625_v12  ;;  %v6044_v51 = vld [vmem:[%s26873_s24 + $0x1378] sm:$0x11] }
 0x403   : > { %v17187_v33 = vpop.f32.mrf.mxu0  ;;  %v17227_v34 = vpop.f32.mrf.mxu1  ;;  %v5124_v11 = vpack.c.bf16 %v28831_v30, %v28831_v30 }
 0x404   : > { %v355_v34 = vld [vmem:[%s26866_s29 + $0x3b8] sm:$0xff] }
 0x405   : > { %v17263_v42 = vpop.f32.mrf.mxu0  ;;  %v17303_v43 = vpop.f32.mrf.mxu1  ;;  %19182 = vmatmul.mubr.bf16.vlgmr.msra.gmra.mxu0 %v5108_v26  ;;  %19222 = vmatmul.mubr.bf16.vlgmr.msra.gmra.mxu1 %v5110_v27  ;;  %v28850_v58 = vrot.slane %v355_v34, %v26895_v24 }
 0x406   : > { %v17264_v44 = vadd.f32 %v17263_v42, %v17224_v21  ;;  %19244 = vmatpush1.bf16.xpose.msra.mxu0 %v25964_v31  ;;  %19284 = vmatpush1.bf16.xpose.msra.mxu1 %v25966_v32  ;;  %v5658_v21 = vld [vmem:[%s26873_s24 + $0x768] sm:$0xff]  ;;  %v28834_v31 = vrot.slane %v2626_v13, %v26895_v24  ;;  %v25977_v32 = vcombine.high %v5657_v15, %v6041_v20  ;;  %v6045_v13 = vld [vmem:[%s26873_s24 + $0x1380] sm:$0x11] }
 0x407   : > { %v17265_v45 = vpop.f32.mrf.mxu0  ;;  %v17305_v46 = vpop.f32.mrf.mxu1  ;;  %19261 = vmatprep.mubr.bf16.mxu0 %v5113_v35  ;;  %19301 = vmatprep.mubr.bf16.mxu1 %v5115_v36  ;;  %v25979_v33 = vcombine.high %v5658_v21, %v6042_v22  ;;  %v2643_v42 = vcombine.high %v355_v34, %v355_v34 }
 0x408   : > { %v17304_v50 = vadd.f32 %v17303_v43, %v17264_v44  ;;  %19323 = vmatprep.subr.bf16.mxu0 %v25969_v39  ;;  %19363 = vmatprep.subr.bf16.mxu1 %v25971_v40  ;;  %v2641_v40 = vcombine.high %v28831_v30, %v28831_v30  ;;  %v2642_v41 = vcombine.high %v28834_v31, %v28834_v31  ;;  %v5659_v44 = vld [vmem:[%s26873_s24 + $0x770] sm:$0xff] }
 0x409   : > { %v17266_v52 = vpop.f32.mrf.mxu0  ;;  %v17306_v53 = vpop.f32.mrf.mxu1  ;;  %v5126_v12 = vpack.c.bf16 %v28834_v31, %v28834_v31 }
 0x40a   : > { %v25976_v52 = vcombine.low %v5657_v15, %v6041_v20  ;;  %v25978_v53 = vcombine.low %v5658_v21, %v6042_v22  ;;  %v5125_v56 = vpack.c.bf16 %v2641_v40, %v2641_v40  ;;  %v5127_v57 = vpack.c.bf16 %v2642_v41, %v2642_v41  ;;  %v6046_v15 = vld [vmem:[%s26873_s24 + $0x1388] sm:$0x11] }
 0x40b   : > { %v17267_v61 = vpop.f32.mrf.mxu0  ;;  %v17307_v62 = vpop.f32.mrf.mxu1  ;;  %v5128_v40 = vpack.c.bf16 %v28850_v58, %v28850_v58 }
 0x40c   : > { %v356_v62 = vld [vmem:[%s26866_s29 + $0x3c0] sm:$0xff] }
 0x40d   : > { %v17343_v6 = vpop.f32.mrf.mxu0  ;;  %v17383_v7 = vpop.f32.mrf.mxu1  ;;  %19262 = vmatmul.mubr.bf16.vlgmr.msra.gmra.mxu0 %v5112_v54  ;;  %19302 = vmatmul.mubr.bf16.vlgmr.msra.gmra.mxu1 %v5114_v55  ;;  %v28869_v22 = vrot.slane %v356_v62, %v26895_v24 }
 0x40e   : > { %v17344_v8 = vadd.f32 %v17343_v6, %v17304_v50  ;;  %19324 = vmatpush1.bf16.xpose.msra.mxu0 %v25968_v59  ;;  %19364 = vmatpush1.bf16.xpose.msra.mxu1 %v25970_v60  ;;  %v5660_v50 = vld [vmem:[%s26873_s24 + $0x778] sm:$0xff]  ;;  %v28853_v59 = vrot.slane %v2643_v42, %v26895_v24  ;;  %v25981_v60 = vcombine.high %v5659_v44, %v6043_v49  ;;  %v6047_v42 = vld [vmem:[%s26873_s24 + $0x1390] sm:$0x11] }
 0x40f   : > { %v17345_v9 = vpop.f32.mrf.mxu0  ;;  %v17385_v10 = vpop.f32.mrf.mxu1  ;;  %19341 = vmatprep.mubr.bf16.mxu0 %v5117_v63  ;;  %19381 = vmatprep.mubr.bf16.mxu1 %v5119_v0  ;;  %v25983_v61 = vcombine.high %v5660_v50, %v6044_v51  ;;  %v2660_v6 = vcombine.high %v356_v62, %v356_v62 }
 0x410   : > { %v17384_v14 = vadd.f32 %v17383_v7, %v17344_v8  ;;  %19403 = vmatprep.subr.bf16.mxu0 %v25973_v3  ;;  %19443 = vmatprep.subr.bf16.mxu1 %v25975_v4  ;;  %v2658_v4 = vcombine.high %v28850_v58, %v28850_v58  ;;  %v2659_v5 = vcombine.high %v28853_v59, %v28853_v59  ;;  %v5661_v8 = vld [vmem:[%s26873_s24 + $0x780] sm:$0xff] }
 0x411   : > { %v17346_v16 = vpop.f32.mrf.mxu0  ;;  %v17386_v17 = vpop.f32.mrf.mxu1  ;;  %v5130_v41 = vpack.c.bf16 %v28853_v59, %v28853_v59 }
 0x412   : > { %v25980_v16 = vcombine.low %v5659_v44, %v6043_v49  ;;  %v25982_v17 = vcombine.low %v5660_v50, %v6044_v51  ;;  %v5129_v20 = vpack.c.bf16 %v2658_v4, %v2658_v4  ;;  %v5131_v21 = vpack.c.bf16 %v2659_v5, %v2659_v5  ;;  %v6048_v44 = vld [vmem:[%s26873_s24 + $0x1398] sm:$0x11] }
 0x413   : > { %v17347_v26 = vpop.f32.mrf.mxu0  ;;  %v17387_v27 = vpop.f32.mrf.mxu1  ;;  %v5132_v4 = vpack.c.bf16 %v28869_v22, %v28869_v22 }
 0x414   : > { %v357_v27 = vld [vmem:[%s26866_s29 + $0x3c8] sm:$0xff] }
 0x415   : > { %v17423_v35 = vpop.f32.mrf.mxu0  ;;  %v17463_v36 = vpop.f32.mrf.mxu1  ;;  %19342 = vmatmul.mubr.bf16.vlgmr.msra.gmra.mxu0 %v5116_v18  ;;  %19382 = vmatmul.mubr.bf16.vlgmr.msra.gmra.mxu1 %v5118_v19  ;;  %v28888_v51 = vrot.slane %v357_v27, %v26895_v24 }
 0x416   : > { %v17424_v37 = vadd.f32 %v17423_v35, %v17384_v14  ;;  %19404 = vmatpush1.bf16.xpose.msra.mxu0 %v25972_v23  ;;  %19444 = vmatpush1.bf16.xpose.msra.mxu1 %v25974_v25  ;;  %v5662_v14 = vld [vmem:[%s26873_s24 + $0x788] sm:$0xff]  ;;  %v28872_v23 = vrot.slane %v2660_v6, %v26895_v24  ;;  %v25985_v25 = vcombine.high %v5661_v8, %v6045_v13  ;;  %v6049_v6 = vld [vmem:[%s26873_s24 + $0x13a0] sm:$0x11] }
 0x417   : > { %v17425_v38 = vpop.f32.mrf.mxu0  ;;  %v17465_v39 = vpop.f32.mrf.mxu1  ;;  %19421 = vmatprep.mubr.bf16.mxu0 %v5121_v28  ;;  %19461 = vmatprep.mubr.bf16.mxu1 %v5123_v29  ;;  %v25987_v26 = vcombine.high %v5662_v14, %v6046_v15  ;;  %v2677_v35 = vcombine.high %v357_v27, %v357_v27 }
 0x418   : > { %v17464_v43 = vadd.f32 %v17463_v36, %v17424_v37  ;;  %19483 = vmatprep.subr.bf16.mxu0 %v25977_v32  ;;  %19523 = vmatprep.subr.bf16.mxu1 %v25979_v33  ;;  %v2675_v33 = vcombine.high %v28869_v22, %v28869_v22  ;;  %v2676_v34 = vcombine.high %v28872_v23, %v28872_v23  ;;  %v5663_v37 = vld [vmem:[%s26873_s24 + $0x790] sm:$0xff] }
 0x419   : > { %v17426_v45 = vpop.f32.mrf.mxu0  ;;  %v17466_v46 = vpop.f32.mrf.mxu1  ;;  %v5134_v5 = vpack.c.bf16 %v28872_v23, %v28872_v23 }
 0x41a   : > { %v25984_v45 = vcombine.low %v5661_v8, %v6045_v13  ;;  %v25986_v46 = vcombine.low %v5662_v14, %v6046_v15  ;;  %v5133_v49 = vpack.c.bf16 %v2675_v33, %v2675_v33  ;;  %v5135_v50 = vpack.c.bf16 %v2676_v34, %v2676_v34  ;;  %v6050_v8 = vld [vmem:[%s26873_s24 + $0x13a8] sm:$0x11] }
 0x41b   : > { %v17427_v54 = vpop.f32.mrf.mxu0  ;;  %v17467_v55 = vpop.f32.mrf.mxu1  ;;  %v5136_v33 = vpack.c.bf16 %v28888_v51, %v28888_v51 }
 0x41c   : > { %v358_v55 = vld [vmem:[%s26866_s29 + $0x3d0] sm:$0xff] }
 0x41d   : > { %v17503_v63 = vpop.f32.mrf.mxu0  ;;  %v17543_v0 = vpop.f32.mrf.mxu1  ;;  %19422 = vmatmul.mubr.bf16.vlgmr.msra.gmra.mxu0 %v5120_v47  ;;  %19462 = vmatmul.mubr.bf16.vlgmr.msra.gmra.mxu1 %v5122_v48  ;;  %v28907_v15 = vrot.slane %v358_v55, %v26895_v24 }
 0x41e   : > { %v17504_v1 = vadd.f32 %v17503_v63, %v17464_v43  ;;  %19484 = vmatpush1.bf16.xpose.msra.mxu0 %v25976_v52  ;;  %19524 = vmatpush1.bf16.xpose.msra.mxu1 %v25978_v53  ;;  %v5664_v43 = vld [vmem:[%s26873_s24 + $0x798] sm:$0xff]  ;;  %v28891_v52 = vrot.slane %v2677_v35, %v26895_v24  ;;  %v25989_v53 = vcombine.high %v5663_v37, %v6047_v42  ;;  %v6051_v35 = vld [vmem:[%s26873_s24 + $0x13b0] sm:$0x11] }
 0x41f   : > { %v17505_v2 = vpop.f32.mrf.mxu0  ;;  %v17545_v3 = vpop.f32.mrf.mxu1  ;;  %19501 = vmatprep.mubr.bf16.mxu0 %v5125_v56  ;;  %19541 = vmatprep.mubr.bf16.mxu1 %v5127_v57  ;;  %v25991_v54 = vcombine.high %v5664_v43, %v6048_v44  ;;  %v2694_v63 = vcombine.high %v358_v55, %v358_v55 }
 0x420   : > { %v17544_v7 = vadd.f32 %v17543_v0, %v17504_v1  ;;  %19563 = vmatprep.subr.bf16.mxu0 %v25981_v60  ;;  %19603 = vmatprep.subr.bf16.mxu1 %v25983_v61  ;;  %v2692_v61 = vcombine.high %v28888_v51, %v28888_v51  ;;  %v2693_v62 = vcombine.high %v28891_v52, %v28891_v52  ;;  %v5665_v1 = vld [vmem:[%s26873_s24 + $0x7a0] sm:$0xff] }
 0x421   : > { %v17506_v9 = vpop.f32.mrf.mxu0  ;;  %v17546_v10 = vpop.f32.mrf.mxu1  ;;  %v5138_v34 = vpack.c.bf16 %v28891_v52, %v28891_v52 }
 0x422   : > { %v25988_v9 = vcombine.low %v5663_v37, %v6047_v42  ;;  %v25990_v10 = vcombine.low %v5664_v43, %v6048_v44  ;;  %v5137_v13 = vpack.c.bf16 %v2692_v61, %v2692_v61  ;;  %v5139_v14 = vpack.c.bf16 %v2693_v62, %v2693_v62  ;;  %v6052_v37 = vld [vmem:[%s26873_s24 + $0x13b8] sm:$0x11] }
 0x423   : > { %v17507_v18 = vpop.f32.mrf.mxu0  ;;  %v17547_v19 = vpop.f32.mrf.mxu1  ;;  %v5140_v61 = vpack.c.bf16 %v28907_v15, %v28907_v15 }
 0x424   : > { %v359_v19 = vld [vmem:[%s26866_s29 + $0x3d8] sm:$0xff] }
 0x425   : > { %v17583_v28 = vpop.f32.mrf.mxu0  ;;  %v17623_v29 = vpop.f32.mrf.mxu1  ;;  %19502 = vmatmul.mubr.bf16.vlgmr.msra.gmra.mxu0 %v5124_v11  ;;  %19542 = vmatmul.mubr.bf16.vlgmr.msra.gmra.mxu1 %v5126_v12  ;;  %v28926_v44 = vrot.slane %v359_v19, %v26895_v24 }
 0x426   : > { %v17584_v30 = vadd.f32 %v17583_v28, %v17544_v7  ;;  %19564 = vmatpush1.bf16.xpose.msra.mxu0 %v25980_v16  ;;  %19604 = vmatpush1.bf16.xpose.msra.mxu1 %v25982_v17  ;;  %v5666_v7 = vld [vmem:[%s26873_s24 + $0x7a8] sm:$0xff]  ;;  %v28910_v16 = vrot.slane %v2694_v63, %v26895_v24  ;;  %v25993_v17 = vcombine.high %v5665_v1, %v6049_v6  ;;  %v6053_v63 = vld [vmem:[%s26873_s24 + $0x13c0] sm:$0x11] }
 0x427   : > { %v17585_v31 = vpop.f32.mrf.mxu0  ;;  %v17625_v32 = vpop.f32.mrf.mxu1  ;;  %19581 = vmatprep.mubr.bf16.mxu0 %v5129_v20  ;;  %19621 = vmatprep.mubr.bf16.mxu1 %v5131_v21  ;;  %v25995_v18 = vcombine.high %v5666_v7, %v6050_v8  ;;  %v2711_v28 = vcombine.high %v359_v19, %v359_v19 }
 0x428   : > { %v17624_v36 = vadd.f32 %v17623_v29, %v17584_v30  ;;  %19643 = vmatprep.subr.bf16.mxu0 %v25985_v25  ;;  %19683 = vmatprep.subr.bf16.mxu1 %v25987_v26  ;;  %v2709_v26 = vcombine.high %v28907_v15, %v28907_v15  ;;  %v2710_v27 = vcombine.high %v28910_v16, %v28910_v16  ;;  %v5667_v30 = vld [vmem:[%s26873_s24 + $0x7b0] sm:$0xff] }
 0x429   : > { %v17586_v38 = vpop.f32.mrf.mxu0  ;;  %v17626_v39 = vpop.f32.mrf.mxu1  ;;  %v5142_v62 = vpack.c.bf16 %v28910_v16, %v28910_v16 }
 0x42a   : > { %v25992_v38 = vcombine.low %v5665_v1, %v6049_v6  ;;  %v25994_v39 = vcombine.low %v5666_v7, %v6050_v8  ;;  %v5141_v42 = vpack.c.bf16 %v2709_v26, %v2709_v26  ;;  %v5143_v43 = vpack.c.bf16 %v2710_v27, %v2710_v27  ;;  %v6054_v1 = vld [vmem:[%s26873_s24 + $0x13c8] sm:$0x11] }
 0x42b   : > { %v17587_v47 = vpop.f32.mrf.mxu0  ;;  %v17627_v48 = vpop.f32.mrf.mxu1  ;;  %v5144_v26 = vpack.c.bf16 %v28926_v44, %v28926_v44 }
 0x42c   : > { %v360_v48 = vld [vmem:[%s26866_s29 + $0x3e0] sm:$0xff] }
 0x42d   : > { %v17663_v56 = vpop.f32.mrf.mxu0  ;;  %v17703_v57 = vpop.f32.mrf.mxu1  ;;  %19582 = vmatmul.mubr.bf16.vlgmr.msra.gmra.mxu0 %v5128_v40  ;;  %19622 = vmatmul.mubr.bf16.vlgmr.msra.gmra.mxu1 %v5130_v41  ;;  %v28945_v8 = vrot.slane %v360_v48, %v26895_v24 }
 0x42e   : > { %v17664_v58 = vadd.f32 %v17663_v56, %v17624_v36  ;;  %19644 = vmatpush1.bf16.xpose.msra.mxu0 %v25984_v45  ;;  %19684 = vmatpush1.bf16.xpose.msra.mxu1 %v25986_v46  ;;  %v5668_v36 = vld [vmem:[%s26873_s24 + $0x7b8] sm:$0xff]  ;;  %v28929_v45 = vrot.slane %v2711_v28, %v26895_v24  ;;  %v25997_v46 = vcombine.high %v5667_v30, %v6051_v35  ;;  %v6055_v28 = vld [vmem:[%s26873_s24 + $0x13d0] sm:$0x11] }
 0x42f   : > { %v17665_v59 = vpop.f32.mrf.mxu0  ;;  %v17705_v60 = vpop.f32.mrf.mxu1  ;;  %19661 = vmatprep.mubr.bf16.mxu0 %v5133_v49  ;;  %19701 = vmatprep.mubr.bf16.mxu1 %v5135_v50  ;;  %v25999_v47 = vcombine.high %v5668_v36, %v6052_v37  ;;  %v2728_v56 = vcombine.high %v360_v48, %v360_v48 }
 0x430   : > { %v17704_v0 = vadd.f32 %v17703_v57, %v17664_v58  ;;  %19723 = vmatprep.subr.bf16.mxu0 %v25989_v53  ;;  %19763 = vmatprep.subr.bf16.mxu1 %v25991_v54  ;;  %v2726_v54 = vcombine.high %v28926_v44, %v28926_v44  ;;  %v2727_v55 = vcombine.high %v28929_v45, %v28929_v45  ;;  %v5669_v58 = vld [vmem:[%s26873_s24 + $0x7c0] sm:$0xff] }
 0x431   : > { %v17666_v2 = vpop.f32.mrf.mxu0  ;;  %v17706_v3 = vpop.f32.mrf.mxu1  ;;  %v5146_v27 = vpack.c.bf16 %v28929_v45, %v28929_v45 }
 0x432   : > { %v25996_v2 = vcombine.low %v5667_v30, %v6051_v35  ;;  %v25998_v3 = vcombine.low %v5668_v36, %v6052_v37  ;;  %v5145_v6 = vpack.c.bf16 %v2726_v54, %v2726_v54  ;;  %v5147_v7 = vpack.c.bf16 %v2727_v55, %v2727_v55  ;;  %v6056_v30 = vld [vmem:[%s26873_s24 + $0x13d8] sm:$0x11] }
 0x433   : > { %v17667_v11 = vpop.f32.mrf.mxu0  ;;  %v17707_v12 = vpop.f32.mrf.mxu1  ;;  %v5148_v54 = vpack.c.bf16 %v28945_v8, %v28945_v8 }
 0x434   : > { %v361_v12 = vld [vmem:[%s26866_s29 + $0x3e8] sm:$0xff] }
 0x435   : > { %v17743_v20 = vpop.f32.mrf.mxu0  ;;  %v17783_v21 = vpop.f32.mrf.mxu1  ;;  %19662 = vmatmul.mubr.bf16.vlgmr.msra.gmra.mxu0 %v5132_v4  ;;  %19702 = vmatmul.mubr.bf16.vlgmr.msra.gmra.mxu1 %v5134_v5  ;;  %v28964_v37 = vrot.slane %v361_v12, %v26895_v24 }
 0x436   : > { %v17744_v22 = vadd.f32 %v17743_v20, %v17704_v0  ;;  %19724 = vmatpush1.bf16.xpose.msra.mxu0 %v25988_v9  ;;  %19764 = vmatpush1.bf16.xpose.msra.mxu1 %v25990_v10  ;;  %v5670_v0 = vld [vmem:[%s26873_s24 + $0x7c8] sm:$0xff]  ;;  %v28948_v9 = vrot.slane %v2728_v56, %v26895_v24  ;;  %v26001_v10 = vcombine.high %v5669_v58, %v6053_v63  ;;  %v6057_v56 = vld [vmem:[%s26873_s24 + $0x13e0] sm:$0x11] }
 0x437   : > { %v17745_v23 = vpop.f32.mrf.mxu0  ;;  %v17785_v25 = vpop.f32.mrf.mxu1  ;;  %19741 = vmatprep.mubr.bf16.mxu0 %v5137_v13  ;;  %19781 = vmatprep.mubr.bf16.mxu1 %v5139_v14  ;;  %v26003_v11 = vcombine.high %v5670_v0, %v6054_v1  ;;  %v2745_v20 = vcombine.high %v361_v12, %v361_v12 }
 0x438   : > { %v17784_v29 = vadd.f32 %v17783_v21, %v17744_v22  ;;  %19803 = vmatprep.subr.bf16.mxu0 %v25993_v17  ;;  %19843 = vmatprep.subr.bf16.mxu1 %v25995_v18  ;;  %v2743_v18 = vcombine.high %v28945_v8, %v28945_v8  ;;  %v2744_v19 = vcombine.high %v28948_v9, %v28948_v9  ;;  %v5671_v22 = vld [vmem:[%s26873_s24 + $0x7d0] sm:$0xff] }
 0x439   : > { %v17746_v31 = vpop.f32.mrf.mxu0  ;;  %v17786_v32 = vpop.f32.mrf.mxu1  ;;  %v5150_v55 = vpack.c.bf16 %v28948_v9, %v28948_v9 }
 0x43a   : > { %v26000_v31 = vcombine.low %v5669_v58, %v6053_v63  ;;  %v26002_v32 = vcombine.low %v5670_v0, %v6054_v1  ;;  %v5149_v35 = vpack.c.bf16 %v2743_v18, %v2743_v18  ;;  %v5151_v36 = vpack.c.bf16 %v2744_v19, %v2744_v19  ;;  %v6058_v58 = vld [vmem:[%s26873_s24 + $0x13e8] sm:$0x11] }
 0x43b   : > { %v17747_v40 = vpop.f32.mrf.mxu0  ;;  %v17787_v41 = vpop.f32.mrf.mxu1  ;;  %v5152_v18 = vpack.c.bf16 %v28964_v37, %v28964_v37 }
 0x43c   : > { %v362_v41 = vld [vmem:[%s26866_s29 + $0x3f0] sm:$0xff] }
 0x43d   : > { %v17823_v49 = vpop.f32.mrf.mxu0  ;;  %v17863_v50 = vpop.f32.mrf.mxu1  ;;  %19742 = vmatmul.mubr.bf16.vlgmr.msra.gmra.mxu0 %v5136_v33  ;;  %19782 = vmatmul.mubr.bf16.vlgmr.msra.gmra.mxu1 %v5138_v34  ;;  %v28983_v1 = vrot.slane %v362_v41, %v26895_v24 }
 0x43e   : > { %v17824_v51 = vadd.f32 %v17823_v49, %v17784_v29  ;;  %19804 = vmatpush1.bf16.xpose.msra.mxu0 %v25992_v38  ;;  %19844 = vmatpush1.bf16.xpose.msra.mxu1 %v25994_v39  ;;  %v5672_v29 = vld [vmem:[%s26873_s24 + $0x7d8] sm:$0xff]  ;;  %v28967_v38 = vrot.slane %v2745_v20, %v26895_v24  ;;  %v26005_v39 = vcombine.high %v5671_v22, %v6055_v28  ;;  %v6059_v20 = vld [vmem:[%s26873_s24 + $0x13f0] sm:$0x11] }
 0x43f   : > { %v17825_v52 = vpop.f32.mrf.mxu0  ;;  %v17865_v53 = vpop.f32.mrf.mxu1  ;;  %19821 = vmatprep.mubr.bf16.mxu0 %v5141_v42  ;;  %19861 = vmatprep.mubr.bf16.mxu1 %v5143_v43  ;;  %v26007_v40 = vcombine.high %v5672_v29, %v6056_v30  ;;  %v2762_v49 = vcombine.high %v362_v41, %v362_v41 }
 0x440   : > { %v17864_v57 = vadd.f32 %v17863_v50, %v17824_v51  ;;  %19883 = vmatprep.subr.bf16.mxu0 %v25997_v46  ;;  %19923 = vmatprep.subr.bf16.mxu1 %v25999_v47  ;;  %v2760_v47 = vcombine.high %v28964_v37, %v28964_v37  ;;  %v2761_v48 = vcombine.high %v28967_v38, %v28967_v38  ;;  %v5673_v51 = vld [vmem:[%s26873_s24 + $0x7e0] sm:$0xff] }
 0x441   : > { %v17826_v59 = vpop.f32.mrf.mxu0  ;;  %v17866_v60 = vpop.f32.mrf.mxu1  ;;  %v5154_v19 = vpack.c.bf16 %v28967_v38, %v28967_v38 }
 0x442   : > { %v26004_v59 = vcombine.low %v5671_v22, %v6055_v28  ;;  %v26006_v60 = vcombine.low %v5672_v29, %v6056_v30  ;;  %v5153_v63 = vpack.c.bf16 %v2760_v47, %v2760_v47  ;;  %v5155_v0 = vpack.c.bf16 %v2761_v48, %v2761_v48  ;;  %v6060_v22 = vld [vmem:[%s26873_s24 + $0x13f8] sm:$0x11] }
 0x443   : > { %v17827_v4 = vpop.f32.mrf.mxu0  ;;  %v17867_v5 = vpop.f32.mrf.mxu1  ;;  %v5156_v47 = vpack.c.bf16 %v28983_v1, %v28983_v1 }
 0x444   : > { %v363_v5 = vld [vmem:[%s26866_s29 + $0x3f8] sm:$0xff] }
 0x445   : > { %v17903_v13 = vpop.f32.mrf.mxu0  ;;  %v17943_v14 = vpop.f32.mrf.mxu1  ;;  %19822 = vmatmul.mubr.bf16.vlgmr.msra.gmra.mxu0 %v5140_v61  ;;  %19862 = vmatmul.mubr.bf16.vlgmr.msra.gmra.mxu1 %v5142_v62  ;;  %v29002_v30 = vrot.slane %v363_v5, %v26895_v24 }
 0x446   : > { %v17904_v15 = vadd.f32 %v17903_v13, %v17864_v57  ;;  %19884 = vmatpush1.bf16.xpose.msra.mxu0 %v25996_v2  ;;  %19924 = vmatpush1.bf16.xpose.msra.mxu1 %v25998_v3  ;;  %v5674_v57 = vld [vmem:[%s26873_s24 + $0x7e8] sm:$0xff]  ;;  %v28986_v2 = vrot.slane %v2762_v49, %v26895_v24  ;;  %v26009_v3 = vcombine.high %v5673_v51, %v6057_v56  ;;  %v6061_v49 = vld [vmem:[%s26873_s24 + $0x1400] sm:$0x11] }
 0x447   : > { %v17905_v16 = vpop.f32.mrf.mxu0  ;;  %v17945_v17 = vpop.f32.mrf.mxu1  ;;  %19901 = vmatprep.mubr.bf16.mxu0 %v5145_v6  ;;  %19941 = vmatprep.mubr.bf16.mxu1 %v5147_v7  ;;  %v26011_v4 = vcombine.high %v5674_v57, %v6058_v58  ;;  %v2779_v13 = vcombine.high %v363_v5, %v363_v5 }
 0x448   : > { %v17944_v21 = vadd.f32 %v17943_v14, %v17904_v15  ;;  %19963 = vmatprep.subr.bf16.mxu0 %v26001_v10  ;;  %20003 = vmatprep.subr.bf16.mxu1 %v26003_v11  ;;  %v2777_v11 = vcombine.high %v28983_v1, %v28983_v1  ;;  %v2778_v12 = vcombine.high %v28986_v2, %v28986_v2  ;;  %v5675_v15 = vld [vmem:[%s26873_s24 + $0x7f0] sm:$0xff] }
 0x449   : > { %v17906_v23 = vpop.f32.mrf.mxu0  ;;  %v17946_v25 = vpop.f32.mrf.mxu1  ;;  %v5158_v48 = vpack.c.bf16 %v28986_v2, %v28986_v2 }
 0x44a   : > { %v26008_v23 = vcombine.low %v5673_v51, %v6057_v56  ;;  %v26010_v25 = vcombine.low %v5674_v57, %v6058_v58  ;;  %v5157_v28 = vpack.c.bf16 %v2777_v11, %v2777_v11  ;;  %v5159_v29 = vpack.c.bf16 %v2778_v12, %v2778_v12  ;;  %v6062_v51 = vld [vmem:[%s26873_s24 + $0x1408] sm:$0x11] }
 0x44b   : > { %v17907_v33 = vpop.f32.mrf.mxu0  ;;  %v17947_v34 = vpop.f32.mrf.mxu1  ;;  %v5160_v11 = vpack.c.bf16 %v29002_v30, %v29002_v30 }
 0x44c   : > { %v364_v34 = vld [vmem:[%s26866_s29 + $0x400] sm:$0xff] }
 0x44d   : > { %v17983_v42 = vpop.f32.mrf.mxu0  ;;  %v18023_v43 = vpop.f32.mrf.mxu1  ;;  %19902 = vmatmul.mubr.bf16.vlgmr.msra.gmra.mxu0 %v5144_v26  ;;  %19942 = vmatmul.mubr.bf16.vlgmr.msra.gmra.mxu1 %v5146_v27  ;;  %v29021_v58 = vrot.slane %v364_v34, %v26895_v24 }
 0x44e   : > { %v17984_v44 = vadd.f32 %v17983_v42, %v17944_v21  ;;  %19964 = vmatpush1.bf16.xpose.msra.mxu0 %v26000_v31  ;;  %20004 = vmatpush1.bf16.xpose.msra.mxu1 %v26002_v32  ;;  %v5676_v21 = vld [vmem:[%s26873_s24 + $0x7f8] sm:$0xff]  ;;  %v29005_v31 = vrot.slane %v2779_v13, %v26895_v24  ;;  %v26013_v32 = vcombine.high %v5675_v15, %v6059_v20  ;;  %v6063_v13 = vld [vmem:[%s26873_s24 + $0x1410] sm:$0x11] }
 0x44f   : > { %v17985_v45 = vpop.f32.mrf.mxu0  ;;  %v18025_v46 = vpop.f32.mrf.mxu1  ;;  %19981 = vmatprep.mubr.bf16.mxu0 %v5149_v35  ;;  %20021 = vmatprep.mubr.bf16.mxu1 %v5151_v36  ;;  %v26015_v33 = vcombine.high %v5676_v21, %v6060_v22  ;;  %v2796_v42 = vcombine.high %v364_v34, %v364_v34 }
 0x450   : > { %v18024_v50 = vadd.f32 %v18023_v43, %v17984_v44  ;;  %20043 = vmatprep.subr.bf16.mxu0 %v26005_v39  ;;  %20083 = vmatprep.subr.bf16.mxu1 %v26007_v40  ;;  %v2794_v40 = vcombine.high %v29002_v30, %v29002_v30  ;;  %v2795_v41 = vcombine.high %v29005_v31, %v29005_v31  ;;  %v5677_v44 = vld [vmem:[%s26873_s24 + $0x800] sm:$0xff] }
 0x451   : > { %v17986_v52 = vpop.f32.mrf.mxu0  ;;  %v18026_v53 = vpop.f32.mrf.mxu1  ;;  %v5162_v12 = vpack.c.bf16 %v29005_v31, %v29005_v31 }
 0x452   : > { %v26012_v52 = vcombine.low %v5675_v15, %v6059_v20  ;;  %v26014_v53 = vcombine.low %v5676_v21, %v6060_v22  ;;  %v5161_v56 = vpack.c.bf16 %v2794_v40, %v2794_v40  ;;  %v5163_v57 = vpack.c.bf16 %v2795_v41, %v2795_v41  ;;  %v6064_v15 = vld [vmem:[%s26873_s24 + $0x1418] sm:$0x11] }
 0x453   : > { %v17987_v61 = vpop.f32.mrf.mxu0  ;;  %v18027_v62 = vpop.f32.mrf.mxu1  ;;  %v5164_v40 = vpack.c.bf16 %v29021_v58, %v29021_v58 }
 0x454   : > { %v365_v62 = vld [vmem:[%s26866_s29 + $0x408] sm:$0xff] }
 0x455   : > { %v18063_v6 = vpop.f32.mrf.mxu0  ;;  %v18103_v7 = vpop.f32.mrf.mxu1  ;;  %19982 = vmatmul.mubr.bf16.vlgmr.msra.gmra.mxu0 %v5148_v54  ;;  %20022 = vmatmul.mubr.bf16.vlgmr.msra.gmra.mxu1 %v5150_v55  ;;  %v29040_v22 = vrot.slane %v365_v62, %v26895_v24 }
 0x456   : > { %v18064_v8 = vadd.f32 %v18063_v6, %v18024_v50  ;;  %20044 = vmatpush1.bf16.xpose.msra.mxu0 %v26004_v59  ;;  %20084 = vmatpush1.bf16.xpose.msra.mxu1 %v26006_v60  ;;  %v5678_v50 = vld [vmem:[%s26873_s24 + $0x808] sm:$0xff]  ;;  %v29024_v59 = vrot.slane %v2796_v42, %v26895_v24  ;;  %v26017_v60 = vcombine.high %v5677_v44, %v6061_v49  ;;  %v6065_v42 = vld [vmem:[%s26873_s24 + $0x1420] sm:$0x11] }
 0x457   : > { %v18065_v9 = vpop.f32.mrf.mxu0  ;;  %v18105_v10 = vpop.f32.mrf.mxu1  ;;  %20061 = vmatprep.mubr.bf16.mxu0 %v5153_v63  ;;  %20101 = vmatprep.mubr.bf16.mxu1 %v5155_v0  ;;  %v26019_v61 = vcombine.high %v5678_v50, %v6062_v51  ;;  %v2813_v6 = vcombine.high %v365_v62, %v365_v62 }
 0x458   : > { %v18104_v14 = vadd.f32 %v18103_v7, %v18064_v8  ;;  %20123 = vmatprep.subr.bf16.mxu0 %v26009_v3  ;;  %20163 = vmatprep.subr.bf16.mxu1 %v26011_v4  ;;  %v2811_v4 = vcombine.high %v29021_v58, %v29021_v58  ;;  %v2812_v5 = vcombine.high %v29024_v59, %v29024_v59  ;;  %v5679_v8 = vld [vmem:[%s26873_s24 + $0x810] sm:$0xff] }
 0x459   : > { %v18066_v16 = vpop.f32.mrf.mxu0  ;;  %v18106_v17 = vpop.f32.mrf.mxu1  ;;  %v5166_v41 = vpack.c.bf16 %v29024_v59, %v29024_v59 }
 0x45a   : > { %v26016_v16 = vcombine.low %v5677_v44, %v6061_v49  ;;  %v26018_v17 = vcombine.low %v5678_v50, %v6062_v51  ;;  %v5165_v20 = vpack.c.bf16 %v2811_v4, %v2811_v4  ;;  %v5167_v21 = vpack.c.bf16 %v2812_v5, %v2812_v5  ;;  %v6066_v44 = vld [vmem:[%s26873_s24 + $0x1428] sm:$0x11] }
 0x45b   : > { %v18067_v26 = vpop.f32.mrf.mxu0  ;;  %v18107_v27 = vpop.f32.mrf.mxu1  ;;  %v5168_v4 = vpack.c.bf16 %v29040_v22, %v29040_v22 }
 0x45c   : > { %v366_v27 = vld [vmem:[%s26866_s29 + $0x410] sm:$0xff] }
 0x45d   : > { %v18143_v35 = vpop.f32.mrf.mxu0  ;;  %v18183_v36 = vpop.f32.mrf.mxu1  ;;  %20062 = vmatmul.mubr.bf16.vlgmr.msra.gmra.mxu0 %v5152_v18  ;;  %20102 = vmatmul.mubr.bf16.vlgmr.msra.gmra.mxu1 %v5154_v19  ;;  %v29059_v51 = vrot.slane %v366_v27, %v26895_v24 }
 0x45e   : > { %v18144_v37 = vadd.f32 %v18143_v35, %v18104_v14  ;;  %20124 = vmatpush1.bf16.xpose.msra.mxu0 %v26008_v23  ;;  %20164 = vmatpush1.bf16.xpose.msra.mxu1 %v26010_v25  ;;  %v5680_v14 = vld [vmem:[%s26873_s24 + $0x818] sm:$0xff]  ;;  %v29043_v23 = vrot.slane %v2813_v6, %v26895_v24  ;;  %v26021_v25 = vcombine.high %v5679_v8, %v6063_v13  ;;  %v6067_v6 = vld [vmem:[%s26873_s24 + $0x1430] sm:$0x11] }
 0x45f   : > { %v18145_v38 = vpop.f32.mrf.mxu0  ;;  %v18185_v39 = vpop.f32.mrf.mxu1  ;;  %20141 = vmatprep.mubr.bf16.mxu0 %v5157_v28  ;;  %20181 = vmatprep.mubr.bf16.mxu1 %v5159_v29  ;;  %v26023_v26 = vcombine.high %v5680_v14, %v6064_v15  ;;  %v2830_v35 = vcombine.high %v366_v27, %v366_v27 }
 0x460   : > { %v18184_v43 = vadd.f32 %v18183_v36, %v18144_v37  ;;  %20203 = vmatprep.subr.bf16.mxu0 %v26013_v32  ;;  %20243 = vmatprep.subr.bf16.mxu1 %v26015_v33  ;;  %v2828_v33 = vcombine.high %v29040_v22, %v29040_v22  ;;  %v2829_v34 = vcombine.high %v29043_v23, %v29043_v23  ;;  %v5681_v37 = vld [vmem:[%s26873_s24 + $0x820] sm:$0xff] }
 0x461   : > { %v18146_v45 = vpop.f32.mrf.mxu0  ;;  %v18186_v46 = vpop.f32.mrf.mxu1  ;;  %v5170_v5 = vpack.c.bf16 %v29043_v23, %v29043_v23 }
 0x462   : > { %v26020_v45 = vcombine.low %v5679_v8, %v6063_v13  ;;  %v26022_v46 = vcombine.low %v5680_v14, %v6064_v15  ;;  %v5169_v49 = vpack.c.bf16 %v2828_v33, %v2828_v33  ;;  %v5171_v50 = vpack.c.bf16 %v2829_v34, %v2829_v34  ;;  %v6068_v8 = vld [vmem:[%s26873_s24 + $0x1438] sm:$0x11] }
 0x463   : > { %v18147_v54 = vpop.f32.mrf.mxu0  ;;  %v18187_v55 = vpop.f32.mrf.mxu1  ;;  %v5172_v33 = vpack.c.bf16 %v29059_v51, %v29059_v51 }
 0x464   : > { %v367_v55 = vld [vmem:[%s26866_s29 + $0x418] sm:$0xff] }
 0x465   : > { %v18223_v63 = vpop.f32.mrf.mxu0  ;;  %v18263_v0 = vpop.f32.mrf.mxu1  ;;  %20142 = vmatmul.mubr.bf16.vlgmr.msra.gmra.mxu0 %v5156_v47  ;;  %20182 = vmatmul.mubr.bf16.vlgmr.msra.gmra.mxu1 %v5158_v48  ;;  %v29078_v15 = vrot.slane %v367_v55, %v26895_v24 }
 0x466   : > { %v18224_v1 = vadd.f32 %v18223_v63, %v18184_v43  ;;  %20204 = vmatpush1.bf16.xpose.msra.mxu0 %v26012_v52  ;;  %20244 = vmatpush1.bf16.xpose.msra.mxu1 %v26014_v53  ;;  %v5682_v43 = vld [vmem:[%s26873_s24 + $0x828] sm:$0xff]  ;;  %v29062_v52 = vrot.slane %v2830_v35, %v26895_v24  ;;  %v26025_v53 = vcombine.high %v5681_v37, %v6065_v42  ;;  %v6069_v35 = vld [vmem:[%s26873_s24 + $0x1440] sm:$0x11] }
 0x467   : > { %v18225_v2 = vpop.f32.mrf.mxu0  ;;  %v18265_v3 = vpop.f32.mrf.mxu1  ;;  %20221 = vmatprep.mubr.bf16.mxu0 %v5161_v56  ;;  %20261 = vmatprep.mubr.bf16.mxu1 %v5163_v57  ;;  %v26027_v54 = vcombine.high %v5682_v43, %v6066_v44  ;;  %v2847_v63 = vcombine.high %v367_v55, %v367_v55 }
 0x468   : > { %v18264_v7 = vadd.f32 %v18263_v0, %v18224_v1  ;;  %20283 = vmatprep.subr.bf16.mxu0 %v26017_v60  ;;  %20323 = vmatprep.subr.bf16.mxu1 %v26019_v61  ;;  %v2845_v61 = vcombine.high %v29059_v51, %v29059_v51  ;;  %v2846_v62 = vcombine.high %v29062_v52, %v29062_v52  ;;  %v5683_v1 = vld [vmem:[%s26873_s24 + $0x830] sm:$0xff] }
 0x469   : > { %v18226_v9 = vpop.f32.mrf.mxu0  ;;  %v18266_v10 = vpop.f32.mrf.mxu1  ;;  %v5174_v34 = vpack.c.bf16 %v29062_v52, %v29062_v52 }
 0x46a   : > { %v26024_v9 = vcombine.low %v5681_v37, %v6065_v42  ;;  %v26026_v10 = vcombine.low %v5682_v43, %v6066_v44  ;;  %v5173_v13 = vpack.c.bf16 %v2845_v61, %v2845_v61  ;;  %v5175_v14 = vpack.c.bf16 %v2846_v62, %v2846_v62  ;;  %v6070_v37 = vld [vmem:[%s26873_s24 + $0x1448] sm:$0x11] }
 0x46b   : > { %v18227_v18 = vpop.f32.mrf.mxu0  ;;  %v18267_v19 = vpop.f32.mrf.mxu1  ;;  %v5176_v61 = vpack.c.bf16 %v29078_v15, %v29078_v15 }
 0x46c   : > { %v368_v19 = vld [vmem:[%s26866_s29 + $0x420] sm:$0xff] }
 0x46d   : > { %v18303_v28 = vpop.f32.mrf.mxu0  ;;  %v18343_v29 = vpop.f32.mrf.mxu1  ;;  %20222 = vmatmul.mubr.bf16.vlgmr.msra.gmra.mxu0 %v5160_v11  ;;  %20262 = vmatmul.mubr.bf16.vlgmr.msra.gmra.mxu1 %v5162_v12  ;;  %v29097_v44 = vrot.slane %v368_v19, %v26895_v24 }
 0x46e   : > { %v18304_v30 = vadd.f32 %v18303_v28, %v18264_v7  ;;  %20284 = vmatpush1.bf16.xpose.msra.mxu0 %v26016_v16  ;;  %20324 = vmatpush1.bf16.xpose.msra.mxu1 %v26018_v17  ;;  %v5684_v7 = vld [vmem:[%s26873_s24 + $0x838] sm:$0xff]  ;;  %v29081_v16 = vrot.slane %v2847_v63, %v26895_v24  ;;  %v26029_v17 = vcombine.high %v5683_v1, %v6067_v6  ;;  %v6071_v63 = vld [vmem:[%s26873_s24 + $0x1450] sm:$0x11] }
 0x46f   : > { %v18305_v31 = vpop.f32.mrf.mxu0  ;;  %v18345_v32 = vpop.f32.mrf.mxu1  ;;  %20301 = vmatprep.mubr.bf16.mxu0 %v5165_v20  ;;  %20341 = vmatprep.mubr.bf16.mxu1 %v5167_v21  ;;  %v26031_v18 = vcombine.high %v5684_v7, %v6068_v8  ;;  %v2864_v28 = vcombine.high %v368_v19, %v368_v19 }
 0x470   : > { %v18344_v36 = vadd.f32 %v18343_v29, %v18304_v30  ;;  %20363 = vmatprep.subr.bf16.mxu0 %v26021_v25  ;;  %20403 = vmatprep.subr.bf16.mxu1 %v26023_v26  ;;  %v2862_v26 = vcombine.high %v29078_v15, %v29078_v15  ;;  %v2863_v27 = vcombine.high %v29081_v16, %v29081_v16  ;;  %v5685_v30 = vld [vmem:[%s26873_s24 + $0x840] sm:$0xff] }
 0x471   : > { %v18306_v38 = vpop.f32.mrf.mxu0  ;;  %v18346_v39 = vpop.f32.mrf.mxu1  ;;  %v5178_v62 = vpack.c.bf16 %v29081_v16, %v29081_v16 }
 0x472   : > { %v26028_v38 = vcombine.low %v5683_v1, %v6067_v6  ;;  %v26030_v39 = vcombine.low %v5684_v7, %v6068_v8  ;;  %v5177_v42 = vpack.c.bf16 %v2862_v26, %v2862_v26  ;;  %v5179_v43 = vpack.c.bf16 %v2863_v27, %v2863_v27  ;;  %v6072_v1 = vld [vmem:[%s26873_s24 + $0x1458] sm:$0x11] }
 0x473   : > { %v18307_v47 = vpop.f32.mrf.mxu0  ;;  %v18347_v48 = vpop.f32.mrf.mxu1  ;;  %v5180_v26 = vpack.c.bf16 %v29097_v44, %v29097_v44 }
 0x474   : > { %v369_v48 = vld [vmem:[%s26866_s29 + $0x428] sm:$0xff] }
 0x475   : > { %v18383_v56 = vpop.f32.mrf.mxu0  ;;  %v18423_v57 = vpop.f32.mrf.mxu1  ;;  %20302 = vmatmul.mubr.bf16.vlgmr.msra.gmra.mxu0 %v5164_v40  ;;  %20342 = vmatmul.mubr.bf16.vlgmr.msra.gmra.mxu1 %v5166_v41  ;;  %v29116_v8 = vrot.slane %v369_v48, %v26895_v24 }
 0x476   : > { %v18384_v58 = vadd.f32 %v18383_v56, %v18344_v36  ;;  %20364 = vmatpush1.bf16.xpose.msra.mxu0 %v26020_v45  ;;  %20404 = vmatpush1.bf16.xpose.msra.mxu1 %v26022_v46  ;;  %v5686_v36 = vld [vmem:[%s26873_s24 + $0x848] sm:$0xff]  ;;  %v29100_v45 = vrot.slane %v2864_v28, %v26895_v24  ;;  %v26033_v46 = vcombine.high %v5685_v30, %v6069_v35  ;;  %v6073_v28 = vld [vmem:[%s26873_s24 + $0x1460] sm:$0x11] }
 0x477   : > { %v18385_v59 = vpop.f32.mrf.mxu0  ;;  %v18425_v60 = vpop.f32.mrf.mxu1  ;;  %20381 = vmatprep.mubr.bf16.mxu0 %v5169_v49  ;;  %20421 = vmatprep.mubr.bf16.mxu1 %v5171_v50  ;;  %v26035_v47 = vcombine.high %v5686_v36, %v6070_v37  ;;  %v2881_v56 = vcombine.high %v369_v48, %v369_v48 }
 0x478   : > { %v18424_v0 = vadd.f32 %v18423_v57, %v18384_v58  ;;  %20443 = vmatprep.subr.bf16.mxu0 %v26025_v53  ;;  %20483 = vmatprep.subr.bf16.mxu1 %v26027_v54  ;;  %v2879_v54 = vcombine.high %v29097_v44, %v29097_v44  ;;  %v2880_v55 = vcombine.high %v29100_v45, %v29100_v45  ;;  %v5687_v58 = vld [vmem:[%s26873_s24 + $0x850] sm:$0xff] }
 0x479   : > { %v18386_v2 = vpop.f32.mrf.mxu0  ;;  %v18426_v3 = vpop.f32.mrf.mxu1  ;;  %v5182_v27 = vpack.c.bf16 %v29100_v45, %v29100_v45 }
 0x47a   : > { %v26032_v2 = vcombine.low %v5685_v30, %v6069_v35  ;;  %v26034_v3 = vcombine.low %v5686_v36, %v6070_v37  ;;  %v5181_v6 = vpack.c.bf16 %v2879_v54, %v2879_v54  ;;  %v5183_v7 = vpack.c.bf16 %v2880_v55, %v2880_v55  ;;  %v6074_v30 = vld [vmem:[%s26873_s24 + $0x1468] sm:$0x11] }
 0x47b   : > { %v18387_v11 = vpop.f32.mrf.mxu0  ;;  %v18427_v12 = vpop.f32.mrf.mxu1  ;;  %v5184_v54 = vpack.c.bf16 %v29116_v8, %v29116_v8 }
 0x47c   : > { %v370_v12 = vld [vmem:[%s26866_s29 + $0x430] sm:$0xff] }
 0x47d   : > { %v18463_v20 = vpop.f32.mrf.mxu0  ;;  %v18503_v21 = vpop.f32.mrf.mxu1  ;;  %20382 = vmatmul.mubr.bf16.vlgmr.msra.gmra.mxu0 %v5168_v4  ;;  %20422 = vmatmul.mubr.bf16.vlgmr.msra.gmra.mxu1 %v5170_v5  ;;  %v29135_v37 = vrot.slane %v370_v12, %v26895_v24 }
 0x47e   : > { %v18464_v22 = vadd.f32 %v18463_v20, %v18424_v0  ;;  %20444 = vmatpush1.bf16.xpose.msra.mxu0 %v26024_v9  ;;  %20484 = vmatpush1.bf16.xpose.msra.mxu1 %v26026_v10  ;;  %v5688_v0 = vld [vmem:[%s26873_s24 + $0x858] sm:$0xff]  ;;  %v29119_v9 = vrot.slane %v2881_v56, %v26895_v24  ;;  %v26037_v10 = vcombine.high %v5687_v58, %v6071_v63  ;;  %v6075_v56 = vld [vmem:[%s26873_s24 + $0x1470] sm:$0x11] }
 0x47f   : > { %v18465_v23 = vpop.f32.mrf.mxu0  ;;  %v18505_v25 = vpop.f32.mrf.mxu1  ;;  %20461 = vmatprep.mubr.bf16.mxu0 %v5173_v13  ;;  %20501 = vmatprep.mubr.bf16.mxu1 %v5175_v14  ;;  %v26039_v11 = vcombine.high %v5688_v0, %v6072_v1  ;;  %v2898_v20 = vcombine.high %v370_v12, %v370_v12 }
 0x480   : > { %v18504_v29 = vadd.f32 %v18503_v21, %v18464_v22  ;;  %20523 = vmatprep.subr.bf16.mxu0 %v26029_v17  ;;  %20563 = vmatprep.subr.bf16.mxu1 %v26031_v18  ;;  %v2896_v18 = vcombine.high %v29116_v8, %v29116_v8  ;;  %v2897_v19 = vcombine.high %v29119_v9, %v29119_v9  ;;  %v5689_v22 = vld [vmem:[%s26873_s24 + $0x860] sm:$0xff] }
 0x481   : > { %v18466_v31 = vpop.f32.mrf.mxu0  ;;  %v18506_v32 = vpop.f32.mrf.mxu1  ;;  %v5186_v55 = vpack.c.bf16 %v29119_v9, %v29119_v9 }
 0x482   : > { %v26036_v31 = vcombine.low %v5687_v58, %v6071_v63  ;;  %v26038_v32 = vcombine.low %v5688_v0, %v6072_v1  ;;  %v5185_v35 = vpack.c.bf16 %v2896_v18, %v2896_v18  ;;  %v5187_v36 = vpack.c.bf16 %v2897_v19, %v2897_v19  ;;  %v6076_v58 = vld [vmem:[%s26873_s24 + $0x1478] sm:$0x11] }
 0x483   : > { %v18467_v40 = vpop.f32.mrf.mxu0  ;;  %v18507_v41 = vpop.f32.mrf.mxu1  ;;  %v5188_v18 = vpack.c.bf16 %v29135_v37, %v29135_v37 }
 0x484   : > { %v371_v41 = vld [vmem:[%s26866_s29 + $0x438] sm:$0xff] }
 0x485   : > { %v18543_v49 = vpop.f32.mrf.mxu0  ;;  %v18583_v50 = vpop.f32.mrf.mxu1  ;;  %20462 = vmatmul.mubr.bf16.vlgmr.msra.gmra.mxu0 %v5172_v33  ;;  %20502 = vmatmul.mubr.bf16.vlgmr.msra.gmra.mxu1 %v5174_v34  ;;  %v29154_v1 = vrot.slane %v371_v41, %v26895_v24 }
 0x486   : > { %v18544_v51 = vadd.f32 %v18543_v49, %v18504_v29  ;;  %20524 = vmatpush1.bf16.xpose.msra.mxu0 %v26028_v38  ;;  %20564 = vmatpush1.bf16.xpose.msra.mxu1 %v26030_v39  ;;  %v5690_v29 = vld [vmem:[%s26873_s24 + $0x868] sm:$0xff]  ;;  %v29138_v38 = vrot.slane %v2898_v20, %v26895_v24  ;;  %v26041_v39 = vcombine.high %v5689_v22, %v6073_v28  ;;  %v6077_v20 = vld [vmem:[%s26873_s24 + $0x1480] sm:$0x11] }
 0x487   : > { %v18545_v52 = vpop.f32.mrf.mxu0  ;;  %v18585_v53 = vpop.f32.mrf.mxu1  ;;  %20541 = vmatprep.mubr.bf16.mxu0 %v5177_v42  ;;  %20581 = vmatprep.mubr.bf16.mxu1 %v5179_v43  ;;  %v26043_v40 = vcombine.high %v5690_v29, %v6074_v30  ;;  %v2915_v49 = vcombine.high %v371_v41, %v371_v41 }
 0x488   : > { %v18584_v57 = vadd.f32 %v18583_v50, %v18544_v51  ;;  %20603 = vmatprep.subr.bf16.mxu0 %v26033_v46  ;;  %20643 = vmatprep.subr.bf16.mxu1 %v26035_v47  ;;  %v2913_v47 = vcombine.high %v29135_v37, %v29135_v37  ;;  %v2914_v48 = vcombine.high %v29138_v38, %v29138_v38  ;;  %v5691_v51 = vld [vmem:[%s26873_s24 + $0x870] sm:$0xff] }
 0x489   : > { %v18546_v59 = vpop.f32.mrf.mxu0  ;;  %v18586_v60 = vpop.f32.mrf.mxu1  ;;  %v5190_v19 = vpack.c.bf16 %v29138_v38, %v29138_v38 }
 0x48a   : > { %v26040_v59 = vcombine.low %v5689_v22, %v6073_v28  ;;  %v26042_v60 = vcombine.low %v5690_v29, %v6074_v30  ;;  %v5189_v63 = vpack.c.bf16 %v2913_v47, %v2913_v47  ;;  %v5191_v0 = vpack.c.bf16 %v2914_v48, %v2914_v48  ;;  %v6078_v22 = vld [vmem:[%s26873_s24 + $0x1488] sm:$0x11] }
 0x48b   : > { %v18547_v4 = vpop.f32.mrf.mxu0  ;;  %v18587_v5 = vpop.f32.mrf.mxu1  ;;  %v5192_v47 = vpack.c.bf16 %v29154_v1, %v29154_v1 }
 0x48c   : > { %v372_v5 = vld [vmem:[%s26866_s29 + $0x440] sm:$0xff] }
 0x48d   : > { %v18623_v13 = vpop.f32.mrf.mxu0  ;;  %v18663_v14 = vpop.f32.mrf.mxu1  ;;  %20542 = vmatmul.mubr.bf16.vlgmr.msra.gmra.mxu0 %v5176_v61  ;;  %20582 = vmatmul.mubr.bf16.vlgmr.msra.gmra.mxu1 %v5178_v62  ;;  %v29173_v30 = vrot.slane %v372_v5, %v26895_v24 }
 0x48e   : > { %v18624_v15 = vadd.f32 %v18623_v13, %v18584_v57  ;;  %20604 = vmatpush1.bf16.xpose.msra.mxu0 %v26032_v2  ;;  %20644 = vmatpush1.bf16.xpose.msra.mxu1 %v26034_v3  ;;  %v5692_v57 = vld [vmem:[%s26873_s24 + $0x878] sm:$0xff]  ;;  %v29157_v2 = vrot.slane %v2915_v49, %v26895_v24  ;;  %v26045_v3 = vcombine.high %v5691_v51, %v6075_v56  ;;  %v6079_v49 = vld [vmem:[%s26873_s24 + $0x1490] sm:$0x11] }
 0x48f   : > { %v18625_v16 = vpop.f32.mrf.mxu0  ;;  %v18665_v17 = vpop.f32.mrf.mxu1  ;;  %20621 = vmatprep.mubr.bf16.mxu0 %v5181_v6  ;;  %20661 = vmatprep.mubr.bf16.mxu1 %v5183_v7  ;;  %v26047_v4 = vcombine.high %v5692_v57, %v6076_v58  ;;  %v2932_v13 = vcombine.high %v372_v5, %v372_v5 }
 0x490   : > { %v18664_v21 = vadd.f32 %v18663_v14, %v18624_v15  ;;  %20683 = vmatprep.subr.bf16.mxu0 %v26037_v10  ;;  %20723 = vmatprep.subr.bf16.mxu1 %v26039_v11  ;;  %v2930_v11 = vcombine.high %v29154_v1, %v29154_v1  ;;  %v2931_v12 = vcombine.high %v29157_v2, %v29157_v2  ;;  %v5693_v15 = vld [vmem:[%s26873_s24 + $0x880] sm:$0xff] }
 0x491   : > { %v18626_v23 = vpop.f32.mrf.mxu0  ;;  %v18666_v25 = vpop.f32.mrf.mxu1  ;;  %v5194_v48 = vpack.c.bf16 %v29157_v2, %v29157_v2 }
 0x492   : > { %v26044_v23 = vcombine.low %v5691_v51, %v6075_v56  ;;  %v26046_v25 = vcombine.low %v5692_v57, %v6076_v58  ;;  %v5193_v28 = vpack.c.bf16 %v2930_v11, %v2930_v11  ;;  %v5195_v29 = vpack.c.bf16 %v2931_v12, %v2931_v12  ;;  %v6080_v51 = vld [vmem:[%s26873_s24 + $0x1498] sm:$0x11] }
 0x493   : > { %v18627_v33 = vpop.f32.mrf.mxu0  ;;  %v18667_v34 = vpop.f32.mrf.mxu1  ;;  %v5196_v11 = vpack.c.bf16 %v29173_v30, %v29173_v30 }
 0x494   : > { %v373_v34 = vld [vmem:[%s26866_s29 + $0x448] sm:$0xff] }
 0x495   : > { %v18703_v42 = vpop.f32.mrf.mxu0  ;;  %v18743_v43 = vpop.f32.mrf.mxu1  ;;  %20622 = vmatmul.mubr.bf16.vlgmr.msra.gmra.mxu0 %v5180_v26  ;;  %20662 = vmatmul.mubr.bf16.vlgmr.msra.gmra.mxu1 %v5182_v27  ;;  %v29192_v58 = vrot.slane %v373_v34, %v26895_v24 }
 0x496   : > { %v18704_v44 = vadd.f32 %v18703_v42, %v18664_v21  ;;  %20684 = vmatpush1.bf16.xpose.msra.mxu0 %v26036_v31  ;;  %20724 = vmatpush1.bf16.xpose.msra.mxu1 %v26038_v32  ;;  %v5694_v21 = vld [vmem:[%s26873_s24 + $0x888] sm:$0xff]  ;;  %v29176_v31 = vrot.slane %v2932_v13, %v26895_v24  ;;  %v26049_v32 = vcombine.high %v5693_v15, %v6077_v20  ;;  %v6081_v13 = vld [vmem:[%s26873_s24 + $0x14a0] sm:$0x11] }
 0x497   : > { %v18705_v45 = vpop.f32.mrf.mxu0  ;;  %v18745_v46 = vpop.f32.mrf.mxu1  ;;  %20701 = vmatprep.mubr.bf16.mxu0 %v5185_v35  ;;  %20741 = vmatprep.mubr.bf16.mxu1 %v5187_v36  ;;  %v26051_v33 = vcombine.high %v5694_v21, %v6078_v22  ;;  %v2949_v42 = vcombine.high %v373_v34, %v373_v34 }
 0x498   : > { %v18744_v50 = vadd.f32 %v18743_v43, %v18704_v44  ;;  %20763 = vmatprep.subr.bf16.mxu0 %v26041_v39  ;;  %20803 = vmatprep.subr.bf16.mxu1 %v26043_v40  ;;  %v2947_v40 = vcombine.high %v29173_v30, %v29173_v30  ;;  %v2948_v41 = vcombine.high %v29176_v31, %v29176_v31  ;;  %v5695_v44 = vld [vmem:[%s26873_s24 + $0x890] sm:$0xff] }
 0x499   : > { %v18706_v52 = vpop.f32.mrf.mxu0  ;;  %v18746_v53 = vpop.f32.mrf.mxu1  ;;  %v5198_v12 = vpack.c.bf16 %v29176_v31, %v29176_v31 }
 0x49a   : > { %v26048_v52 = vcombine.low %v5693_v15, %v6077_v20  ;;  %v26050_v53 = vcombine.low %v5694_v21, %v6078_v22  ;;  %v5197_v56 = vpack.c.bf16 %v2947_v40, %v2947_v40  ;;  %v5199_v57 = vpack.c.bf16 %v2948_v41, %v2948_v41  ;;  %v6082_v15 = vld [vmem:[%s26873_s24 + $0x14a8] sm:$0x11] }
 0x49b   : > { %v18707_v61 = vpop.f32.mrf.mxu0  ;;  %v18747_v62 = vpop.f32.mrf.mxu1  ;;  %v5200_v40 = vpack.c.bf16 %v29192_v58, %v29192_v58 }
 0x49c   : > { %v374_v62 = vld [vmem:[%s26866_s29 + $0x450] sm:$0xff] }
 0x49d   : > { %v18783_v6 = vpop.f32.mrf.mxu0  ;;  %v18823_v7 = vpop.f32.mrf.mxu1  ;;  %20702 = vmatmul.mubr.bf16.vlgmr.msra.gmra.mxu0 %v5184_v54  ;;  %20742 = vmatmul.mubr.bf16.vlgmr.msra.gmra.mxu1 %v5186_v55  ;;  %v29211_v22 = vrot.slane %v374_v62, %v26895_v24 }
 0x49e   : > { %v18784_v8 = vadd.f32 %v18783_v6, %v18744_v50  ;;  %20764 = vmatpush1.bf16.xpose.msra.mxu0 %v26040_v59  ;;  %20804 = vmatpush1.bf16.xpose.msra.mxu1 %v26042_v60  ;;  %v5696_v50 = vld [vmem:[%s26873_s24 + $0x898] sm:$0xff]  ;;  %v29195_v59 = vrot.slane %v2949_v42, %v26895_v24  ;;  %v26053_v60 = vcombine.high %v5695_v44, %v6079_v49  ;;  %v6083_v42 = vld [vmem:[%s26873_s24 + $0x14b0] sm:$0x11] }
 0x49f   : > { %v18785_v9 = vpop.f32.mrf.mxu0  ;;  %v18825_v10 = vpop.f32.mrf.mxu1  ;;  %20781 = vmatprep.mubr.bf16.mxu0 %v5189_v63  ;;  %20821 = vmatprep.mubr.bf16.mxu1 %v5191_v0  ;;  %v26055_v61 = vcombine.high %v5696_v50, %v6080_v51  ;;  %v2966_v6 = vcombine.high %v374_v62, %v374_v62 }
 0x4a0   : > { %v18824_v14 = vadd.f32 %v18823_v7, %v18784_v8  ;;  %20843 = vmatprep.subr.bf16.mxu0 %v26045_v3  ;;  %20883 = vmatprep.subr.bf16.mxu1 %v26047_v4  ;;  %v2964_v4 = vcombine.high %v29192_v58, %v29192_v58  ;;  %v2965_v5 = vcombine.high %v29195_v59, %v29195_v59  ;;  %v5697_v8 = vld [vmem:[%s26873_s24 + $0x8a0] sm:$0xff] }
 0x4a1   : > { %v18786_v16 = vpop.f32.mrf.mxu0  ;;  %v18826_v17 = vpop.f32.mrf.mxu1  ;;  %v5202_v41 = vpack.c.bf16 %v29195_v59, %v29195_v59 }
 0x4a2   : > { %v26052_v16 = vcombine.low %v5695_v44, %v6079_v49  ;;  %v26054_v17 = vcombine.low %v5696_v50, %v6080_v51  ;;  %v5201_v20 = vpack.c.bf16 %v2964_v4, %v2964_v4  ;;  %v5203_v21 = vpack.c.bf16 %v2965_v5, %v2965_v5  ;;  %v6084_v44 = vld [vmem:[%s26873_s24 + $0x14b8] sm:$0x11] }
 0x4a3   : > { %v18787_v26 = vpop.f32.mrf.mxu0  ;;  %v18827_v27 = vpop.f32.mrf.mxu1  ;;  %v5204_v4 = vpack.c.bf16 %v29211_v22, %v29211_v22 }
 0x4a4   : > { %v375_v27 = vld [vmem:[%s26866_s29 + $0x458] sm:$0xff] }
 0x4a5   : > { %v18863_v35 = vpop.f32.mrf.mxu0  ;;  %v18903_v36 = vpop.f32.mrf.mxu1  ;;  %20782 = vmatmul.mubr.bf16.vlgmr.msra.gmra.mxu0 %v5188_v18  ;;  %20822 = vmatmul.mubr.bf16.vlgmr.msra.gmra.mxu1 %v5190_v19  ;;  %v29230_v51 = vrot.slane %v375_v27, %v26895_v24 }
 0x4a6   : > { %v18864_v37 = vadd.f32 %v18863_v35, %v18824_v14  ;;  %20844 = vmatpush1.bf16.xpose.msra.mxu0 %v26044_v23  ;;  %20884 = vmatpush1.bf16.xpose.msra.mxu1 %v26046_v25  ;;  %v5698_v14 = vld [vmem:[%s26873_s24 + $0x8a8] sm:$0xff]  ;;  %v29214_v23 = vrot.slane %v2966_v6, %v26895_v24  ;;  %v26057_v25 = vcombine.high %v5697_v8, %v6081_v13  ;;  %v6085_v6 = vld [vmem:[%s26873_s24 + $0x14c0] sm:$0x11] }
 0x4a7   : > { %v18865_v38 = vpop.f32.mrf.mxu0  ;;  %v18905_v39 = vpop.f32.mrf.mxu1  ;;  %20861 = vmatprep.mubr.bf16.mxu0 %v5193_v28  ;;  %20901 = vmatprep.mubr.bf16.mxu1 %v5195_v29  ;;  %v26059_v26 = vcombine.high %v5698_v14, %v6082_v15  ;;  %v2983_v35 = vcombine.high %v375_v27, %v375_v27 }
 0x4a8   : > { %v18904_v43 = vadd.f32 %v18903_v36, %v18864_v37  ;;  %20923 = vmatprep.subr.bf16.mxu0 %v26049_v32  ;;  %20963 = vmatprep.subr.bf16.mxu1 %v26051_v33  ;;  %v2981_v33 = vcombine.high %v29211_v22, %v29211_v22  ;;  %v2982_v34 = vcombine.high %v29214_v23, %v29214_v23  ;;  %v5699_v37 = vld [vmem:[%s26873_s24 + $0x8b0] sm:$0xff] }
 0x4a9   : > { %v18866_v45 = vpop.f32.mrf.mxu0  ;;  %v18906_v46 = vpop.f32.mrf.mxu1  ;;  %v5206_v5 = vpack.c.bf16 %v29214_v23, %v29214_v23 }
 0x4aa   : > { %v26056_v45 = vcombine.low %v5697_v8, %v6081_v13  ;;  %v26058_v46 = vcombine.low %v5698_v14, %v6082_v15  ;;  %v5205_v49 = vpack.c.bf16 %v2981_v33, %v2981_v33  ;;  %v5207_v50 = vpack.c.bf16 %v2982_v34, %v2982_v34  ;;  %v6086_v8 = vld [vmem:[%s26873_s24 + $0x14c8] sm:$0x11] }
 0x4ab   : > { %v18867_v54 = vpop.f32.mrf.mxu0  ;;  %v18907_v55 = vpop.f32.mrf.mxu1  ;;  %v5208_v33 = vpack.c.bf16 %v29230_v51, %v29230_v51 }
 0x4ac   : > { %v376_v55 = vld [vmem:[%s26866_s29 + $0x460] sm:$0xff] }
 0x4ad   : > { %v18943_v63 = vpop.f32.mrf.mxu0  ;;  %v18983_v0 = vpop.f32.mrf.mxu1  ;;  %20862 = vmatmul.mubr.bf16.vlgmr.msra.gmra.mxu0 %v5192_v47  ;;  %20902 = vmatmul.mubr.bf16.vlgmr.msra.gmra.mxu1 %v5194_v48  ;;  %v29249_v15 = vrot.slane %v376_v55, %v26895_v24 }
 0x4ae   : > { %v18944_v1 = vadd.f32 %v18943_v63, %v18904_v43  ;;  %20924 = vmatpush1.bf16.xpose.msra.mxu0 %v26048_v52  ;;  %20964 = vmatpush1.bf16.xpose.msra.mxu1 %v26050_v53  ;;  %v5700_v43 = vld [vmem:[%s26873_s24 + $0x8b8] sm:$0xff]  ;;  %v29233_v52 = vrot.slane %v2983_v35, %v26895_v24  ;;  %v26061_v53 = vcombine.high %v5699_v37, %v6083_v42  ;;  %v6087_v35 = vld [vmem:[%s26873_s24 + $0x14d0] sm:$0x11] }
 0x4af   : > { %v18945_v2 = vpop.f32.mrf.mxu0  ;;  %v18985_v3 = vpop.f32.mrf.mxu1  ;;  %20941 = vmatprep.mubr.bf16.mxu0 %v5197_v56  ;;  %20981 = vmatprep.mubr.bf16.mxu1 %v5199_v57  ;;  %v26063_v54 = vcombine.high %v5700_v43, %v6084_v44  ;;  %v3000_v63 = vcombine.high %v376_v55, %v376_v55 }
 0x4b0   : > { %v18984_v7 = vadd.f32 %v18983_v0, %v18944_v1  ;;  %21003 = vmatprep.subr.bf16.mxu0 %v26053_v60  ;;  %21043 = vmatprep.subr.bf16.mxu1 %v26055_v61  ;;  %v2998_v61 = vcombine.high %v29230_v51, %v29230_v51  ;;  %v2999_v62 = vcombine.high %v29233_v52, %v29233_v52  ;;  %v5701_v1 = vld [vmem:[%s26873_s24 + $0x8c0] sm:$0xff] }
 0x4b1   : > { %v18946_v9 = vpop.f32.mrf.mxu0  ;;  %v18986_v10 = vpop.f32.mrf.mxu1  ;;  %v5210_v34 = vpack.c.bf16 %v29233_v52, %v29233_v52 }
 0x4b2   : > { %v26060_v9 = vcombine.low %v5699_v37, %v6083_v42  ;;  %v26062_v10 = vcombine.low %v5700_v43, %v6084_v44  ;;  %v5209_v13 = vpack.c.bf16 %v2998_v61, %v2998_v61  ;;  %v5211_v14 = vpack.c.bf16 %v2999_v62, %v2999_v62  ;;  %v6088_v37 = vld [vmem:[%s26873_s24 + $0x14d8] sm:$0x11] }
 0x4b3   : > { %v18947_v18 = vpop.f32.mrf.mxu0  ;;  %v18987_v19 = vpop.f32.mrf.mxu1  ;;  %v5212_v61 = vpack.c.bf16 %v29249_v15, %v29249_v15 }
 0x4b4   : > { %v377_v19 = vld [vmem:[%s26866_s29 + $0x468] sm:$0xff] }
 0x4b5   : > { %v19023_v28 = vpop.f32.mrf.mxu0  ;;  %v19063_v29 = vpop.f32.mrf.mxu1  ;;  %20942 = vmatmul.mubr.bf16.vlgmr.msra.gmra.mxu0 %v5196_v11  ;;  %20982 = vmatmul.mubr.bf16.vlgmr.msra.gmra.mxu1 %v5198_v12  ;;  %v29268_v44 = vrot.slane %v377_v19, %v26895_v24 }
 0x4b6   : > { %v19024_v30 = vadd.f32 %v19023_v28, %v18984_v7  ;;  %21004 = vmatpush1.bf16.xpose.msra.mxu0 %v26052_v16  ;;  %21044 = vmatpush1.bf16.xpose.msra.mxu1 %v26054_v17  ;;  %v5702_v7 = vld [vmem:[%s26873_s24 + $0x8c8] sm:$0xff]  ;;  %v29252_v16 = vrot.slane %v3000_v63, %v26895_v24  ;;  %v26065_v17 = vcombine.high %v5701_v1, %v6085_v6  ;;  %v6089_v63 = vld [vmem:[%s26873_s24 + $0x14e0] sm:$0x11] }
 0x4b7   : > { %v19025_v31 = vpop.f32.mrf.mxu0  ;;  %v19065_v32 = vpop.f32.mrf.mxu1  ;;  %21021 = vmatprep.mubr.bf16.mxu0 %v5201_v20  ;;  %21061 = vmatprep.mubr.bf16.mxu1 %v5203_v21  ;;  %v26067_v18 = vcombine.high %v5702_v7, %v6086_v8  ;;  %v3017_v28 = vcombine.high %v377_v19, %v377_v19 }
 0x4b8   : > { %v19064_v36 = vadd.f32 %v19063_v29, %v19024_v30  ;;  %21083 = vmatprep.subr.bf16.mxu0 %v26057_v25  ;;  %21123 = vmatprep.subr.bf16.mxu1 %v26059_v26  ;;  %v3015_v26 = vcombine.high %v29249_v15, %v29249_v15  ;;  %v3016_v27 = vcombine.high %v29252_v16, %v29252_v16  ;;  %v5703_v30 = vld [vmem:[%s26873_s24 + $0x8d0] sm:$0xff] }
 0x4b9   : > { %v19026_v38 = vpop.f32.mrf.mxu0  ;;  %v19066_v39 = vpop.f32.mrf.mxu1  ;;  %v5214_v62 = vpack.c.bf16 %v29252_v16, %v29252_v16 }
 0x4ba   : > { %v26064_v38 = vcombine.low %v5701_v1, %v6085_v6  ;;  %v26066_v39 = vcombine.low %v5702_v7, %v6086_v8  ;;  %v5213_v42 = vpack.c.bf16 %v3015_v26, %v3015_v26  ;;  %v5215_v43 = vpack.c.bf16 %v3016_v27, %v3016_v27  ;;  %v6090_v1 = vld [vmem:[%s26873_s24 + $0x14e8] sm:$0x11] }
 0x4bb   : > { %v19027_v47 = vpop.f32.mrf.mxu0  ;;  %v19067_v48 = vpop.f32.mrf.mxu1  ;;  %v5216_v26 = vpack.c.bf16 %v29268_v44, %v29268_v44 }
 0x4bc   : > { %v378_v48 = vld [vmem:[%s26866_s29 + $0x470] sm:$0xff] }
 0x4bd   : > { %v19103_v56 = vpop.f32.mrf.mxu0  ;;  %v19143_v57 = vpop.f32.mrf.mxu1  ;;  %21022 = vmatmul.mubr.bf16.vlgmr.msra.gmra.mxu0 %v5200_v40  ;;  %21062 = vmatmul.mubr.bf16.vlgmr.msra.gmra.mxu1 %v5202_v41  ;;  %v29287_v8 = vrot.slane %v378_v48, %v26895_v24 }
 0x4be   : > { %v19104_v58 = vadd.f32 %v19103_v56, %v19064_v36  ;;  %21084 = vmatpush1.bf16.xpose.msra.mxu0 %v26056_v45  ;;  %21124 = vmatpush1.bf16.xpose.msra.mxu1 %v26058_v46  ;;  %v5704_v36 = vld [vmem:[%s26873_s24 + $0x8d8] sm:$0xff]  ;;  %v29271_v45 = vrot.slane %v3017_v28, %v26895_v24  ;;  %v26069_v46 = vcombine.high %v5703_v30, %v6087_v35  ;;  %v6091_v28 = vld [vmem:[%s26873_s24 + $0x14f0] sm:$0x11] }
 0x4bf   : > { %v19105_v59 = vpop.f32.mrf.mxu0  ;;  %v19145_v60 = vpop.f32.mrf.mxu1  ;;  %21101 = vmatprep.mubr.bf16.mxu0 %v5205_v49  ;;  %21141 = vmatprep.mubr.bf16.mxu1 %v5207_v50  ;;  %v26071_v47 = vcombine.high %v5704_v36, %v6088_v37  ;;  %v3034_v56 = vcombine.high %v378_v48, %v378_v48 }
 0x4c0   : > { %v19144_v0 = vadd.f32 %v19143_v57, %v19104_v58  ;;  %21163 = vmatprep.subr.bf16.mxu0 %v26061_v53  ;;  %21203 = vmatprep.subr.bf16.mxu1 %v26063_v54  ;;  %v3032_v54 = vcombine.high %v29268_v44, %v29268_v44  ;;  %v3033_v55 = vcombine.high %v29271_v45, %v29271_v45  ;;  %v5705_v58 = vld [vmem:[%s26873_s24 + $0x8e0] sm:$0xff] }
 0x4c1   : > { %v19106_v2 = vpop.f32.mrf.mxu0  ;;  %v19146_v3 = vpop.f32.mrf.mxu1  ;;  %v5218_v27 = vpack.c.bf16 %v29271_v45, %v29271_v45 }
 0x4c2   : > { %v26068_v2 = vcombine.low %v5703_v30, %v6087_v35  ;;  %v26070_v3 = vcombine.low %v5704_v36, %v6088_v37  ;;  %v5217_v6 = vpack.c.bf16 %v3032_v54, %v3032_v54  ;;  %v5219_v7 = vpack.c.bf16 %v3033_v55, %v3033_v55  ;;  %v6092_v30 = vld [vmem:[%s26873_s24 + $0x14f8] sm:$0x11] }
 0x4c3   : > { %v19107_v11 = vpop.f32.mrf.mxu0  ;;  %v19147_v12 = vpop.f32.mrf.mxu1  ;;  %v5220_v54 = vpack.c.bf16 %v29287_v8, %v29287_v8 }
 0x4c4   : > { %v379_v12 = vld [vmem:[%s26866_s29 + $0x478] sm:$0xff] }
 0x4c5   : > { %v19183_v20 = vpop.f32.mrf.mxu0  ;;  %v19223_v21 = vpop.f32.mrf.mxu1  ;;  %21102 = vmatmul.mubr.bf16.vlgmr.msra.gmra.mxu0 %v5204_v4  ;;  %21142 = vmatmul.mubr.bf16.vlgmr.msra.gmra.mxu1 %v5206_v5  ;;  %v29306_v37 = vrot.slane %v379_v12, %v26895_v24 }
 0x4c6   : > { %v19184_v22 = vadd.f32 %v19183_v20, %v19144_v0  ;;  %21164 = vmatpush1.bf16.xpose.msra.mxu0 %v26060_v9  ;;  %21204 = vmatpush1.bf16.xpose.msra.mxu1 %v26062_v10  ;;  %v5706_v0 = vld [vmem:[%s26873_s24 + $0x8e8] sm:$0xff]  ;;  %v29290_v9 = vrot.slane %v3034_v56, %v26895_v24  ;;  %v26073_v10 = vcombine.high %v5705_v58, %v6089_v63  ;;  %v6093_v56 = vld [vmem:[%s26873_s24 + $0x1500] sm:$0x11] }
 0x4c7   : > { %v19185_v23 = vpop.f32.mrf.mxu0  ;;  %v19225_v25 = vpop.f32.mrf.mxu1  ;;  %21181 = vmatprep.mubr.bf16.mxu0 %v5209_v13  ;;  %21221 = vmatprep.mubr.bf16.mxu1 %v5211_v14  ;;  %v26075_v11 = vcombine.high %v5706_v0, %v6090_v1  ;;  %v3051_v20 = vcombine.high %v379_v12, %v379_v12 }
 0x4c8   : > { %v19224_v29 = vadd.f32 %v19223_v21, %v19184_v22  ;;  %21243 = vmatprep.subr.bf16.mxu0 %v26065_v17  ;;  %21283 = vmatprep.subr.bf16.mxu1 %v26067_v18  ;;  %v3049_v18 = vcombine.high %v29287_v8, %v29287_v8  ;;  %v3050_v19 = vcombine.high %v29290_v9, %v29290_v9  ;;  %v5707_v22 = vld [vmem:[%s26873_s24 + $0x8f0] sm:$0xff] }
 0x4c9   : > { %v19186_v31 = vpop.f32.mrf.mxu0  ;;  %v19226_v32 = vpop.f32.mrf.mxu1  ;;  %v5222_v55 = vpack.c.bf16 %v29290_v9, %v29290_v9 }
 0x4ca   : > { %v26072_v31 = vcombine.low %v5705_v58, %v6089_v63  ;;  %v26074_v32 = vcombine.low %v5706_v0, %v6090_v1  ;;  %v5221_v35 = vpack.c.bf16 %v3049_v18, %v3049_v18  ;;  %v5223_v36 = vpack.c.bf16 %v3050_v19, %v3050_v19  ;;  %v6094_v58 = vld [vmem:[%s26873_s24 + $0x1508] sm:$0x11] }
 0x4cb   : > { %v19187_v40 = vpop.f32.mrf.mxu0  ;;  %v19227_v41 = vpop.f32.mrf.mxu1  ;;  %v5224_v18 = vpack.c.bf16 %v29306_v37, %v29306_v37 }
 0x4cc   : > { %v380_v41 = vld [vmem:[%s26866_s29 + $0x480] sm:$0xff] }
 0x4cd   : > { %v19263_v49 = vpop.f32.mrf.mxu0  ;;  %v19303_v50 = vpop.f32.mrf.mxu1  ;;  %21182 = vmatmul.mubr.bf16.vlgmr.msra.gmra.mxu0 %v5208_v33  ;;  %21222 = vmatmul.mubr.bf16.vlgmr.msra.gmra.mxu1 %v5210_v34  ;;  %v29325_v1 = vrot.slane %v380_v41, %v26895_v24 }
 0x4ce   : > { %v19264_v51 = vadd.f32 %v19263_v49, %v19224_v29  ;;  %21244 = vmatpush1.bf16.xpose.msra.mxu0 %v26064_v38  ;;  %21284 = vmatpush1.bf16.xpose.msra.mxu1 %v26066_v39  ;;  %v5708_v29 = vld [vmem:[%s26873_s24 + $0x8f8] sm:$0xff]  ;;  %v29309_v38 = vrot.slane %v3051_v20, %v26895_v24  ;;  %v26077_v39 = vcombine.high %v5707_v22, %v6091_v28  ;;  %v6095_v20 = vld [vmem:[%s26873_s24 + $0x1510] sm:$0x11] }
 0x4cf   : > { %v19265_v52 = vpop.f32.mrf.mxu0  ;;  %v19305_v53 = vpop.f32.mrf.mxu1  ;;  %21261 = vmatprep.mubr.bf16.mxu0 %v5213_v42  ;;  %21301 = vmatprep.mubr.bf16.mxu1 %v5215_v43  ;;  %v26079_v40 = vcombine.high %v5708_v29, %v6092_v30  ;;  %v3068_v49 = vcombine.high %v380_v41, %v380_v41 }
 0x4d0   : > { %v19304_v57 = vadd.f32 %v19303_v50, %v19264_v51  ;;  %21323 = vmatprep.subr.bf16.mxu0 %v26069_v46  ;;  %21363 = vmatprep.subr.bf16.mxu1 %v26071_v47  ;;  %v3066_v47 = vcombine.high %v29306_v37, %v29306_v37  ;;  %v3067_v48 = vcombine.high %v29309_v38, %v29309_v38  ;;  %v5709_v51 = vld [vmem:[%s26873_s24 + $0x900] sm:$0xff] }
 0x4d1   : > { %v19266_v59 = vpop.f32.mrf.mxu0  ;;  %v19306_v60 = vpop.f32.mrf.mxu1  ;;  %v5226_v19 = vpack.c.bf16 %v29309_v38, %v29309_v38 }
 0x4d2   : > { %v26076_v59 = vcombine.low %v5707_v22, %v6091_v28  ;;  %v26078_v60 = vcombine.low %v5708_v29, %v6092_v30  ;;  %v5225_v63 = vpack.c.bf16 %v3066_v47, %v3066_v47  ;;  %v5227_v0 = vpack.c.bf16 %v3067_v48, %v3067_v48  ;;  %v6096_v22 = vld [vmem:[%s26873_s24 + $0x1518] sm:$0x11] }
 0x4d3   : > { %v19267_v4 = vpop.f32.mrf.mxu0  ;;  %v19307_v5 = vpop.f32.mrf.mxu1  ;;  %v5228_v47 = vpack.c.bf16 %v29325_v1, %v29325_v1 }
 0x4d4   : > { %v381_v5 = vld [vmem:[%s26866_s29 + $0x488] sm:$0xff] }
 0x4d5   : > { %v19343_v13 = vpop.f32.mrf.mxu0  ;;  %v19383_v14 = vpop.f32.mrf.mxu1  ;;  %21262 = vmatmul.mubr.bf16.vlgmr.msra.gmra.mxu0 %v5212_v61  ;;  %21302 = vmatmul.mubr.bf16.vlgmr.msra.gmra.mxu1 %v5214_v62  ;;  %v29344_v30 = vrot.slane %v381_v5, %v26895_v24 }
 0x4d6   : > { %v19344_v15 = vadd.f32 %v19343_v13, %v19304_v57  ;;  %21324 = vmatpush1.bf16.xpose.msra.mxu0 %v26068_v2  ;;  %21364 = vmatpush1.bf16.xpose.msra.mxu1 %v26070_v3  ;;  %v5710_v57 = vld [vmem:[%s26873_s24 + $0x908] sm:$0xff]  ;;  %v29328_v2 = vrot.slane %v3068_v49, %v26895_v24  ;;  %v26081_v3 = vcombine.high %v5709_v51, %v6093_v56  ;;  %v6097_v49 = vld [vmem:[%s26873_s24 + $0x1520] sm:$0x11] }
 0x4d7   : > { %v19345_v16 = vpop.f32.mrf.mxu0  ;;  %v19385_v17 = vpop.f32.mrf.mxu1  ;;  %21341 = vmatprep.mubr.bf16.mxu0 %v5217_v6  ;;  %21381 = vmatprep.mubr.bf16.mxu1 %v5219_v7  ;;  %v26083_v4 = vcombine.high %v5710_v57, %v6094_v58  ;;  %v3085_v13 = vcombine.high %v381_v5, %v381_v5 }
 0x4d8   : > { %v19384_v21 = vadd.f32 %v19383_v14, %v19344_v15  ;;  %21403 = vmatprep.subr.bf16.mxu0 %v26073_v10  ;;  %21443 = vmatprep.subr.bf16.mxu1 %v26075_v11  ;;  %v3083_v11 = vcombine.high %v29325_v1, %v29325_v1  ;;  %v3084_v12 = vcombine.high %v29328_v2, %v29328_v2  ;;  %v5711_v15 = vld [vmem:[%s26873_s24 + $0x910] sm:$0xff] }
 0x4d9   : > { %v19346_v23 = vpop.f32.mrf.mxu0  ;;  %v19386_v25 = vpop.f32.mrf.mxu1  ;;  %v5230_v48 = vpack.c.bf16 %v29328_v2, %v29328_v2 }
 0x4da   : > { %v26080_v23 = vcombine.low %v5709_v51, %v6093_v56  ;;  %v26082_v25 = vcombine.low %v5710_v57, %v6094_v58  ;;  %v5229_v28 = vpack.c.bf16 %v3083_v11, %v3083_v11  ;;  %v5231_v29 = vpack.c.bf16 %v3084_v12, %v3084_v12  ;;  %v6098_v51 = vld [vmem:[%s26873_s24 + $0x1528] sm:$0x11] }
 0x4db   : > { %v19347_v33 = vpop.f32.mrf.mxu0  ;;  %v19387_v34 = vpop.f32.mrf.mxu1  ;;  %v5232_v11 = vpack.c.bf16 %v29344_v30, %v29344_v30 }
 0x4dc   : > { %v382_v34 = vld [vmem:[%s26866_s29 + $0x490] sm:$0xff] }
 0x4dd   : > { %v19423_v42 = vpop.f32.mrf.mxu0  ;;  %v19463_v43 = vpop.f32.mrf.mxu1  ;;  %21342 = vmatmul.mubr.bf16.vlgmr.msra.gmra.mxu0 %v5216_v26  ;;  %21382 = vmatmul.mubr.bf16.vlgmr.msra.gmra.mxu1 %v5218_v27  ;;  %v29363_v58 = vrot.slane %v382_v34, %v26895_v24 }
 0x4de   : > { %v19424_v44 = vadd.f32 %v19423_v42, %v19384_v21  ;;  %21404 = vmatpush1.bf16.xpose.msra.mxu0 %v26072_v31  ;;  %21444 = vmatpush1.bf16.xpose.msra.mxu1 %v26074_v32  ;;  %v5712_v21 = vld [vmem:[%s26873_s24 + $0x918] sm:$0xff]  ;;  %v29347_v31 = vrot.slane %v3085_v13, %v26895_v24  ;;  %v26085_v32 = vcombine.high %v5711_v15, %v6095_v20  ;;  %v6099_v13 = vld [vmem:[%s26873_s24 + $0x1530] sm:$0x11] }
 0x4df   : > { %v19425_v45 = vpop.f32.mrf.mxu0  ;;  %v19465_v46 = vpop.f32.mrf.mxu1  ;;  %21421 = vmatprep.mubr.bf16.mxu0 %v5221_v35  ;;  %21461 = vmatprep.mubr.bf16.mxu1 %v5223_v36  ;;  %v26087_v33 = vcombine.high %v5712_v21, %v6096_v22  ;;  %v3102_v42 = vcombine.high %v382_v34, %v382_v34 }
 0x4e0   : > { %v19464_v50 = vadd.f32 %v19463_v43, %v19424_v44  ;;  %21483 = vmatprep.subr.bf16.mxu0 %v26077_v39  ;;  %21523 = vmatprep.subr.bf16.mxu1 %v26079_v40  ;;  %v3100_v40 = vcombine.high %v29344_v30, %v29344_v30  ;;  %v3101_v41 = vcombine.high %v29347_v31, %v29347_v31  ;;  %v5713_v44 = vld [vmem:[%s26873_s24 + $0x920] sm:$0xff] }
 0x4e1   : > { %v19426_v52 = vpop.f32.mrf.mxu0  ;;  %v19466_v53 = vpop.f32.mrf.mxu1  ;;  %v5234_v12 = vpack.c.bf16 %v29347_v31, %v29347_v31 }
 0x4e2   : > { %v26084_v52 = vcombine.low %v5711_v15, %v6095_v20  ;;  %v26086_v53 = vcombine.low %v5712_v21, %v6096_v22  ;;  %v5233_v56 = vpack.c.bf16 %v3100_v40, %v3100_v40  ;;  %v5235_v57 = vpack.c.bf16 %v3101_v41, %v3101_v41  ;;  %v6100_v15 = vld [vmem:[%s26873_s24 + $0x1538] sm:$0x11] }
 0x4e3   : > { %v19427_v61 = vpop.f32.mrf.mxu0  ;;  %v19467_v62 = vpop.f32.mrf.mxu1  ;;  %v5236_v40 = vpack.c.bf16 %v29363_v58, %v29363_v58 }
 0x4e4   : > { %v383_v62 = vld [vmem:[%s26866_s29 + $0x498] sm:$0xff] }
 0x4e5   : > { %v19503_v6 = vpop.f32.mrf.mxu0  ;;  %v19543_v7 = vpop.f32.mrf.mxu1  ;;  %21422 = vmatmul.mubr.bf16.vlgmr.msra.gmra.mxu0 %v5220_v54  ;;  %21462 = vmatmul.mubr.bf16.vlgmr.msra.gmra.mxu1 %v5222_v55  ;;  %v29382_v22 = vrot.slane %v383_v62, %v26895_v24 }
 0x4e6   : > { %v19504_v8 = vadd.f32 %v19503_v6, %v19464_v50  ;;  %21484 = vmatpush1.bf16.xpose.msra.mxu0 %v26076_v59  ;;  %21524 = vmatpush1.bf16.xpose.msra.mxu1 %v26078_v60  ;;  %v5714_v50 = vld [vmem:[%s26873_s24 + $0x928] sm:$0xff]  ;;  %v29366_v59 = vrot.slane %v3102_v42, %v26895_v24  ;;  %v26089_v60 = vcombine.high %v5713_v44, %v6097_v49  ;;  %v6101_v42 = vld [vmem:[%s26873_s24 + $0x1540] sm:$0x11] }
 0x4e7   : > { %v19505_v9 = vpop.f32.mrf.mxu0  ;;  %v19545_v10 = vpop.f32.mrf.mxu1  ;;  %21501 = vmatprep.mubr.bf16.mxu0 %v5225_v63  ;;  %21541 = vmatprep.mubr.bf16.mxu1 %v5227_v0  ;;  %v26091_v61 = vcombine.high %v5714_v50, %v6098_v51  ;;  %v3119_v6 = vcombine.high %v383_v62, %v383_v62 }
 0x4e8   : > { %v19544_v14 = vadd.f32 %v19543_v7, %v19504_v8  ;;  %21563 = vmatprep.subr.bf16.mxu0 %v26081_v3  ;;  %21603 = vmatprep.subr.bf16.mxu1 %v26083_v4  ;;  %v3117_v4 = vcombine.high %v29363_v58, %v29363_v58  ;;  %v3118_v5 = vcombine.high %v29366_v59, %v29366_v59  ;;  %v5715_v8 = vld [vmem:[%s26873_s24 + $0x930] sm:$0xff] }
 0x4e9   : > { %v19506_v16 = vpop.f32.mrf.mxu0  ;;  %v19546_v17 = vpop.f32.mrf.mxu1  ;;  %v5238_v41 = vpack.c.bf16 %v29366_v59, %v29366_v59 }
 0x4ea   : > { %v26088_v16 = vcombine.low %v5713_v44, %v6097_v49  ;;  %v26090_v17 = vcombine.low %v5714_v50, %v6098_v51  ;;  %v5237_v20 = vpack.c.bf16 %v3117_v4, %v3117_v4  ;;  %v5239_v21 = vpack.c.bf16 %v3118_v5, %v3118_v5  ;;  %v6102_v44 = vld [vmem:[%s26873_s24 + $0x1548] sm:$0x11] }
 0x4eb   : > { %v19507_v26 = vpop.f32.mrf.mxu0  ;;  %v19547_v27 = vpop.f32.mrf.mxu1  ;;  %v5240_v4 = vpack.c.bf16 %v29382_v22, %v29382_v22 }
 0x4ec   : > { %v384_v27 = vld [vmem:[%s26866_s29 + $0x4a0] sm:$0xff] }
 0x4ed   : > { %v19583_v35 = vpop.f32.mrf.mxu0  ;;  %v19623_v36 = vpop.f32.mrf.mxu1  ;;  %21502 = vmatmul.mubr.bf16.vlgmr.msra.gmra.mxu0 %v5224_v18  ;;  %21542 = vmatmul.mubr.bf16.vlgmr.msra.gmra.mxu1 %v5226_v19  ;;  %v29401_v51 = vrot.slane %v384_v27, %v26895_v24 }
 0x4ee   : > { %v19584_v37 = vadd.f32 %v19583_v35, %v19544_v14  ;;  %21564 = vmatpush1.bf16.xpose.msra.mxu0 %v26080_v23  ;;  %21604 = vmatpush1.bf16.xpose.msra.mxu1 %v26082_v25  ;;  %v5716_v14 = vld [vmem:[%s26873_s24 + $0x938] sm:$0xff]  ;;  %v29385_v23 = vrot.slane %v3119_v6, %v26895_v24  ;;  %v26093_v25 = vcombine.high %v5715_v8, %v6099_v13  ;;  %v6103_v6 = vld [vmem:[%s26873_s24 + $0x1550] sm:$0x11] }
 0x4ef   : > { %v19585_v38 = vpop.f32.mrf.mxu0  ;;  %v19625_v39 = vpop.f32.mrf.mxu1  ;;  %21581 = vmatprep.mubr.bf16.mxu0 %v5229_v28  ;;  %21621 = vmatprep.mubr.bf16.mxu1 %v5231_v29  ;;  %v26095_v26 = vcombine.high %v5716_v14, %v6100_v15  ;;  %v3136_v35 = vcombine.high %v384_v27, %v384_v27 }
 0x4f0   : > { %v19624_v43 = vadd.f32 %v19623_v36, %v19584_v37  ;;  %21643 = vmatprep.subr.bf16.mxu0 %v26085_v32  ;;  %21683 = vmatprep.subr.bf16.mxu1 %v26087_v33  ;;  %v3134_v33 = vcombine.high %v29382_v22, %v29382_v22  ;;  %v3135_v34 = vcombine.high %v29385_v23, %v29385_v23  ;;  %v5717_v37 = vld [vmem:[%s26873_s24 + $0x940] sm:$0xff] }
 0x4f1   : > { %v19586_v45 = vpop.f32.mrf.mxu0  ;;  %v19626_v46 = vpop.f32.mrf.mxu1  ;;  %v5242_v5 = vpack.c.bf16 %v29385_v23, %v29385_v23 }
 0x4f2   : > { %v26092_v45 = vcombine.low %v5715_v8, %v6099_v13  ;;  %v26094_v46 = vcombine.low %v5716_v14, %v6100_v15  ;;  %v5241_v49 = vpack.c.bf16 %v3134_v33, %v3134_v33  ;;  %v5243_v50 = vpack.c.bf16 %v3135_v34, %v3135_v34  ;;  %v6104_v8 = vld [vmem:[%s26873_s24 + $0x1558] sm:$0x11] }
 0x4f3   : > { %v19587_v54 = vpop.f32.mrf.mxu0  ;;  %v19627_v55 = vpop.f32.mrf.mxu1  ;;  %v5244_v33 = vpack.c.bf16 %v29401_v51, %v29401_v51 }
 0x4f4   : > { %v385_v55 = vld [vmem:[%s26866_s29 + $0x4a8] sm:$0xff] }
 0x4f5   : > { %v19663_v63 = vpop.f32.mrf.mxu0  ;;  %v19703_v0 = vpop.f32.mrf.mxu1  ;;  %21582 = vmatmul.mubr.bf16.vlgmr.msra.gmra.mxu0 %v5228_v47  ;;  %21622 = vmatmul.mubr.bf16.vlgmr.msra.gmra.mxu1 %v5230_v48  ;;  %v29420_v15 = vrot.slane %v385_v55, %v26895_v24 }
 0x4f6   : > { %v19664_v1 = vadd.f32 %v19663_v63, %v19624_v43  ;;  %21644 = vmatpush1.bf16.xpose.msra.mxu0 %v26084_v52  ;;  %21684 = vmatpush1.bf16.xpose.msra.mxu1 %v26086_v53  ;;  %v5718_v43 = vld [vmem:[%s26873_s24 + $0x948] sm:$0xff]  ;;  %v29404_v52 = vrot.slane %v3136_v35, %v26895_v24  ;;  %v26097_v53 = vcombine.high %v5717_v37, %v6101_v42  ;;  %v6105_v35 = vld [vmem:[%s26873_s24 + $0x1560] sm:$0x11] }
 0x4f7   : > { %v19665_v2 = vpop.f32.mrf.mxu0  ;;  %v19705_v3 = vpop.f32.mrf.mxu1  ;;  %21661 = vmatprep.mubr.bf16.mxu0 %v5233_v56  ;;  %21701 = vmatprep.mubr.bf16.mxu1 %v5235_v57  ;;  %v26099_v54 = vcombine.high %v5718_v43, %v6102_v44  ;;  %v3153_v63 = vcombine.high %v385_v55, %v385_v55 }
 0x4f8   : > { %v19704_v7 = vadd.f32 %v19703_v0, %v19664_v1  ;;  %21723 = vmatprep.subr.bf16.mxu0 %v26089_v60  ;;  %21763 = vmatprep.subr.bf16.mxu1 %v26091_v61  ;;  %v3151_v61 = vcombine.high %v29401_v51, %v29401_v51  ;;  %v3152_v62 = vcombine.high %v29404_v52, %v29404_v52  ;;  %v5719_v1 = vld [vmem:[%s26873_s24 + $0x950] sm:$0xff] }
 0x4f9   : > { %v19666_v9 = vpop.f32.mrf.mxu0  ;;  %v19706_v10 = vpop.f32.mrf.mxu1  ;;  %v5246_v34 = vpack.c.bf16 %v29404_v52, %v29404_v52 }
 0x4fa   : > { %v26096_v9 = vcombine.low %v5717_v37, %v6101_v42  ;;  %v26098_v10 = vcombine.low %v5718_v43, %v6102_v44  ;;  %v5245_v13 = vpack.c.bf16 %v3151_v61, %v3151_v61  ;;  %v5247_v14 = vpack.c.bf16 %v3152_v62, %v3152_v62  ;;  %v6106_v37 = vld [vmem:[%s26873_s24 + $0x1568] sm:$0x11] }
 0x4fb   : > { %v19667_v18 = vpop.f32.mrf.mxu0  ;;  %v19707_v19 = vpop.f32.mrf.mxu1  ;;  %v5248_v61 = vpack.c.bf16 %v29420_v15, %v29420_v15 }
 0x4fc   : > { %v386_v19 = vld [vmem:[%s26866_s29 + $0x4b0] sm:$0xff] }
 0x4fd   : > { %v19743_v28 = vpop.f32.mrf.mxu0  ;;  %v19783_v29 = vpop.f32.mrf.mxu1  ;;  %21662 = vmatmul.mubr.bf16.vlgmr.msra.gmra.mxu0 %v5232_v11  ;;  %21702 = vmatmul.mubr.bf16.vlgmr.msra.gmra.mxu1 %v5234_v12  ;;  %v29439_v44 = vrot.slane %v386_v19, %v26895_v24 }
 0x4fe   : > { %v19744_v30 = vadd.f32 %v19743_v28, %v19704_v7  ;;  %21724 = vmatpush1.bf16.xpose.msra.mxu0 %v26088_v16  ;;  %21764 = vmatpush1.bf16.xpose.msra.mxu1 %v26090_v17  ;;  %v5720_v7 = vld [vmem:[%s26873_s24 + $0x958] sm:$0xff]  ;;  %v29423_v16 = vrot.slane %v3153_v63, %v26895_v24  ;;  %v26101_v17 = vcombine.high %v5719_v1, %v6103_v6  ;;  %v6107_v63 = vld [vmem:[%s26873_s24 + $0x1570] sm:$0x11] }
 0x4ff   : > { %v19745_v31 = vpop.f32.mrf.mxu0  ;;  %v19785_v32 = vpop.f32.mrf.mxu1  ;;  %21741 = vmatprep.mubr.bf16.mxu0 %v5237_v20  ;;  %21781 = vmatprep.mubr.bf16.mxu1 %v5239_v21  ;;  %v26103_v18 = vcombine.high %v5720_v7, %v6104_v8  ;;  %v3170_v28 = vcombine.high %v386_v19, %v386_v19 }
 0x500   : > { %v19784_v36 = vadd.f32 %v19783_v29, %v19744_v30  ;;  %21803 = vmatprep.subr.bf16.mxu0 %v26093_v25  ;;  %21843 = vmatprep.subr.bf16.mxu1 %v26095_v26  ;;  %v3168_v26 = vcombine.high %v29420_v15, %v29420_v15  ;;  %v3169_v27 = vcombine.high %v29423_v16, %v29423_v16  ;;  %v5721_v30 = vld [vmem:[%s26873_s24 + $0x960] sm:$0xff] }
 0x501   : > { %v19746_v38 = vpop.f32.mrf.mxu0  ;;  %v19786_v39 = vpop.f32.mrf.mxu1  ;;  %v5250_v62 = vpack.c.bf16 %v29423_v16, %v29423_v16 }
 0x502   : > { %v26100_v38 = vcombine.low %v5719_v1, %v6103_v6  ;;  %v26102_v39 = vcombine.low %v5720_v7, %v6104_v8  ;;  %v5249_v42 = vpack.c.bf16 %v3168_v26, %v3168_v26  ;;  %v5251_v43 = vpack.c.bf16 %v3169_v27, %v3169_v27  ;;  %v6108_v1 = vld [vmem:[%s26873_s24 + $0x1578] sm:$0x11] }
 0x503   : > { %v19747_v47 = vpop.f32.mrf.mxu0  ;;  %v19787_v48 = vpop.f32.mrf.mxu1  ;;  %v5252_v26 = vpack.c.bf16 %v29439_v44, %v29439_v44 }
 0x504   : > { %v387_v48 = vld [vmem:[%s26866_s29 + $0x4b8] sm:$0xff] }
 0x505   : > { %v19823_v56 = vpop.f32.mrf.mxu0  ;;  %v19863_v57 = vpop.f32.mrf.mxu1  ;;  %21742 = vmatmul.mubr.bf16.vlgmr.msra.gmra.mxu0 %v5236_v40  ;;  %21782 = vmatmul.mubr.bf16.vlgmr.msra.gmra.mxu1 %v5238_v41  ;;  %v29458_v8 = vrot.slane %v387_v48, %v26895_v24 }
 0x506   : > { %v19824_v58 = vadd.f32 %v19823_v56, %v19784_v36  ;;  %21804 = vmatpush1.bf16.xpose.msra.mxu0 %v26092_v45  ;;  %21844 = vmatpush1.bf16.xpose.msra.mxu1 %v26094_v46  ;;  %v5722_v36 = vld [vmem:[%s26873_s24 + $0x968] sm:$0xff]  ;;  %v29442_v45 = vrot.slane %v3170_v28, %v26895_v24  ;;  %v26105_v46 = vcombine.high %v5721_v30, %v6105_v35  ;;  %v6109_v28 = vld [vmem:[%s26873_s24 + $0x1580] sm:$0x11] }
 0x507   : > { %v19825_v59 = vpop.f32.mrf.mxu0  ;;  %v19865_v60 = vpop.f32.mrf.mxu1  ;;  %21821 = vmatprep.mubr.bf16.mxu0 %v5241_v49  ;;  %21861 = vmatprep.mubr.bf16.mxu1 %v5243_v50  ;;  %v26107_v47 = vcombine.high %v5722_v36, %v6106_v37  ;;  %v3187_v56 = vcombine.high %v387_v48, %v387_v48 }
 0x508   : > { %v19864_v0 = vadd.f32 %v19863_v57, %v19824_v58  ;;  %21883 = vmatprep.subr.bf16.mxu0 %v26097_v53  ;;  %21923 = vmatprep.subr.bf16.mxu1 %v26099_v54  ;;  %v3185_v54 = vcombine.high %v29439_v44, %v29439_v44  ;;  %v3186_v55 = vcombine.high %v29442_v45, %v29442_v45  ;;  %v5723_v58 = vld [vmem:[%s26873_s24 + $0x970] sm:$0xff] }
 0x509   : > { %v19826_v2 = vpop.f32.mrf.mxu0  ;;  %v19866_v3 = vpop.f32.mrf.mxu1  ;;  %v5254_v27 = vpack.c.bf16 %v29442_v45, %v29442_v45 }
 0x50a   : > { %v26104_v2 = vcombine.low %v5721_v30, %v6105_v35  ;;  %v26106_v3 = vcombine.low %v5722_v36, %v6106_v37  ;;  %v5253_v6 = vpack.c.bf16 %v3185_v54, %v3185_v54  ;;  %v5255_v7 = vpack.c.bf16 %v3186_v55, %v3186_v55  ;;  %v6110_v30 = vld [vmem:[%s26873_s24 + $0x1588] sm:$0x11] }
 0x50b   : > { %v19827_v11 = vpop.f32.mrf.mxu0  ;;  %v19867_v12 = vpop.f32.mrf.mxu1  ;;  %v5256_v54 = vpack.c.bf16 %v29458_v8, %v29458_v8 }
 0x50c   : > { %v388_v12 = vld [vmem:[%s26866_s29 + $0x4c0] sm:$0xff] }
 0x50d   : > { %v19903_v20 = vpop.f32.mrf.mxu0  ;;  %v19943_v21 = vpop.f32.mrf.mxu1  ;;  %21822 = vmatmul.mubr.bf16.vlgmr.msra.gmra.mxu0 %v5240_v4  ;;  %21862 = vmatmul.mubr.bf16.vlgmr.msra.gmra.mxu1 %v5242_v5  ;;  %v29477_v37 = vrot.slane %v388_v12, %v26895_v24 }
 0x50e   : > { %v19904_v22 = vadd.f32 %v19903_v20, %v19864_v0  ;;  %21884 = vmatpush1.bf16.xpose.msra.mxu0 %v26096_v9  ;;  %21924 = vmatpush1.bf16.xpose.msra.mxu1 %v26098_v10  ;;  %v5724_v0 = vld [vmem:[%s26873_s24 + $0x978] sm:$0xff]  ;;  %v29461_v9 = vrot.slane %v3187_v56, %v26895_v24  ;;  %v26109_v10 = vcombine.high %v5723_v58, %v6107_v63  ;;  %v6111_v56 = vld [vmem:[%s26873_s24 + $0x1590] sm:$0x11] }
 0x50f   : > { %v19905_v23 = vpop.f32.mrf.mxu0  ;;  %v19945_v25 = vpop.f32.mrf.mxu1  ;;  %21901 = vmatprep.mubr.bf16.mxu0 %v5245_v13  ;;  %21941 = vmatprep.mubr.bf16.mxu1 %v5247_v14  ;;  %v26111_v11 = vcombine.high %v5724_v0, %v6108_v1  ;;  %v3204_v20 = vcombine.high %v388_v12, %v388_v12 }
 0x510   : > { %v19944_v29 = vadd.f32 %v19943_v21, %v19904_v22  ;;  %21963 = vmatprep.subr.bf16.mxu0 %v26101_v17  ;;  %22003 = vmatprep.subr.bf16.mxu1 %v26103_v18  ;;  %v3202_v18 = vcombine.high %v29458_v8, %v29458_v8  ;;  %v3203_v19 = vcombine.high %v29461_v9, %v29461_v9  ;;  %v5725_v22 = vld [vmem:[%s26873_s24 + $0x980] sm:$0xff] }
 0x511   : > { %v19906_v31 = vpop.f32.mrf.mxu0  ;;  %v19946_v32 = vpop.f32.mrf.mxu1  ;;  %v5258_v55 = vpack.c.bf16 %v29461_v9, %v29461_v9 }
 0x512   : > { %v26108_v31 = vcombine.low %v5723_v58, %v6107_v63  ;;  %v26110_v32 = vcombine.low %v5724_v0, %v6108_v1  ;;  %v5257_v35 = vpack.c.bf16 %v3202_v18, %v3202_v18  ;;  %v5259_v36 = vpack.c.bf16 %v3203_v19, %v3203_v19  ;;  %v6112_v58 = vld [vmem:[%s26873_s24 + $0x1598] sm:$0x11] }
 0x513   : > { %v19907_v40 = vpop.f32.mrf.mxu0  ;;  %v19947_v41 = vpop.f32.mrf.mxu1  ;;  %v5260_v18 = vpack.c.bf16 %v29477_v37, %v29477_v37 }
 0x514   : > { %v389_v41 = vld [vmem:[%s26866_s29 + $0x4c8] sm:$0xff] }
 0x515   : > { %v19983_v49 = vpop.f32.mrf.mxu0  ;;  %v20023_v50 = vpop.f32.mrf.mxu1  ;;  %21902 = vmatmul.mubr.bf16.vlgmr.msra.gmra.mxu0 %v5244_v33  ;;  %21942 = vmatmul.mubr.bf16.vlgmr.msra.gmra.mxu1 %v5246_v34  ;;  %v29496_v1 = vrot.slane %v389_v41, %v26895_v24 }
 0x516   : > { %v19984_v51 = vadd.f32 %v19983_v49, %v19944_v29  ;;  %21964 = vmatpush1.bf16.xpose.msra.mxu0 %v26100_v38  ;;  %22004 = vmatpush1.bf16.xpose.msra.mxu1 %v26102_v39  ;;  %v5726_v29 = vld [vmem:[%s26873_s24 + $0x988] sm:$0xff]  ;;  %v29480_v38 = vrot.slane %v3204_v20, %v26895_v24  ;;  %v26113_v39 = vcombine.high %v5725_v22, %v6109_v28  ;;  %v6113_v20 = vld [vmem:[%s26873_s24 + $0x15a0] sm:$0x11] }
 0x517   : > { %v19985_v52 = vpop.f32.mrf.mxu0  ;;  %v20025_v53 = vpop.f32.mrf.mxu1  ;;  %21981 = vmatprep.mubr.bf16.mxu0 %v5249_v42  ;;  %22021 = vmatprep.mubr.bf16.mxu1 %v5251_v43  ;;  %v26115_v40 = vcombine.high %v5726_v29, %v6110_v30  ;;  %v3221_v49 = vcombine.high %v389_v41, %v389_v41 }
 0x518   : > { %v20024_v57 = vadd.f32 %v20023_v50, %v19984_v51  ;;  %22043 = vmatprep.subr.bf16.mxu0 %v26105_v46  ;;  %22083 = vmatprep.subr.bf16.mxu1 %v26107_v47  ;;  %v3219_v47 = vcombine.high %v29477_v37, %v29477_v37  ;;  %v3220_v48 = vcombine.high %v29480_v38, %v29480_v38  ;;  %v5727_v51 = vld [vmem:[%s26873_s24 + $0x990] sm:$0xff] }
 0x519   : > { %v19986_v59 = vpop.f32.mrf.mxu0  ;;  %v20026_v60 = vpop.f32.mrf.mxu1  ;;  %v5262_v19 = vpack.c.bf16 %v29480_v38, %v29480_v38 }
 0x51a   : > { %v26112_v59 = vcombine.low %v5725_v22, %v6109_v28  ;;  %v26114_v60 = vcombine.low %v5726_v29, %v6110_v30  ;;  %v5261_v63 = vpack.c.bf16 %v3219_v47, %v3219_v47  ;;  %v5263_v0 = vpack.c.bf16 %v3220_v48, %v3220_v48  ;;  %v6114_v22 = vld [vmem:[%s26873_s24 + $0x15a8] sm:$0x11] }
 0x51b   : > { %v19987_v4 = vpop.f32.mrf.mxu0  ;;  %v20027_v5 = vpop.f32.mrf.mxu1  ;;  %v5264_v47 = vpack.c.bf16 %v29496_v1, %v29496_v1 }
 0x51c   : > { %v390_v5 = vld [vmem:[%s26866_s29 + $0x4d0] sm:$0xff] }
 0x51d   : > { %v20063_v13 = vpop.f32.mrf.mxu0  ;;  %v20103_v14 = vpop.f32.mrf.mxu1  ;;  %21982 = vmatmul.mubr.bf16.vlgmr.msra.gmra.mxu0 %v5248_v61  ;;  %22022 = vmatmul.mubr.bf16.vlgmr.msra.gmra.mxu1 %v5250_v62  ;;  %v29515_v30 = vrot.slane %v390_v5, %v26895_v24 }
 0x51e   : > { %v20064_v15 = vadd.f32 %v20063_v13, %v20024_v57  ;;  %22044 = vmatpush1.bf16.xpose.msra.mxu0 %v26104_v2  ;;  %22084 = vmatpush1.bf16.xpose.msra.mxu1 %v26106_v3  ;;  %v5728_v57 = vld [vmem:[%s26873_s24 + $0x998] sm:$0xff]  ;;  %v29499_v2 = vrot.slane %v3221_v49, %v26895_v24  ;;  %v26117_v3 = vcombine.high %v5727_v51, %v6111_v56  ;;  %v6115_v49 = vld [vmem:[%s26873_s24 + $0x15b0] sm:$0x11] }
 0x51f   : > { %v20065_v16 = vpop.f32.mrf.mxu0  ;;  %v20105_v17 = vpop.f32.mrf.mxu1  ;;  %22061 = vmatprep.mubr.bf16.mxu0 %v5253_v6  ;;  %22101 = vmatprep.mubr.bf16.mxu1 %v5255_v7  ;;  %v26119_v4 = vcombine.high %v5728_v57, %v6112_v58  ;;  %v3238_v13 = vcombine.high %v390_v5, %v390_v5 }
 0x520   : > { %v20104_v21 = vadd.f32 %v20103_v14, %v20064_v15  ;;  %22123 = vmatprep.subr.bf16.mxu0 %v26109_v10  ;;  %22163 = vmatprep.subr.bf16.mxu1 %v26111_v11  ;;  %v3236_v11 = vcombine.high %v29496_v1, %v29496_v1  ;;  %v3237_v12 = vcombine.high %v29499_v2, %v29499_v2  ;;  %v5729_v15 = vld [vmem:[%s26873_s24 + $0x9a0] sm:$0xff] }
 0x521   : > { %v20066_v23 = vpop.f32.mrf.mxu0  ;;  %v20106_v25 = vpop.f32.mrf.mxu1  ;;  %v5266_v48 = vpack.c.bf16 %v29499_v2, %v29499_v2 }
 0x522   : > { %v26116_v23 = vcombine.low %v5727_v51, %v6111_v56  ;;  %v26118_v25 = vcombine.low %v5728_v57, %v6112_v58  ;;  %v5265_v28 = vpack.c.bf16 %v3236_v11, %v3236_v11  ;;  %v5267_v29 = vpack.c.bf16 %v3237_v12, %v3237_v12  ;;  %v6116_v51 = vld [vmem:[%s26873_s24 + $0x15b8] sm:$0x11] }
 0x523   : > { %v20067_v33 = vpop.f32.mrf.mxu0  ;;  %v20107_v34 = vpop.f32.mrf.mxu1  ;;  %v5268_v11 = vpack.c.bf16 %v29515_v30, %v29515_v30 }
 0x524   : > { %v391_v34 = vld [vmem:[%s26866_s29 + $0x4d8] sm:$0xff] }
 0x525   : > { %v20143_v42 = vpop.f32.mrf.mxu0  ;;  %v20183_v43 = vpop.f32.mrf.mxu1  ;;  %22062 = vmatmul.mubr.bf16.vlgmr.msra.gmra.mxu0 %v5252_v26  ;;  %22102 = vmatmul.mubr.bf16.vlgmr.msra.gmra.mxu1 %v5254_v27  ;;  %v29534_v58 = vrot.slane %v391_v34, %v26895_v24 }
 0x526   : > { %v20144_v44 = vadd.f32 %v20143_v42, %v20104_v21  ;;  %22124 = vmatpush1.bf16.xpose.msra.mxu0 %v26108_v31  ;;  %22164 = vmatpush1.bf16.xpose.msra.mxu1 %v26110_v32  ;;  %v5730_v21 = vld [vmem:[%s26873_s24 + $0x9a8] sm:$0xff]  ;;  %v29518_v31 = vrot.slane %v3238_v13, %v26895_v24  ;;  %v26121_v32 = vcombine.high %v5729_v15, %v6113_v20  ;;  %v6117_v13 = vld [vmem:[%s26873_s24 + $0x15c0] sm:$0x11] }
 0x527   : > { %v20145_v45 = vpop.f32.mrf.mxu0  ;;  %v20185_v46 = vpop.f32.mrf.mxu1  ;;  %22141 = vmatprep.mubr.bf16.mxu0 %v5257_v35  ;;  %22181 = vmatprep.mubr.bf16.mxu1 %v5259_v36  ;;  %v26123_v33 = vcombine.high %v5730_v21, %v6114_v22  ;;  %v3255_v42 = vcombine.high %v391_v34, %v391_v34 }
 0x528   : > { %v20184_v50 = vadd.f32 %v20183_v43, %v20144_v44  ;;  %22203 = vmatprep.subr.bf16.mxu0 %v26113_v39  ;;  %22243 = vmatprep.subr.bf16.mxu1 %v26115_v40  ;;  %v3253_v40 = vcombine.high %v29515_v30, %v29515_v30  ;;  %v3254_v41 = vcombine.high %v29518_v31, %v29518_v31  ;;  %v5731_v44 = vld [vmem:[%s26873_s24 + $0x9b0] sm:$0xff] }
 0x529   : > { %v20146_v52 = vpop.f32.mrf.mxu0  ;;  %v20186_v53 = vpop.f32.mrf.mxu1  ;;  %v5270_v12 = vpack.c.bf16 %v29518_v31, %v29518_v31 }
 0x52a   : > { %v26120_v52 = vcombine.low %v5729_v15, %v6113_v20  ;;  %v26122_v53 = vcombine.low %v5730_v21, %v6114_v22  ;;  %v5269_v56 = vpack.c.bf16 %v3253_v40, %v3253_v40  ;;  %v5271_v57 = vpack.c.bf16 %v3254_v41, %v3254_v41  ;;  %v6118_v15 = vld [vmem:[%s26873_s24 + $0x15c8] sm:$0x11] }
 0x52b   : > { %v20147_v61 = vpop.f32.mrf.mxu0  ;;  %v20187_v62 = vpop.f32.mrf.mxu1  ;;  %v5272_v40 = vpack.c.bf16 %v29534_v58, %v29534_v58 }
 0x52c   : > { %v392_v62 = vld [vmem:[%s26866_s29 + $0x4e0] sm:$0xff] }
 0x52d   : > { %v20223_v6 = vpop.f32.mrf.mxu0  ;;  %v20263_v7 = vpop.f32.mrf.mxu1  ;;  %22142 = vmatmul.mubr.bf16.vlgmr.msra.gmra.mxu0 %v5256_v54  ;;  %22182 = vmatmul.mubr.bf16.vlgmr.msra.gmra.mxu1 %v5258_v55  ;;  %v29553_v22 = vrot.slane %v392_v62, %v26895_v24 }
 0x52e   : > { %v20224_v8 = vadd.f32 %v20223_v6, %v20184_v50  ;;  %22204 = vmatpush1.bf16.xpose.msra.mxu0 %v26112_v59  ;;  %22244 = vmatpush1.bf16.xpose.msra.mxu1 %v26114_v60  ;;  %v5732_v50 = vld [vmem:[%s26873_s24 + $0x9b8] sm:$0xff]  ;;  %v29537_v59 = vrot.slane %v3255_v42, %v26895_v24  ;;  %v26125_v60 = vcombine.high %v5731_v44, %v6115_v49  ;;  %v6119_v42 = vld [vmem:[%s26873_s24 + $0x15d0] sm:$0x11] }
 0x52f   : > { %v20225_v9 = vpop.f32.mrf.mxu0  ;;  %v20265_v10 = vpop.f32.mrf.mxu1  ;;  %22221 = vmatprep.mubr.bf16.mxu0 %v5261_v63  ;;  %22261 = vmatprep.mubr.bf16.mxu1 %v5263_v0  ;;  %v26127_v61 = vcombine.high %v5732_v50, %v6116_v51  ;;  %v3272_v6 = vcombine.high %v392_v62, %v392_v62 }
 0x530   : > { %v20264_v14 = vadd.f32 %v20263_v7, %v20224_v8  ;;  %22283 = vmatprep.subr.bf16.mxu0 %v26117_v3  ;;  %22323 = vmatprep.subr.bf16.mxu1 %v26119_v4  ;;  %v3270_v4 = vcombine.high %v29534_v58, %v29534_v58  ;;  %v3271_v5 = vcombine.high %v29537_v59, %v29537_v59  ;;  %v5733_v8 = vld [vmem:[%s26873_s24 + $0x9c0] sm:$0xff] }
 0x531   : > { %v20226_v16 = vpop.f32.mrf.mxu0  ;;  %v20266_v17 = vpop.f32.mrf.mxu1  ;;  %v5274_v41 = vpack.c.bf16 %v29537_v59, %v29537_v59 }
 0x532   : > { %v26124_v16 = vcombine.low %v5731_v44, %v6115_v49  ;;  %v26126_v17 = vcombine.low %v5732_v50, %v6116_v51  ;;  %v5273_v20 = vpack.c.bf16 %v3270_v4, %v3270_v4  ;;  %v5275_v21 = vpack.c.bf16 %v3271_v5, %v3271_v5  ;;  %v6120_v44 = vld [vmem:[%s26873_s24 + $0x15d8] sm:$0x11] }
 0x533   : > { %v20227_v26 = vpop.f32.mrf.mxu0  ;;  %v20267_v27 = vpop.f32.mrf.mxu1  ;;  %v5276_v4 = vpack.c.bf16 %v29553_v22, %v29553_v22 }
 0x534   : > { %v393_v27 = vld [vmem:[%s26866_s29 + $0x4e8] sm:$0xff] }
 0x535   : > { %v20303_v35 = vpop.f32.mrf.mxu0  ;;  %v20343_v36 = vpop.f32.mrf.mxu1  ;;  %22222 = vmatmul.mubr.bf16.vlgmr.msra.gmra.mxu0 %v5260_v18  ;;  %22262 = vmatmul.mubr.bf16.vlgmr.msra.gmra.mxu1 %v5262_v19  ;;  %v29572_v51 = vrot.slane %v393_v27, %v26895_v24 }
 0x536   : > { %v20304_v37 = vadd.f32 %v20303_v35, %v20264_v14  ;;  %22284 = vmatpush1.bf16.xpose.msra.mxu0 %v26116_v23  ;;  %22324 = vmatpush1.bf16.xpose.msra.mxu1 %v26118_v25  ;;  %v5734_v14 = vld [vmem:[%s26873_s24 + $0x9c8] sm:$0xff]  ;;  %v29556_v23 = vrot.slane %v3272_v6, %v26895_v24  ;;  %v26129_v25 = vcombine.high %v5733_v8, %v6117_v13  ;;  %v6121_v6 = vld [vmem:[%s26873_s24 + $0x15e0] sm:$0x11] }
 0x537   : > { %v20305_v38 = vpop.f32.mrf.mxu0  ;;  %v20345_v39 = vpop.f32.mrf.mxu1  ;;  %22301 = vmatprep.mubr.bf16.mxu0 %v5265_v28  ;;  %22341 = vmatprep.mubr.bf16.mxu1 %v5267_v29  ;;  %v26131_v26 = vcombine.high %v5734_v14, %v6118_v15  ;;  %v3289_v35 = vcombine.high %v393_v27, %v393_v27 }
 0x538   : > { %v20344_v43 = vadd.f32 %v20343_v36, %v20304_v37  ;;  %22363 = vmatprep.subr.bf16.mxu0 %v26121_v32  ;;  %22403 = vmatprep.subr.bf16.mxu1 %v26123_v33  ;;  %v3287_v33 = vcombine.high %v29553_v22, %v29553_v22  ;;  %v3288_v34 = vcombine.high %v29556_v23, %v29556_v23  ;;  %v5735_v37 = vld [vmem:[%s26873_s24 + $0x9d0] sm:$0xff] }
 0x539   : > { %v20306_v45 = vpop.f32.mrf.mxu0  ;;  %v20346_v46 = vpop.f32.mrf.mxu1  ;;  %v5278_v5 = vpack.c.bf16 %v29556_v23, %v29556_v23 }
 0x53a   : > { %v26128_v45 = vcombine.low %v5733_v8, %v6117_v13  ;;  %v26130_v46 = vcombine.low %v5734_v14, %v6118_v15  ;;  %v5277_v49 = vpack.c.bf16 %v3287_v33, %v3287_v33  ;;  %v5279_v50 = vpack.c.bf16 %v3288_v34, %v3288_v34  ;;  %v6122_v8 = vld [vmem:[%s26873_s24 + $0x15e8] sm:$0x11] }
 0x53b   : > { %v20307_v54 = vpop.f32.mrf.mxu0  ;;  %v20347_v55 = vpop.f32.mrf.mxu1  ;;  %v5280_v33 = vpack.c.bf16 %v29572_v51, %v29572_v51 }
 0x53c   : > { %v394_v55 = vld [vmem:[%s26866_s29 + $0x4f0] sm:$0xff] }
 0x53d   : > { %v20383_v63 = vpop.f32.mrf.mxu0  ;;  %v20423_v0 = vpop.f32.mrf.mxu1  ;;  %22302 = vmatmul.mubr.bf16.vlgmr.msra.gmra.mxu0 %v5264_v47  ;;  %22342 = vmatmul.mubr.bf16.vlgmr.msra.gmra.mxu1 %v5266_v48  ;;  %v29591_v15 = vrot.slane %v394_v55, %v26895_v24 }
 0x53e   : > { %v20384_v1 = vadd.f32 %v20383_v63, %v20344_v43  ;;  %22364 = vmatpush1.bf16.xpose.msra.mxu0 %v26120_v52  ;;  %22404 = vmatpush1.bf16.xpose.msra.mxu1 %v26122_v53  ;;  %v5736_v43 = vld [vmem:[%s26873_s24 + $0x9d8] sm:$0xff]  ;;  %v29575_v52 = vrot.slane %v3289_v35, %v26895_v24  ;;  %v26133_v53 = vcombine.high %v5735_v37, %v6119_v42  ;;  %v6123_v35 = vld [vmem:[%s26873_s24 + $0x15f0] sm:$0x11] }
 0x53f   : > { %v20385_v2 = vpop.f32.mrf.mxu0  ;;  %v20425_v3 = vpop.f32.mrf.mxu1  ;;  %22381 = vmatprep.mubr.bf16.mxu0 %v5269_v56  ;;  %22421 = vmatprep.mubr.bf16.mxu1 %v5271_v57  ;;  %v26135_v54 = vcombine.high %v5736_v43, %v6120_v44  ;;  %v3306_v63 = vcombine.high %v394_v55, %v394_v55 }
 0x540   : > { %v20424_v7 = vadd.f32 %v20423_v0, %v20384_v1  ;;  %22443 = vmatprep.subr.bf16.mxu0 %v26125_v60  ;;  %22483 = vmatprep.subr.bf16.mxu1 %v26127_v61  ;;  %v3304_v61 = vcombine.high %v29572_v51, %v29572_v51  ;;  %v3305_v62 = vcombine.high %v29575_v52, %v29575_v52  ;;  %v5737_v1 = vld [vmem:[%s26873_s24 + $0x9e0] sm:$0xff] }
 0x541   : > { %v20386_v9 = vpop.f32.mrf.mxu0  ;;  %v20426_v10 = vpop.f32.mrf.mxu1  ;;  %v5282_v34 = vpack.c.bf16 %v29575_v52, %v29575_v52 }
 0x542   : > { %v26132_v9 = vcombine.low %v5735_v37, %v6119_v42  ;;  %v26134_v10 = vcombine.low %v5736_v43, %v6120_v44  ;;  %v5281_v13 = vpack.c.bf16 %v3304_v61, %v3304_v61  ;;  %v5283_v14 = vpack.c.bf16 %v3305_v62, %v3305_v62  ;;  %v6124_v37 = vld [vmem:[%s26873_s24 + $0x15f8] sm:$0x11] }
 0x543   : > { %v20387_v18 = vpop.f32.mrf.mxu0  ;;  %v20427_v19 = vpop.f32.mrf.mxu1  ;;  %v5284_v61 = vpack.c.bf16 %v29591_v15, %v29591_v15 }
 0x544   : > { %v395_v19 = vld [vmem:[%s26866_s29 + $0x4f8] sm:$0xff] }
 0x545   : > { %v20463_v28 = vpop.f32.mrf.mxu0  ;;  %v20503_v29 = vpop.f32.mrf.mxu1  ;;  %22382 = vmatmul.mubr.bf16.vlgmr.msra.gmra.mxu0 %v5268_v11  ;;  %22422 = vmatmul.mubr.bf16.vlgmr.msra.gmra.mxu1 %v5270_v12  ;;  %v29610_v44 = vrot.slane %v395_v19, %v26895_v24 }
 0x546   : > { %v20464_v30 = vadd.f32 %v20463_v28, %v20424_v7  ;;  %22444 = vmatpush1.bf16.xpose.msra.mxu0 %v26124_v16  ;;  %22484 = vmatpush1.bf16.xpose.msra.mxu1 %v26126_v17  ;;  %v5738_v7 = vld [vmem:[%s26873_s24 + $0x9e8] sm:$0xff]  ;;  %v29594_v16 = vrot.slane %v3306_v63, %v26895_v24  ;;  %v26137_v17 = vcombine.high %v5737_v1, %v6121_v6  ;;  %v6125_v63 = vld [vmem:[%s26873_s24 + $0x1600] sm:$0x11] }
 0x547   : > { %v20465_v31 = vpop.f32.mrf.mxu0  ;;  %v20505_v32 = vpop.f32.mrf.mxu1  ;;  %22461 = vmatprep.mubr.bf16.mxu0 %v5273_v20  ;;  %22501 = vmatprep.mubr.bf16.mxu1 %v5275_v21  ;;  %v26139_v18 = vcombine.high %v5738_v7, %v6122_v8  ;;  %v3323_v28 = vcombine.high %v395_v19, %v395_v19 }
 0x548   : > { %v20504_v36 = vadd.f32 %v20503_v29, %v20464_v30  ;;  %22523 = vmatprep.subr.bf16.mxu0 %v26129_v25  ;;  %22563 = vmatprep.subr.bf16.mxu1 %v26131_v26  ;;  %v3321_v26 = vcombine.high %v29591_v15, %v29591_v15  ;;  %v3322_v27 = vcombine.high %v29594_v16, %v29594_v16  ;;  %v5739_v30 = vld [vmem:[%s26873_s24 + $0x9f0] sm:$0xff] }
 0x549   : > { %v20466_v38 = vpop.f32.mrf.mxu0  ;;  %v20506_v39 = vpop.f32.mrf.mxu1  ;;  %v5286_v62 = vpack.c.bf16 %v29594_v16, %v29594_v16 }
 0x54a   : > { %v26136_v38 = vcombine.low %v5737_v1, %v6121_v6  ;;  %v26138_v39 = vcombine.low %v5738_v7, %v6122_v8  ;;  %v5285_v42 = vpack.c.bf16 %v3321_v26, %v3321_v26  ;;  %v5287_v43 = vpack.c.bf16 %v3322_v27, %v3322_v27  ;;  %v6126_v1 = vld [vmem:[%s26873_s24 + $0x1608] sm:$0x11] }
 0x54b   : > { %v20467_v47 = vpop.f32.mrf.mxu0  ;;  %v20507_v48 = vpop.f32.mrf.mxu1  ;;  %v5288_v26 = vpack.c.bf16 %v29610_v44, %v29610_v44 }
 0x54c   : > { %v396_v48 = vld [vmem:[%s26866_s29 + $0x500] sm:$0xff] }
 0x54d   : > { %v20543_v56 = vpop.f32.mrf.mxu0  ;;  %v20583_v57 = vpop.f32.mrf.mxu1  ;;  %22462 = vmatmul.mubr.bf16.vlgmr.msra.gmra.mxu0 %v5272_v40  ;;  %22502 = vmatmul.mubr.bf16.vlgmr.msra.gmra.mxu1 %v5274_v41  ;;  %v29629_v8 = vrot.slane %v396_v48, %v26895_v24 }
 0x54e   : > { %v20544_v58 = vadd.f32 %v20543_v56, %v20504_v36  ;;  %22524 = vmatpush1.bf16.xpose.msra.mxu0 %v26128_v45  ;;  %22564 = vmatpush1.bf16.xpose.msra.mxu1 %v26130_v46  ;;  %v5740_v36 = vld [vmem:[%s26873_s24 + $0x9f8] sm:$0xff]  ;;  %v29613_v45 = vrot.slane %v3323_v28, %v26895_v24  ;;  %v26141_v46 = vcombine.high %v5739_v30, %v6123_v35  ;;  %v6127_v28 = vld [vmem:[%s26873_s24 + $0x1610] sm:$0x11] }
 0x54f   : > { %v20545_v59 = vpop.f32.mrf.mxu0  ;;  %v20585_v60 = vpop.f32.mrf.mxu1  ;;  %22541 = vmatprep.mubr.bf16.mxu0 %v5277_v49  ;;  %22581 = vmatprep.mubr.bf16.mxu1 %v5279_v50  ;;  %v26143_v47 = vcombine.high %v5740_v36, %v6124_v37  ;;  %v3340_v56 = vcombine.high %v396_v48, %v396_v48 }
 0x550   : > { %v20584_v0 = vadd.f32 %v20583_v57, %v20544_v58  ;;  %22603 = vmatprep.subr.bf16.mxu0 %v26133_v53  ;;  %22643 = vmatprep.subr.bf16.mxu1 %v26135_v54  ;;  %v3338_v54 = vcombine.high %v29610_v44, %v29610_v44  ;;  %v3339_v55 = vcombine.high %v29613_v45, %v29613_v45  ;;  %v5741_v58 = vld [vmem:[%s26873_s24 + $0xa00] sm:$0xff] }
 0x551   : > { %v20546_v2 = vpop.f32.mrf.mxu0  ;;  %v20586_v3 = vpop.f32.mrf.mxu1  ;;  %v5290_v27 = vpack.c.bf16 %v29613_v45, %v29613_v45 }
 0x552   : > { %v26140_v2 = vcombine.low %v5739_v30, %v6123_v35  ;;  %v26142_v3 = vcombine.low %v5740_v36, %v6124_v37  ;;  %v5289_v6 = vpack.c.bf16 %v3338_v54, %v3338_v54  ;;  %v5291_v7 = vpack.c.bf16 %v3339_v55, %v3339_v55  ;;  %v6128_v30 = vld [vmem:[%s26873_s24 + $0x1618] sm:$0x11] }
 0x553   : > { %v20547_v11 = vpop.f32.mrf.mxu0  ;;  %v20587_v12 = vpop.f32.mrf.mxu1  ;;  %v5292_v54 = vpack.c.bf16 %v29629_v8, %v29629_v8 }
 0x554   : > { %v397_v12 = vld [vmem:[%s26866_s29 + $0x508] sm:$0xff] }
 0x555   : > { %v20623_v20 = vpop.f32.mrf.mxu0  ;;  %v20663_v21 = vpop.f32.mrf.mxu1  ;;  %22542 = vmatmul.mubr.bf16.vlgmr.msra.gmra.mxu0 %v5276_v4  ;;  %22582 = vmatmul.mubr.bf16.vlgmr.msra.gmra.mxu1 %v5278_v5  ;;  %v29648_v37 = vrot.slane %v397_v12, %v26895_v24 }
 0x556   : > { %v20624_v22 = vadd.f32 %v20623_v20, %v20584_v0  ;;  %22604 = vmatpush1.bf16.xpose.msra.mxu0 %v26132_v9  ;;  %22644 = vmatpush1.bf16.xpose.msra.mxu1 %v26134_v10  ;;  %v5742_v0 = vld [vmem:[%s26873_s24 + $0xa08] sm:$0xff]  ;;  %v29632_v9 = vrot.slane %v3340_v56, %v26895_v24  ;;  %v26145_v10 = vcombine.high %v5741_v58, %v6125_v63  ;;  %v6129_v56 = vld [vmem:[%s26873_s24 + $0x1620] sm:$0x11] }
 0x557   : > { %v20625_v23 = vpop.f32.mrf.mxu0  ;;  %v20665_v25 = vpop.f32.mrf.mxu1  ;;  %22621 = vmatprep.mubr.bf16.mxu0 %v5281_v13  ;;  %22661 = vmatprep.mubr.bf16.mxu1 %v5283_v14  ;;  %v26147_v11 = vcombine.high %v5742_v0, %v6126_v1  ;;  %v3357_v20 = vcombine.high %v397_v12, %v397_v12 }
 0x558   : > { %v20664_v29 = vadd.f32 %v20663_v21, %v20624_v22  ;;  %22683 = vmatprep.subr.bf16.mxu0 %v26137_v17  ;;  %22723 = vmatprep.subr.bf16.mxu1 %v26139_v18  ;;  %v3355_v18 = vcombine.high %v29629_v8, %v29629_v8  ;;  %v3356_v19 = vcombine.high %v29632_v9, %v29632_v9  ;;  %v5743_v22 = vld [vmem:[%s26873_s24 + $0xa10] sm:$0xff] }
 0x559   : > { %v20626_v31 = vpop.f32.mrf.mxu0  ;;  %v20666_v32 = vpop.f32.mrf.mxu1  ;;  %v5294_v55 = vpack.c.bf16 %v29632_v9, %v29632_v9 }
 0x55a   : > { %v26144_v31 = vcombine.low %v5741_v58, %v6125_v63  ;;  %v26146_v32 = vcombine.low %v5742_v0, %v6126_v1  ;;  %v5293_v35 = vpack.c.bf16 %v3355_v18, %v3355_v18  ;;  %v5295_v36 = vpack.c.bf16 %v3356_v19, %v3356_v19  ;;  %v6130_v58 = vld [vmem:[%s26873_s24 + $0x1628] sm:$0x11] }
 0x55b   : > { %v20627_v40 = vpop.f32.mrf.mxu0  ;;  %v20667_v41 = vpop.f32.mrf.mxu1  ;;  %v5296_v18 = vpack.c.bf16 %v29648_v37, %v29648_v37 }
 0x55c   : > { %v398_v41 = vld [vmem:[%s26866_s29 + $0x510] sm:$0xff] }
 0x55d   : > { %v20703_v49 = vpop.f32.mrf.mxu0  ;;  %v20743_v50 = vpop.f32.mrf.mxu1  ;;  %22622 = vmatmul.mubr.bf16.vlgmr.msra.gmra.mxu0 %v5280_v33  ;;  %22662 = vmatmul.mubr.bf16.vlgmr.msra.gmra.mxu1 %v5282_v34  ;;  %v29667_v1 = vrot.slane %v398_v41, %v26895_v24 }
 0x55e   : > { %v20704_v51 = vadd.f32 %v20703_v49, %v20664_v29  ;;  %22684 = vmatpush1.bf16.xpose.msra.mxu0 %v26136_v38  ;;  %22724 = vmatpush1.bf16.xpose.msra.mxu1 %v26138_v39  ;;  %v5744_v29 = vld [vmem:[%s26873_s24 + $0xa18] sm:$0xff]  ;;  %v29651_v38 = vrot.slane %v3357_v20, %v26895_v24  ;;  %v26149_v39 = vcombine.high %v5743_v22, %v6127_v28  ;;  %v6131_v20 = vld [vmem:[%s26873_s24 + $0x1630] sm:$0x11] }
 0x55f   : > { %v20705_v52 = vpop.f32.mrf.mxu0  ;;  %v20745_v53 = vpop.f32.mrf.mxu1  ;;  %22701 = vmatprep.mubr.bf16.mxu0 %v5285_v42  ;;  %22741 = vmatprep.mubr.bf16.mxu1 %v5287_v43  ;;  %v26151_v40 = vcombine.high %v5744_v29, %v6128_v30  ;;  %v3374_v49 = vcombine.high %v398_v41, %v398_v41 }
 0x560   : > { %v20744_v57 = vadd.f32 %v20743_v50, %v20704_v51  ;;  %22763 = vmatprep.subr.bf16.mxu0 %v26141_v46  ;;  %22803 = vmatprep.subr.bf16.mxu1 %v26143_v47  ;;  %v3372_v47 = vcombine.high %v29648_v37, %v29648_v37  ;;  %v3373_v48 = vcombine.high %v29651_v38, %v29651_v38  ;;  %v5745_v51 = vld [vmem:[%s26873_s24 + $0xa20] sm:$0xff] }
 0x561   : > { %v20706_v59 = vpop.f32.mrf.mxu0  ;;  %v20746_v60 = vpop.f32.mrf.mxu1  ;;  %v5298_v19 = vpack.c.bf16 %v29651_v38, %v29651_v38 }
 0x562   : > { %v26148_v59 = vcombine.low %v5743_v22, %v6127_v28  ;;  %v26150_v60 = vcombine.low %v5744_v29, %v6128_v30  ;;  %v5297_v63 = vpack.c.bf16 %v3372_v47, %v3372_v47  ;;  %v5299_v0 = vpack.c.bf16 %v3373_v48, %v3373_v48  ;;  %v6132_v22 = vld [vmem:[%s26873_s24 + $0x1638] sm:$0x11] }
 0x563   : > { %v20707_v4 = vpop.f32.mrf.mxu0  ;;  %v20747_v5 = vpop.f32.mrf.mxu1  ;;  %v5300_v47 = vpack.c.bf16 %v29667_v1, %v29667_v1 }
 0x564   : > { %v399_v5 = vld [vmem:[%s26866_s29 + $0x518] sm:$0xff] }
 0x565   : > { %v20783_v13 = vpop.f32.mrf.mxu0  ;;  %v20823_v14 = vpop.f32.mrf.mxu1  ;;  %22702 = vmatmul.mubr.bf16.vlgmr.msra.gmra.mxu0 %v5284_v61  ;;  %22742 = vmatmul.mubr.bf16.vlgmr.msra.gmra.mxu1 %v5286_v62  ;;  %v29686_v30 = vrot.slane %v399_v5, %v26895_v24 }
 0x566   : > { %v20784_v15 = vadd.f32 %v20783_v13, %v20744_v57  ;;  %22764 = vmatpush1.bf16.xpose.msra.mxu0 %v26140_v2  ;;  %22804 = vmatpush1.bf16.xpose.msra.mxu1 %v26142_v3  ;;  %v5746_v57 = vld [vmem:[%s26873_s24 + $0xa28] sm:$0xff]  ;;  %v29670_v2 = vrot.slane %v3374_v49, %v26895_v24  ;;  %v26153_v3 = vcombine.high %v5745_v51, %v6129_v56  ;;  %v6133_v49 = vld [vmem:[%s26873_s24 + $0x1640] sm:$0x11] }
 0x567   : > { %v20785_v16 = vpop.f32.mrf.mxu0  ;;  %v20825_v17 = vpop.f32.mrf.mxu1  ;;  %22781 = vmatprep.mubr.bf16.mxu0 %v5289_v6  ;;  %22821 = vmatprep.mubr.bf16.mxu1 %v5291_v7  ;;  %v26155_v4 = vcombine.high %v5746_v57, %v6130_v58  ;;  %v3391_v13 = vcombine.high %v399_v5, %v399_v5 }
 0x568   : > { %v20824_v21 = vadd.f32 %v20823_v14, %v20784_v15  ;;  %22843 = vmatprep.subr.bf16.mxu0 %v26145_v10  ;;  %22883 = vmatprep.subr.bf16.mxu1 %v26147_v11  ;;  %v3389_v11 = vcombine.high %v29667_v1, %v29667_v1  ;;  %v3390_v12 = vcombine.high %v29670_v2, %v29670_v2  ;;  %v5747_v15 = vld [vmem:[%s26873_s24 + $0xa30] sm:$0xff] }
 0x569   : > { %v20786_v23 = vpop.f32.mrf.mxu0  ;;  %v20826_v25 = vpop.f32.mrf.mxu1  ;;  %v5302_v48 = vpack.c.bf16 %v29670_v2, %v29670_v2 }
 0x56a   : > { %v26152_v23 = vcombine.low %v5745_v51, %v6129_v56  ;;  %v26154_v25 = vcombine.low %v5746_v57, %v6130_v58  ;;  %v5301_v28 = vpack.c.bf16 %v3389_v11, %v3389_v11  ;;  %v5303_v29 = vpack.c.bf16 %v3390_v12, %v3390_v12  ;;  %v6134_v51 = vld [vmem:[%s26873_s24 + $0x1648] sm:$0x11] }
 0x56b   : > { %v20787_v33 = vpop.f32.mrf.mxu0  ;;  %v20827_v34 = vpop.f32.mrf.mxu1  ;;  %v5304_v11 = vpack.c.bf16 %v29686_v30, %v29686_v30 }
 0x56c   : > { %v400_v34 = vld [vmem:[%s26866_s29 + $0x520] sm:$0xff] }
 0x56d   : > { %v20863_v42 = vpop.f32.mrf.mxu0  ;;  %v20903_v43 = vpop.f32.mrf.mxu1  ;;  %22782 = vmatmul.mubr.bf16.vlgmr.msra.gmra.mxu0 %v5288_v26  ;;  %22822 = vmatmul.mubr.bf16.vlgmr.msra.gmra.mxu1 %v5290_v27  ;;  %v29705_v58 = vrot.slane %v400_v34, %v26895_v24 }
 0x56e   : > { %v20864_v44 = vadd.f32 %v20863_v42, %v20824_v21  ;;  %22844 = vmatpush1.bf16.xpose.msra.mxu0 %v26144_v31  ;;  %22884 = vmatpush1.bf16.xpose.msra.mxu1 %v26146_v32  ;;  %v5748_v21 = vld [vmem:[%s26873_s24 + $0xa38] sm:$0xff]  ;;  %v29689_v31 = vrot.slane %v3391_v13, %v26895_v24  ;;  %v26157_v32 = vcombine.high %v5747_v15, %v6131_v20  ;;  %v6135_v13 = vld [vmem:[%s26873_s24 + $0x1650] sm:$0x11] }
 0x56f   : > { %v20865_v45 = vpop.f32.mrf.mxu0  ;;  %v20905_v46 = vpop.f32.mrf.mxu1  ;;  %22861 = vmatprep.mubr.bf16.mxu0 %v5293_v35  ;;  %22901 = vmatprep.mubr.bf16.mxu1 %v5295_v36  ;;  %v26159_v33 = vcombine.high %v5748_v21, %v6132_v22  ;;  %v3408_v42 = vcombine.high %v400_v34, %v400_v34 }
 0x570   : > { %v20904_v50 = vadd.f32 %v20903_v43, %v20864_v44  ;;  %22923 = vmatprep.subr.bf16.mxu0 %v26149_v39  ;;  %22963 = vmatprep.subr.bf16.mxu1 %v26151_v40  ;;  %v3406_v40 = vcombine.high %v29686_v30, %v29686_v30  ;;  %v3407_v41 = vcombine.high %v29689_v31, %v29689_v31  ;;  %v5749_v44 = vld [vmem:[%s26873_s24 + $0xa40] sm:$0xff] }
 0x571   : > { %v20866_v52 = vpop.f32.mrf.mxu0  ;;  %v20906_v53 = vpop.f32.mrf.mxu1  ;;  %v5306_v12 = vpack.c.bf16 %v29689_v31, %v29689_v31 }
 0x572   : > { %v26156_v52 = vcombine.low %v5747_v15, %v6131_v20  ;;  %v26158_v53 = vcombine.low %v5748_v21, %v6132_v22  ;;  %v5305_v56 = vpack.c.bf16 %v3406_v40, %v3406_v40  ;;  %v5307_v57 = vpack.c.bf16 %v3407_v41, %v3407_v41  ;;  %v6136_v15 = vld [vmem:[%s26873_s24 + $0x1658] sm:$0x11] }
 0x573   : > { %v20867_v61 = vpop.f32.mrf.mxu0  ;;  %v20907_v62 = vpop.f32.mrf.mxu1  ;;  %v5308_v40 = vpack.c.bf16 %v29705_v58, %v29705_v58 }
 0x574   : > { %v401_v62 = vld [vmem:[%s26866_s29 + $0x528] sm:$0xff] }
 0x575   : > { %v20943_v6 = vpop.f32.mrf.mxu0  ;;  %v20983_v7 = vpop.f32.mrf.mxu1  ;;  %22862 = vmatmul.mubr.bf16.vlgmr.msra.gmra.mxu0 %v5292_v54  ;;  %22902 = vmatmul.mubr.bf16.vlgmr.msra.gmra.mxu1 %v5294_v55  ;;  %v29724_v22 = vrot.slane %v401_v62, %v26895_v24 }
 0x576   : > { %v20944_v8 = vadd.f32 %v20943_v6, %v20904_v50  ;;  %22924 = vmatpush1.bf16.xpose.msra.mxu0 %v26148_v59  ;;  %22964 = vmatpush1.bf16.xpose.msra.mxu1 %v26150_v60  ;;  %v5750_v50 = vld [vmem:[%s26873_s24 + $0xa48] sm:$0xff]  ;;  %v29708_v59 = vrot.slane %v3408_v42, %v26895_v24  ;;  %v26161_v60 = vcombine.high %v5749_v44, %v6133_v49  ;;  %v6137_v42 = vld [vmem:[%s26873_s24 + $0x1660] sm:$0x11] }
 0x577   : > { %v20945_v9 = vpop.f32.mrf.mxu0  ;;  %v20985_v10 = vpop.f32.mrf.mxu1  ;;  %22941 = vmatprep.mubr.bf16.mxu0 %v5297_v63  ;;  %22981 = vmatprep.mubr.bf16.mxu1 %v5299_v0  ;;  %v26163_v61 = vcombine.high %v5750_v50, %v6134_v51  ;;  %v3425_v6 = vcombine.high %v401_v62, %v401_v62 }
 0x578   : > { %v20984_v14 = vadd.f32 %v20983_v7, %v20944_v8  ;;  %23003 = vmatprep.subr.bf16.mxu0 %v26153_v3  ;;  %23043 = vmatprep.subr.bf16.mxu1 %v26155_v4  ;;  %v3423_v4 = vcombine.high %v29705_v58, %v29705_v58  ;;  %v3424_v5 = vcombine.high %v29708_v59, %v29708_v59  ;;  %v5751_v8 = vld [vmem:[%s26873_s24 + $0xa50] sm:$0xff] }
 0x579   : > { %v20946_v16 = vpop.f32.mrf.mxu0  ;;  %v20986_v17 = vpop.f32.mrf.mxu1  ;;  %v5310_v41 = vpack.c.bf16 %v29708_v59, %v29708_v59 }
 0x57a   : > { %v26160_v16 = vcombine.low %v5749_v44, %v6133_v49  ;;  %v26162_v17 = vcombine.low %v5750_v50, %v6134_v51  ;;  %v5309_v20 = vpack.c.bf16 %v3423_v4, %v3423_v4  ;;  %v5311_v21 = vpack.c.bf16 %v3424_v5, %v3424_v5  ;;  %v6138_v44 = vld [vmem:[%s26873_s24 + $0x1668] sm:$0x11] }
 0x57b   : > { %v20947_v26 = vpop.f32.mrf.mxu0  ;;  %v20987_v27 = vpop.f32.mrf.mxu1  ;;  %v5312_v4 = vpack.c.bf16 %v29724_v22, %v29724_v22 }
 0x57c   : > { %v402_v27 = vld [vmem:[%s26866_s29 + $0x530] sm:$0xff] }
 0x57d   : > { %v21023_v35 = vpop.f32.mrf.mxu0  ;;  %v21063_v36 = vpop.f32.mrf.mxu1  ;;  %22942 = vmatmul.mubr.bf16.vlgmr.msra.gmra.mxu0 %v5296_v18  ;;  %22982 = vmatmul.mubr.bf16.vlgmr.msra.gmra.mxu1 %v5298_v19  ;;  %v29743_v51 = vrot.slane %v402_v27, %v26895_v24 }
 0x57e   : > { %v21024_v37 = vadd.f32 %v21023_v35, %v20984_v14  ;;  %23004 = vmatpush1.bf16.xpose.msra.mxu0 %v26152_v23  ;;  %23044 = vmatpush1.bf16.xpose.msra.mxu1 %v26154_v25  ;;  %v5752_v14 = vld [vmem:[%s26873_s24 + $0xa58] sm:$0xff]  ;;  %v29727_v23 = vrot.slane %v3425_v6, %v26895_v24  ;;  %v26165_v25 = vcombine.high %v5751_v8, %v6135_v13  ;;  %v6139_v6 = vld [vmem:[%s26873_s24 + $0x1670] sm:$0x11] }
 0x57f   : > { %v21025_v38 = vpop.f32.mrf.mxu0  ;;  %v21065_v39 = vpop.f32.mrf.mxu1  ;;  %23021 = vmatprep.mubr.bf16.mxu0 %v5301_v28  ;;  %23061 = vmatprep.mubr.bf16.mxu1 %v5303_v29  ;;  %v26167_v26 = vcombine.high %v5752_v14, %v6136_v15  ;;  %v3442_v35 = vcombine.high %v402_v27, %v402_v27 }
 0x580   : > { %v21064_v43 = vadd.f32 %v21063_v36, %v21024_v37  ;;  %23083 = vmatprep.subr.bf16.mxu0 %v26157_v32  ;;  %23123 = vmatprep.subr.bf16.mxu1 %v26159_v33  ;;  %v3440_v33 = vcombine.high %v29724_v22, %v29724_v22  ;;  %v3441_v34 = vcombine.high %v29727_v23, %v29727_v23  ;;  %v5753_v37 = vld [vmem:[%s26873_s24 + $0xa60] sm:$0xff] }
 0x581   : > { %v21026_v45 = vpop.f32.mrf.mxu0  ;;  %v21066_v46 = vpop.f32.mrf.mxu1  ;;  %v5314_v5 = vpack.c.bf16 %v29727_v23, %v29727_v23 }
 0x582   : > { %v26164_v45 = vcombine.low %v5751_v8, %v6135_v13  ;;  %v26166_v46 = vcombine.low %v5752_v14, %v6136_v15  ;;  %v5313_v49 = vpack.c.bf16 %v3440_v33, %v3440_v33  ;;  %v5315_v50 = vpack.c.bf16 %v3441_v34, %v3441_v34  ;;  %v6140_v8 = vld [vmem:[%s26873_s24 + $0x1678] sm:$0x11] }
 0x583   : > { %v21027_v54 = vpop.f32.mrf.mxu0  ;;  %v21067_v55 = vpop.f32.mrf.mxu1  ;;  %v5316_v33 = vpack.c.bf16 %v29743_v51, %v29743_v51 }
 0x584   : > { %v403_v55 = vld [vmem:[%s26866_s29 + $0x538] sm:$0xff] }
 0x585   : > { %v21103_v63 = vpop.f32.mrf.mxu0  ;;  %v21143_v0 = vpop.f32.mrf.mxu1  ;;  %23022 = vmatmul.mubr.bf16.vlgmr.msra.gmra.mxu0 %v5300_v47  ;;  %23062 = vmatmul.mubr.bf16.vlgmr.msra.gmra.mxu1 %v5302_v48  ;;  %v29762_v15 = vrot.slane %v403_v55, %v26895_v24 }
 0x586   : > { %v21104_v1 = vadd.f32 %v21103_v63, %v21064_v43  ;;  %23084 = vmatpush1.bf16.xpose.msra.mxu0 %v26156_v52  ;;  %23124 = vmatpush1.bf16.xpose.msra.mxu1 %v26158_v53  ;;  %v5754_v43 = vld [vmem:[%s26873_s24 + $0xa68] sm:$0xff]  ;;  %v29746_v52 = vrot.slane %v3442_v35, %v26895_v24  ;;  %v26169_v53 = vcombine.high %v5753_v37, %v6137_v42  ;;  %v6141_v35 = vld [vmem:[%s26873_s24 + $0x1680] sm:$0x11] }
 0x587   : > { %v21105_v2 = vpop.f32.mrf.mxu0  ;;  %v21145_v3 = vpop.f32.mrf.mxu1  ;;  %23101 = vmatprep.mubr.bf16.mxu0 %v5305_v56  ;;  %23141 = vmatprep.mubr.bf16.mxu1 %v5307_v57  ;;  %v26171_v54 = vcombine.high %v5754_v43, %v6138_v44  ;;  %v3459_v63 = vcombine.high %v403_v55, %v403_v55 }
 0x588   : > { %v21144_v7 = vadd.f32 %v21143_v0, %v21104_v1  ;;  %23163 = vmatprep.subr.bf16.mxu0 %v26161_v60  ;;  %23203 = vmatprep.subr.bf16.mxu1 %v26163_v61  ;;  %v3457_v61 = vcombine.high %v29743_v51, %v29743_v51  ;;  %v3458_v62 = vcombine.high %v29746_v52, %v29746_v52  ;;  %v5755_v1 = vld [vmem:[%s26873_s24 + $0xa70] sm:$0xff] }
 0x589   : > { %v21106_v9 = vpop.f32.mrf.mxu0  ;;  %v21146_v10 = vpop.f32.mrf.mxu1  ;;  %v5318_v34 = vpack.c.bf16 %v29746_v52, %v29746_v52 }
 0x58a   : > { %v26168_v9 = vcombine.low %v5753_v37, %v6137_v42  ;;  %v26170_v10 = vcombine.low %v5754_v43, %v6138_v44  ;;  %v5317_v13 = vpack.c.bf16 %v3457_v61, %v3457_v61  ;;  %v5319_v14 = vpack.c.bf16 %v3458_v62, %v3458_v62  ;;  %v6142_v37 = vld [vmem:[%s26873_s24 + $0x1688] sm:$0x11] }
 0x58b   : > { %v21107_v18 = vpop.f32.mrf.mxu0  ;;  %v21147_v19 = vpop.f32.mrf.mxu1  ;;  %v5320_v61 = vpack.c.bf16 %v29762_v15, %v29762_v15 }
 0x58c   : > { %v404_v19 = vld [vmem:[%s26866_s29 + $0x540] sm:$0xff] }
 0x58d   : > { %v21183_v28 = vpop.f32.mrf.mxu0  ;;  %v21223_v29 = vpop.f32.mrf.mxu1  ;;  %23102 = vmatmul.mubr.bf16.vlgmr.msra.gmra.mxu0 %v5304_v11  ;;  %23142 = vmatmul.mubr.bf16.vlgmr.msra.gmra.mxu1 %v5306_v12  ;;  %v29781_v44 = vrot.slane %v404_v19, %v26895_v24 }
 0x58e   : > { %v21184_v30 = vadd.f32 %v21183_v28, %v21144_v7  ;;  %23164 = vmatpush1.bf16.xpose.msra.mxu0 %v26160_v16  ;;  %23204 = vmatpush1.bf16.xpose.msra.mxu1 %v26162_v17  ;;  %v5756_v7 = vld [vmem:[%s26873_s24 + $0xa78] sm:$0xff]  ;;  %v29765_v16 = vrot.slane %v3459_v63, %v26895_v24  ;;  %v26173_v17 = vcombine.high %v5755_v1, %v6139_v6  ;;  %v6143_v63 = vld [vmem:[%s26873_s24 + $0x1690] sm:$0x11] }
 0x58f   : > { %v21185_v31 = vpop.f32.mrf.mxu0  ;;  %v21225_v32 = vpop.f32.mrf.mxu1  ;;  %23181 = vmatprep.mubr.bf16.mxu0 %v5309_v20  ;;  %23221 = vmatprep.mubr.bf16.mxu1 %v5311_v21  ;;  %v26175_v18 = vcombine.high %v5756_v7, %v6140_v8  ;;  %v3476_v28 = vcombine.high %v404_v19, %v404_v19 }
 0x590   : > { %v21224_v36 = vadd.f32 %v21223_v29, %v21184_v30  ;;  %23243 = vmatprep.subr.bf16.mxu0 %v26165_v25  ;;  %23283 = vmatprep.subr.bf16.mxu1 %v26167_v26  ;;  %v3474_v26 = vcombine.high %v29762_v15, %v29762_v15  ;;  %v3475_v27 = vcombine.high %v29765_v16, %v29765_v16  ;;  %v5757_v30 = vld [vmem:[%s26873_s24 + $0xa80] sm:$0xff] }
 0x591   : > { %v21186_v38 = vpop.f32.mrf.mxu0  ;;  %v21226_v39 = vpop.f32.mrf.mxu1  ;;  %v5322_v62 = vpack.c.bf16 %v29765_v16, %v29765_v16 }
 0x592   : > { %v26172_v38 = vcombine.low %v5755_v1, %v6139_v6  ;;  %v26174_v39 = vcombine.low %v5756_v7, %v6140_v8  ;;  %v5321_v42 = vpack.c.bf16 %v3474_v26, %v3474_v26  ;;  %v5323_v43 = vpack.c.bf16 %v3475_v27, %v3475_v27  ;;  %v6144_v1 = vld [vmem:[%s26873_s24 + $0x1698] sm:$0x11] }
 0x593   : > { %v21187_v47 = vpop.f32.mrf.mxu0  ;;  %v21227_v48 = vpop.f32.mrf.mxu1  ;;  %v5324_v26 = vpack.c.bf16 %v29781_v44, %v29781_v44 }
 0x594   : > { %v405_v48 = vld [vmem:[%s26866_s29 + $0x548] sm:$0xff] }
 0x595   : > { %v21263_v56 = vpop.f32.mrf.mxu0  ;;  %v21303_v57 = vpop.f32.mrf.mxu1  ;;  %23182 = vmatmul.mubr.bf16.vlgmr.msra.gmra.mxu0 %v5308_v40  ;;  %23222 = vmatmul.mubr.bf16.vlgmr.msra.gmra.mxu1 %v5310_v41  ;;  %v29800_v8 = vrot.slane %v405_v48, %v26895_v24 }
 0x596   : > { %v21264_v58 = vadd.f32 %v21263_v56, %v21224_v36  ;;  %23244 = vmatpush1.bf16.xpose.msra.mxu0 %v26164_v45  ;;  %23284 = vmatpush1.bf16.xpose.msra.mxu1 %v26166_v46  ;;  %v5758_v36 = vld [vmem:[%s26873_s24 + $0xa88] sm:$0xff]  ;;  %v29784_v45 = vrot.slane %v3476_v28, %v26895_v24  ;;  %v26177_v46 = vcombine.high %v5757_v30, %v6141_v35  ;;  %v6145_v28 = vld [vmem:[%s26873_s24 + $0x16a0] sm:$0x11] }
 0x597   : > { %v21265_v59 = vpop.f32.mrf.mxu0  ;;  %v21305_v60 = vpop.f32.mrf.mxu1  ;;  %23261 = vmatprep.mubr.bf16.mxu0 %v5313_v49  ;;  %23301 = vmatprep.mubr.bf16.mxu1 %v5315_v50  ;;  %v26179_v47 = vcombine.high %v5758_v36, %v6142_v37  ;;  %v3493_v56 = vcombine.high %v405_v48, %v405_v48 }
 0x598   : > { %v21304_v0 = vadd.f32 %v21303_v57, %v21264_v58  ;;  %23323 = vmatprep.subr.bf16.mxu0 %v26169_v53  ;;  %23363 = vmatprep.subr.bf16.mxu1 %v26171_v54  ;;  %v3491_v54 = vcombine.high %v29781_v44, %v29781_v44  ;;  %v3492_v55 = vcombine.high %v29784_v45, %v29784_v45  ;;  %v5759_v58 = vld [vmem:[%s26873_s24 + $0xa90] sm:$0xff] }
 0x599   : > { %v21266_v2 = vpop.f32.mrf.mxu0  ;;  %v21306_v3 = vpop.f32.mrf.mxu1  ;;  %v5326_v27 = vpack.c.bf16 %v29784_v45, %v29784_v45 }
 0x59a   : > { %v26176_v2 = vcombine.low %v5757_v30, %v6141_v35  ;;  %v26178_v3 = vcombine.low %v5758_v36, %v6142_v37  ;;  %v5325_v6 = vpack.c.bf16 %v3491_v54, %v3491_v54  ;;  %v5327_v7 = vpack.c.bf16 %v3492_v55, %v3492_v55  ;;  %v6146_v30 = vld [vmem:[%s26873_s24 + $0x16a8] sm:$0x11] }
 0x59b   : > { %v21267_v11 = vpop.f32.mrf.mxu0  ;;  %v21307_v12 = vpop.f32.mrf.mxu1  ;;  %v5328_v54 = vpack.c.bf16 %v29800_v8, %v29800_v8 }
 0x59c   : > { %v406_v12 = vld [vmem:[%s26866_s29 + $0x550] sm:$0xff] }
 0x59d   : > { %v21343_v20 = vpop.f32.mrf.mxu0  ;;  %v21383_v21 = vpop.f32.mrf.mxu1  ;;  %23262 = vmatmul.mubr.bf16.vlgmr.msra.gmra.mxu0 %v5312_v4  ;;  %23302 = vmatmul.mubr.bf16.vlgmr.msra.gmra.mxu1 %v5314_v5  ;;  %v29819_v37 = vrot.slane %v406_v12, %v26895_v24 }
 0x59e   : > { %v21344_v22 = vadd.f32 %v21343_v20, %v21304_v0  ;;  %23324 = vmatpush1.bf16.xpose.msra.mxu0 %v26168_v9  ;;  %23364 = vmatpush1.bf16.xpose.msra.mxu1 %v26170_v10  ;;  %v5760_v0 = vld [vmem:[%s26873_s24 + $0xa98] sm:$0xff]  ;;  %v29803_v9 = vrot.slane %v3493_v56, %v26895_v24  ;;  %v26181_v10 = vcombine.high %v5759_v58, %v6143_v63  ;;  %v6147_v56 = vld [vmem:[%s26873_s24 + $0x16b0] sm:$0x11] }
 0x59f   : > { %v21345_v23 = vpop.f32.mrf.mxu0  ;;  %v21385_v25 = vpop.f32.mrf.mxu1  ;;  %23341 = vmatprep.mubr.bf16.mxu0 %v5317_v13  ;;  %23381 = vmatprep.mubr.bf16.mxu1 %v5319_v14  ;;  %v26183_v11 = vcombine.high %v5760_v0, %v6144_v1  ;;  %v3510_v20 = vcombine.high %v406_v12, %v406_v12 }
 0x5a0   : > { %v21384_v29 = vadd.f32 %v21383_v21, %v21344_v22  ;;  %23403 = vmatprep.subr.bf16.mxu0 %v26173_v17  ;;  %23443 = vmatprep.subr.bf16.mxu1 %v26175_v18  ;;  %v3508_v18 = vcombine.high %v29800_v8, %v29800_v8  ;;  %v3509_v19 = vcombine.high %v29803_v9, %v29803_v9  ;;  %v5761_v22 = vld [vmem:[%s26873_s24 + $0xaa0] sm:$0xff] }
 0x5a1   : > { %v21346_v31 = vpop.f32.mrf.mxu0  ;;  %v21386_v32 = vpop.f32.mrf.mxu1  ;;  %v5330_v55 = vpack.c.bf16 %v29803_v9, %v29803_v9 }
 0x5a2   : > { %v26180_v31 = vcombine.low %v5759_v58, %v6143_v63  ;;  %v26182_v32 = vcombine.low %v5760_v0, %v6144_v1  ;;  %v5329_v35 = vpack.c.bf16 %v3508_v18, %v3508_v18  ;;  %v5331_v36 = vpack.c.bf16 %v3509_v19, %v3509_v19  ;;  %v6148_v58 = vld [vmem:[%s26873_s24 + $0x16b8] sm:$0x11] }
 0x5a3   : > { %v21347_v40 = vpop.f32.mrf.mxu0  ;;  %v21387_v41 = vpop.f32.mrf.mxu1  ;;  %v5332_v18 = vpack.c.bf16 %v29819_v37, %v29819_v37 }
 0x5a4   : > { %v407_v41 = vld [vmem:[%s26866_s29 + $0x558] sm:$0xff] }
 0x5a5   : > { %v21423_v49 = vpop.f32.mrf.mxu0  ;;  %v21463_v50 = vpop.f32.mrf.mxu1  ;;  %23342 = vmatmul.mubr.bf16.vlgmr.msra.gmra.mxu0 %v5316_v33  ;;  %23382 = vmatmul.mubr.bf16.vlgmr.msra.gmra.mxu1 %v5318_v34  ;;  %v29838_v1 = vrot.slane %v407_v41, %v26895_v24 }
 0x5a6   : > { %v21424_v51 = vadd.f32 %v21423_v49, %v21384_v29  ;;  %23404 = vmatpush1.bf16.xpose.msra.mxu0 %v26172_v38  ;;  %23444 = vmatpush1.bf16.xpose.msra.mxu1 %v26174_v39  ;;  %v5762_v29 = vld [vmem:[%s26873_s24 + $0xaa8] sm:$0xff]  ;;  %v29822_v38 = vrot.slane %v3510_v20, %v26895_v24  ;;  %v26185_v39 = vcombine.high %v5761_v22, %v6145_v28  ;;  %v6149_v20 = vld [vmem:[%s26873_s24 + $0x16c0] sm:$0x11] }
 0x5a7   : > { %v21425_v52 = vpop.f32.mrf.mxu0  ;;  %v21465_v53 = vpop.f32.mrf.mxu1  ;;  %23421 = vmatprep.mubr.bf16.mxu0 %v5321_v42  ;;  %23461 = vmatprep.mubr.bf16.mxu1 %v5323_v43  ;;  %v26187_v40 = vcombine.high %v5762_v29, %v6146_v30  ;;  %v3527_v49 = vcombine.high %v407_v41, %v407_v41 }
 0x5a8   : > { %v21464_v57 = vadd.f32 %v21463_v50, %v21424_v51  ;;  %23483 = vmatprep.subr.bf16.mxu0 %v26177_v46  ;;  %23523 = vmatprep.subr.bf16.mxu1 %v26179_v47  ;;  %v3525_v47 = vcombine.high %v29819_v37, %v29819_v37  ;;  %v3526_v48 = vcombine.high %v29822_v38, %v29822_v38  ;;  %v5763_v51 = vld [vmem:[%s26873_s24 + $0xab0] sm:$0xff] }
 0x5a9   : > { %v21426_v59 = vpop.f32.mrf.mxu0  ;;  %v21466_v60 = vpop.f32.mrf.mxu1  ;;  %v5334_v19 = vpack.c.bf16 %v29822_v38, %v29822_v38 }
 0x5aa   : > { %v26184_v59 = vcombine.low %v5761_v22, %v6145_v28  ;;  %v26186_v60 = vcombine.low %v5762_v29, %v6146_v30  ;;  %v5333_v63 = vpack.c.bf16 %v3525_v47, %v3525_v47  ;;  %v5335_v0 = vpack.c.bf16 %v3526_v48, %v3526_v48  ;;  %v6150_v22 = vld [vmem:[%s26873_s24 + $0x16c8] sm:$0x11] }
 0x5ab   : > { %v21427_v4 = vpop.f32.mrf.mxu0  ;;  %v21467_v5 = vpop.f32.mrf.mxu1  ;;  %v5336_v47 = vpack.c.bf16 %v29838_v1, %v29838_v1 }
 0x5ac   : > { %v408_v5 = vld [vmem:[%s26866_s29 + $0x560] sm:$0xff] }
 0x5ad   : > { %v21503_v13 = vpop.f32.mrf.mxu0  ;;  %v21543_v14 = vpop.f32.mrf.mxu1  ;;  %23422 = vmatmul.mubr.bf16.vlgmr.msra.gmra.mxu0 %v5320_v61  ;;  %23462 = vmatmul.mubr.bf16.vlgmr.msra.gmra.mxu1 %v5322_v62  ;;  %v29857_v30 = vrot.slane %v408_v5, %v26895_v24 }
 0x5ae   : > { %v21504_v15 = vadd.f32 %v21503_v13, %v21464_v57  ;;  %23484 = vmatpush1.bf16.xpose.msra.mxu0 %v26176_v2  ;;  %23524 = vmatpush1.bf16.xpose.msra.mxu1 %v26178_v3  ;;  %v5764_v57 = vld [vmem:[%s26873_s24 + $0xab8] sm:$0xff]  ;;  %v29841_v2 = vrot.slane %v3527_v49, %v26895_v24  ;;  %v26189_v3 = vcombine.high %v5763_v51, %v6147_v56  ;;  %v6151_v49 = vld [vmem:[%s26873_s24 + $0x16d0] sm:$0x11] }
 0x5af   : > { %v21505_v16 = vpop.f32.mrf.mxu0  ;;  %v21545_v17 = vpop.f32.mrf.mxu1  ;;  %23501 = vmatprep.mubr.bf16.mxu0 %v5325_v6  ;;  %23541 = vmatprep.mubr.bf16.mxu1 %v5327_v7  ;;  %v26191_v4 = vcombine.high %v5764_v57, %v6148_v58  ;;  %v3544_v13 = vcombine.high %v408_v5, %v408_v5 }
 0x5b0   : > { %v21544_v21 = vadd.f32 %v21543_v14, %v21504_v15  ;;  %23563 = vmatprep.subr.bf16.mxu0 %v26181_v10  ;;  %23603 = vmatprep.subr.bf16.mxu1 %v26183_v11  ;;  %v3542_v11 = vcombine.high %v29838_v1, %v29838_v1  ;;  %v3543_v12 = vcombine.high %v29841_v2, %v29841_v2  ;;  %v5765_v15 = vld [vmem:[%s26873_s24 + $0xac0] sm:$0xff] }
 0x5b1   : > { %v21506_v23 = vpop.f32.mrf.mxu0  ;;  %v21546_v25 = vpop.f32.mrf.mxu1  ;;  %v5338_v48 = vpack.c.bf16 %v29841_v2, %v29841_v2 }
 0x5b2   : > { %v26188_v23 = vcombine.low %v5763_v51, %v6147_v56  ;;  %v26190_v25 = vcombine.low %v5764_v57, %v6148_v58  ;;  %v5337_v28 = vpack.c.bf16 %v3542_v11, %v3542_v11  ;;  %v5339_v29 = vpack.c.bf16 %v3543_v12, %v3543_v12  ;;  %v6152_v51 = vld [vmem:[%s26873_s24 + $0x16d8] sm:$0x11] }
 0x5b3   : > { %v21507_v33 = vpop.f32.mrf.mxu0  ;;  %v21547_v34 = vpop.f32.mrf.mxu1  ;;  %v5340_v11 = vpack.c.bf16 %v29857_v30, %v29857_v30 }
 0x5b4   : > { %v409_v34 = vld [vmem:[%s26866_s29 + $0x568] sm:$0xff] }
 0x5b5   : > { %v21583_v42 = vpop.f32.mrf.mxu0  ;;  %v21623_v43 = vpop.f32.mrf.mxu1  ;;  %23502 = vmatmul.mubr.bf16.vlgmr.msra.gmra.mxu0 %v5324_v26  ;;  %23542 = vmatmul.mubr.bf16.vlgmr.msra.gmra.mxu1 %v5326_v27  ;;  %v29876_v58 = vrot.slane %v409_v34, %v26895_v24 }
 0x5b6   : > { %v21584_v44 = vadd.f32 %v21583_v42, %v21544_v21  ;;  %23564 = vmatpush1.bf16.xpose.msra.mxu0 %v26180_v31  ;;  %23604 = vmatpush1.bf16.xpose.msra.mxu1 %v26182_v32  ;;  %v5766_v21 = vld [vmem:[%s26873_s24 + $0xac8] sm:$0xff]  ;;  %v29860_v31 = vrot.slane %v3544_v13, %v26895_v24  ;;  %v26193_v32 = vcombine.high %v5765_v15, %v6149_v20  ;;  %v6153_v13 = vld [vmem:[%s26873_s24 + $0x16e0] sm:$0x11] }
 0x5b7   : > { %v21585_v45 = vpop.f32.mrf.mxu0  ;;  %v21625_v46 = vpop.f32.mrf.mxu1  ;;  %23581 = vmatprep.mubr.bf16.mxu0 %v5329_v35  ;;  %23621 = vmatprep.mubr.bf16.mxu1 %v5331_v36  ;;  %v26195_v33 = vcombine.high %v5766_v21, %v6150_v22  ;;  %v3561_v42 = vcombine.high %v409_v34, %v409_v34 }
 0x5b8   : > { %v21624_v50 = vadd.f32 %v21623_v43, %v21584_v44  ;;  %23643 = vmatprep.subr.bf16.mxu0 %v26185_v39  ;;  %23683 = vmatprep.subr.bf16.mxu1 %v26187_v40  ;;  %v3559_v40 = vcombine.high %v29857_v30, %v29857_v30  ;;  %v3560_v41 = vcombine.high %v29860_v31, %v29860_v31  ;;  %v5767_v44 = vld [vmem:[%s26873_s24 + $0xad0] sm:$0xff] }
 0x5b9   : > { %v21586_v52 = vpop.f32.mrf.mxu0  ;;  %v21626_v53 = vpop.f32.mrf.mxu1  ;;  %v5342_v12 = vpack.c.bf16 %v29860_v31, %v29860_v31 }
 0x5ba   : > { %v26192_v52 = vcombine.low %v5765_v15, %v6149_v20  ;;  %v26194_v53 = vcombine.low %v5766_v21, %v6150_v22  ;;  %v5341_v56 = vpack.c.bf16 %v3559_v40, %v3559_v40  ;;  %v5343_v57 = vpack.c.bf16 %v3560_v41, %v3560_v41  ;;  %v6154_v15 = vld [vmem:[%s26873_s24 + $0x16e8] sm:$0x11] }
 0x5bb   : > { %v21587_v61 = vpop.f32.mrf.mxu0  ;;  %v21627_v62 = vpop.f32.mrf.mxu1  ;;  %v5344_v40 = vpack.c.bf16 %v29876_v58, %v29876_v58 }
 0x5bc   : > { %v410_v62 = vld [vmem:[%s26866_s29 + $0x570] sm:$0xff] }
 0x5bd   : > { %v21663_v6 = vpop.f32.mrf.mxu0  ;;  %v21703_v7 = vpop.f32.mrf.mxu1  ;;  %23582 = vmatmul.mubr.bf16.vlgmr.msra.gmra.mxu0 %v5328_v54  ;;  %23622 = vmatmul.mubr.bf16.vlgmr.msra.gmra.mxu1 %v5330_v55  ;;  %v29895_v22 = vrot.slane %v410_v62, %v26895_v24 }
 0x5be   : > { %v21664_v8 = vadd.f32 %v21663_v6, %v21624_v50  ;;  %23644 = vmatpush1.bf16.xpose.msra.mxu0 %v26184_v59  ;;  %23684 = vmatpush1.bf16.xpose.msra.mxu1 %v26186_v60  ;;  %v5768_v50 = vld [vmem:[%s26873_s24 + $0xad8] sm:$0xff]  ;;  %v29879_v59 = vrot.slane %v3561_v42, %v26895_v24  ;;  %v26197_v60 = vcombine.high %v5767_v44, %v6151_v49  ;;  %v6155_v42 = vld [vmem:[%s26873_s24 + $0x16f0] sm:$0x11] }
 0x5bf   : > { %v21665_v9 = vpop.f32.mrf.mxu0  ;;  %v21705_v10 = vpop.f32.mrf.mxu1  ;;  %23661 = vmatprep.mubr.bf16.mxu0 %v5333_v63  ;;  %23701 = vmatprep.mubr.bf16.mxu1 %v5335_v0  ;;  %v26199_v61 = vcombine.high %v5768_v50, %v6152_v51  ;;  %v3578_v6 = vcombine.high %v410_v62, %v410_v62 }
 0x5c0   : > { %v21704_v14 = vadd.f32 %v21703_v7, %v21664_v8  ;;  %23723 = vmatprep.subr.bf16.mxu0 %v26189_v3  ;;  %23763 = vmatprep.subr.bf16.mxu1 %v26191_v4  ;;  %v3576_v4 = vcombine.high %v29876_v58, %v29876_v58  ;;  %v3577_v5 = vcombine.high %v29879_v59, %v29879_v59  ;;  %v5769_v8 = vld [vmem:[%s26873_s24 + $0xae0] sm:$0xff] }
 0x5c1   : > { %v21666_v16 = vpop.f32.mrf.mxu0  ;;  %v21706_v17 = vpop.f32.mrf.mxu1  ;;  %v5346_v41 = vpack.c.bf16 %v29879_v59, %v29879_v59 }
 0x5c2   : > { %v26196_v16 = vcombine.low %v5767_v44, %v6151_v49  ;;  %v26198_v17 = vcombine.low %v5768_v50, %v6152_v51  ;;  %v5345_v20 = vpack.c.bf16 %v3576_v4, %v3576_v4  ;;  %v5347_v21 = vpack.c.bf16 %v3577_v5, %v3577_v5  ;;  %v6156_v44 = vld [vmem:[%s26873_s24 + $0x16f8] sm:$0x11] }
 0x5c3   : > { %v21667_v26 = vpop.f32.mrf.mxu0  ;;  %v21707_v27 = vpop.f32.mrf.mxu1  ;;  %v5348_v4 = vpack.c.bf16 %v29895_v22, %v29895_v22 }
 0x5c4   : > { %v411_v27 = vld [vmem:[%s26866_s29 + $0x578] sm:$0xff] }
 0x5c5   : > { %v21743_v35 = vpop.f32.mrf.mxu0  ;;  %v21783_v36 = vpop.f32.mrf.mxu1  ;;  %23662 = vmatmul.mubr.bf16.vlgmr.msra.gmra.mxu0 %v5332_v18  ;;  %23702 = vmatmul.mubr.bf16.vlgmr.msra.gmra.mxu1 %v5334_v19  ;;  %v29914_v51 = vrot.slane %v411_v27, %v26895_v24 }
 0x5c6   : > { %v21744_v37 = vadd.f32 %v21743_v35, %v21704_v14  ;;  %23724 = vmatpush1.bf16.xpose.msra.mxu0 %v26188_v23  ;;  %23764 = vmatpush1.bf16.xpose.msra.mxu1 %v26190_v25  ;;  %v5770_v14 = vld [vmem:[%s26873_s24 + $0xae8] sm:$0xff]  ;;  %v29898_v23 = vrot.slane %v3578_v6, %v26895_v24  ;;  %v26201_v25 = vcombine.high %v5769_v8, %v6153_v13  ;;  %v6157_v6 = vld [vmem:[%s26873_s24 + $0x1700] sm:$0x11] }
 0x5c7   : > { %v21745_v38 = vpop.f32.mrf.mxu0  ;;  %v21785_v39 = vpop.f32.mrf.mxu1  ;;  %23741 = vmatprep.mubr.bf16.mxu0 %v5337_v28  ;;  %23781 = vmatprep.mubr.bf16.mxu1 %v5339_v29  ;;  %v26203_v26 = vcombine.high %v5770_v14, %v6154_v15  ;;  %v3595_v35 = vcombine.high %v411_v27, %v411_v27 }
 0x5c8   : > { %v21784_v43 = vadd.f32 %v21783_v36, %v21744_v37  ;;  %23803 = vmatprep.subr.bf16.mxu0 %v26193_v32  ;;  %23843 = vmatprep.subr.bf16.mxu1 %v26195_v33  ;;  %v3593_v33 = vcombine.high %v29895_v22, %v29895_v22  ;;  %v3594_v34 = vcombine.high %v29898_v23, %v29898_v23  ;;  %v5771_v37 = vld [vmem:[%s26873_s24 + $0xaf0] sm:$0xff] }
 0x5c9   : > { %v21746_v45 = vpop.f32.mrf.mxu0  ;;  %v21786_v46 = vpop.f32.mrf.mxu1  ;;  %v5350_v5 = vpack.c.bf16 %v29898_v23, %v29898_v23 }
 0x5ca   : > { %v26200_v45 = vcombine.low %v5769_v8, %v6153_v13  ;;  %v26202_v46 = vcombine.low %v5770_v14, %v6154_v15  ;;  %v5349_v49 = vpack.c.bf16 %v3593_v33, %v3593_v33  ;;  %v5351_v50 = vpack.c.bf16 %v3594_v34, %v3594_v34  ;;  %v6158_v8 = vld [vmem:[%s26873_s24 + $0x1708] sm:$0x11] }
 0x5cb   : > { %v21747_v54 = vpop.f32.mrf.mxu0  ;;  %v21787_v55 = vpop.f32.mrf.mxu1  ;;  %v5352_v33 = vpack.c.bf16 %v29914_v51, %v29914_v51 }
 0x5cc   : > { %v412_v55 = vld [vmem:[%s26866_s29 + $0x580] sm:$0xff] }
 0x5cd   : > { %v21823_v63 = vpop.f32.mrf.mxu0  ;;  %v21863_v0 = vpop.f32.mrf.mxu1  ;;  %23742 = vmatmul.mubr.bf16.vlgmr.msra.gmra.mxu0 %v5336_v47  ;;  %23782 = vmatmul.mubr.bf16.vlgmr.msra.gmra.mxu1 %v5338_v48  ;;  %v29933_v15 = vrot.slane %v412_v55, %v26895_v24 }
 0x5ce   : > { %v21824_v1 = vadd.f32 %v21823_v63, %v21784_v43  ;;  %23804 = vmatpush1.bf16.xpose.msra.mxu0 %v26192_v52  ;;  %23844 = vmatpush1.bf16.xpose.msra.mxu1 %v26194_v53  ;;  %v5772_v43 = vld [vmem:[%s26873_s24 + $0xaf8] sm:$0xff]  ;;  %v29917_v52 = vrot.slane %v3595_v35, %v26895_v24  ;;  %v26205_v53 = vcombine.high %v5771_v37, %v6155_v42  ;;  %v6159_v35 = vld [vmem:[%s26873_s24 + $0x1710] sm:$0x11] }
 0x5cf   : > { %v21825_v2 = vpop.f32.mrf.mxu0  ;;  %v21865_v3 = vpop.f32.mrf.mxu1  ;;  %23821 = vmatprep.mubr.bf16.mxu0 %v5341_v56  ;;  %23861 = vmatprep.mubr.bf16.mxu1 %v5343_v57  ;;  %v26207_v54 = vcombine.high %v5772_v43, %v6156_v44  ;;  %v3612_v63 = vcombine.high %v412_v55, %v412_v55 }
 0x5d0   : > { %v21864_v7 = vadd.f32 %v21863_v0, %v21824_v1  ;;  %23883 = vmatprep.subr.bf16.mxu0 %v26197_v60  ;;  %23923 = vmatprep.subr.bf16.mxu1 %v26199_v61  ;;  %v3610_v61 = vcombine.high %v29914_v51, %v29914_v51  ;;  %v3611_v62 = vcombine.high %v29917_v52, %v29917_v52  ;;  %v5773_v1 = vld [vmem:[%s26873_s24 + $0xb00] sm:$0xff] }
 0x5d1   : > { %v21826_v9 = vpop.f32.mrf.mxu0  ;;  %v21866_v10 = vpop.f32.mrf.mxu1  ;;  %v5354_v34 = vpack.c.bf16 %v29917_v52, %v29917_v52 }
 0x5d2   : > { %v26204_v9 = vcombine.low %v5771_v37, %v6155_v42  ;;  %v26206_v10 = vcombine.low %v5772_v43, %v6156_v44  ;;  %v5353_v13 = vpack.c.bf16 %v3610_v61, %v3610_v61  ;;  %v5355_v14 = vpack.c.bf16 %v3611_v62, %v3611_v62  ;;  %v6160_v37 = vld [vmem:[%s26873_s24 + $0x1718] sm:$0x11] }
 0x5d3   : > { %v21827_v18 = vpop.f32.mrf.mxu0  ;;  %v21867_v19 = vpop.f32.mrf.mxu1  ;;  %v5356_v61 = vpack.c.bf16 %v29933_v15, %v29933_v15 }
 0x5d4   : > { %v413_v19 = vld [vmem:[%s26866_s29 + $0x588] sm:$0xff] }
 0x5d5   : > { %v21903_v28 = vpop.f32.mrf.mxu0  ;;  %v21943_v29 = vpop.f32.mrf.mxu1  ;;  %23822 = vmatmul.mubr.bf16.vlgmr.msra.gmra.mxu0 %v5340_v11  ;;  %23862 = vmatmul.mubr.bf16.vlgmr.msra.gmra.mxu1 %v5342_v12  ;;  %v29952_v44 = vrot.slane %v413_v19, %v26895_v24 }
 0x5d6   : > { %v21904_v30 = vadd.f32 %v21903_v28, %v21864_v7  ;;  %23884 = vmatpush1.bf16.xpose.msra.mxu0 %v26196_v16  ;;  %23924 = vmatpush1.bf16.xpose.msra.mxu1 %v26198_v17  ;;  %v5774_v7 = vld [vmem:[%s26873_s24 + $0xb08] sm:$0xff]  ;;  %v29936_v16 = vrot.slane %v3612_v63, %v26895_v24  ;;  %v26209_v17 = vcombine.high %v5773_v1, %v6157_v6  ;;  %v6161_v63 = vld [vmem:[%s26873_s24 + $0x1720] sm:$0x11] }
 0x5d7   : > { %v21905_v31 = vpop.f32.mrf.mxu0  ;;  %v21945_v32 = vpop.f32.mrf.mxu1  ;;  %23901 = vmatprep.mubr.bf16.mxu0 %v5345_v20  ;;  %23941 = vmatprep.mubr.bf16.mxu1 %v5347_v21  ;;  %v26211_v18 = vcombine.high %v5774_v7, %v6158_v8  ;;  %v3629_v28 = vcombine.high %v413_v19, %v413_v19 }
 0x5d8   : > { %v21944_v36 = vadd.f32 %v21943_v29, %v21904_v30  ;;  %23963 = vmatprep.subr.bf16.mxu0 %v26201_v25  ;;  %24003 = vmatprep.subr.bf16.mxu1 %v26203_v26  ;;  %v3627_v26 = vcombine.high %v29933_v15, %v29933_v15  ;;  %v3628_v27 = vcombine.high %v29936_v16, %v29936_v16  ;;  %v5775_v30 = vld [vmem:[%s26873_s24 + $0xb10] sm:$0xff] }
 0x5d9   : > { %v21906_v38 = vpop.f32.mrf.mxu0  ;;  %v21946_v39 = vpop.f32.mrf.mxu1  ;;  %v5358_v62 = vpack.c.bf16 %v29936_v16, %v29936_v16 }
 0x5da   : > { %v26208_v38 = vcombine.low %v5773_v1, %v6157_v6  ;;  %v26210_v39 = vcombine.low %v5774_v7, %v6158_v8  ;;  %v5357_v42 = vpack.c.bf16 %v3627_v26, %v3627_v26  ;;  %v5359_v43 = vpack.c.bf16 %v3628_v27, %v3628_v27  ;;  %v6162_v1 = vld [vmem:[%s26873_s24 + $0x1728] sm:$0x11] }
 0x5db   : > { %v21907_v47 = vpop.f32.mrf.mxu0  ;;  %v21947_v48 = vpop.f32.mrf.mxu1  ;;  %v5360_v26 = vpack.c.bf16 %v29952_v44, %v29952_v44 }
 0x5dc   : > { %v414_v48 = vld [vmem:[%s26866_s29 + $0x590] sm:$0xff] }
 0x5dd   : > { %v21983_v56 = vpop.f32.mrf.mxu0  ;;  %v22023_v57 = vpop.f32.mrf.mxu1  ;;  %23902 = vmatmul.mubr.bf16.vlgmr.msra.gmra.mxu0 %v5344_v40  ;;  %23942 = vmatmul.mubr.bf16.vlgmr.msra.gmra.mxu1 %v5346_v41  ;;  %v29971_v8 = vrot.slane %v414_v48, %v26895_v24 }
 0x5de   : > { %v21984_v58 = vadd.f32 %v21983_v56, %v21944_v36  ;;  %23964 = vmatpush1.bf16.xpose.msra.mxu0 %v26200_v45  ;;  %24004 = vmatpush1.bf16.xpose.msra.mxu1 %v26202_v46  ;;  %v5776_v36 = vld [vmem:[%s26873_s24 + $0xb18] sm:$0xff]  ;;  %v29955_v45 = vrot.slane %v3629_v28, %v26895_v24  ;;  %v26213_v46 = vcombine.high %v5775_v30, %v6159_v35  ;;  %v6163_v28 = vld [vmem:[%s26873_s24 + $0x1730] sm:$0x11] }
 0x5df   : > { %v21985_v59 = vpop.f32.mrf.mxu0  ;;  %v22025_v60 = vpop.f32.mrf.mxu1  ;;  %23981 = vmatprep.mubr.bf16.mxu0 %v5349_v49  ;;  %24021 = vmatprep.mubr.bf16.mxu1 %v5351_v50  ;;  %v26215_v47 = vcombine.high %v5776_v36, %v6160_v37  ;;  %v3646_v56 = vcombine.high %v414_v48, %v414_v48 }
 0x5e0   : > { %v22024_v0 = vadd.f32 %v22023_v57, %v21984_v58  ;;  %24043 = vmatprep.subr.bf16.mxu0 %v26205_v53  ;;  %24083 = vmatprep.subr.bf16.mxu1 %v26207_v54  ;;  %v3644_v54 = vcombine.high %v29952_v44, %v29952_v44  ;;  %v3645_v55 = vcombine.high %v29955_v45, %v29955_v45  ;;  %v5777_v58 = vld [vmem:[%s26873_s24 + $0xb20] sm:$0xff] }
 0x5e1   : > { %v21986_v2 = vpop.f32.mrf.mxu0  ;;  %v22026_v3 = vpop.f32.mrf.mxu1  ;;  %v5362_v27 = vpack.c.bf16 %v29955_v45, %v29955_v45 }
 0x5e2   : > { %v26212_v2 = vcombine.low %v5775_v30, %v6159_v35  ;;  %v26214_v3 = vcombine.low %v5776_v36, %v6160_v37  ;;  %v5361_v6 = vpack.c.bf16 %v3644_v54, %v3644_v54  ;;  %v5363_v7 = vpack.c.bf16 %v3645_v55, %v3645_v55  ;;  %v6164_v30 = vld [vmem:[%s26873_s24 + $0x1738] sm:$0x11] }
 0x5e3   : > { %v21987_v11 = vpop.f32.mrf.mxu0  ;;  %v22027_v12 = vpop.f32.mrf.mxu1  ;;  %v5364_v54 = vpack.c.bf16 %v29971_v8, %v29971_v8 }
 0x5e4   : > { %v415_v12 = vld [vmem:[%s26866_s29 + $0x598] sm:$0xff] }
 0x5e5   : > { %v22063_v20 = vpop.f32.mrf.mxu0  ;;  %v22103_v21 = vpop.f32.mrf.mxu1  ;;  %23982 = vmatmul.mubr.bf16.vlgmr.msra.gmra.mxu0 %v5348_v4  ;;  %24022 = vmatmul.mubr.bf16.vlgmr.msra.gmra.mxu1 %v5350_v5  ;;  %v29990_v37 = vrot.slane %v415_v12, %v26895_v24 }
 0x5e6   : > { %v22064_v22 = vadd.f32 %v22063_v20, %v22024_v0  ;;  %24044 = vmatpush1.bf16.xpose.msra.mxu0 %v26204_v9  ;;  %24084 = vmatpush1.bf16.xpose.msra.mxu1 %v26206_v10  ;;  %v5778_v0 = vld [vmem:[%s26873_s24 + $0xb28] sm:$0xff]  ;;  %v29974_v9 = vrot.slane %v3646_v56, %v26895_v24  ;;  %v26217_v10 = vcombine.high %v5777_v58, %v6161_v63  ;;  %v6165_v56 = vld [vmem:[%s26873_s24 + $0x1740] sm:$0x11] }
 0x5e7   : > { %v22065_v23 = vpop.f32.mrf.mxu0  ;;  %v22105_v25 = vpop.f32.mrf.mxu1  ;;  %24061 = vmatprep.mubr.bf16.mxu0 %v5353_v13  ;;  %24101 = vmatprep.mubr.bf16.mxu1 %v5355_v14  ;;  %v26219_v11 = vcombine.high %v5778_v0, %v6162_v1  ;;  %v3663_v20 = vcombine.high %v415_v12, %v415_v12 }
 0x5e8   : > { %v22104_v29 = vadd.f32 %v22103_v21, %v22064_v22  ;;  %24123 = vmatprep.subr.bf16.mxu0 %v26209_v17  ;;  %24163 = vmatprep.subr.bf16.mxu1 %v26211_v18  ;;  %v3661_v18 = vcombine.high %v29971_v8, %v29971_v8  ;;  %v3662_v19 = vcombine.high %v29974_v9, %v29974_v9  ;;  %v5779_v22 = vld [vmem:[%s26873_s24 + $0xb30] sm:$0xff] }
 0x5e9   : > { %v22066_v31 = vpop.f32.mrf.mxu0  ;;  %v22106_v32 = vpop.f32.mrf.mxu1  ;;  %v5366_v55 = vpack.c.bf16 %v29974_v9, %v29974_v9 }
 0x5ea   : > { %v26216_v31 = vcombine.low %v5777_v58, %v6161_v63  ;;  %v26218_v32 = vcombine.low %v5778_v0, %v6162_v1  ;;  %v5365_v35 = vpack.c.bf16 %v3661_v18, %v3661_v18  ;;  %v5367_v36 = vpack.c.bf16 %v3662_v19, %v3662_v19  ;;  %v6166_v58 = vld [vmem:[%s26873_s24 + $0x1748] sm:$0x11] }
 0x5eb   : > { %v22067_v40 = vpop.f32.mrf.mxu0  ;;  %v22107_v41 = vpop.f32.mrf.mxu1  ;;  %v5368_v18 = vpack.c.bf16 %v29990_v37, %v29990_v37 }
 0x5ec   : > { %v416_v41 = vld [vmem:[%s26866_s29 + $0x5a0] sm:$0xff] }
 0x5ed   : > { %v22143_v49 = vpop.f32.mrf.mxu0  ;;  %v22183_v50 = vpop.f32.mrf.mxu1  ;;  %24062 = vmatmul.mubr.bf16.vlgmr.msra.gmra.mxu0 %v5352_v33  ;;  %24102 = vmatmul.mubr.bf16.vlgmr.msra.gmra.mxu1 %v5354_v34  ;;  %v30009_v1 = vrot.slane %v416_v41, %v26895_v24 }
 0x5ee   : > { %v22144_v51 = vadd.f32 %v22143_v49, %v22104_v29  ;;  %24124 = vmatpush1.bf16.xpose.msra.mxu0 %v26208_v38  ;;  %24164 = vmatpush1.bf16.xpose.msra.mxu1 %v26210_v39  ;;  %v5780_v29 = vld [vmem:[%s26873_s24 + $0xb38] sm:$0xff]  ;;  %v29993_v38 = vrot.slane %v3663_v20, %v26895_v24  ;;  %v26221_v39 = vcombine.high %v5779_v22, %v6163_v28  ;;  %v6167_v20 = vld [vmem:[%s26873_s24 + $0x1750] sm:$0x11] }
 0x5ef   : > { %v22145_v52 = vpop.f32.mrf.mxu0  ;;  %v22185_v53 = vpop.f32.mrf.mxu1  ;;  %24141 = vmatprep.mubr.bf16.mxu0 %v5357_v42  ;;  %24181 = vmatprep.mubr.bf16.mxu1 %v5359_v43  ;;  %v26223_v40 = vcombine.high %v5780_v29, %v6164_v30  ;;  %v3680_v49 = vcombine.high %v416_v41, %v416_v41 }
 0x5f0   : > { %v22184_v57 = vadd.f32 %v22183_v50, %v22144_v51  ;;  %24203 = vmatprep.subr.bf16.mxu0 %v26213_v46  ;;  %24243 = vmatprep.subr.bf16.mxu1 %v26215_v47  ;;  %v3678_v47 = vcombine.high %v29990_v37, %v29990_v37  ;;  %v3679_v48 = vcombine.high %v29993_v38, %v29993_v38  ;;  %v5781_v51 = vld [vmem:[%s26873_s24 + $0xb40] sm:$0xff] }
 0x5f1   : > { %v22146_v59 = vpop.f32.mrf.mxu0  ;;  %v22186_v60 = vpop.f32.mrf.mxu1  ;;  %v5370_v19 = vpack.c.bf16 %v29993_v38, %v29993_v38 }
 0x5f2   : > { %v26220_v59 = vcombine.low %v5779_v22, %v6163_v28  ;;  %v26222_v60 = vcombine.low %v5780_v29, %v6164_v30  ;;  %v5369_v63 = vpack.c.bf16 %v3678_v47, %v3678_v47  ;;  %v5371_v0 = vpack.c.bf16 %v3679_v48, %v3679_v48  ;;  %v6168_v22 = vld [vmem:[%s26873_s24 + $0x1758] sm:$0x11] }
 0x5f3   : > { %v22147_v4 = vpop.f32.mrf.mxu0  ;;  %v22187_v5 = vpop.f32.mrf.mxu1  ;;  %v5372_v47 = vpack.c.bf16 %v30009_v1, %v30009_v1 }
 0x5f4   : > { %v417_v5 = vld [vmem:[%s26866_s29 + $0x5a8] sm:$0xff] }
 0x5f5   : > { %v22223_v13 = vpop.f32.mrf.mxu0  ;;  %v22263_v14 = vpop.f32.mrf.mxu1  ;;  %24142 = vmatmul.mubr.bf16.vlgmr.msra.gmra.mxu0 %v5356_v61  ;;  %24182 = vmatmul.mubr.bf16.vlgmr.msra.gmra.mxu1 %v5358_v62  ;;  %v30028_v30 = vrot.slane %v417_v5, %v26895_v24 }
 0x5f6   : > { %v22224_v15 = vadd.f32 %v22223_v13, %v22184_v57  ;;  %24204 = vmatpush1.bf16.xpose.msra.mxu0 %v26212_v2  ;;  %24244 = vmatpush1.bf16.xpose.msra.mxu1 %v26214_v3  ;;  %v5782_v57 = vld [vmem:[%s26873_s24 + $0xb48] sm:$0xff]  ;;  %v30012_v2 = vrot.slane %v3680_v49, %v26895_v24  ;;  %v26225_v3 = vcombine.high %v5781_v51, %v6165_v56  ;;  %v6169_v49 = vld [vmem:[%s26873_s24 + $0x1760] sm:$0x11] }
 0x5f7   : > { %v22225_v16 = vpop.f32.mrf.mxu0  ;;  %v22265_v17 = vpop.f32.mrf.mxu1  ;;  %24221 = vmatprep.mubr.bf16.mxu0 %v5361_v6  ;;  %24261 = vmatprep.mubr.bf16.mxu1 %v5363_v7  ;;  %v26227_v4 = vcombine.high %v5782_v57, %v6166_v58  ;;  %v3697_v13 = vcombine.high %v417_v5, %v417_v5 }
 0x5f8   : > { %v22264_v21 = vadd.f32 %v22263_v14, %v22224_v15  ;;  %24283 = vmatprep.subr.bf16.mxu0 %v26217_v10  ;;  %24323 = vmatprep.subr.bf16.mxu1 %v26219_v11  ;;  %v3695_v11 = vcombine.high %v30009_v1, %v30009_v1  ;;  %v3696_v12 = vcombine.high %v30012_v2, %v30012_v2  ;;  %v5783_v15 = vld [vmem:[%s26873_s24 + $0xb50] sm:$0xff] }
 0x5f9   : > { %v22226_v23 = vpop.f32.mrf.mxu0  ;;  %v22266_v25 = vpop.f32.mrf.mxu1  ;;  %v5374_v48 = vpack.c.bf16 %v30012_v2, %v30012_v2 }
 0x5fa   : > { %v26224_v23 = vcombine.low %v5781_v51, %v6165_v56  ;;  %v26226_v25 = vcombine.low %v5782_v57, %v6166_v58  ;;  %v5373_v28 = vpack.c.bf16 %v3695_v11, %v3695_v11  ;;  %v5375_v29 = vpack.c.bf16 %v3696_v12, %v3696_v12  ;;  %v6170_v51 = vld [vmem:[%s26873_s24 + $0x1768] sm:$0x11] }
 0x5fb   : > { %v22227_v33 = vpop.f32.mrf.mxu0  ;;  %v22267_v34 = vpop.f32.mrf.mxu1  ;;  %v5376_v11 = vpack.c.bf16 %v30028_v30, %v30028_v30 }
 0x5fc   : > { %v418_v34 = vld [vmem:[%s26866_s29 + $0x5b0] sm:$0xff] }
 0x5fd   : > { %v22303_v42 = vpop.f32.mrf.mxu0  ;;  %v22343_v43 = vpop.f32.mrf.mxu1  ;;  %24222 = vmatmul.mubr.bf16.vlgmr.msra.gmra.mxu0 %v5360_v26  ;;  %24262 = vmatmul.mubr.bf16.vlgmr.msra.gmra.mxu1 %v5362_v27  ;;  %v30047_v58 = vrot.slane %v418_v34, %v26895_v24 }
 0x5fe   : > { %v22304_v44 = vadd.f32 %v22303_v42, %v22264_v21  ;;  %24284 = vmatpush1.bf16.xpose.msra.mxu0 %v26216_v31  ;;  %24324 = vmatpush1.bf16.xpose.msra.mxu1 %v26218_v32  ;;  %v5784_v21 = vld [vmem:[%s26873_s24 + $0xb58] sm:$0xff]  ;;  %v30031_v31 = vrot.slane %v3697_v13, %v26895_v24  ;;  %v26229_v32 = vcombine.high %v5783_v15, %v6167_v20  ;;  %v6171_v13 = vld [vmem:[%s26873_s24 + $0x1770] sm:$0x11] }
 0x5ff   : > { %v22305_v45 = vpop.f32.mrf.mxu0  ;;  %v22345_v46 = vpop.f32.mrf.mxu1  ;;  %24301 = vmatprep.mubr.bf16.mxu0 %v5365_v35  ;;  %24341 = vmatprep.mubr.bf16.mxu1 %v5367_v36  ;;  %v26231_v33 = vcombine.high %v5784_v21, %v6168_v22  ;;  %v3714_v42 = vcombine.high %v418_v34, %v418_v34 }
 0x600   : > { %v22344_v50 = vadd.f32 %v22343_v43, %v22304_v44  ;;  %24363 = vmatprep.subr.bf16.mxu0 %v26221_v39  ;;  %24403 = vmatprep.subr.bf16.mxu1 %v26223_v40  ;;  %v3712_v40 = vcombine.high %v30028_v30, %v30028_v30  ;;  %v3713_v41 = vcombine.high %v30031_v31, %v30031_v31  ;;  %v5785_v44 = vld [vmem:[%s26873_s24 + $0xb60] sm:$0xff] }
 0x601   : > { %v22306_v52 = vpop.f32.mrf.mxu0  ;;  %v22346_v53 = vpop.f32.mrf.mxu1  ;;  %v5378_v12 = vpack.c.bf16 %v30031_v31, %v30031_v31 }
 0x602   : > { %v26228_v52 = vcombine.low %v5783_v15, %v6167_v20  ;;  %v26230_v53 = vcombine.low %v5784_v21, %v6168_v22  ;;  %v5377_v56 = vpack.c.bf16 %v3712_v40, %v3712_v40  ;;  %v5379_v57 = vpack.c.bf16 %v3713_v41, %v3713_v41  ;;  %v6172_v15 = vld [vmem:[%s26873_s24 + $0x1778] sm:$0x11] }
 0x603   : > { %v22307_v61 = vpop.f32.mrf.mxu0  ;;  %v22347_v62 = vpop.f32.mrf.mxu1  ;;  %v5380_v40 = vpack.c.bf16 %v30047_v58, %v30047_v58 }
 0x604   : > { %v419_v62 = vld [vmem:[%s26866_s29 + $0x5b8] sm:$0xff] }
 0x605   : > { %v22383_v6 = vpop.f32.mrf.mxu0  ;;  %v22423_v7 = vpop.f32.mrf.mxu1  ;;  %24302 = vmatmul.mubr.bf16.vlgmr.msra.gmra.mxu0 %v5364_v54  ;;  %24342 = vmatmul.mubr.bf16.vlgmr.msra.gmra.mxu1 %v5366_v55  ;;  %v30066_v22 = vrot.slane %v419_v62, %v26895_v24 }
 0x606   : > { %v22384_v8 = vadd.f32 %v22383_v6, %v22344_v50  ;;  %24364 = vmatpush1.bf16.xpose.msra.mxu0 %v26220_v59  ;;  %24404 = vmatpush1.bf16.xpose.msra.mxu1 %v26222_v60  ;;  %v5786_v50 = vld [vmem:[%s26873_s24 + $0xb68] sm:$0xff]  ;;  %v30050_v59 = vrot.slane %v3714_v42, %v26895_v24  ;;  %v26233_v60 = vcombine.high %v5785_v44, %v6169_v49  ;;  %v6173_v42 = vld [vmem:[%s26873_s24 + $0x1780] sm:$0x11] }
 0x607   : > { %v22385_v9 = vpop.f32.mrf.mxu0  ;;  %v22425_v10 = vpop.f32.mrf.mxu1  ;;  %24381 = vmatprep.mubr.bf16.mxu0 %v5369_v63  ;;  %24421 = vmatprep.mubr.bf16.mxu1 %v5371_v0  ;;  %v26235_v61 = vcombine.high %v5786_v50, %v6170_v51  ;;  %v3731_v6 = vcombine.high %v419_v62, %v419_v62 }
 0x608   : > { %v22424_v14 = vadd.f32 %v22423_v7, %v22384_v8  ;;  %24443 = vmatprep.subr.bf16.mxu0 %v26225_v3  ;;  %24483 = vmatprep.subr.bf16.mxu1 %v26227_v4  ;;  %v3729_v4 = vcombine.high %v30047_v58, %v30047_v58  ;;  %v3730_v5 = vcombine.high %v30050_v59, %v30050_v59  ;;  %v5787_v8 = vld [vmem:[%s26873_s24 + $0xb70] sm:$0xff] }
 0x609   : > { %v22386_v16 = vpop.f32.mrf.mxu0  ;;  %v22426_v17 = vpop.f32.mrf.mxu1  ;;  %v5382_v41 = vpack.c.bf16 %v30050_v59, %v30050_v59 }
 0x60a   : > { %v26232_v16 = vcombine.low %v5785_v44, %v6169_v49  ;;  %v26234_v17 = vcombine.low %v5786_v50, %v6170_v51  ;;  %v5381_v20 = vpack.c.bf16 %v3729_v4, %v3729_v4  ;;  %v5383_v21 = vpack.c.bf16 %v3730_v5, %v3730_v5  ;;  %v6174_v44 = vld [vmem:[%s26873_s24 + $0x1788] sm:$0x11] }
 0x60b   : > { %v22387_v26 = vpop.f32.mrf.mxu0  ;;  %v22427_v27 = vpop.f32.mrf.mxu1  ;;  %v5384_v4 = vpack.c.bf16 %v30066_v22, %v30066_v22 }
 0x60c   : > { %v420_v27 = vld [vmem:[%s26866_s29 + $0x5c0] sm:$0xff] }
 0x60d   : > { %v22463_v35 = vpop.f32.mrf.mxu0  ;;  %v22503_v36 = vpop.f32.mrf.mxu1  ;;  %24382 = vmatmul.mubr.bf16.vlgmr.msra.gmra.mxu0 %v5368_v18  ;;  %24422 = vmatmul.mubr.bf16.vlgmr.msra.gmra.mxu1 %v5370_v19  ;;  %v30085_v51 = vrot.slane %v420_v27, %v26895_v24 }
 0x60e   : > { %v22464_v37 = vadd.f32 %v22463_v35, %v22424_v14  ;;  %24444 = vmatpush1.bf16.xpose.msra.mxu0 %v26224_v23  ;;  %24484 = vmatpush1.bf16.xpose.msra.mxu1 %v26226_v25  ;;  %v5788_v14 = vld [vmem:[%s26873_s24 + $0xb78] sm:$0xff]  ;;  %v30069_v23 = vrot.slane %v3731_v6, %v26895_v24  ;;  %v26237_v25 = vcombine.high %v5787_v8, %v6171_v13  ;;  %v6175_v6 = vld [vmem:[%s26873_s24 + $0x1790] sm:$0x11] }
 0x60f   : > { %v22465_v38 = vpop.f32.mrf.mxu0  ;;  %v22505_v39 = vpop.f32.mrf.mxu1  ;;  %24461 = vmatprep.mubr.bf16.mxu0 %v5373_v28  ;;  %24501 = vmatprep.mubr.bf16.mxu1 %v5375_v29  ;;  %v26239_v26 = vcombine.high %v5788_v14, %v6172_v15  ;;  %v3748_v35 = vcombine.high %v420_v27, %v420_v27 }
 0x610   : > { %v22504_v43 = vadd.f32 %v22503_v36, %v22464_v37  ;;  %24523 = vmatprep.subr.bf16.mxu0 %v26229_v32  ;;  %24563 = vmatprep.subr.bf16.mxu1 %v26231_v33  ;;  %v3746_v33 = vcombine.high %v30066_v22, %v30066_v22  ;;  %v3747_v34 = vcombine.high %v30069_v23, %v30069_v23  ;;  %v5789_v37 = vld [vmem:[%s26873_s24 + $0xb80] sm:$0xff] }
 0x611   : > { %v22466_v45 = vpop.f32.mrf.mxu0  ;;  %v22506_v46 = vpop.f32.mrf.mxu1  ;;  %v5386_v5 = vpack.c.bf16 %v30069_v23, %v30069_v23 }
 0x612   : > { %v26236_v45 = vcombine.low %v5787_v8, %v6171_v13  ;;  %v26238_v46 = vcombine.low %v5788_v14, %v6172_v15  ;;  %v5385_v49 = vpack.c.bf16 %v3746_v33, %v3746_v33  ;;  %v5387_v50 = vpack.c.bf16 %v3747_v34, %v3747_v34  ;;  %v6176_v8 = vld [vmem:[%s26873_s24 + $0x1798] sm:$0x11] }
 0x613   : > { %v22467_v54 = vpop.f32.mrf.mxu0  ;;  %v22507_v55 = vpop.f32.mrf.mxu1  ;;  %v5388_v33 = vpack.c.bf16 %v30085_v51, %v30085_v51 }
 0x614   : > { %v421_v55 = vld [vmem:[%s26866_s29 + $0x5c8] sm:$0xff] }
 0x615   : > { %v22543_v63 = vpop.f32.mrf.mxu0  ;;  %v22583_v0 = vpop.f32.mrf.mxu1  ;;  %24462 = vmatmul.mubr.bf16.vlgmr.msra.gmra.mxu0 %v5372_v47  ;;  %24502 = vmatmul.mubr.bf16.vlgmr.msra.gmra.mxu1 %v5374_v48  ;;  %v30104_v15 = vrot.slane %v421_v55, %v26895_v24 }
 0x616   : > { %v22544_v1 = vadd.f32 %v22543_v63, %v22504_v43  ;;  %24524 = vmatpush1.bf16.xpose.msra.mxu0 %v26228_v52  ;;  %24564 = vmatpush1.bf16.xpose.msra.mxu1 %v26230_v53  ;;  %v5790_v43 = vld [vmem:[%s26873_s24 + $0xb88] sm:$0xff]  ;;  %v30088_v52 = vrot.slane %v3748_v35, %v26895_v24  ;;  %v26241_v53 = vcombine.high %v5789_v37, %v6173_v42  ;;  %v6177_v35 = vld [vmem:[%s26873_s24 + $0x17a0] sm:$0x11] }
 0x617   : > { %v22545_v2 = vpop.f32.mrf.mxu0  ;;  %v22585_v3 = vpop.f32.mrf.mxu1  ;;  %24541 = vmatprep.mubr.bf16.mxu0 %v5377_v56  ;;  %24581 = vmatprep.mubr.bf16.mxu1 %v5379_v57  ;;  %v26243_v54 = vcombine.high %v5790_v43, %v6174_v44  ;;  %v3765_v63 = vcombine.high %v421_v55, %v421_v55 }
 0x618   : > { %v22584_v7 = vadd.f32 %v22583_v0, %v22544_v1  ;;  %24603 = vmatprep.subr.bf16.mxu0 %v26233_v60  ;;  %24643 = vmatprep.subr.bf16.mxu1 %v26235_v61  ;;  %v3763_v61 = vcombine.high %v30085_v51, %v30085_v51  ;;  %v3764_v62 = vcombine.high %v30088_v52, %v30088_v52  ;;  %v5791_v1 = vld [vmem:[%s26873_s24 + $0xb90] sm:$0xff] }
 0x619   : > { %v22546_v9 = vpop.f32.mrf.mxu0  ;;  %v22586_v10 = vpop.f32.mrf.mxu1  ;;  %v5390_v34 = vpack.c.bf16 %v30088_v52, %v30088_v52 }
 0x61a   : > { %v26240_v9 = vcombine.low %v5789_v37, %v6173_v42  ;;  %v26242_v10 = vcombine.low %v5790_v43, %v6174_v44  ;;  %v5389_v13 = vpack.c.bf16 %v3763_v61, %v3763_v61  ;;  %v5391_v14 = vpack.c.bf16 %v3764_v62, %v3764_v62  ;;  %v6178_v37 = vld [vmem:[%s26873_s24 + $0x17a8] sm:$0x11] }
 0x61b   : > { %v22547_v18 = vpop.f32.mrf.mxu0  ;;  %v22587_v19 = vpop.f32.mrf.mxu1  ;;  %v5392_v61 = vpack.c.bf16 %v30104_v15, %v30104_v15 }
 0x61c   : > { %v422_v19 = vld [vmem:[%s26866_s29 + $0x5d0] sm:$0xff] }
 0x61d   : > { %v22623_v28 = vpop.f32.mrf.mxu0  ;;  %v22663_v29 = vpop.f32.mrf.mxu1  ;;  %24542 = vmatmul.mubr.bf16.vlgmr.msra.gmra.mxu0 %v5376_v11  ;;  %24582 = vmatmul.mubr.bf16.vlgmr.msra.gmra.mxu1 %v5378_v12  ;;  %v30123_v44 = vrot.slane %v422_v19, %v26895_v24 }
 0x61e   : > { %v22624_v30 = vadd.f32 %v22623_v28, %v22584_v7  ;;  %24604 = vmatpush1.bf16.xpose.msra.mxu0 %v26232_v16  ;;  %24644 = vmatpush1.bf16.xpose.msra.mxu1 %v26234_v17  ;;  %v5792_v7 = vld [vmem:[%s26873_s24 + $0xb98] sm:$0xff]  ;;  %v30107_v16 = vrot.slane %v3765_v63, %v26895_v24  ;;  %v26245_v17 = vcombine.high %v5791_v1, %v6175_v6  ;;  %v6179_v63 = vld [vmem:[%s26873_s24 + $0x17b0] sm:$0x11] }
 0x61f   : > { %v22625_v31 = vpop.f32.mrf.mxu0  ;;  %v22665_v32 = vpop.f32.mrf.mxu1  ;;  %24621 = vmatprep.mubr.bf16.mxu0 %v5381_v20  ;;  %24661 = vmatprep.mubr.bf16.mxu1 %v5383_v21  ;;  %v26247_v18 = vcombine.high %v5792_v7, %v6176_v8  ;;  %v3782_v28 = vcombine.high %v422_v19, %v422_v19 }
 0x620   : > { %v22664_v36 = vadd.f32 %v22663_v29, %v22624_v30  ;;  %24683 = vmatprep.subr.bf16.mxu0 %v26237_v25  ;;  %24723 = vmatprep.subr.bf16.mxu1 %v26239_v26  ;;  %v3780_v26 = vcombine.high %v30104_v15, %v30104_v15  ;;  %v3781_v27 = vcombine.high %v30107_v16, %v30107_v16  ;;  %v5793_v30 = vld [vmem:[%s26873_s24 + $0xba0] sm:$0xff] }
 0x621   : > { %v22626_v38 = vpop.f32.mrf.mxu0  ;;  %v22666_v39 = vpop.f32.mrf.mxu1  ;;  %v5394_v62 = vpack.c.bf16 %v30107_v16, %v30107_v16 }
 0x622   : > { %v26244_v38 = vcombine.low %v5791_v1, %v6175_v6  ;;  %v26246_v39 = vcombine.low %v5792_v7, %v6176_v8  ;;  %v5393_v42 = vpack.c.bf16 %v3780_v26, %v3780_v26  ;;  %v5395_v43 = vpack.c.bf16 %v3781_v27, %v3781_v27  ;;  %v6180_v1 = vld [vmem:[%s26873_s24 + $0x17b8] sm:$0x11] }
 0x623   : > { %v22627_v47 = vpop.f32.mrf.mxu0  ;;  %v22667_v48 = vpop.f32.mrf.mxu1  ;;  %v5396_v26 = vpack.c.bf16 %v30123_v44, %v30123_v44 }
 0x624   : > { %v423_v48 = vld [vmem:[%s26866_s29 + $0x5d8] sm:$0xff] }
 0x625   : > { %v22703_v56 = vpop.f32.mrf.mxu0  ;;  %v22743_v57 = vpop.f32.mrf.mxu1  ;;  %24622 = vmatmul.mubr.bf16.vlgmr.msra.gmra.mxu0 %v5380_v40  ;;  %24662 = vmatmul.mubr.bf16.vlgmr.msra.gmra.mxu1 %v5382_v41  ;;  %v30142_v8 = vrot.slane %v423_v48, %v26895_v24 }
 0x626   : > { %v22704_v58 = vadd.f32 %v22703_v56, %v22664_v36  ;;  %24684 = vmatpush1.bf16.xpose.msra.mxu0 %v26236_v45  ;;  %24724 = vmatpush1.bf16.xpose.msra.mxu1 %v26238_v46  ;;  %v5794_v36 = vld [vmem:[%s26873_s24 + $0xba8] sm:$0xff]  ;;  %v30126_v45 = vrot.slane %v3782_v28, %v26895_v24  ;;  %v26249_v46 = vcombine.high %v5793_v30, %v6177_v35  ;;  %v6181_v28 = vld [vmem:[%s26873_s24 + $0x17c0] sm:$0x11] }
 0x627   : > { %v22705_v59 = vpop.f32.mrf.mxu0  ;;  %v22745_v60 = vpop.f32.mrf.mxu1  ;;  %24701 = vmatprep.mubr.bf16.mxu0 %v5385_v49  ;;  %24741 = vmatprep.mubr.bf16.mxu1 %v5387_v50  ;;  %v26251_v47 = vcombine.high %v5794_v36, %v6178_v37  ;;  %v3799_v56 = vcombine.high %v423_v48, %v423_v48 }
 0x628   : > { %v22744_v0 = vadd.f32 %v22743_v57, %v22704_v58  ;;  %24763 = vmatprep.subr.bf16.mxu0 %v26241_v53  ;;  %24803 = vmatprep.subr.bf16.mxu1 %v26243_v54  ;;  %v3797_v54 = vcombine.high %v30123_v44, %v30123_v44  ;;  %v3798_v55 = vcombine.high %v30126_v45, %v30126_v45  ;;  %v5795_v58 = vld [vmem:[%s26873_s24 + $0xbb0] sm:$0xff] }
 0x629   : > { %v22706_v2 = vpop.f32.mrf.mxu0  ;;  %v22746_v3 = vpop.f32.mrf.mxu1  ;;  %v5398_v27 = vpack.c.bf16 %v30126_v45, %v30126_v45 }
 0x62a   : > { %v26248_v2 = vcombine.low %v5793_v30, %v6177_v35  ;;  %v26250_v3 = vcombine.low %v5794_v36, %v6178_v37  ;;  %v5397_v6 = vpack.c.bf16 %v3797_v54, %v3797_v54  ;;  %v5399_v7 = vpack.c.bf16 %v3798_v55, %v3798_v55  ;;  %v6182_v30 = vld [vmem:[%s26873_s24 + $0x17c8] sm:$0x11] }
 0x62b   : > { %v22707_v11 = vpop.f32.mrf.mxu0  ;;  %v22747_v12 = vpop.f32.mrf.mxu1  ;;  %v5400_v54 = vpack.c.bf16 %v30142_v8, %v30142_v8 }
 0x62c   : > { %v424_v12 = vld [vmem:[%s26866_s29 + $0x5e0] sm:$0xff] }
 0x62d   : > { %v22783_v20 = vpop.f32.mrf.mxu0  ;;  %v22823_v21 = vpop.f32.mrf.mxu1  ;;  %24702 = vmatmul.mubr.bf16.vlgmr.msra.gmra.mxu0 %v5384_v4  ;;  %24742 = vmatmul.mubr.bf16.vlgmr.msra.gmra.mxu1 %v5386_v5  ;;  %v30161_v37 = vrot.slane %v424_v12, %v26895_v24 }
 0x62e   : > { %v22784_v22 = vadd.f32 %v22783_v20, %v22744_v0  ;;  %24764 = vmatpush1.bf16.xpose.msra.mxu0 %v26240_v9  ;;  %24804 = vmatpush1.bf16.xpose.msra.mxu1 %v26242_v10  ;;  %v5796_v0 = vld [vmem:[%s26873_s24 + $0xbb8] sm:$0xff]  ;;  %v30145_v9 = vrot.slane %v3799_v56, %v26895_v24  ;;  %v26253_v10 = vcombine.high %v5795_v58, %v6179_v63  ;;  %v6183_v56 = vld [vmem:[%s26873_s24 + $0x17d0] sm:$0x11] }
 0x62f   : > { %v22785_v23 = vpop.f32.mrf.mxu0  ;;  %v22825_v25 = vpop.f32.mrf.mxu1  ;;  %24781 = vmatprep.mubr.bf16.mxu0 %v5389_v13  ;;  %24821 = vmatprep.mubr.bf16.mxu1 %v5391_v14  ;;  %v26255_v11 = vcombine.high %v5796_v0, %v6180_v1  ;;  %v3816_v20 = vcombine.high %v424_v12, %v424_v12 }
 0x630   : > { %v22824_v29 = vadd.f32 %v22823_v21, %v22784_v22  ;;  %24843 = vmatprep.subr.bf16.mxu0 %v26245_v17  ;;  %24883 = vmatprep.subr.bf16.mxu1 %v26247_v18  ;;  %v3814_v18 = vcombine.high %v30142_v8, %v30142_v8  ;;  %v3815_v19 = vcombine.high %v30145_v9, %v30145_v9  ;;  %v5797_v22 = vld [vmem:[%s26873_s24 + $0xbc0] sm:$0xff] }
 0x631   : > { %v22786_v31 = vpop.f32.mrf.mxu0  ;;  %v22826_v32 = vpop.f32.mrf.mxu1  ;;  %v5402_v55 = vpack.c.bf16 %v30145_v9, %v30145_v9 }
 0x632   : > { %v26252_v31 = vcombine.low %v5795_v58, %v6179_v63  ;;  %v26254_v32 = vcombine.low %v5796_v0, %v6180_v1  ;;  %v5401_v35 = vpack.c.bf16 %v3814_v18, %v3814_v18  ;;  %v5403_v36 = vpack.c.bf16 %v3815_v19, %v3815_v19  ;;  %v6184_v58 = vld [vmem:[%s26873_s24 + $0x17d8] sm:$0x11] }
 0x633   : > { %v22787_v40 = vpop.f32.mrf.mxu0  ;;  %v22827_v41 = vpop.f32.mrf.mxu1  ;;  %v5404_v18 = vpack.c.bf16 %v30161_v37, %v30161_v37 }
 0x634   : > { %v425_v41 = vld [vmem:[%s26866_s29 + $0x5e8] sm:$0xff] }
 0x635   : > { %v22863_v49 = vpop.f32.mrf.mxu0  ;;  %v22903_v50 = vpop.f32.mrf.mxu1  ;;  %24782 = vmatmul.mubr.bf16.vlgmr.msra.gmra.mxu0 %v5388_v33  ;;  %24822 = vmatmul.mubr.bf16.vlgmr.msra.gmra.mxu1 %v5390_v34  ;;  %v30180_v1 = vrot.slane %v425_v41, %v26895_v24 }
 0x636   : > { %v22864_v51 = vadd.f32 %v22863_v49, %v22824_v29  ;;  %24844 = vmatpush1.bf16.xpose.msra.mxu0 %v26244_v38  ;;  %24884 = vmatpush1.bf16.xpose.msra.mxu1 %v26246_v39  ;;  %v5798_v29 = vld [vmem:[%s26873_s24 + $0xbc8] sm:$0xff]  ;;  %v30164_v38 = vrot.slane %v3816_v20, %v26895_v24  ;;  %v26257_v39 = vcombine.high %v5797_v22, %v6181_v28  ;;  %v6185_v20 = vld [vmem:[%s26873_s24 + $0x17e0] sm:$0x11] }
 0x637   : > { %v22865_v52 = vpop.f32.mrf.mxu0  ;;  %v22905_v53 = vpop.f32.mrf.mxu1  ;;  %24861 = vmatprep.mubr.bf16.mxu0 %v5393_v42  ;;  %24901 = vmatprep.mubr.bf16.mxu1 %v5395_v43  ;;  %v26259_v40 = vcombine.high %v5798_v29, %v6182_v30  ;;  %v3833_v49 = vcombine.high %v425_v41, %v425_v41 }
 0x638   : > { %v22904_v57 = vadd.f32 %v22903_v50, %v22864_v51  ;;  %24923 = vmatprep.subr.bf16.mxu0 %v26249_v46  ;;  %24963 = vmatprep.subr.bf16.mxu1 %v26251_v47  ;;  %v3831_v47 = vcombine.high %v30161_v37, %v30161_v37  ;;  %v3832_v48 = vcombine.high %v30164_v38, %v30164_v38  ;;  %v5799_v51 = vld [vmem:[%s26873_s24 + $0xbd0] sm:$0xff] }
 0x639   : > { %v22866_v59 = vpop.f32.mrf.mxu0  ;;  %v22906_v60 = vpop.f32.mrf.mxu1  ;;  %v5406_v19 = vpack.c.bf16 %v30164_v38, %v30164_v38 }
 0x63a   : > { %v26256_v59 = vcombine.low %v5797_v22, %v6181_v28  ;;  %v26258_v60 = vcombine.low %v5798_v29, %v6182_v30  ;;  %v5405_v63 = vpack.c.bf16 %v3831_v47, %v3831_v47  ;;  %v5407_v0 = vpack.c.bf16 %v3832_v48, %v3832_v48  ;;  %v6186_v22 = vld [vmem:[%s26873_s24 + $0x17e8] sm:$0x11] }
 0x63b   : > { %v22867_v4 = vpop.f32.mrf.mxu0  ;;  %v22907_v5 = vpop.f32.mrf.mxu1  ;;  %v5408_v47 = vpack.c.bf16 %v30180_v1, %v30180_v1 }
 0x63c   : > { %v426_v5 = vld [vmem:[%s26866_s29 + $0x5f0] sm:$0xff] }
 0x63d   : > { %v22943_v13 = vpop.f32.mrf.mxu0  ;;  %v22983_v14 = vpop.f32.mrf.mxu1  ;;  %24862 = vmatmul.mubr.bf16.vlgmr.msra.gmra.mxu0 %v5392_v61  ;;  %24902 = vmatmul.mubr.bf16.vlgmr.msra.gmra.mxu1 %v5394_v62  ;;  %v30199_v30 = vrot.slane %v426_v5, %v26895_v24 }
 0x63e   : > { %v22944_v15 = vadd.f32 %v22943_v13, %v22904_v57  ;;  %24924 = vmatpush1.bf16.xpose.msra.mxu0 %v26248_v2  ;;  %24964 = vmatpush1.bf16.xpose.msra.mxu1 %v26250_v3  ;;  %v5800_v57 = vld [vmem:[%s26873_s24 + $0xbd8] sm:$0xff]  ;;  %v30183_v2 = vrot.slane %v3833_v49, %v26895_v24  ;;  %v26261_v3 = vcombine.high %v5799_v51, %v6183_v56  ;;  %v6187_v49 = vld [vmem:[%s26873_s24 + $0x17f0] sm:$0x11] }
 0x63f   : > { %v22945_v16 = vpop.f32.mrf.mxu0  ;;  %v22985_v17 = vpop.f32.mrf.mxu1  ;;  %24941 = vmatprep.mubr.bf16.mxu0 %v5397_v6  ;;  %24981 = vmatprep.mubr.bf16.mxu1 %v5399_v7  ;;  %v26263_v4 = vcombine.high %v5800_v57, %v6184_v58  ;;  %v3850_v13 = vcombine.high %v426_v5, %v426_v5 }
 0x640   : > { %v22984_v21 = vadd.f32 %v22983_v14, %v22944_v15  ;;  %25003 = vmatprep.subr.bf16.mxu0 %v26253_v10  ;;  %25043 = vmatprep.subr.bf16.mxu1 %v26255_v11  ;;  %v3848_v11 = vcombine.high %v30180_v1, %v30180_v1  ;;  %v3849_v12 = vcombine.high %v30183_v2, %v30183_v2  ;;  %v5801_v15 = vld [vmem:[%s26873_s24 + $0xbe0] sm:$0xff] }
 0x641   : > { %v22946_v23 = vpop.f32.mrf.mxu0  ;;  %v22986_v25 = vpop.f32.mrf.mxu1  ;;  %v5410_v48 = vpack.c.bf16 %v30183_v2, %v30183_v2 }
 0x642   : > { %v26260_v23 = vcombine.low %v5799_v51, %v6183_v56  ;;  %v26262_v25 = vcombine.low %v5800_v57, %v6184_v58  ;;  %v5409_v28 = vpack.c.bf16 %v3848_v11, %v3848_v11  ;;  %v5411_v29 = vpack.c.bf16 %v3849_v12, %v3849_v12  ;;  %v6188_v51 = vld [vmem:[%s26873_s24 + $0x17f8] sm:$0x11] }
 0x643   : > { %v22947_v33 = vpop.f32.mrf.mxu0  ;;  %v22987_v34 = vpop.f32.mrf.mxu1 }
 0x644   : > { %v427_v34 = vld [vmem:[%s26866_s29 + $0x5f8] sm:$0xff] }
 0x645   : > { %v23023_v42 = vpop.f32.mrf.mxu0  ;;  %v23063_v43 = vpop.f32.mrf.mxu1  ;;  %24942 = vmatmul.mubr.bf16.vlgmr.msra.gmra.mxu0 %v5396_v26  ;;  %24982 = vmatmul.mubr.bf16.vlgmr.msra.gmra.mxu1 %v5398_v27  ;;  %v3874_v58 = vrot.slane %v427_v34, %v26895_v24 }
 0x646   : > { %v23024_v44 = vadd.f32 %v23023_v42, %v22984_v21  ;;  %25004 = vmatpush1.bf16.xpose.msra.mxu0 %v26252_v31  ;;  %25044 = vmatpush1.bf16.xpose.msra.mxu1 %v26254_v32  ;;  %v5802_v21 = vld [vmem:[%s26873_s24 + $0xbe8] sm:$0xff]  ;;  %v30202_v31 = vrot.slane %v3850_v13, %v26895_v24  ;;  %v26265_v32 = vcombine.high %v5801_v15, %v6185_v20 }
 0x647   : > { %v23025_v45 = vpop.f32.mrf.mxu0  ;;  %v23065_v46 = vpop.f32.mrf.mxu1  ;;  %25021 = vmatprep.mubr.bf16.mxu0 %v5401_v35  ;;  %25061 = vmatprep.mubr.bf16.mxu1 %v5403_v36  ;;  %v26267_v33 = vcombine.high %v5802_v21, %v6186_v22  ;;  %v3867_v42 = vcombine.high %v427_v34, %v427_v34 }
 0x648   : > { %v23064_v50 = vadd.f32 %v23063_v43, %v23024_v44  ;;  %25083 = vmatprep.subr.bf16.mxu0 %v26257_v39  ;;  %25123 = vmatprep.subr.bf16.mxu1 %v26259_v40  ;;  %v3865_v40 = vcombine.high %v30199_v30, %v30199_v30  ;;  %v3866_v41 = vcombine.high %v30202_v31, %v30202_v31  ;;  %v5803_v44 = vld [vmem:[%s26873_s24 + $0xbf0] sm:$0xff] }
 0x649   : > { %v23026_v52 = vpop.f32.mrf.mxu0  ;;  %v23066_v53 = vpop.f32.mrf.mxu1 }
 0x64a   : > { %v26264_v52 = vcombine.low %v5801_v15, %v6185_v20  ;;  %v26266_v53 = vcombine.low %v5802_v21, %v6186_v22  ;;  %v5413_v56 = vpack.c.bf16 %v3865_v40, %v3865_v40  ;;  %v5415_v57 = vpack.c.bf16 %v3866_v41, %v3866_v41 }
 0x64b   : > { %v23027_v61 = vpop.f32.mrf.mxu0  ;;  %v23067_v62 = vpop.f32.mrf.mxu1 }
 0x64d   : > { %v23103_v6 = vpop.f32.mrf.mxu0  ;;  %v23143_v7 = vpop.f32.mrf.mxu1  ;;  %25022 = vmatmul.mubr.bf16.vlgmr.msra.gmra.mxu0 %v5400_v54  ;;  %25062 = vmatmul.mubr.bf16.vlgmr.msra.gmra.mxu1 %v5402_v55 }
 0x64e   : > { %v23104_v8 = vadd.f32 %v23103_v6, %v23064_v50  ;;  %25084 = vmatpush1.bf16.xpose.msra.mxu0 %v26256_v59  ;;  %25124 = vmatpush1.bf16.xpose.msra.mxu1 %v26258_v60  ;;  %v5804_v50 = vld [vmem:[%s26873_s24 + $0xbf8] sm:$0xff]  ;;  %v3881_v59 = vrot.slane %v3867_v42, %v26895_v24  ;;  %v26269_v60 = vcombine.high %v5803_v44, %v6187_v49 }
 0x64f   : > { %v23105_v9 = vpop.f32.mrf.mxu0  ;;  %v23145_v10 = vpop.f32.mrf.mxu1  ;;  %25101 = vmatprep.mubr.bf16.mxu0 %v5405_v63  ;;  %25141 = vmatprep.mubr.bf16.mxu1 %v5407_v0  ;;  %v26271_v61 = vcombine.high %v5804_v50, %v6188_v51 }
 0x650   : > { %v23144_v14 = vadd.f32 %v23143_v7, %v23104_v8  ;;  %25163 = vmatprep.subr.bf16.mxu0 %v26261_v3  ;;  %25203 = vmatprep.subr.bf16.mxu1 %v26263_v4  ;;  %v3882_v3 = vcombine.high %v3874_v58, %v3874_v58  ;;  %v3883_v4 = vcombine.high %v3881_v59, %v3881_v59 }
 0x651   : > { %v23106_v16 = vpop.f32.mrf.mxu0  ;;  %v23146_v17 = vpop.f32.mrf.mxu1  ;;  %v5412_v7 = vpack.c.bf16 %v30199_v30, %v30199_v30  ;;  %v5414_v8 = vpack.c.bf16 %v30202_v31, %v30202_v31  ;;  %v26268_v9 = vcombine.low %v5803_v44, %v6187_v49  ;;  %v26270_v10 = vcombine.low %v5804_v50, %v6188_v51 }
 0x652   : > { %v5417_v13 = vpack.c.bf16 %v3882_v3, %v3882_v3 }
 0x653   : > { %v23107_v26 = vpop.f32.mrf.mxu0  ;;  %v23147_v27 = vpop.f32.mrf.mxu1 }
 0x655   : > { %v23183_v35 = vpop.f32.mrf.mxu0  ;;  %v23223_v36 = vpop.f32.mrf.mxu1  ;;  %25102 = vmatmul.mubr.bf16.vlgmr.msra.gmra.mxu0 %v5404_v18  ;;  %25142 = vmatmul.mubr.bf16.vlgmr.msra.gmra.mxu1 %v5406_v19 }
 0x656   : > { %v23184_v37 = vadd.f32 %v23183_v35, %v23144_v14  ;;  %25164 = vmatpush1.bf16.xpose.msra.mxu0 %v26260_v23  ;;  %25204 = vmatpush1.bf16.xpose.msra.mxu1 %v26262_v25  ;;  %v5419_v14 = vpack.c.bf16 %v3883_v4, %v3883_v4  ;;  %v5416_v23 = vpack.c.bf16 %v3874_v58, %v3874_v58 }
 0x657   : > { %v23185_v38 = vpop.f32.mrf.mxu0  ;;  %v23225_v39 = vpop.f32.mrf.mxu1  ;;  %25181 = vmatprep.mubr.bf16.mxu0 %v5409_v28  ;;  %25221 = vmatprep.mubr.bf16.mxu1 %v5411_v29  ;;  %v5418_v25 = vpack.c.bf16 %v3881_v59, %v3881_v59 }
 0x658   : > { %v23224_v43 = vadd.f32 %v23223_v36, %v23184_v37  ;;  %25243 = vmatprep.subr.bf16.mxu0 %v26265_v32  ;;  %25283 = vmatprep.subr.bf16.mxu1 %v26267_v33 }
 0x659   : > { %v23186_v45 = vpop.f32.mrf.mxu0  ;;  %v23226_v46 = vpop.f32.mrf.mxu1 }
 0x65b   : > { %v23187_v54 = vpop.f32.mrf.mxu0  ;;  %v23227_v55 = vpop.f32.mrf.mxu1 }
 0x65d   : > { %v23263_v62 = vpop.f32.mrf.mxu0  ;;  %v23303_v63 = vpop.f32.mrf.mxu1  ;;  %25182 = vmatmul.mubr.bf16.vlgmr.msra.gmra.mxu0 %v5408_v47  ;;  %25222 = vmatmul.mubr.bf16.vlgmr.msra.gmra.mxu1 %v5410_v48 }
 0x65e   : > { %v23264_v0 = vadd.f32 %v23263_v62, %v23224_v43  ;;  %25244 = vmatpush1.bf16.xpose.msra.mxu0 %v26264_v52  ;;  %25284 = vmatpush1.bf16.xpose.msra.mxu1 %v26266_v53 }
 0x65f   : > { %v23265_v1 = vpop.f32.mrf.mxu0  ;;  %v23305_v2 = vpop.f32.mrf.mxu1  ;;  %25261 = vmatprep.mubr.bf16.mxu0 %v5413_v56  ;;  %25301 = vmatprep.mubr.bf16.mxu1 %v5415_v57 }
 0x660   : > { %v23304_v5 = vadd.f32 %v23303_v63, %v23264_v0  ;;  %25323 = vmatprep.subr.bf16.mxu0 %v26269_v60  ;;  %25363 = vmatprep.subr.bf16.mxu1 %v26271_v61 }
 0x661   : > { %v23266_v6 = vpop.f32.mrf.mxu0  ;;  %v23306_v24 = vpop.f32.mrf.mxu1 }
 0x663   : > { %v23267_v11 = vpop.f32.mrf.mxu0  ;;  %v23307_v12 = vpop.f32.mrf.mxu1 }
 0x665   : > { %v23343_v15 = vpop.f32.mrf.mxu0  ;;  %v23383_v16 = vpop.f32.mrf.mxu1  ;;  %25262 = vmatmul.mubr.bf16.vlgmr.msra.gmra.mxu0 %v5412_v7  ;;  %25302 = vmatmul.mubr.bf16.vlgmr.msra.gmra.mxu1 %v5414_v8 }
 0x666   : > { %v23344_v17 = vadd.f32 %v23343_v15, %v23304_v5  ;;  %25324 = vmatpush1.bf16.xpose.msra.mxu0 %v26268_v9  ;;  %25364 = vmatpush1.bf16.xpose.msra.mxu1 %v26270_v10 }
 0x667   : > { %v23345_v18 = vpop.f32.mrf.mxu0  ;;  %v23385_v19 = vpop.f32.mrf.mxu1  ;;  %25341 = vmatprep.mubr.bf16.mxu0 %v5417_v13  ;;  %25381 = vmatprep.mubr.bf16.mxu1 %v5419_v14 }
 0x668   : > { %v23384_v20 = vadd.f32 %v23383_v16, %v23344_v17 }
 0x669   : > { %v23346_v21 = vpop.f32.mrf.mxu0  ;;  %v23386_v22 = vpop.f32.mrf.mxu1 }
 0x66b   : > { %v23347_v26 = vpop.f32.mrf.mxu0  ;;  %v23387_v27 = vpop.f32.mrf.mxu1 }
 0x66d   : > { %v23423_v28 = vpop.f32.mrf.mxu0  ;;  %v23463_v29 = vpop.f32.mrf.mxu1  ;;  %25342 = vmatmul.mubr.bf16.vlgmr.msra.gmra.mxu0 %v5416_v23  ;;  %25382 = vmatmul.mubr.bf16.vlgmr.msra.gmra.mxu1 %v5418_v25 }
 0x66e   : > { %v23424_v30 = vadd.f32 %v23423_v28, %v23384_v20 }
 0x66f   : > { %v23425_v31 = vpop.f32.mrf.mxu0  ;;  %v23465_v32 = vpop.f32.mrf.mxu1 }
 0x670   : > { %v23464_v33 = vadd.f32 %v23463_v29, %v23424_v30 }
 0x671   : > { %v23426_v34 = vpop.f32.mrf.mxu0  ;;  %v23466_v35 = vpop.f32.mrf.mxu1 }
 0x673   : > { %v23427_v36 = vpop.f32.mrf.mxu0  ;;  %v23467_v37 = vpop.f32.mrf.mxu1 }
 0x675   : > { %v23503_v38 = vpop.f32.mrf.mxu0  ;;  %v23543_v39 = vpop.f32.mrf.mxu1 }
 0x676   : > { %v23504_v40 = vadd.f32 %v23503_v38, %v23464_v33 }
 0x677   : > { %v23505_v41 = vpop.f32.mrf.mxu0  ;;  %v23545_v42 = vpop.f32.mrf.mxu1 }
 0x678   : > { %v23544_v43 = vadd.f32 %v23543_v39, %v23504_v40 }
 0x679   : > { %v23506_v44 = vpop.f32.mrf.mxu0  ;;  %v23546_v45 = vpop.f32.mrf.mxu1 }
 0x67b   : > { %v23507_v46 = vpop.f32.mrf.mxu0  ;;  %v23547_v47 = vpop.f32.mrf.mxu1 }
 0x67d   : > { %v23583_v48 = vpop.f32.mrf.mxu0  ;;  %v23623_v49 = vpop.f32.mrf.mxu1 }
 0x67e   : > { %v23584_v50 = vadd.f32 %v23583_v48, %v23544_v43 }
 0x67f   : > { %v23585_v51 = vpop.f32.mrf.mxu0  ;;  %v23625_v52 = vpop.f32.mrf.mxu1 }
 0x680   : > { %v23624_v53 = vadd.f32 %v23623_v49, %v23584_v50 }
 0x681   : > { %v23586_v54 = vpop.f32.mrf.mxu0  ;;  %v23626_v55 = vpop.f32.mrf.mxu1 }
 0x683   : > { %v23587_v56 = vpop.f32.mrf.mxu0  ;;  %v23627_v57 = vpop.f32.mrf.mxu1 }
 0x685   : > { %v23663_v58 = vpop.f32.mrf.mxu0  ;;  %v23703_v59 = vpop.f32.mrf.mxu1 }
 0x686   : > { %v23664_v60 = vadd.f32 %v23663_v58, %v23624_v53 }
 0x687   : > { %v23665_v61 = vpop.f32.mrf.mxu0  ;;  %v23705_v62 = vpop.f32.mrf.mxu1 }
 0x688   : > { %v23704_v63 = vadd.f32 %v23703_v59, %v23664_v60 }
 0x689   : > { %v23666_v0 = vpop.f32.mrf.mxu0  ;;  %v23706_v1 = vpop.f32.mrf.mxu1 }
 0x68b   : > { %v23667_v2 = vpop.f32.mrf.mxu0  ;;  %v23707_v3 = vpop.f32.mrf.mxu1 }
 0x68d   : > { %v23743_v4 = vpop.f32.mrf.mxu0  ;;  %v23783_v5 = vpop.f32.mrf.mxu1 }
 0x68e   : > { %v23744_v6 = vadd.f32 %v23743_v4, %v23704_v63 }
 0x68f   : > { %v23745_v24 = vpop.f32.mrf.mxu0  ;;  %v23785_v7 = vpop.f32.mrf.mxu1 }
 0x690   : > { %v23784_v8 = vadd.f32 %v23783_v5, %v23744_v6 }
 0x691   : > { %v23746_v9 = vpop.f32.mrf.mxu0  ;;  %v23786_v10 = vpop.f32.mrf.mxu1 }
 0x693   : > { %v23747_v11 = vpop.f32.mrf.mxu0  ;;  %v23787_v12 = vpop.f32.mrf.mxu1 }
 0x695   : > { %v23823_v13 = vpop.f32.mrf.mxu0  ;;  %v23863_v14 = vpop.f32.mrf.mxu1 }
 0x696   : > { %v23824_v15 = vadd.f32 %v23823_v13, %v23784_v8 }
 0x697   : > { %v23825_v16 = vpop.f32.mrf.mxu0  ;;  %v23865_v17 = vpop.f32.mrf.mxu1 }
 0x698   : > { %v23864_v18 = vadd.f32 %v23863_v14, %v23824_v15 }
 0x699   : > { %v23826_v19 = vpop.f32.mrf.mxu0  ;;  %v23866_v20 = vpop.f32.mrf.mxu1 }
 0x69b   : > { %v23827_v21 = vpop.f32.mrf.mxu0  ;;  %v23867_v22 = vpop.f32.mrf.mxu1 }
 0x69d   : > { %v23903_v23 = vpop.f32.mrf.mxu0  ;;  %v23943_v25 = vpop.f32.mrf.mxu1 }
 0x69e   : > { %v23904_v26 = vadd.f32 %v23903_v23, %v23864_v18 }
 0x69f   : > { %v23905_v27 = vpop.f32.mrf.mxu0  ;;  %v23945_v28 = vpop.f32.mrf.mxu1 }
 0x6a0   : > { %v23944_v29 = vadd.f32 %v23943_v25, %v23904_v26 }
 0x6a1   : > { %v23906_v30 = vpop.f32.mrf.mxu0  ;;  %v23946_v31 = vpop.f32.mrf.mxu1 }
 0x6a3   : > { %v23907_v32 = vpop.f32.mrf.mxu0  ;;  %v23947_v33 = vpop.f32.mrf.mxu1 }
 0x6a5   : > { %v23983_v34 = vpop.f32.mrf.mxu0  ;;  %v24023_v35 = vpop.f32.mrf.mxu1 }
 0x6a6   : > { %v23984_v36 = vadd.f32 %v23983_v34, %v23944_v29 }
 0x6a7   : > { %v23985_v37 = vpop.f32.mrf.mxu0  ;;  %v24025_v38 = vpop.f32.mrf.mxu1 }
 0x6a8   : > { %v24024_v39 = vadd.f32 %v24023_v35, %v23984_v36 }
 0x6a9   : > { %v23986_v40 = vpop.f32.mrf.mxu0  ;;  %v24026_v41 = vpop.f32.mrf.mxu1 }
 0x6ab   : > { %v23987_v42 = vpop.f32.mrf.mxu0  ;;  %v24027_v43 = vpop.f32.mrf.mxu1 }
 0x6ad   : > { %v24063_v44 = vpop.f32.mrf.mxu0  ;;  %v24103_v45 = vpop.f32.mrf.mxu1 }
 0x6ae   : > { %v24064_v46 = vadd.f32 %v24063_v44, %v24024_v39 }
 0x6af   : > { %v24065_v47 = vpop.f32.mrf.mxu0  ;;  %v24105_v48 = vpop.f32.mrf.mxu1 }
 0x6b0   : > { %v24104_v49 = vadd.f32 %v24103_v45, %v24064_v46 }
 0x6b1   : > { %v24066_v50 = vpop.f32.mrf.mxu0  ;;  %v24106_v51 = vpop.f32.mrf.mxu1 }
 0x6b3   : > { %v24067_v52 = vpop.f32.mrf.mxu0  ;;  %v24107_v53 = vpop.f32.mrf.mxu1 }
 0x6b5   : > { %v24143_v54 = vpop.f32.mrf.mxu0  ;;  %v24183_v55 = vpop.f32.mrf.mxu1 }
 0x6b6   : > { %v24144_v21 = vadd.f32 %v24143_v54, %v24104_v49 }
 0x6b7   : > { %v24145_v56 = vpop.f32.mrf.mxu0  ;;  %v24185_v57 = vpop.f32.mrf.mxu1 }
 0x6b8   : > { %v24184_v27 = vadd.f32 %v24183_v55, %v24144_v21 }
 0x6b9   : > { %v24146_v58 = vpop.f32.mrf.mxu0  ;;  %v24186_v59 = vpop.f32.mrf.mxu1 }
 0x6bb   : > { %v24147_v60 = vpop.f32.mrf.mxu0  ;;  %v24187_v61 = vpop.f32.mrf.mxu1 }
 0x6bd   : > { %v24223_v62 = vpop.f32.mrf.mxu0  ;;  %v24263_v63 = vpop.f32.mrf.mxu1 }
 0x6be   : > { %v24224_v30 = vadd.f32 %v24223_v62, %v24184_v27 }
 0x6bf   : > { %v24225_v0 = vpop.f32.mrf.mxu0  ;;  %v24265_v1 = vpop.f32.mrf.mxu1 }
 0x6c0   : > { %v24264_v35 = vadd.f32 %v24263_v63, %v24224_v30 }
 0x6c1   : > { %v24226_v2 = vpop.f32.mrf.mxu0  ;;  %v24266_v3 = vpop.f32.mrf.mxu1 }
 0x6c3   : > { %v24227_v4 = vpop.f32.mrf.mxu0  ;;  %v24267_v5 = vpop.f32.mrf.mxu1 }
 0x6c5   : > { %v24303_v6 = vpop.f32.mrf.mxu0  ;;  %v24343_v24 = vpop.f32.mrf.mxu1 }
 0x6c6   : > { %v24304_v38 = vadd.f32 %v24303_v6, %v24264_v35 }
 0x6c7   : > { %v24305_v7 = vpop.f32.mrf.mxu0  ;;  %v24345_v8 = vpop.f32.mrf.mxu1 }
 0x6c8   : > { %v24344_v43 = vadd.f32 %v24343_v24, %v24304_v38 }
 0x6c9   : > { %v24306_v9 = vpop.f32.mrf.mxu0  ;;  %v24346_v10 = vpop.f32.mrf.mxu1 }
 0x6cb   : > { %v24307_v11 = vpop.f32.mrf.mxu0  ;;  %v24347_v12 = vpop.f32.mrf.mxu1 }
 0x6cd   : > { %v24383_v13 = vpop.f32.mrf.mxu0  ;;  %v24423_v14 = vpop.f32.mrf.mxu1 }
 0x6ce   : > { %v24384_v46 = vadd.f32 %v24383_v13, %v24344_v43 }
 0x6cf   : > { %v24385_v15 = vpop.f32.mrf.mxu0  ;;  %v24425_v16 = vpop.f32.mrf.mxu1 }
 0x6d0   : > { %v24424_v51 = vadd.f32 %v24423_v14, %v24384_v46 }
 0x6d1   : > { %v24386_v17 = vpop.f32.mrf.mxu0  ;;  %v24426_v18 = vpop.f32.mrf.mxu1 }
 0x6d3   : > { %v24387_v19 = vpop.f32.mrf.mxu0  ;;  %v24427_v20 = vpop.f32.mrf.mxu1 }
 0x6d5   : > { %v24463_v22 = vpop.f32.mrf.mxu0  ;;  %v24503_v23 = vpop.f32.mrf.mxu1 }
 0x6d6   : > { %v24464_v54 = vadd.f32 %v24463_v22, %v24424_v51 }
 0x6d7   : > { %v24465_v25 = vpop.f32.mrf.mxu0  ;;  %v24505_v26 = vpop.f32.mrf.mxu1 }
 0x6d8   : > { %v24504_v59 = vadd.f32 %v24503_v23, %v24464_v54 }
 0x6d9   : > { %v24466_v28 = vpop.f32.mrf.mxu0  ;;  %v24506_v29 = vpop.f32.mrf.mxu1 }
 0x6db   : > { %v24467_v31 = vpop.f32.mrf.mxu0  ;;  %v24507_v32 = vpop.f32.mrf.mxu1 }
 0x6dd   : > { %v24543_v33 = vpop.f32.mrf.mxu0  ;;  %v24583_v34 = vpop.f32.mrf.mxu1 }
 0x6de   : > { %v24544_v62 = vadd.f32 %v24543_v33, %v24504_v59 }
 0x6df   : > { %v24545_v36 = vpop.f32.mrf.mxu0  ;;  %v24585_v37 = vpop.f32.mrf.mxu1 }
 0x6e0   : > { %v24584_v3 = vadd.f32 %v24583_v34, %v24544_v62 }
 0x6e1   : > { %v24546_v39 = vpop.f32.mrf.mxu0  ;;  %v24586_v40 = vpop.f32.mrf.mxu1 }
 0x6e3   : > { %v24547_v41 = vpop.f32.mrf.mxu0  ;;  %v24587_v42 = vpop.f32.mrf.mxu1 }
 0x6e5   : > { %v24623_v44 = vpop.f32.mrf.mxu0  ;;  %v24663_v45 = vpop.f32.mrf.mxu1 }
 0x6e6   : > { %v24624_v6 = vadd.f32 %v24623_v44, %v24584_v3 }
 0x6e7   : > { %v24625_v47 = vpop.f32.mrf.mxu0  ;;  %v24665_v48 = vpop.f32.mrf.mxu1 }
 0x6e8   : > { %v24664_v10 = vadd.f32 %v24663_v45, %v24624_v6 }
 0x6e9   : > { %v24626_v49 = vpop.f32.mrf.mxu0  ;;  %v24666_v50 = vpop.f32.mrf.mxu1 }
 0x6eb   : > { %v24627_v52 = vpop.f32.mrf.mxu0  ;;  %v24667_v53 = vpop.f32.mrf.mxu1 }
 0x6ed   : > { %v24703_v55 = vpop.f32.mrf.mxu0  ;;  %v24743_v56 = vpop.f32.mrf.mxu1 }
 0x6ee   : > { %v24704_v13 = vadd.f32 %v24703_v55, %v24664_v10 }
 0x6ef   : > { %v24705_v57 = vpop.f32.mrf.mxu0  ;;  %v24745_v58 = vpop.f32.mrf.mxu1 }
 0x6f0   : > { %v24744_v18 = vadd.f32 %v24743_v56, %v24704_v13 }
 0x6f1   : > { %v24706_v60 = vpop.f32.mrf.mxu0  ;;  %v24746_v61 = vpop.f32.mrf.mxu1 }
 0x6f3   : > { %v24707_v63 = vpop.f32.mrf.mxu0  ;;  %v24747_v0 = vpop.f32.mrf.mxu1 }
 0x6f5   : > { %v24783_v1 = vpop.f32.mrf.mxu0  ;;  %v24823_v2 = vpop.f32.mrf.mxu1 }
 0x6f6   : > { %v24784_v21 = vadd.f32 %v24783_v1, %v24744_v18 }
 0x6f7   : > { %v24785_v4 = vpop.f32.mrf.mxu0  ;;  %v24825_v5 = vpop.f32.mrf.mxu1 }
 0x6f8   : > { %v24824_v27 = vadd.f32 %v24823_v2, %v24784_v21 }
 0x6f9   : > { %v24786_v24 = vpop.f32.mrf.mxu0  ;;  %v24826_v7 = vpop.f32.mrf.mxu1 }
 0x6fb   : > { %v24787_v8 = vpop.f32.mrf.mxu0  ;;  %v24827_v9 = vpop.f32.mrf.mxu1 }
 0x6fd   : > { %v24863_v11 = vpop.f32.mrf.mxu0  ;;  %v24903_v12 = vpop.f32.mrf.mxu1 }
 0x6fe   : > { %v24864_v30 = vadd.f32 %v24863_v11, %v24824_v27 }
 0x6ff   : > { %v24865_v14 = vpop.f32.mrf.mxu0  ;;  %v24905_v15 = vpop.f32.mrf.mxu1 }
 0x700   : > { %v24904_v35 = vadd.f32 %v24903_v12, %v24864_v30  ;;  %v5420_v14 = vld [vmem:[#allocation8] sm:$0x3] }
 0x701   : > { %v24866_v16 = vpop.f32.mrf.mxu0  ;;  %v24906_v17 = vpop.f32.mrf.mxu1 }
 0x703   : > { %v24867_v19 = vpop.f32.mrf.mxu0  ;;  %v24907_v20 = vpop.f32.mrf.mxu1 }
 0x705   : > { %v24943_v22 = vpop.f32.mrf.mxu0  ;;  %v24983_v23 = vpop.f32.mrf.mxu1 }
 0x706   : > { %v24944_v38 = vadd.f32 %v24943_v22, %v24904_v35 }
 0x707   : > { %v24945_v25 = vpop.f32.mrf.mxu0  ;;  %v24985_v26 = vpop.f32.mrf.mxu1 }
 0x708   : > { %v24984_v43 = vadd.f32 %v24983_v23, %v24944_v38 }
 0x709   : > { %v24946_v28 = vpop.f32.mrf.mxu0  ;;  %v24986_v29 = vpop.f32.mrf.mxu1 }
 0x70b   : > { %v24947_v31 = vpop.f32.mrf.mxu0  ;;  %v24987_v32 = vpop.f32.mrf.mxu1 }
 0x70d   : > { %v25023_v33 = vpop.f32.mrf.mxu0  ;;  %v25063_v34 = vpop.f32.mrf.mxu1 }
 0x70e   : > { %v25024_v46 = vadd.f32 %v25023_v33, %v24984_v43 }
 0x70f   : > { %v25025_v36 = vpop.f32.mrf.mxu0  ;;  %v25065_v37 = vpop.f32.mrf.mxu1 }
 0x710   : > { %v25064_v51 = vadd.f32 %v25063_v34, %v25024_v46 }
 0x711   : > { %v25026_v39 = vpop.f32.mrf.mxu0  ;;  %v25066_v40 = vpop.f32.mrf.mxu1 }
 0x713   : > { %v25027_v41 = vpop.f32.mrf.mxu0  ;;  %v25067_v42 = vpop.f32.mrf.mxu1 }
 0x715   : > { %v25103_v44 = vpop.f32.mrf.mxu0  ;;  %v25143_v45 = vpop.f32.mrf.mxu1 }
 0x716   : > { %v25104_v54 = vadd.f32 %v25103_v44, %v25064_v51 }
 0x717   : > { %v25105_v47 = vpop.f32.mrf.mxu0  ;;  %v25145_v48 = vpop.f32.mrf.mxu1 }
 0x718   : > { %v25144_v59 = vadd.f32 %v25143_v45, %v25104_v54 }
 0x719   : > { %v25106_v49 = vpop.f32.mrf.mxu0  ;;  %v25146_v50 = vpop.f32.mrf.mxu1 }
 0x71b   : > { %v25107_v52 = vpop.f32.mrf.mxu0  ;;  %v25147_v53 = vpop.f32.mrf.mxu1 }
 0x71d   : > { %v25183_v55 = vpop.f32.mrf.mxu0  ;;  %v25223_v56 = vpop.f32.mrf.mxu1 }
 0x71e   : > { %v25184_v62 = vadd.f32 %v25183_v55, %v25144_v59 }
 0x71f   : > { %v25185_v57 = vpop.f32.mrf.mxu0  ;;  %v25225_v58 = vpop.f32.mrf.mxu1 }
 0x720   : > { %v25224_v3 = vadd.f32 %v25223_v56, %v25184_v62 }
 0x721   : > { %v25186_v60 = vpop.f32.mrf.mxu0  ;;  %v25226_v61 = vpop.f32.mrf.mxu1 }
 0x723   : > { %v25187_v63 = vpop.f32.mrf.mxu0  ;;  %v25227_v0 = vpop.f32.mrf.mxu1 }
 0x725   : > { %v25263_v1 = vpop.f32.mrf.mxu0  ;;  %v25303_v2 = vpop.f32.mrf.mxu1 }
 0x726   : > { %v25264_v6 = vadd.f32 %v25263_v1, %v25224_v3 }
 0x727   : > { %v25265_v4 = vpop.f32.mrf.mxu0  ;;  %v25305_v5 = vpop.f32.mrf.mxu1 }
 0x728   : > { %v25304_v10 = vadd.f32 %v25303_v2, %v25264_v6 }
 0x729   : > { %v25266_v24 = vpop.f32.mrf.mxu0  ;;  %v25306_v7 = vpop.f32.mrf.mxu1 }
 0x72b   : > { %v25267_v8 = vpop.f32.mrf.mxu0  ;;  %v25307_v9 = vpop.f32.mrf.mxu1 }
 0x72d   : > { %v25343_v11 = vpop.f32.mrf.mxu0  ;;  %v25383_v12 = vpop.f32.mrf.mxu1 }
 0x72e   : > { %v25344_v13 = vadd.f32 %v25343_v11, %v25304_v10 }
 0x72f   : > { %v25345_v15 = vpop.f32.mrf.mxu0  ;;  %v25385_v16 = vpop.f32.mrf.mxu1 }
 0x730   : > { %v25384_v17 = vadd.f32 %v25383_v12, %v25344_v13  ;;  %25395 = sbr.rel (%p26272_p5) target bundleno = 1855 (0x73f), region = 52 }
 0x731   : > { %v25346_v18 = vpop.f32.mrf.mxu0  ;;  %v25386_v19 = vpop.f32.mrf.mxu1 }
 0x732   : > { %v25389_v20 = vadd.f32 %v25384_v17, %v5420_v14 }
 0x733   : > { %v25347_v21 = vpop.f32.mrf.mxu0  ;;  %v25387_v22 = vpop.f32.mrf.mxu1 }
 0x734   : > { %25391 = vst.msk [vmem:[#allocation8] sm:$0x3] %vm25390_vm1, %v25389_v20 }
 0x735   : > { %v26273_v25 = vld [vmem:[#allocation7] ss:$0 sm:$0xff] }
 0x73b   : > { %v25396_v23 = vld [vmem:[#allocation8] sm:$0x3] }
 0x73c   : > { %v25404_v26 = vadd.f32 %v26273_v25, %v25396_v23 }
 0x73e   : > { %25405 = vst.msk [vmem:[#allocation8] sm:$0x3] %vm25390_vm1, %v25404_v26 }
 0x73f PF: > { %p26310_p1 = scmp.eq.s32.totalorder %s26745_s16, 1  ;;  %s26705_s21 = smov [#allocation8]  }
 0x740   : > { %s25413_s22 = sshll.u32 %s26705_s21, 4  ;;  %s25414_s22 = int_to_ptr.vmem [resolvable:$true] %s25413_s22 }
 0x741   : > { %s26625_s26 = scalar_lea.vmem %s25414_s22, 32  ;;  %p26632_p3 = scmp.lt.s32.totalorder %s25414_s22, %s25414_s22 }
 0x742   : > { %p26626_p6 = scmp.ne.s32.totalorder %s25414_s22, %s26625_s26  ;;  %p26633_p11 = scmp.lt.s32.totalorder %s26625_s26, %s26625_s26 }
 0x744   : > { %p26627_p9 = pnand %p26626_p6, %p26310_p1  ;;  %p26634_p4 = por %p26633_p11, %p26632_p3 }
 0x746   : > { %p26628_p10 = pneg %p26627_p9 }
 0x748   : > { %p26635_p8 = pnand %p26634_p4, %p26628_p10 }
 0x74a   : > { %26638 = shalt.err (!%p26635_p8)
}
 0x74b   : > { %26293 = dma.vmem_to_hbm [thread:$0]  (%p26310_p1), %s25414_s22, 32, %s30252_s3, [#allocation4]  }
 0x74c   : > { %26678 = dma.done.wait (%p26310_p1), [#allocation4], 32  }
 0x74d   : > { %26680 = vsyncadd (%p26310_p1), [#allocation4], 4294967264 }
 0x74e PF: > { %p17_p7 = scmp.ge.s32.totalorder %s26748_s17, 4   ;;  %s30265_s12 = smov %s26687_s13 }
 0x74f   : > { %s30266_s13 = smov %s26691_s14  ;;  %s30267_s14 = smov %s26758_s20 }
 0x750   : > { %s30268_s15 = smov %s26748_s17  ;;  %19 = sbr.rel (!%p17_p7) target bundleno = 6 (0x6), region = 94 }
 0x755   :  { %25426 = vsyncpa [#allocation3], 1 }
 0x756   :  { %25428 = vsyncpa [#allocation3 + $0x1], 1 }
 0x757   :  { %25429 = vsyncpa [#allocation6], 1 }
 0x758   :  { %25431 = vsyncpa [#allocation6 + $0x1], 1 }
 0x759   :  { %25432 = vsyncpa [#allocation4], 1 }
 0x75a   :  { %25434 = vsyncpa [#allocation4 + $0x1], 1 }

</bundles_post_ra>
